<compile_context>
chip_gen: v5e
topology: v5e:2x2
jax: 0.10.0
libtpu: 0.0.40
codegen_flags: <defaults>
</compile_context>

<pallas_src>
import functools

import jax
import jax.numpy as jnp
from jax.experimental import pallas as pl
from jax.experimental.pallas import tpu as pltpu


# ---------------------------------------------------------------------------
# P4ConvP4 weight transform (GrouPy convention).
# For output rotation u, the filter applied to input-rotation r is the base
# filter at input-rotation (r - u) mod 4, spatially rotated by u * 90 degrees.
# ---------------------------------------------------------------------------
def transform_p4_weights(w):
    """w: (Cout, Cin, 4, k, k) -> (k*k*Cin*4, Cout*4) f32, rows ordered (ky, kx, cin, r)."""
    Cout, Cin, _, K, _ = w.shape
    planes = []
    for u in range(4):
        perm = [(r - u) % 4 for r in range(4)]
        wp = w[:, :, perm, :, :]                 # (Cout, Cin, 4r, k, k)
        wr = jnp.rot90(wp, k=u, axes=(-2, -1))   # spatial rotation by u*90 deg
        planes.append(wr)
    tw = jnp.stack(planes, axis=1)               # (Cout, 4u, Cin, 4r, k, k)
    wm = jnp.transpose(tw, (4, 5, 2, 3, 0, 1))   # (k, k, Cin, 4r, Cout, 4u)
    return wm.reshape(K * K * Cin * 4, Cout * 4).astype(jnp.float32)


# ---------------------------------------------------------------------------
# Pallas conv kernel: per batch image, build padded (optionally BN+ReLU'd)
# input in VMEM, im2col-concat the K*K taps, one deep bf16 MXU matmul.
# Also emits per-image sum / sum-of-squares for BatchNorm batch statistics.
# ---------------------------------------------------------------------------
def _conv_kernel(*refs, K, stride, pad, Ho, Wo, fuse_input_bn):
    if fuse_input_bn:
        x_ref, w_ref, s_ref, b_ref, o_ref, sum_ref, ssq_ref, xpad_ref = refs
    else:
        x_ref, w_ref, o_ref, sum_ref, ssq_ref, xpad_ref = refs

    H, W, Cin4 = x_ref.shape[1], x_ref.shape[2], x_ref.shape[3]
    Cout4 = o_ref.shape[3]

    xv = x_ref[0]                                     # (H, W, Cin4) f32
    if fuse_input_bn:
        # Fused epilogue of the previous layer: ReLU(BN(y_prev)).
        xv = jnp.maximum(xv * s_ref[...] + b_ref[...], 0.0)

    if K == 1 and pad == 0 and stride == 1:
        patch = xv                                    # (Ho, Wo, Cin4)
    else:
        # Zero-padded copy in VMEM (padding folded into the kernel).
        if pad > 0:
            xpad_ref[...] = jnp.zeros_like(xpad_ref)
            xpad_ref[pad:pad + H, pad:pad + W, :] = xv
        else:
            xpad_ref[...] = xv
        taps = []
        for ky in range(K):
            for kx in range(K):
                if stride == 1:
                    taps.append(xpad_ref[ky:ky + Ho, kx:kx + Wo, :])
                else:
                    # TODO(synk): for stride==2, pre-extract the W parities once
                    # per kx parity to avoid repeated sublane-strided gathers.
                    taps.append(xpad_ref[pl.ds(ky, Ho, stride),
                                         pl.ds(kx, Wo, stride), :])
        patch = taps[0] if K == 1 else jnp.concatenate(taps, axis=-1)

    # One deep matmul: contraction = K*K*Cin4, bf16 operands, f32 accumulate.
    patch2d = patch.reshape(Ho * Wo, K * K * Cin4).astype(jnp.bfloat16)
    y = jnp.dot(patch2d, w_ref[...], preferred_element_type=jnp.float32)

    o_ref[...] = y.reshape(1, Ho, Wo, Cout4)
    # Per-image moments so the BN stats pass never re-reads y from HBM.
    sum_ref[...] = jnp.sum(y, axis=0).reshape(1, 1, Cout4)
    ssq_ref[...] = jnp.sum(y * y, axis=0).reshape(1, 1, Cout4)


def p4_conv(x_nhwc, w_mat, *, K, stride, padding, input_scale=None, input_bias=None):
    """Returns (y, per-image channel sums, per-image channel sum-of-squares)."""
    N, H, W, Cin4 = x_nhwc.shape
    Cout4 = w_mat.shape[-1]
    Ho = (H + 2 * padding - K) // stride + 1
    Wo = (W + 2 * padding - K) // stride + 1
    Hp, Wp = H + 2 * padding, W + 2 * padding
    fuse = input_scale is not None

    kern = functools.partial(_conv_kernel, K=K, stride=stride, pad=padding,
                             Ho=Ho, Wo=Wo, fuse_input_bn=fuse)

    in_specs = [pl.BlockSpec((1, H, W, Cin4), lambda n: (n, 0, 0, 0)),
                pl.BlockSpec((K * K * Cin4, Cout4), lambda n: (0, 0))]
    args = [x_nhwc, w_mat.astype(jnp.bfloat16)]      # bf16 weights: half the DMA bytes
    if fuse:
        in_specs += [pl.BlockSpec((1, Cin4), lambda n: (0, 0)),
                     pl.BlockSpec((1, Cin4), lambda n: (0, 0))]
        args += [input_scale.reshape(1, Cin4).astype(jnp.float32),
                 input_bias.reshape(1, Cin4).astype(jnp.float32)]

    out_shape = (jax.ShapeDtypeStruct((N, Ho, Wo, Cout4), jnp.float32),
                 jax.ShapeDtypeStruct((N, 1, Cout4), jnp.float32),
                 jax.ShapeDtypeStruct((N, 1, Cout4), jnp.float32))
    out_specs = (pl.BlockSpec((1, Ho, Wo, Cout4), lambda n: (n, 0, 0, 0)),
                 pl.BlockSpec((1, 1, Cout4), lambda n: (n, 0, 0)),
                 pl.BlockSpec((1, 1, Cout4), lambda n: (n, 0, 0)))

    # TODO(synk): for large images, add spatial row-band tiling (band + halo) and
    #             size the bands per generation (v7x: 64 MiB VMEM) via vmem_limit_bytes;
    #             CIFAR-scale whole images fit comfortably in VMEM.
    return pl.pallas_call(
        kern,
        out_shape=out_shape,
        grid=(N,),
        in_specs=in_specs,
        out_specs=out_specs,
        scratch_shapes=[pltpu.VMEM((Hp, Wp, Cin4), jnp.float32)],
        compiler_params=pltpu.CompilerParams(dimension_semantics=("parallel",)),
    )(*args)


# ---------------------------------------------------------------------------
# BatchNorm3d training-mode batch stats from the conv kernels' moments.
# Stats are per base channel over (N, 4, H, W); biased variance (PyTorch fwd).
# ---------------------------------------------------------------------------
def bn_scale_bias_from_moments(sums, ssqs, n_spatial, gamma, beta, eps=1e-5):
    C4 = sums.shape[-1]
    C = C4 // 4
    s = sums.sum(axis=(0, 1)).reshape(C, 4).sum(-1)
    q = ssqs.sum(axis=(0, 1)).reshape(C, 4).sum(-1)
    n = float(n_spatial * 4)
    mean = s / n
    var = q / n - mean * mean
    scale = gamma / jnp.sqrt(var + eps)
    bias = beta - mean * scale
    # TODO(synk): running-stats (momentum) update is training bookkeeping and is
    #             not materialized here (it does not affect the forward output).
    return jnp.repeat(scale, 4), jnp.repeat(bias, 4)


# ---------------------------------------------------------------------------
# Lane-dense fused BN + residual + ReLU elementwise kernels.
# Tensors are viewed as (N*Ho, Wo*C*4) so the lane dim is a big multiple of 128.
# ---------------------------------------------------------------------------
def _bn_add_relu_proj_kernel(y_ref, s_ref, b_ref, r_ref, rs_ref, rb_ref, o_ref):
    o_ref[...] = jnp.maximum(y_ref[...] * s_ref[...] + b_ref[...]
                             + r_ref[...] * rs_ref[...] + rb_ref[...], 0.0)


def _bn_add_relu_id_kernel(y_ref, s_ref, b_ref, r_ref, o_ref):
    o_ref[...] = jnp.maximum(y_ref[...] * s_ref[...] + b_ref[...] + r_ref[...], 0.0)


def _elementwise_call(kernel, args, rows, lanes):
    tile_r = min(rows, 512) if rows % 8 == 0 else rows
    in_specs = []
    for a in args:
        if a.shape[0] == 1:
            in_specs.append(pl.BlockSpec((1, lanes), lambda i: (0, 0)))
        else:
            in_specs.append(pl.BlockSpec((tile_r, lanes), lambda i: (i, 0)))
    return pl.pallas_call(
        kernel,
        out_shape=jax.ShapeDtypeStruct((rows, lanes), jnp.float32),
        grid=(pl.cdiv(rows, tile_r),),
        in_specs=in_specs,
        out_specs=pl.BlockSpec((tile_r, lanes), lambda i: (i, 0)),
        compiler_params=pltpu.CompilerParams(dimension_semantics=("parallel",)),
    )(*args)


def bn_add_relu(y, s, b, r, rs=None, rb=None):
    """relu(y*s + b + (r*rs + rb if projection else r)) on a lane-dense 2D view."""
    N, Ho, Wo, C4 = y.shape
    L = Wo * C4
    rows = N * Ho
    y2 = y.reshape(rows, L)
    r2 = r.reshape(rows, L)
    tile = lambda v: jnp.tile(v.astype(jnp.float32), Wo).reshape(1, L)
    if rs is None:
        out2 = _elementwise_call(_bn_add_relu_id_kernel,
                                 [y2, tile(s), tile(b), r2], rows, L)
    else:
        out2 = _elementwise_call(_bn_add_relu_proj_kernel,
                                 [y2, tile(s), tile(b), r2, tile(rs), tile(rb)],
                                 rows, L)
    return out2.reshape(N, Ho, Wo, C4)


# ---------------------------------------------------------------------------
# BasicBlock forward (Pallas).
# ---------------------------------------------------------------------------
def basic_block_forward(x_pt, params, in_planes, planes, stride):
    N, Cin, G, H, W = x_pt.shape
    # TODO(synk): fold this NCHW(4)->NHWC transpose into the first conv's DMA.
    x = jnp.transpose(x_pt, (0, 3, 4, 1, 2)).reshape(N, H, W, Cin * 4)

    w1 = transform_p4_weights(params['conv1_w'])
    y1, m1, q1 = p4_conv(x, w1, K=3, stride=stride, padding=1)
    Ho, Wo = y1.shape[1], y1.shape[2]
    s1, b1 = bn_scale_bias_from_moments(m1, q1, N * Ho * Wo,
                                        params['bn1_gamma'], params['bn1_beta'])

    # conv2 fuses ReLU(BN1(y1)) into its input prologue (o1 never hits HBM).
    w2 = transform_p4_weights(params['conv2_w'])
    y2, m2, q2 = p4_conv(y1, w2, K=3, stride=1, padding=1,
                         input_scale=s1, input_bias=b1)
    s2, b2 = bn_scale_bias_from_moments(m2, q2, N * Ho * Wo,
                                        params['bn2_gamma'], params['bn2_beta'])

    if stride != 1 or in_planes != planes:
        ws = transform_p4_weights(params['sc_w'])
        ys, ms, qs = p4_conv(x, ws, K=1, stride=stride, padding=0)
        ss, bs = bn_scale_bias_from_moments(ms, qs, N * Ho * Wo,
                                            params['sc_gamma'], params['sc_beta'])
        out = bn_add_relu(y2, s2, b2, ys, ss, bs)
    else:
        out = bn_add_relu(y2, s2, b2, x)   # identity shortcut: no useless affine

    return out.reshape(N, Ho, Wo, planes, 4).transpose(0, 3, 4, 1, 2)


# ---------------------------------------------------------------------------
# Pure-JAX reference (same weight transform + bf16 conv inputs, lax conv).
# ---------------------------------------------------------------------------
def ref_forward(x_pt, params, in_planes, planes, stride):
    N, Cin, G, H, W = x_pt.shape
    x = jnp.transpose(x_pt, (0, 3, 4, 1, 2)).reshape(N, H, W, Cin * 4)

    def conv_ref(xn, wmat, K, s, pad):
        Cin4 = xn.shape[-1]
        w4 = wmat.reshape(K, K, Cin4, -1).astype(jnp.bfloat16)
        return jax.lax.conv_general_dilated(
            xn.astype(jnp.bfloat16), w4, (s, s), ((pad, pad), (pad, pad)),
            dimension_numbers=('NHWC', 'HWIO', 'NHWC'),
            preferred_element_type=jnp.float32)

    def bn_sb(y, gamma, beta, eps=1e-5):
        Nn, Hh, Ww, CF = y.shape
        C = CF // 4
        yr = y.reshape(Nn, Hh, Ww, C, 4)
        mean = yr.mean(axis=(0, 1, 2, 4))
        var = yr.var(axis=(0, 1, 2, 4))            # biased variance (PyTorch fwd)
        scale = gamma / jnp.sqrt(var + eps)
        bias = beta - mean * scale
        return (jnp.repeat(scale, 4).reshape(1, 1, 1, CF),
                jnp.repeat(bias, 4).reshape(1, 1, 1, CF))

    y1 = conv_ref(x, transform_p4_weights(params['conv1_w']), 3, stride, 1)
    s1, b1 = bn_sb(y1, params['bn1_gamma'], params['bn1_beta'])
    o1 = jnp.maximum(y1 * s1 + b1, 0.0)
    y2 = conv_ref(o1, transform_p4_weights(params['conv2_w']), 3, 1, 1)
    s2, b2 = bn_sb(y2, params['bn2_gamma'], params['bn2_beta'])
    if stride != 1 or in_planes != planes:
        ys = conv_ref(x, transform_p4_weights(params['sc_w']), 1, stride, 0)
        ss, bs = bn_sb(ys, params['sc_gamma'], params['sc_beta'])
        short = ys * ss + bs
    else:
        short = x
    out = jnp.maximum(y2 * s2 + b2 + short, 0.0)
    Ho, Wo = out.shape[1], out.shape[2]
    return out.reshape(N, Ho, Wo, planes, 4).transpose(0, 3, 4, 1, 2)


if __name__ == "__main__":
    key = jax.random.PRNGKey(0)
    in_planes, planes, stride = 4, 8, 1      # in_planes != planes -> projection shortcut
    N, H, W = 2, 16, 16
    ks = jax.random.split(key, 8)

    x = jax.random.normal(ks[0], (N, in_planes, 4, H, W), jnp.float32)
    params = {
        'conv1_w': 0.1 * jax.random.normal(ks[1], (planes, in_planes, 4, 3, 3), jnp.float32),
        'bn1_gamma': 1.0 + 0.1 * jax.random.normal(ks[2], (planes,), jnp.float32),
        'bn1_beta': 0.1 * jax.random.normal(ks[3], (planes,), jnp.float32),
        'conv2_w': 0.1 * jax.random.normal(ks[4], (planes, planes, 4, 3, 3), jnp.float32),
        'bn2_gamma': 1.0 + 0.1 * jax.random.normal(ks[5], (planes,), jnp.float32),
        'bn2_beta': 0.1 * jax.random.normal(ks[6], (planes,), jnp.float32),
    }
    if stride != 1 or in_planes != planes:
        k7, k8, k9 = jax.random.split(ks[7], 3)
        params['sc_w'] = 0.1 * jax.random.normal(k7, (planes, in_planes, 4, 1, 1), jnp.float32)
        params['sc_gamma'] = 1.0 + 0.1 * jax.random.normal(k8, (planes,), jnp.float32)
        params['sc_beta'] = 0.1 * jax.random.normal(k9, (planes,), jnp.float32)

    fwd = jax.jit(functools.partial(basic_block_forward, in_planes=in_planes,
                                    planes=planes, stride=stride))
    out = jax.block_until_ready(fwd(x, params))
    ref = jax.block_until_ready(ref_forward(x, params, in_planes, planes, stride))

    assert out.shape == (N, planes, 4, H // stride, W // stride), out.shape
    max_err = float(jnp.max(jnp.abs(out - ref)))
    mean_err = float(jnp.mean(jnp.abs(out - ref)))
    # Both paths use identical bf16 operands with f32 accumulation; residual
    # differences come from summation order and one-ulp bf16 re-rounding of the
    # fused BN+ReLU intermediate.
    assert max_err < 2e-2 and mean_err < 1e-3, (max_err, mean_err)
    print("KERNEL_OK")
</pallas_src>

<mosaic_0001>
module attributes {stable_mosaic.version = 11 : i64} {
  func.func @_conv_kernel(%arg0: i32, %arg1: memref<1x16x16x16xf32, #tpu.memory_space<vmem>>, %arg2: memref<144x32xbf16, #tpu.memory_space<vmem>>, %arg3: memref<1x16x16x32xf32, #tpu.memory_space<vmem>>, %arg4: memref<1x1x32xf32, #tpu.memory_space<vmem>>, %arg5: memref<1x1x32xf32, #tpu.memory_space<vmem>>, %arg6: memref<18x18x16xf32, #tpu.memory_space<vmem>>) attributes {dimension_semantics = [#tpu.dimension_semantics<parallel>], iteration_bounds = array<i64: 2>, scalar_prefetch = 0 : i64, scratch_operands = 1 : i64, tpu.core_type = #tpu.core_type<tc>, window_params = [{transform_indices = @transform_0, window_bounds = array<i64: 1, 16, 16, 16>}, {pipeline_mode = #tpu.pipeline_mode<synchronous>, transform_indices = @transform_1, window_bounds = array<i64: 144, 32>}, {transform_indices = @transform_2, window_bounds = array<i64: 1, 16, 16, 32>}, {transform_indices = @transform_3, window_bounds = array<i64: 1, 1, 32>}, {transform_indices = @transform_4, window_bounds = array<i64: 1, 1, 32>}]} {
    %c0 = arith.constant 0 : index
    %c0_0 = arith.constant 0 : index
    %c0_1 = arith.constant 0 : index
    %c0_2 = arith.constant 0 : index
    %0 = vector.load %arg1[%c0, %c0_0, %c0_1, %c0_2] : memref<1x16x16x16xf32, #tpu.memory_space<vmem>>, vector<1x16x16x16xf32>
    %1 = vector.shape_cast %0 : vector<1x16x16x16xf32> to vector<16x16x16xf32>
    %cst = arith.constant 0.000000e+00 : f32
    %2 = vector.broadcast %cst : f32 to vector<18x18x16xf32>
    %c0_3 = arith.constant 0 : index
    %c0_4 = arith.constant 0 : index
    %c0_5 = arith.constant 0 : index
    %3 = vector.load %arg6[%c0_3, %c0_4, %c0_5] : memref<18x18x16xf32, #tpu.memory_space<vmem>>, vector<18x18x16xf32>
    tpu.vector_store %arg6[%c0_3, %c0_4, %c0_5], %2 {strides = array<i32>} : memref<18x18x16xf32, #tpu.memory_space<vmem>>, vector<18x18x16xf32>,
    %c1 = arith.constant 1 : index
    %c1_6 = arith.constant 1 : index
    %c0_7 = arith.constant 0 : index
    %4 = vector.load %arg6[%c1, %c1_6, %c0_7] : memref<18x18x16xf32, #tpu.memory_space<vmem>>, vector<16x16x16xf32>
    tpu.vector_store %arg6[%c1, %c1_6, %c0_7], %1 {strides = array<i32>} : memref<18x18x16xf32, #tpu.memory_space<vmem>>, vector<16x16x16xf32>,
    %c0_8 = arith.constant 0 : index
    %c0_9 = arith.constant 0 : index
    %c0_10 = arith.constant 0 : index
    %5 = vector.load %arg6[%c0_8, %c0_9, %c0_10] : memref<18x18x16xf32, #tpu.memory_space<vmem>>, vector<16x16x16xf32>
    %c0_11 = arith.constant 0 : index
    %c1_12 = arith.constant 1 : index
    %c0_13 = arith.constant 0 : index
    %6 = vector.load %arg6[%c0_11, %c1_12, %c0_13] : memref<18x18x16xf32, #tpu.memory_space<vmem>>, vector<16x16x16xf32>
    %c0_14 = arith.constant 0 : index
    %c2 = arith.constant 2 : index
    %c0_15 = arith.constant 0 : index
    %7 = vector.load %arg6[%c0_14, %c2, %c0_15] : memref<18x18x16xf32, #tpu.memory_space<vmem>>, vector<16x16x16xf32>
    %c1_16 = arith.constant 1 : index
    %c0_17 = arith.constant 0 : index
    %c0_18 = arith.constant 0 : index
    %8 = vector.load %arg6[%c1_16, %c0_17, %c0_18] : memref<18x18x16xf32, #tpu.memory_space<vmem>>, vector<16x16x16xf32>
    %c1_19 = arith.constant 1 : index
    %c1_20 = arith.constant 1 : index
    %c0_21 = arith.constant 0 : index
    %9 = vector.load %arg6[%c1_19, %c1_20, %c0_21] : memref<18x18x16xf32, #tpu.memory_space<vmem>>, vector<16x16x16xf32>
    %c1_22 = arith.constant 1 : index
    %c2_23 = arith.constant 2 : index
    %c0_24 = arith.constant 0 : index
    %10 = vector.load %arg6[%c1_22, %c2_23, %c0_24] : memref<18x18x16xf32, #tpu.memory_space<vmem>>, vector<16x16x16xf32>
    %c2_25 = arith.constant 2 : index
    %c0_26 = arith.constant 0 : index
    %c0_27 = arith.constant 0 : index
    %11 = vector.load %arg6[%c2_25, %c0_26, %c0_27] : memref<18x18x16xf32, #tpu.memory_space<vmem>>, vector<16x16x16xf32>
    %c2_28 = arith.constant 2 : index
    %c1_29 = arith.constant 1 : index
    %c0_30 = arith.constant 0 : index
    %12 = vector.load %arg6[%c2_28, %c1_29, %c0_30] : memref<18x18x16xf32, #tpu.memory_space<vmem>>, vector<16x16x16xf32>
    %c2_31 = arith.constant 2 : index
    %c2_32 = arith.constant 2 : index
    %c0_33 = arith.constant 0 : index
    %13 = vector.load %arg6[%c2_31, %c2_32, %c0_33] : memref<18x18x16xf32, #tpu.memory_space<vmem>>, vector<16x16x16xf32>
    %14 = tpu.concatenate %5, %6, %7, %8, %9, %10, %11, %12, %13 in 2 : vector<16x16x16xf32>, vector<16x16x16xf32>, vector<16x16x16xf32>, vector<16x16x16xf32>, vector<16x16x16xf32>, vector<16x16x16xf32>, vector<16x16x16xf32>, vector<16x16x16xf32>, vector<16x16x16xf32> -> vector<16x16x144xf32>
    %15 = vector.shape_cast %14 : vector<16x16x144xf32> to vector<256x144xf32>
    %16 = arith.truncf %15 : vector<256x144xf32> to vector<256x144xbf16>
    %c0_34 = arith.constant 0 : index
    %c0_35 = arith.constant 0 : index
    %17 = vector.load %arg2[%c0_34, %c0_35] : memref<144x32xbf16, #tpu.memory_space<vmem>>, vector<144x32xbf16>
    %cst_36 = arith.constant dense<0.000000e+00> : vector<256x32xf32>
    %18 = tpu.matmul %16, %17, %cst_36 {dimension_numbers = #tpu.dot_dimension_numbers<[1], [0], [0], [1], [0, 0, 1, 1], [], []>} : vector<256x144xbf16>, vector<144x32xbf16>, vector<256x32xf32> -> vector<256x32xf32>
    %19 = vector.shape_cast %18 : vector<256x32xf32> to vector<1x16x16x32xf32>
    %c0_37 = arith.constant 0 : index
    %c0_38 = arith.constant 0 : index
    %c0_39 = arith.constant 0 : index
    %c0_40 = arith.constant 0 : index
    %20 = vector.load %arg3[%c0_37, %c0_38, %c0_39, %c0_40] : memref<1x16x16x32xf32, #tpu.memory_space<vmem>>, vector<1x16x16x32xf32>
    tpu.vector_store %arg3[%c0_37, %c0_38, %c0_39, %c0_40], %19 {strides = array<i32>} : memref<1x16x16x32xf32, #tpu.memory_space<vmem>>, vector<1x16x16x32xf32>,
    %cst_41 = arith.constant dense<0.000000e+00> : vector<32xf32>
    %21 = vector.multi_reduction <add>, %18, %cst_41 [0] : vector<256x32xf32> to vector<32xf32>
    %22 = vector.shape_cast %21 : vector<32xf32> to vector<1x1x32xf32>
    %c0_42 = arith.constant 0 : index
    %c0_43 = arith.constant 0 : index
    %c0_44 = arith.constant 0 : index
    %23 = vector.load %arg4[%c0_42, %c0_43, %c0_44] : memref<1x1x32xf32, #tpu.memory_space<vmem>>, vector<1x1x32xf32>
    tpu.vector_store %arg4[%c0_42, %c0_43, %c0_44], %22 {strides = array<i32>} : memref<1x1x32xf32, #tpu.memory_space<vmem>>, vector<1x1x32xf32>,
    %24 = arith.mulf %18, %18 : vector<256x32xf32>
    %cst_45 = arith.constant dense<0.000000e+00> : vector<32xf32>
    %25 = vector.multi_reduction <add>, %24, %cst_45 [0] : vector<256x32xf32> to vector<32xf32>
    %26 = vector.shape_cast %25 : vector<32xf32> to vector<1x1x32xf32>
    %c0_46 = arith.constant 0 : index
    %c0_47 = arith.constant 0 : index
    %c0_48 = arith.constant 0 : index
    %27 = vector.load %arg5[%c0_46, %c0_47, %c0_48] : memref<1x1x32xf32, #tpu.memory_space<vmem>>, vector<1x1x32xf32>
    tpu.vector_store %arg5[%c0_46, %c0_47, %c0_48], %26 {strides = array<i32>} : memref<1x1x32xf32, #tpu.memory_space<vmem>>, vector<1x1x32xf32>,
    return
  }
  func.func @transform_0(%arg0: i32) -> (i32, i32, i32, i32) {
    %c0_i32 = arith.constant 0 : i32
    %c0_i32_0 = arith.constant 0 : i32
    %c0_i32_1 = arith.constant 0 : i32
    %c0_i32_2 = arith.constant 0 : i32
    return %arg0, %c0_i32, %c0_i32_0, %c0_i32_1 : i32, i32, i32, i32
  }
  func.func @transform_1(%arg0: i32) -> (i32, i32) {
    %c0_i32 = arith.constant 0 : i32
    %c0_i32_0 = arith.constant 0 : i32
    %c0_i32_1 = arith.constant 0 : i32
    return %c0_i32, %c0_i32_0 : i32, i32
  }
  func.func @transform_2(%arg0: i32) -> (i32, i32, i32, i32) {
    %c0_i32 = arith.constant 0 : i32
    %c0_i32_0 = arith.constant 0 : i32
    %c0_i32_1 = arith.constant 0 : i32
    %c0_i32_2 = arith.constant 0 : i32
    return %arg0, %c0_i32, %c0_i32_0, %c0_i32_1 : i32, i32, i32, i32
  }
  func.func @transform_3(%arg0: i32) -> (i32, i32, i32) {
    %c0_i32 = arith.constant 0 : i32
    %c0_i32_0 = arith.constant 0 : i32
    %c0_i32_1 = arith.constant 0 : i32
    return %arg0, %c0_i32, %c0_i32_0 : i32, i32, i32
  }
  func.func @transform_4(%arg0: i32) -> (i32, i32, i32) {
    %c0_i32 = arith.constant 0 : i32
    %c0_i32_0 = arith.constant 0 : i32
    %c0_i32_1 = arith.constant 0 : i32
    return %arg0, %c0_i32, %c0_i32_0 : i32, i32, i32
  }
}

module attributes {stable_mosaic.version = 11 : i64} {
  func.func @_conv_kernel(%arg0: i32, %arg1: memref<1x16x16x16xf32, #tpu.memory_space<vmem>>, %arg2: memref<16x32xbf16, #tpu.memory_space<vmem>>, %arg3: memref<1x16x16x32xf32, #tpu.memory_space<vmem>>, %arg4: memref<1x1x32xf32, #tpu.memory_space<vmem>>, %arg5: memref<1x1x32xf32, #tpu.memory_space<vmem>>, %arg6: memref<16x16x16xf32, #tpu.memory_space<vmem>>) attributes {dimension_semantics = [#tpu.dimension_semantics<parallel>], iteration_bounds = array<i64: 2>, scalar_prefetch = 0 : i64, scratch_operands = 1 : i64, tpu.core_type = #tpu.core_type<tc>, window_params = [{transform_indices = @transform_0, window_bounds = array<i64: 1, 16, 16, 16>}, {pipeline_mode = #tpu.pipeline_mode<synchronous>, transform_indices = @transform_1, window_bounds = array<i64: 16, 32>}, {transform_indices = @transform_2, window_bounds = array<i64: 1, 16, 16, 32>}, {transform_indices = @transform_3, window_bounds = array<i64: 1, 1, 32>}, {transform_indices = @transform_4, window_bounds = array<i64: 1, 1, 32>}]} {
    %c0 = arith.constant 0 : index
    %c0_0 = arith.constant 0 : index
    %c0_1 = arith.constant 0 : index
    %c0_2 = arith.constant 0 : index
    %0 = vector.load %arg1[%c0, %c0_0, %c0_1, %c0_2] : memref<1x16x16x16xf32, #tpu.memory_space<vmem>>, vector<1x16x16x16xf32>
    %1 = vector.shape_cast %0 : vector<1x16x16x16xf32> to vector<16x16x16xf32>
    %2 = vector.shape_cast %1 : vector<16x16x16xf32> to vector<256x16xf32>
    %3 = arith.truncf %2 : vector<256x16xf32> to vector<256x16xbf16>
    %c0_3 = arith.constant 0 : index
    %c0_4 = arith.constant 0 : index
    %4 = vector.load %arg2[%c0_3, %c0_4] : memref<16x32xbf16, #tpu.memory_space<vmem>>, vector<16x32xbf16>
    %cst = arith.constant dense<0.000000e+00> : vector<256x32xf32>
    %5 = tpu.matmul %3, %4, %cst {dimension_numbers = #tpu.dot_dimension_numbers<[1], [0], [0], [1], [0, 0, 1, 1], [], []>} : vector<256x16xbf16>, vector<16x32xbf16>, vector<256x32xf32> -> vector<256x32xf32>
    %6 = vector.shape_cast %5 : vector<256x32xf32> to vector<1x16x16x32xf32>
    %c0_5 = arith.constant 0 : index
    %c0_6 = arith.constant 0 : index
    %c0_7 = arith.constant 0 : index
    %c0_8 = arith.constant 0 : index
    %7 = vector.load %arg3[%c0_5, %c0_6, %c0_7, %c0_8] : memref<1x16x16x32xf32, #tpu.memory_space<vmem>>, vector<1x16x16x32xf32>
    tpu.vector_store %arg3[%c0_5, %c0_6, %c0_7, %c0_8], %6 {strides = array<i32>} : memref<1x16x16x32xf32, #tpu.memory_space<vmem>>, vector<1x16x16x32xf32>,
    %cst_9 = arith.constant dense<0.000000e+00> : vector<32xf32>
    %8 = vector.multi_reduction <add>, %5, %cst_9 [0] : vector<256x32xf32> to vector<32xf32>
    %9 = vector.shape_cast %8 : vector<32xf32> to vector<1x1x32xf32>
    %c0_10 = arith.constant 0 : index
    %c0_11 = arith.constant 0 : index
    %c0_12 = arith.constant 0 : index
    %10 = vector.load %arg4[%c0_10, %c0_11, %c0_12] : memref<1x1x32xf32, #tpu.memory_space<vmem>>, vector<1x1x32xf32>
    tpu.vector_store %arg4[%c0_10, %c0_11, %c0_12], %9 {strides = array<i32>} : memref<1x1x32xf32, #tpu.memory_space<vmem>>, vector<1x1x32xf32>,
    %11 = arith.mulf %5, %5 : vector<256x32xf32>
    %cst_13 = arith.constant dense<0.000000e+00> : vector<32xf32>
    %12 = vector.multi_reduction <add>, %11, %cst_13 [0] : vector<256x32xf32> to vector<32xf32>
    %13 = vector.shape_cast %12 : vector<32xf32> to vector<1x1x32xf32>
    %c0_14 = arith.constant 0 : index
    %c0_15 = arith.constant 0 : index
    %c0_16 = arith.constant 0 : index
    %14 = vector.load %arg5[%c0_14, %c0_15, %c0_16] : memref<1x1x32xf32, #tpu.memory_space<vmem>>, vector<1x1x32xf32>
    tpu.vector_store %arg5[%c0_14, %c0_15, %c0_16], %13 {strides = array<i32>} : memref<1x1x32xf32, #tpu.memory_space<vmem>>, vector<1x1x32xf32>,
    return
  }
  func.func @transform_0(%arg0: i32) -> (i32, i32, i32, i32) {
    %c0_i32 = arith.constant 0 : i32
    %c0_i32_0 = arith.constant 0 : i32
    %c0_i32_1 = arith.constant 0 : i32
    %c0_i32_2 = arith.constant 0 : i32
    return %arg0, %c0_i32, %c0_i32_0, %c0_i32_1 : i32, i32, i32, i32
  }
  func.func @transform_1(%arg0: i32) -> (i32, i32) {
    %c0_i32 = arith.constant 0 : i32
    %c0_i32_0 = arith.constant 0 : i32
    %c0_i32_1 = arith.constant 0 : i32
    return %c0_i32, %c0_i32_0 : i32, i32
  }
  func.func @transform_2(%arg0: i32) -> (i32, i32, i32, i32) {
    %c0_i32 = arith.constant 0 : i32
    %c0_i32_0 = arith.constant 0 : i32
    %c0_i32_1 = arith.constant 0 : i32
    %c0_i32_2 = arith.constant 0 : i32
    return %arg0, %c0_i32, %c0_i32_0, %c0_i32_1 : i32, i32, i32, i32
  }
  func.func @transform_3(%arg0: i32) -> (i32, i32, i32) {
    %c0_i32 = arith.constant 0 : i32
    %c0_i32_0 = arith.constant 0 : i32
    %c0_i32_1 = arith.constant 0 : i32
    return %arg0, %c0_i32, %c0_i32_0 : i32, i32, i32
  }
  func.func @transform_4(%arg0: i32) -> (i32, i32, i32) {
    %c0_i32 = arith.constant 0 : i32
    %c0_i32_0 = arith.constant 0 : i32
    %c0_i32_1 = arith.constant 0 : i32
    return %arg0, %c0_i32, %c0_i32_0 : i32, i32, i32
  }
}

module attributes {stable_mosaic.version = 11 : i64} {
  func.func @_conv_kernel(%arg0: i32, %arg1: memref<1x16x16x32xf32, #tpu.memory_space<vmem>>, %arg2: memref<288x32xbf16, #tpu.memory_space<vmem>>, %arg3: memref<1x32xf32, #tpu.memory_space<vmem>>, %arg4: memref<1x32xf32, #tpu.memory_space<vmem>>, %arg5: memref<1x16x16x32xf32, #tpu.memory_space<vmem>>, %arg6: memref<1x1x32xf32, #tpu.memory_space<vmem>>, %arg7: memref<1x1x32xf32, #tpu.memory_space<vmem>>, %arg8: memref<18x18x32xf32, #tpu.memory_space<vmem>>) attributes {dimension_semantics = [#tpu.dimension_semantics<parallel>], iteration_bounds = array<i64: 2>, scalar_prefetch = 0 : i64, scratch_operands = 1 : i64, tpu.core_type = #tpu.core_type<tc>, window_params = [{transform_indices = @transform_0, window_bounds = array<i64: 1, 16, 16, 32>}, {pipeline_mode = #tpu.pipeline_mode<synchronous>, transform_indices = @transform_1, window_bounds = array<i64: 288, 32>}, {pipeline_mode = #tpu.pipeline_mode<synchronous>, transform_indices = @transform_2, window_bounds = array<i64: 1, 32>}, {pipeline_mode = #tpu.pipeline_mode<synchronous>, transform_indices = @transform_3, window_bounds = array<i64: 1, 32>}, {transform_indices = @transform_4, window_bounds = array<i64: 1, 16, 16, 32>}, {transform_indices = @transform_5, window_bounds = array<i64: 1, 1, 32>}, {transform_indices = @transform_6, window_bounds = array<i64: 1, 1, 32>}]} {
    %c0 = arith.constant 0 : index
    %c0_0 = arith.constant 0 : index
    %c0_1 = arith.constant 0 : index
    %c0_2 = arith.constant 0 : index
    %0 = vector.load %arg1[%c0, %c0_0, %c0_1, %c0_2] : memref<1x16x16x32xf32, #tpu.memory_space<vmem>>, vector<1x16x16x32xf32>
    %1 = vector.shape_cast %0 : vector<1x16x16x32xf32> to vector<16x16x32xf32>
    %c0_3 = arith.constant 0 : index
    %c0_4 = arith.constant 0 : index
    %2 = vector.load %arg3[%c0_3, %c0_4] : memref<1x32xf32, #tpu.memory_space<vmem>>, vector<1x32xf32>
    %3 = vector.shape_cast %2 : vector<1x32xf32> to vector<1x1x32xf32>
    %4 = vector.broadcast %3 : vector<1x1x32xf32> to vector<16x16x32xf32>
    %5 = arith.mulf %1, %4 : vector<16x16x32xf32>
    %c0_5 = arith.constant 0 : index
    %c0_6 = arith.constant 0 : index
    %6 = vector.load %arg4[%c0_5, %c0_6] : memref<1x32xf32, #tpu.memory_space<vmem>>, vector<1x32xf32>
    %7 = vector.shape_cast %6 : vector<1x32xf32> to vector<1x1x32xf32>
    %8 = vector.broadcast %7 : vector<1x1x32xf32> to vector<16x16x32xf32>
    %9 = arith.addf %5, %8 : vector<16x16x32xf32>
    %cst = arith.constant 0.000000e+00 : f32
    %10 = vector.broadcast %cst : f32 to vector<16x16x32xf32>
    %11 = arith.maximumf %9, %10 : vector<16x16x32xf32>
    %cst_7 = arith.constant 0.000000e+00 : f32
    %12 = vector.broadcast %cst_7 : f32 to vector<18x18x32xf32>
    %c0_8 = arith.constant 0 : index
    %c0_9 = arith.constant 0 : index
    %c0_10 = arith.constant 0 : index
    %13 = vector.load %arg8[%c0_8, %c0_9, %c0_10] : memref<18x18x32xf32, #tpu.memory_space<vmem>>, vector<18x18x32xf32>
    tpu.vector_store %arg8[%c0_8, %c0_9, %c0_10], %12 {strides = array<i32>} : memref<18x18x32xf32, #tpu.memory_space<vmem>>, vector<18x18x32xf32>,
    %c1 = arith.constant 1 : index
    %c1_11 = arith.constant 1 : index
    %c0_12 = arith.constant 0 : index
    %14 = vector.load %arg8[%c1, %c1_11, %c0_12] : memref<18x18x32xf32, #tpu.memory_space<vmem>>, vector<16x16x32xf32>
    tpu.vector_store %arg8[%c1, %c1_11, %c0_12], %11 {strides = array<i32>} : memref<18x18x32xf32, #tpu.memory_space<vmem>>, vector<16x16x32xf32>,
    %c0_13 = arith.constant 0 : index
    %c0_14 = arith.constant 0 : index
    %c0_15 = arith.constant 0 : index
    %15 = vector.load %arg8[%c0_13, %c0_14, %c0_15] : memref<18x18x32xf32, #tpu.memory_space<vmem>>, vector<16x16x32xf32>
    %c0_16 = arith.constant 0 : index
    %c1_17 = arith.constant 1 : index
    %c0_18 = arith.constant 0 : index
    %16 = vector.load %arg8[%c0_16, %c1_17, %c0_18] : memref<18x18x32xf32, #tpu.memory_space<vmem>>, vector<16x16x32xf32>
    %c0_19 = arith.constant 0 : index
    %c2 = arith.constant 2 : index
    %c0_20 = arith.constant 0 : index
    %17 = vector.load %arg8[%c0_19, %c2, %c0_20] : memref<18x18x32xf32, #tpu.memory_space<vmem>>, vector<16x16x32xf32>
    %c1_21 = arith.constant 1 : index
    %c0_22 = arith.constant 0 : index
    %c0_23 = arith.constant 0 : index
    %18 = vector.load %arg8[%c1_21, %c0_22, %c0_23] : memref<18x18x32xf32, #tpu.memory_space<vmem>>, vector<16x16x32xf32>
    %c1_24 = arith.constant 1 : index
    %c1_25 = arith.constant 1 : index
    %c0_26 = arith.constant 0 : index
    %19 = vector.load %arg8[%c1_24, %c1_25, %c0_26] : memref<18x18x32xf32, #tpu.memory_space<vmem>>, vector<16x16x32xf32>
    %c1_27 = arith.constant 1 : index
    %c2_28 = arith.constant 2 : index
    %c0_29 = arith.constant 0 : index
    %20 = vector.load %arg8[%c1_27, %c2_28, %c0_29] : memref<18x18x32xf32, #tpu.memory_space<vmem>>, vector<16x16x32xf32>
    %c2_30 = arith.constant 2 : index
    %c0_31 = arith.constant 0 : index
    %c0_32 = arith.constant 0 : index
    %21 = vector.load %arg8[%c2_30, %c0_31, %c0_32] : memref<18x18x32xf32, #tpu.memory_space<vmem>>, vector<16x16x32xf32>
    %c2_33 = arith.constant 2 : index
    %c1_34 = arith.constant 1 : index
    %c0_35 = arith.constant 0 : index
    %22 = vector.load %arg8[%c2_33, %c1_34, %c0_35] : memref<18x18x32xf32, #tpu.memory_space<vmem>>, vector<16x16x32xf32>
    %c2_36 = arith.constant 2 : index
    %c2_37 = arith.constant 2 : index
    %c0_38 = arith.constant 0 : index
    %23 = vector.load %arg8[%c2_36, %c2_37, %c0_38] : memref<18x18x32xf32, #tpu.memory_space<vmem>>, vector<16x16x32xf32>
    %24 = tpu.concatenate %15, %16, %17, %18, %19, %20, %21, %22, %23 in 2 : vector<16x16x32xf32>, vector<16x16x32xf32>, vector<16x16x32xf32>, vector<16x16x32xf32>, vector<16x16x32xf32>, vector<16x16x32xf32>, vector<16x16x32xf32>, vector<16x16x32xf32>, vector<16x16x32xf32> -> vector<16x16x288xf32>
    %25 = vector.shape_cast %24 : vector<16x16x288xf32> to vector<256x288xf32>
    %26 = arith.truncf %25 : vector<256x288xf32> to vector<256x288xbf16>
    %c0_39 = arith.constant 0 : index
    %c0_40 = arith.constant 0 : index
    %27 = vector.load %arg2[%c0_39, %c0_40] : memref<288x32xbf16, #tpu.memory_space<vmem>>, vector<288x32xbf16>
    %cst_41 = arith.constant dense<0.000000e+00> : vector<256x32xf32>
    %28 = tpu.matmul %26, %27, %cst_41 {dimension_numbers = #tpu.dot_dimension_numbers<[1], [0], [0], [1], [0, 0, 1, 1], [], []>} : vector<256x288xbf16>, vector<288x32xbf16>, vector<256x32xf32> -> vector<256x32xf32>
    %29 = vector.shape_cast %28 : vector<256x32xf32> to vector<1x16x16x32xf32>
    %c0_42 = arith.constant 0 : index
    %c0_43 = arith.constant 0 : index
    %c0_44 = arith.constant 0 : index
    %c0_45 = arith.constant 0 : index
    %30 = vector.load %arg5[%c0_42, %c0_43, %c0_44, %c0_45] : memref<1x16x16x32xf32, #tpu.memory_space<vmem>>, vector<1x16x16x32xf32>
    tpu.vector_store %arg5[%c0_42, %c0_43, %c0_44, %c0_45], %29 {strides = array<i32>} : memref<1x16x16x32xf32, #tpu.memory_space<vmem>>, vector<1x16x16x32xf32>,
    %cst_46 = arith.constant dense<0.000000e+00> : vector<32xf32>
    %31 = vector.multi_reduction <add>, %28, %cst_46 [0] : vector<256x32xf32> to vector<32xf32>
    %32 = vector.shape_cast %31 : vector<32xf32> to vector<1x1x32xf32>
    %c0_47 = arith.constant 0 : index
    %c0_48 = arith.constant 0 : index
    %c0_49 = arith.constant 0 : index
    %33 = vector.load %arg6[%c0_47, %c0_48, %c0_49] : memref<1x1x32xf32, #tpu.memory_space<vmem>>, vector<1x1x32xf32>
    tpu.vector_store %arg6[%c0_47, %c0_48, %c0_49], %32 {strides = array<i32>} : memref<1x1x32xf32, #tpu.memory_space<vmem>>, vector<1x1x32xf32>,
    %34 = arith.mulf %28, %28 : vector<256x32xf32>
    %cst_50 = arith.constant dense<0.000000e+00> : vector<32xf32>
    %35 = vector.multi_reduction <add>, %34, %cst_50 [0] : vector<256x32xf32> to vector<32xf32>
    %36 = vector.shape_cast %35 : vector<32xf32> to vector<1x1x32xf32>
    %c0_51 = arith.constant 0 : index
    %c0_52 = arith.constant 0 : index
    %c0_53 = arith.constant 0 : index
    %37 = vector.load %arg7[%c0_51, %c0_52, %c0_53] : memref<1x1x32xf32, #tpu.memory_space<vmem>>, vector<1x1x32xf32>
    tpu.vector_store %arg7[%c0_51, %c0_52, %c0_53], %36 {strides = array<i32>} : memref<1x1x32xf32, #tpu.memory_space<vmem>>, vector<1x1x32xf32>,
    return
  }
  func.func @transform_0(%arg0: i32) -> (i32, i32, i32, i32) {
    %c0_i32 = arith.constant 0 : i32
    %c0_i32_0 = arith.constant 0 : i32
    %c0_i32_1 = arith.constant 0 : i32
    %c0_i32_2 = arith.constant 0 : i32
    return %arg0, %c0_i32, %c0_i32_0, %c0_i32_1 : i32, i32, i32, i32
  }
  func.func @transform_1(%arg0: i32) -> (i32, i32) {
    %c0_i32 = arith.constant 0 : i32
    %c0_i32_0 = arith.constant 0 : i32
    %c0_i32_1 = arith.constant 0 : i32
    return %c0_i32, %c0_i32_0 : i32, i32
  }
  func.func @transform_2(%arg0: i32) -> (i32, i32) {
    %c0_i32 = arith.constant 0 : i32
    %c0_i32_0 = arith.constant 0 : i32
    %c0_i32_1 = arith.constant 0 : i32
    return %c0_i32, %c0_i32_0 : i32, i32
  }
  func.func @transform_3(%arg0: i32) -> (i32, i32) {
    %c0_i32 = arith.constant 0 : i32
    %c0_i32_0 = arith.constant 0 : i32
    %c0_i32_1 = arith.constant 0 : i32
    return %c0_i32, %c0_i32_0 : i32, i32
  }
  func.func @transform_4(%arg0: i32) -> (i32, i32, i32, i32) {
    %c0_i32 = arith.constant 0 : i32
    %c0_i32_0 = arith.constant 0 : i32
    %c0_i32_1 = arith.constant 0 : i32
    %c0_i32_2 = arith.constant 0 : i32
    return %arg0, %c0_i32, %c0_i32_0, %c0_i32_1 : i32, i32, i32, i32
  }
  func.func @transform_5(%arg0: i32) -> (i32, i32, i32) {
    %c0_i32 = arith.constant 0 : i32
    %c0_i32_0 = arith.constant 0 : i32
    %c0_i32_1 = arith.constant 0 : i32
    return %arg0, %c0_i32, %c0_i32_0 : i32, i32, i32
  }
  func.func @transform_6(%arg0: i32) -> (i32, i32, i32) {
    %c0_i32 = arith.constant 0 : i32
    %c0_i32_0 = arith.constant 0 : i32
    %c0_i32_1 = arith.constant 0 : i32
    return %arg0, %c0_i32, %c0_i32_0 : i32, i32, i32
  }
}

module attributes {stable_mosaic.version = 11 : i64} {
  func.func @_bn_add_relu_proj_kernel(%arg0: i32, %arg1: memref<32x512xf32, #tpu.memory_space<vmem>>, %arg2: memref<1x512xf32, #tpu.memory_space<vmem>>, %arg3: memref<1x512xf32, #tpu.memory_space<vmem>>, %arg4: memref<32x512xf32, #tpu.memory_space<vmem>>, %arg5: memref<1x512xf32, #tpu.memory_space<vmem>>, %arg6: memref<1x512xf32, #tpu.memory_space<vmem>>, %arg7: memref<32x512xf32, #tpu.memory_space<vmem>>) attributes {dimension_semantics = [#tpu.dimension_semantics<parallel>], iteration_bounds = array<i64: 1>, scalar_prefetch = 0 : i64, scratch_operands = 0 : i64, tpu.core_type = #tpu.core_type<tc>, window_params = [{transform_indices = @transform_0, window_bounds = array<i64: 32, 512>}, {pipeline_mode = #tpu.pipeline_mode<synchronous>, transform_indices = @transform_1, window_bounds = array<i64: 1, 512>}, {pipeline_mode = #tpu.pipeline_mode<synchronous>, transform_indices = @transform_2, window_bounds = array<i64: 1, 512>}, {transform_indices = @transform_3, window_bounds = array<i64: 32, 512>}, {pipeline_mode = #tpu.pipeline_mode<synchronous>, transform_indices = @transform_4, window_bounds = array<i64: 1, 512>}, {pipeline_mode = #tpu.pipeline_mode<synchronous>, transform_indices = @transform_5, window_bounds = array<i64: 1, 512>}, {transform_indices = @transform_6, window_bounds = array<i64: 32, 512>}]} {
    %c0 = arith.constant 0 : index
    %c0_0 = arith.constant 0 : index
    %0 = vector.load %arg1[%c0, %c0_0] : memref<32x512xf32, #tpu.memory_space<vmem>>, vector<32x512xf32>
    %c0_1 = arith.constant 0 : index
    %c0_2 = arith.constant 0 : index
    %1 = vector.load %arg2[%c0_1, %c0_2] : memref<1x512xf32, #tpu.memory_space<vmem>>, vector<1x512xf32>
    %2 = vector.broadcast %1 : vector<1x512xf32> to vector<32x512xf32>
    %3 = arith.mulf %0, %2 : vector<32x512xf32>
    %c0_3 = arith.constant 0 : index
    %c0_4 = arith.constant 0 : index
    %4 = vector.load %arg3[%c0_3, %c0_4] : memref<1x512xf32, #tpu.memory_space<vmem>>, vector<1x512xf32>
    %5 = vector.broadcast %4 : vector<1x512xf32> to vector<32x512xf32>
    %6 = arith.addf %3, %5 : vector<32x512xf32>
    %c0_5 = arith.constant 0 : index
    %c0_6 = arith.constant 0 : index
    %7 = vector.load %arg4[%c0_5, %c0_6] : memref<32x512xf32, #tpu.memory_space<vmem>>, vector<32x512xf32>
    %c0_7 = arith.constant 0 : index
    %c0_8 = arith.constant 0 : index
    %8 = vector.load %arg5[%c0_7, %c0_8] : memref<1x512xf32, #tpu.memory_space<vmem>>, vector<1x512xf32>
    %9 = vector.broadcast %8 : vector<1x512xf32> to vector<32x512xf32>
    %10 = arith.mulf %7, %9 : vector<32x512xf32>
    %11 = arith.addf %6, %10 : vector<32x512xf32>
    %c0_9 = arith.constant 0 : index
    %c0_10 = arith.constant 0 : index
    %12 = vector.load %arg6[%c0_9, %c0_10] : memref<1x512xf32, #tpu.memory_space<vmem>>, vector<1x512xf32>
    %13 = vector.broadcast %12 : vector<1x512xf32> to vector<32x512xf32>
    %14 = arith.addf %11, %13 : vector<32x512xf32>
    %cst = arith.constant 0.000000e+00 : f32
    %15 = vector.broadcast %cst : f32 to vector<32x512xf32>
    %16 = arith.maximumf %14, %15 : vector<32x512xf32>
    %c0_11 = arith.constant 0 : index
    %c0_12 = arith.constant 0 : index
    %17 = vector.load %arg7[%c0_11, %c0_12] : memref<32x512xf32, #tpu.memory_space<vmem>>, vector<32x512xf32>
    tpu.vector_store %arg7[%c0_11, %c0_12], %16 {strides = array<i32>} : memref<32x512xf32, #tpu.memory_space<vmem>>, vector<32x512xf32>,
    return
  }
  func.func @transform_0(%arg0: i32) -> (i32, i32) {
    %c0_i32 = arith.constant 0 : i32
    %c0_i32_0 = arith.constant 0 : i32
    return %arg0, %c0_i32 : i32, i32
  }
  func.func @transform_1(%arg0: i32) -> (i32, i32) {
    %c0_i32 = arith.constant 0 : i32
    %c0_i32_0 = arith.constant 0 : i32
    %c0_i32_1 = arith.constant 0 : i32
    return %c0_i32, %c0_i32_0 : i32, i32
  }
  func.func @transform_2(%arg0: i32) -> (i32, i32) {
    %c0_i32 = arith.constant 0 : i32
    %c0_i32_0 = arith.constant 0 : i32
    %c0_i32_1 = arith.constant 0 : i32
    return %c0_i32, %c0_i32_0 : i32, i32
  }
  func.func @transform_3(%arg0: i32) -> (i32, i32) {
    %c0_i32 = arith.constant 0 : i32
    %c0_i32_0 = arith.constant 0 : i32
    return %arg0, %c0_i32 : i32, i32
  }
  func.func @transform_4(%arg0: i32) -> (i32, i32) {
    %c0_i32 = arith.constant 0 : i32
    %c0_i32_0 = arith.constant 0 : i32
    %c0_i32_1 = arith.constant 0 : i32
    return %c0_i32, %c0_i32_0 : i32, i32
  }
  func.func @transform_5(%arg0: i32) -> (i32, i32) {
    %c0_i32 = arith.constant 0 : i32
    %c0_i32_0 = arith.constant 0 : i32
    %c0_i32_1 = arith.constant 0 : i32
    return %c0_i32, %c0_i32_0 : i32, i32
  }
  func.func @transform_6(%arg0: i32) -> (i32, i32) {
    %c0_i32 = arith.constant 0 : i32
    %c0_i32_0 = arith.constant 0 : i32
    return %arg0, %c0_i32 : i32, i32
  }
}

</mosaic_0001>

<bundles_post_ra>
// kernel: basic_block_forward.6
= control target key start
LH: loop header
LB: loop body
LE: loop exit
PB: predicated region body
PF: predicated region fallthrough
CT: control target
= control target key end

     0   :  { %s799_s15 = smov 0   ;;  %s1152_s0 = inlined_call_operand.vmem [shape: f32[2,16,16,16], index: 0, kind: input, shape index: {}]   ;;  %s1153_s1 = inlined_call_operand.vmem [shape: bf16[16,32], index: 1, kind: input, shape index: {}]   ;;  %s1154_s2 = inlined_call_operand.vmem [shape: f32[2,16,16,32], index: 2, kind: output, shape index: {0}]   ;;  %s1155_s3 = inlined_call_operand.vmem [shape: f32[2,1,32], index: 3, kind: output, shape index: {1}]   ;;  %s1156_s4 = inlined_call_operand.vmem [shape: f32[2,1,32], index: 4, kind: output, shape index: {2}]  }
   0x1 LB: > { %s721_s16 = sadd.s32 4294967295, %s772_s15   ;;  %p725_p0 = scmp.ge.s32.totalorder %s772_s15, 1  ;;  %s772_s15 = sphi %s799_s15, %s15_s15  }
   0x2   : > { %p167_p1 = scmp.lt.s32.totalorder %s772_s15, 3 }
   0x4   : > { %p168_p2 = pnand %p725_p0, %p167_p1 }
   0x5   : > { %p199_p3 = scmp.lt.s32.totalorder (!%p168_p2), %s721_s16, 1 }
   0x6   : > { %171 = sbr.rel (%p168_p2) target bundleno = 265 (0x109), region = 28 }
   0xb   : > { %v754_v0 = vld [vmem:[%s1153_s1] sm:$0xff]  ;;  %s1158_s16 = smov (!%p199_p3, %s721_s16), 1  ;;  %vm272_vm0 = vcmask 130048   ;;  %vm410_vm1 = vcmask 261120   ;;  %vm512_vm2 = vcmask 253952  }
   0xc   : > { %328 = vmatpush.bf16.msra.mxu0 %v754_v0  ;;  %755 = vmatpush.bf16.msra.mxu1 %v754_v0  ;;  %s752_s19 = sshll.u32 %s1158_s16, 8  ;;  %s211_s28 = scalar_lea.vmem %s1155_s3, %s1158_s16 }
   0xd   : > { %756 = vmatpush.bf16.msra.mxu2 %v754_v0  ;;  %757 = vmatpush.bf16.msra.mxu3 %v754_v0  ;;  %s818_s22 = scalar_lea.vmem %s1152_s0, %s752_s19  ;;  %s873_s25 = scalar_lea.vmem %s1154_s2, %s752_s19 }
   0xe   : > { %v216_v1 = vld [vmem:[%s818_s22] sm:$0xff]  ;;  %v217_v2 = vld [vmem:[%s818_s22 + $0x8] sm:$0xff]  ;;  %v218_v13 = vld [vmem:[%s818_s22 + $0x10] sm:$0xff]  ;;  %s214_s5 = scalar_lea.vmem %s1156_s4, %s1158_s16 }
   0xf   : > { %v224_v3 = vld [vmem:[%s818_s22 + $0x40] sm:$0xff]  ;;  %v248_v4 = vpack.c.bf16 %v217_v2, %v216_v1  ;;  %v225_v5 = vld [vmem:[%s818_s22 + $0x48] sm:$0xff]  ;;  %v219_v14 = vld [vmem:[%s818_s22 + $0x18] sm:$0xff] }
  0x10   : > { %v252_v6 = vpack.c.bf16 %v225_v5, %v224_v3  ;;  %v232_v7 = vld [vmem:[%s818_s22 + $0x80] sm:$0xff]  ;;  %v233_v8 = vld [vmem:[%s818_s22 + $0x88] sm:$0xff]  ;;  %v226_v15 = vld [vmem:[%s818_s22 + $0x50] sm:$0xff]  ;;  %v249_v19 = vpack.c.bf16 %v219_v14, %v218_v13 }
  0x11   : > { %734 = vmatmul.msk.bf16.vlgmr.msra.gmra.mxu0 %vm272_vm0, %v248_v4  ;;  %v256_v9 = vpack.c.bf16 %v233_v8, %v232_v7  ;;  %v240_v10 = vld [vmem:[%s818_s22 + $0xc0] sm:$0xff]  ;;  %v241_v11 = vld [vmem:[%s818_s22 + $0xc8] sm:$0xff]  ;;  %v227_v16 = vld [vmem:[%s818_s22 + $0x58] sm:$0xff] }
  0x12   : > { %738 = vmatmul.msk.bf16.vlgmr.msra.gmra.mxu1 %vm272_vm0, %v252_v6  ;;  %v260_v12 = vpack.c.bf16 %v241_v11, %v240_v10  ;;  %v234_v17 = vld [vmem:[%s818_s22 + $0x90] sm:$0xff]  ;;  %v235_v18 = vld [vmem:[%s818_s22 + $0x98] sm:$0xff]  ;;  %v253_v20 = vpack.c.bf16 %v227_v16, %v226_v15  ;;  %v220_v25 = vld [vmem:[%s818_s22 + $0x20] sm:$0xff] }
  0x13   : > { %742 = vmatmul.msk.bf16.vlgmr.msra.gmra.mxu2 %vm272_vm0, %v256_v9  ;;  %v257_v21 = vpack.c.bf16 %v235_v18, %v234_v17  ;;  %v242_v22 = vld [vmem:[%s818_s22 + $0xd0] sm:$0xff]  ;;  %v243_v23 = vld [vmem:[%s818_s22 + $0xd8] sm:$0xff]  ;;  %v221_v26 = vld [vmem:[%s818_s22 + $0x28] sm:$0xff] }
  0x14   : > { %746 = vmatmul.msk.bf16.vlgmr.msra.gmra.mxu3 %vm272_vm0, %v260_v12  ;;  %v261_v24 = vpack.c.bf16 %v243_v23, %v242_v22  ;;  %v228_v27 = vld [vmem:[%s818_s22 + $0x60] sm:$0xff]  ;;  %v229_v28 = vld [vmem:[%s818_s22 + $0x68] sm:$0xff]  ;;  %v250_v31 = vpack.c.bf16 %v221_v26, %v220_v25  ;;  %v222_v37 = vld [vmem:[%s818_s22 + $0x30] sm:$0xff] }
  0x15   : > { %v236_v29 = vld [vmem:[%s818_s22 + $0xa0] sm:$0xff]  ;;  %v237_v30 = vld [vmem:[%s818_s22 + $0xa8] sm:$0xff]  ;;  %v254_v32 = vpack.c.bf16 %v229_v28, %v228_v27  ;;  %v223_v38 = vld [vmem:[%s818_s22 + $0x38] sm:$0xff] }
  0x16   : > { %v258_v33 = vpack.c.bf16 %v237_v30, %v236_v29  ;;  %v244_v34 = vld [vmem:[%s818_s22 + $0xe0] sm:$0xff]  ;;  %v245_v35 = vld [vmem:[%s818_s22 + $0xe8] sm:$0xff]  ;;  %v230_v39 = vld [vmem:[%s818_s22 + $0x70] sm:$0xff]  ;;  %v251_v43 = vpack.c.bf16 %v223_v38, %v222_v37 }
  0x17   : > { %v262_v36 = vpack.c.bf16 %v245_v35, %v244_v34  ;;  %v231_v40 = vld [vmem:[%s818_s22 + $0x78] sm:$0xff]  ;;  %v238_v41 = vld [vmem:[%s818_s22 + $0xb0] sm:$0xff] }
  0x18   : > { %v239_v42 = vld [vmem:[%s818_s22 + $0xb8] sm:$0xff]  ;;  %v255_v44 = vpack.c.bf16 %v231_v40, %v230_v39  ;;  %v246_v46 = vld [vmem:[%s818_s22 + $0xf0] sm:$0xff] }
  0x19   : > { %v259_v45 = vpack.c.bf16 %v239_v42, %v238_v41  ;;  %v247_v47 = vld [vmem:[%s818_s22 + $0xf8] sm:$0xff] }
  0x1a   : > { %v263_v48 = vpack.c.bf16 %v247_v47, %v246_v46 }
  0x21   : > { %735 = vmatmul.msk.bf16.gmra.mxu0 %vm272_vm0, %v249_v19 }
  0x22   : > { %739 = vmatmul.msk.bf16.gmra.mxu1 %vm272_vm0, %v253_v20 }
  0x23   : > { %743 = vmatmul.msk.bf16.gmra.mxu2 %vm272_vm0, %v257_v21 }
  0x24   : > { %747 = vmatmul.msk.bf16.gmra.mxu3 %vm272_vm0, %v261_v24 }
  0x31   : > { %736 = vmatmul.msk.bf16.gmra.mxu0 %vm272_vm0, %v250_v31 }
  0x32   : > { %740 = vmatmul.msk.bf16.gmra.mxu1 %vm272_vm0, %v254_v32 }
  0x33   : > { %744 = vmatmul.msk.bf16.gmra.mxu2 %vm272_vm0, %v258_v33 }
  0x34   : > { %748 = vmatmul.msk.bf16.gmra.mxu3 %vm272_vm0, %v262_v36 }
  0x41   : > { %737 = vmatmul.msk.bf16.gmra.mxu0 %vm272_vm0, %v251_v43 }
  0x42   : > { %741 = vmatmul.msk.bf16.gmra.mxu1 %vm272_vm0, %v255_v44 }
  0x43   : > { %745 = vmatmul.msk.bf16.gmra.mxu2 %vm272_vm0, %v259_v45 }
  0x44   : > { %749 = vmatmul.msk.bf16.gmra.mxu3 %vm272_vm0, %v263_v48 }
  0x8e   : > { %v330_v49 = vpop.f32.mrf.mxu0 }
  0x8f   : > { %411 = vst.msk [vmem:[%s873_s25] sm:$0xff] %vm410_vm1, %v330_v49  ;;  %v877_v50 = vpop.f32.mrf.mxu1  ;;  %v514_v7 = vmul.f32 %v330_v49, %v330_v49  ;;  %v443_v11 = vsel %vm410_vm1, %v330_v49, 0.0 }
  0x90   : > { %419 = vst.msk [vmem:[%s873_s25 + $0x40] sm:$0xff] %vm410_vm1, %v877_v50  ;;  %v522_v45 = vmul.f32 %v877_v50, %v877_v50 }
  0x91   : > { %v546_v16 = vsel %vm410_vm1, %v514_v7, 0.0 }
  0x96   : > { %v332_v51 = vpop.f32.mrf.mxu0  ;;  %v882_v52 = vpop.f32.mrf.mxu2 }
  0x97   : > { %412 = vst.msk [vmem:[%s873_s25 + $0x8] sm:$0xff] %vm410_vm1, %v332_v51  ;;  %v886_v53 = vpop.f32.mrf.mxu1  ;;  %v894_v54 = vpop.f32.mrf.mxu3  ;;  %v515_v5 = vmul.f32 %v332_v51, %v332_v51  ;;  %v444_v8 = vsel %vm410_vm1, %v332_v51, 0.0 }
  0x98   : > { %420 = vst.msk [vmem:[%s873_s25 + $0x48] sm:$0xff] %vm410_vm1, %v886_v53  ;;  %v445_v15 = vadd.f32 %v444_v8, %v443_v11  ;;  %v561_v8 = vsel %vm410_vm1, %v522_v45, 0.0 }
  0x99   : > { %427 = vst.msk [vmem:[%s873_s25 + $0x80] sm:$0xff] %vm410_vm1, %v882_v52  ;;  %v547_v12 = vsel %vm410_vm1, %v515_v5, 0.0 }
  0x9a   : > { %435 = vst.msk [vmem:[%s873_s25 + $0xc0] sm:$0xff] %vm410_vm1, %v894_v54  ;;  %v548_v20 = vadd.f32 %v547_v12, %v546_v16 }
  0x9e   : > { %v335_v55 = vpop.f32.mrf.mxu0  ;;  %v899_v56 = vpop.f32.mrf.mxu2 }
  0x9f   : > { %413 = vst.msk [vmem:[%s873_s25 + $0x10] sm:$0xff] %vm410_vm1, %v335_v55  ;;  %v903_v57 = vpop.f32.mrf.mxu1  ;;  %v911_v58 = vpop.f32.mrf.mxu3  ;;  %v516_v9 = vmul.f32 %v335_v55, %v335_v55  ;;  %v446_v13 = vsel %vm410_vm1, %v335_v55, 0.0  ;;  %v458_v55 = vsel %vm410_vm1, %v877_v50, 0.0  ;;  %v460_v50 = vsel %vm410_vm1, %v886_v53, 0.0 }
  0xa0   : > { %421 = vst.msk [vmem:[%s873_s25 + $0x50] sm:$0xff] %vm410_vm1, %v903_v57  ;;  %v447_v21 = vadd.f32 %v446_v13, %v445_v15  ;;  %v531_v45 = vmul.f32 %v899_v56, %v899_v56 }
  0xa1   : > { %428 = vst.msk [vmem:[%s873_s25 + $0x88] sm:$0xff] %vm410_vm1, %v899_v56  ;;  %v549_v17 = vsel %vm410_vm1, %v516_v9, 0.0  ;;  %v524_v9 = vmul.f32 %v903_v57, %v903_v57 }
  0xa2   : > { %436 = vst.msk [vmem:[%s873_s25 + $0xc8] sm:$0xff] %vm410_vm1, %v911_v58  ;;  %v550_v28 = vadd.f32 %v549_v17, %v548_v20 }
  0xa6   : > { %v337_v59 = vpop.f32.mrf.mxu0  ;;  %v916_v60 = vpop.f32.mrf.mxu2 }
  0xa7   : > { %414 = vst.msk [vmem:[%s873_s25 + $0x18] sm:$0xff] %vm410_vm1, %v337_v59  ;;  %v920_v61 = vpop.f32.mrf.mxu1  ;;  %v928_v62 = vpop.f32.mrf.mxu3  ;;  %v517_v14 = vmul.f32 %v337_v59, %v337_v59  ;;  %v448_v18 = vsel %vm410_vm1, %v337_v59, 0.0  ;;  %v523_v59 = vmul.f32 %v886_v53, %v886_v53  ;;  %v565_v53 = vsel %vm410_vm1, %v524_v9, 0.0 }
  0xa8   : > { %422 = vst.msk [vmem:[%s873_s25 + $0x58] sm:$0xff] %vm410_vm1, %v920_v61  ;;  %v449_v29 = vadd.f32 %v448_v18, %v447_v21  ;;  %v525_v15 = vmul.f32 %v920_v61, %v920_v61 }
  0xa9   : > { %429 = vst.msk [vmem:[%s873_s25 + $0x90] sm:$0xff] %vm410_vm1, %v916_v60  ;;  %v551_v24 = vsel %vm410_vm1, %v517_v14, 0.0  ;;  %v563_v13 = vsel %vm410_vm1, %v523_v59, 0.0  ;;  %v462_v14 = vsel %vm410_vm1, %v903_v57, 0.0 }
  0xaa   : > { %437 = vst.msk [vmem:[%s873_s25 + $0xd0] sm:$0xff] %vm410_vm1, %v928_v62  ;;  %v552_v34 = vadd.f32 %v551_v24, %v550_v28 }
  0xae   : > { %v340_v63 = vpop.f32.mrf.mxu0  ;;  %v933_v0 = vpop.f32.mrf.mxu2 }
  0xaf   : > { %415 = vst.msk [vmem:[%s873_s25 + $0x20] sm:$0xff] %vm410_vm1, %v340_v63  ;;  %v937_v1 = vpop.f32.mrf.mxu1  ;;  %v945_v2 = vpop.f32.mrf.mxu3  ;;  %v518_v19 = vmul.f32 %v340_v63, %v340_v63  ;;  %v450_v25 = vsel %vm410_vm1, %v340_v63, 0.0 }
  0xb0   : > { %423 = vst.msk [vmem:[%s873_s25 + $0x60] sm:$0xff] %vm410_vm1, %v937_v1  ;;  %v451_v35 = vadd.f32 %v450_v25, %v449_v29  ;;  %v526_v20 = vmul.f32 %v937_v1, %v937_v1  ;;  %v466_v24 = vsel %vm410_vm1, %v937_v1, 0.0 }
  0xb1   : > { %430 = vst.msk [vmem:[%s873_s25 + $0x98] sm:$0xff] %vm410_vm1, %v933_v0  ;;  %v553_v30 = vsel %vm410_vm1, %v518_v19, 0.0  ;;  %v464_v19 = vsel %vm410_vm1, %v920_v61, 0.0 }
  0xb2   : > { %438 = vst.msk [vmem:[%s873_s25 + $0xd8] sm:$0xff] %vm410_vm1, %v945_v2  ;;  %v554_v38 = vadd.f32 %v553_v30, %v552_v34  ;;  %v569_v29 = vsel %vm410_vm1, %v526_v20, 0.0 }
  0xb6   : > { %v342_v3 = vpop.f32.mrf.mxu0  ;;  %v950_v4 = vpop.f32.mrf.mxu2 }
  0xb7   : > { %416 = vst.msk [vmem:[%s873_s25 + $0x28] sm:$0xff] %vm410_vm1, %v342_v3  ;;  %v954_v6 = vpop.f32.mrf.mxu1  ;;  %v963_v10 = vpop.f32.mrf.mxu3  ;;  %v519_v26 = vmul.f32 %v342_v3, %v342_v3  ;;  %v452_v31 = vsel %vm410_vm1, %v342_v3, 0.0  ;;  %v534_v9 = vmul.f32 %v950_v4, %v950_v4 }
  0xb8   : > { %424 = vst.msk [vmem:[%s873_s25 + $0x68] sm:$0xff] %vm410_vm1, %v954_v6  ;;  %v453_v39 = vadd.f32 %v452_v31, %v451_v35  ;;  %v527_v25 = vmul.f32 %v954_v6, %v954_v6  ;;  %v468_v30 = vsel %vm410_vm1, %v954_v6, 0.0 }
  0xb9   : > { %431 = vst.msk [vmem:[%s873_s25 + $0xa0] sm:$0xff] %vm410_vm1, %v950_v4  ;;  %v555_v36 = vsel %vm410_vm1, %v519_v26, 0.0 }
  0xba   : > { %439 = vst.msk [vmem:[%s873_s25 + $0xe0] sm:$0xff] %vm410_vm1, %v963_v10  ;;  %v556_v41 = vadd.f32 %v555_v36, %v554_v38  ;;  %v571_v34 = vsel %vm410_vm1, %v527_v25, 0.0  ;;  %v538_v25 = vmul.f32 %v894_v54, %v894_v54 }
  0xbe   : > { %v345_v22 = vpop.f32.mrf.mxu0  ;;  %v974_v23 = vpop.f32.mrf.mxu2 }
  0xbf   : > { %417 = vst.msk [vmem:[%s873_s25 + $0x30] sm:$0xff] %vm410_vm1, %v345_v22  ;;  %v980_v27 = vpop.f32.mrf.mxu1  ;;  %v520_v32 = vmul.f32 %v345_v22, %v345_v22  ;;  %v990_v33 = vpop.f32.mrf.mxu3  ;;  %v454_v37 = vsel %vm410_vm1, %v345_v22, 0.0  ;;  %v567_v22 = vsel %vm410_vm1, %v525_v15, 0.0 }
  0xc0   : > { %425 = vst.msk [vmem:[%s873_s25 + $0x70] sm:$0xff] %vm410_vm1, %v980_v27  ;;  %v455_v42 = vadd.f32 %v454_v37, %v453_v39  ;;  %v528_v31 = vmul.f32 %v980_v27, %v980_v27  ;;  %v470_v35 = vsel %vm410_vm1, %v980_v27, 0.0  ;;  %v530_v39 = vmul.f32 %v882_v52, %v882_v52 }
  0xc1   : > { %432 = vst.msk [vmem:[%s873_s25 + $0xa8] sm:$0xff] %vm410_vm1, %v974_v23  ;;  %v557_v40 = vsel %vm410_vm1, %v520_v32, 0.0 }
  0xc2   : > { %440 = vst.msk [vmem:[%s873_s25 + $0xe8] sm:$0xff] %vm410_vm1, %v990_v33  ;;  %v558_v49 = vadd.f32 %v557_v40, %v556_v41  ;;  %v573_v40 = vsel %vm410_vm1, %v528_v31, 0.0 }
  0xc6   : > { %v347_v43 = vpop.f32.mrf.mxu0  ;;  %v998_v44 = vpop.f32.mrf.mxu2 }
  0xc7   : > { %418 = vst.msk [vmem:[%s873_s25 + $0x38] sm:$0xff] %vm410_vm1, %v347_v43  ;;  %v456_v46 = vsel %vm410_vm1, %v347_v43, 0.0  ;;  %v521_v47 = vmul.f32 %v347_v43, %v347_v43  ;;  %v367_v48 = vpop.f32.mrf.mxu1  ;;  %v1015_v3 = vpop.f32.mrf.mxu3  ;;  %v474_v43 = vsel %vm410_vm1, %v882_v52, 0.0  ;;  %v478_v52 = vsel %vm410_vm1, %v916_v60, 0.0 }
  0xc8   : > { %v457_v51 = vadd.f32 %v456_v46, %v455_v42  ;;  %426 = vst.msk [vmem:[%s873_s25 + $0x78] sm:$0xff] %vm410_vm1, %v367_v48  ;;  %v529_v36 = vmul.f32 %v367_v48, %v367_v48  ;;  %v472_v6 = vsel %vm410_vm1, %v367_v48, 0.0  ;;  %v532_v48 = vmul.f32 %v916_v60, %v916_v60 }
  0xc9   : > { %v559_v63 = vsel %vm410_vm1, %v521_v47, 0.0  ;;  %433 = vst.msk [vmem:[%s873_s25 + $0xb0] sm:$0xff] %vm410_vm1, %v998_v44  ;;  %v482_v60 = vsel %vm410_vm1, %v950_v4, 0.0  ;;  %v486_v4 = vsel %vm410_vm1, %v998_v44, 0.0 }
  0xca   : > { %v459_v5 = vadd.f32 %v458_v55, %v457_v51  ;;  %v560_v7 = vadd.f32 %v559_v63, %v558_v49  ;;  %441 = vst.msk [vmem:[%s873_s25 + $0xf0] sm:$0xff] %vm410_vm1, %v1015_v3  ;;  %v575_v27 = vsel %vm410_vm1, %v529_v36, 0.0  ;;  %v577_v49 = vsel %vm410_vm1, %v530_v39, 0.0 }
  0xcb   : > { %v476_v51 = vsel %vm410_vm1, %v899_v56, 0.0  ;;  %v579_v63 = vsel %vm410_vm1, %v531_v45, 0.0  ;;  %v480_v56 = vsel %vm410_vm1, %v933_v0, 0.0  ;;  %v541_v39 = vmul.f32 %v945_v2, %v945_v2 }
  0xcc   : > { %v461_v11 = vadd.f32 %v460_v50, %v459_v5  ;;  %v562_v12 = vadd.f32 %v561_v8, %v560_v7  ;;  %v533_v5 = vmul.f32 %v933_v0, %v933_v0  ;;  %v581_v50 = vsel %vm410_vm1, %v532_v48, 0.0 }
  0xcd   : > { %v484_v0 = vsel %vm410_vm1, %v974_v23, 0.0  ;;  %v544_v48 = vmul.f32 %v1015_v3, %v1015_v3 }
  0xce   : > { %v463_v16 = vadd.f32 %v462_v14, %v461_v11  ;;  %v564_v17 = vadd.f32 %v563_v13, %v562_v12  ;;  %v1030_v18 = vpop.f32.mrf.mxu2  ;;  %v583_v13 = vsel %vm410_vm1, %v533_v5, 0.0  ;;  %v535_v14 = vmul.f32 %v974_v23, %v974_v23 }
  0xcf   : > { %434 = vst.msk [vmem:[%s873_s25 + $0xb8] sm:$0xff] %vm410_vm1, %v1030_v18  ;;  %v1045_v26 = vpop.f32.mrf.mxu3 }
  0xd0   : > { %v566_v57 = vadd.f32 %v565_v53, %v564_v17  ;;  %v465_v21 = vadd.f32 %v464_v19, %v463_v16  ;;  %442 = vst.msk [vmem:[%s873_s25 + $0xf8] sm:$0xff] %vm410_vm1, %v1045_v26  ;;  %v585_v17 = vsel %vm410_vm1, %v534_v9, 0.0  ;;  %v536_v53 = vmul.f32 %v998_v44, %v998_v44 }
  0xd1   : > { %v539_v44 = vmul.f32 %v911_v58, %v911_v58 }
  0xd2   : > { %v467_v28 = vadd.f32 %v466_v24, %v465_v21  ;;  %v568_v61 = vadd.f32 %v567_v22, %v566_v57  ;;  %v587_v57 = vsel %vm410_vm1, %v535_v14, 0.0  ;;  %v537_v21 = vmul.f32 %v1030_v18, %v1030_v18 }
  0xd3   : > { %v589_v23 = vsel %vm410_vm1, %v536_v53, 0.0 }
  0xd4   : > { %v469_v32 = vadd.f32 %v468_v30, %v467_v28  ;;  %v570_v1 = vadd.f32 %v569_v29, %v568_v61  ;;  %v488_v28 = vsel %vm410_vm1, %v1030_v18, 0.0  ;;  %v490_v30 = vsel %vm410_vm1, %v894_v54, 0.0 }
  0xd5   : > { %v591_v31 = vsel %vm410_vm1, %v537_v21, 0.0  ;;  %v540_v18 = vmul.f32 %v928_v62, %v928_v62  ;;  %v494_v54 = vsel %vm410_vm1, %v928_v62, 0.0  ;;  %v498_v62 = vsel %vm410_vm1, %v963_v10, 0.0 }
  0xd6   : > { %v471_v37 = vadd.f32 %v470_v35, %v469_v32  ;;  %v572_v38 = vadd.f32 %v571_v34, %v570_v1  ;;  %v593_v34 = vsel %vm410_vm1, %v538_v25, 0.0  ;;  %v492_v35 = vsel %vm410_vm1, %v911_v58, 0.0 }
  0xd7   : > { %v496_v58 = vsel %vm410_vm1, %v945_v2, 0.0  ;;  %v500_v2 = vsel %vm410_vm1, %v990_v33, 0.0 }
  0xd8   : > { %v574_v41 = vadd.f32 %v573_v40, %v572_v38  ;;  %v473_v42 = vadd.f32 %v472_v6, %v471_v37  ;;  %v595_v38 = vsel %vm410_vm1, %v539_v44, 0.0 }
  0xda   : > { %v475_v46 = vadd.f32 %v474_v43, %v473_v42  ;;  %v576_v47 = vadd.f32 %v575_v27, %v574_v41  ;;  %v597_v41 = vsel %vm410_vm1, %v540_v18, 0.0  ;;  %v542_v42 = vmul.f32 %v963_v10, %v963_v10 }
  0xdb   : > { %v599_v27 = vsel %vm410_vm1, %v541_v39, 0.0  ;;  %v502_v10 = vsel %vm410_vm1, %v1015_v3, 0.0 }
  0xdc   : > { %v477_v55 = vadd.f32 %v476_v51, %v475_v46  ;;  %v578_v59 = vadd.f32 %v577_v49, %v576_v47  ;;  %v543_v46 = vmul.f32 %v990_v33, %v990_v33  ;;  %v601_v51 = vsel %vm410_vm1, %v542_v42, 0.0 }
  0xdd   : > { %v504_v33 = vsel %vm410_vm1, %v1045_v26, 0.0 }
  0xde   : > { %v479_v7 = vadd.f32 %v478_v52, %v477_v55  ;;  %v580_v8 = vadd.f32 %v579_v63, %v578_v59  ;;  %v603_v63 = vsel %vm410_vm1, %v543_v46, 0.0  ;;  %v545_v52 = vmul.f32 %v1045_v26, %v1045_v26 }
  0xe0   : > { %v582_v11 = vadd.f32 %v581_v50, %v580_v8  ;;  %v481_v12 = vadd.f32 %v480_v56, %v479_v7  ;;  %v605_v8 = vsel %vm410_vm1, %v544_v48, 0.0  ;;  %v607_v9 = vsel %vm410_vm1, %v545_v52, 0.0 }
  0xe2   : > { %v483_v15 = vadd.f32 %v482_v60, %v481_v12  ;;  %v584_v16 = vadd.f32 %v583_v13, %v582_v11 }
  0xe4   : > { %v485_v19 = vadd.f32 %v484_v0, %v483_v15  ;;  %v586_v20 = vadd.f32 %v585_v17, %v584_v16 }
  0xe6   : > { %v588_v22 = vadd.f32 %v587_v57, %v586_v20  ;;  %v487_v24 = vadd.f32 %v486_v4, %v485_v19 }
  0xe8   : > { %v590_v61 = vadd.f32 %v589_v23, %v588_v22  ;;  %v489_v29 = vadd.f32 %v488_v28, %v487_v24 }
  0xea   : > { %v491_v32 = vadd.f32 %v490_v30, %v489_v29  ;;  %v592_v1 = vadd.f32 %v591_v31, %v590_v61 }
  0xec   : > { %v493_v36 = vadd.f32 %v492_v35, %v491_v32  ;;  %v594_v37 = vadd.f32 %v593_v34, %v592_v1 }
  0xee   : > { %v495_v40 = vadd.f32 %v494_v54, %v493_v36  ;;  %v596_v6 = vadd.f32 %v595_v38, %v594_v37 }
  0xf0   : > { %v598_v43 = vadd.f32 %v597_v41, %v596_v6  ;;  %v497_v45 = vadd.f32 %v496_v58, %v495_v40 }
  0xf2   : > { %v499_v47 = vadd.f32 %v498_v62, %v497_v45  ;;  %v600_v49 = vadd.f32 %v599_v27, %v598_v43 }
  0xf4   : > { %v501_v55 = vadd.f32 %v500_v2, %v499_v47  ;;  %v602_v59 = vadd.f32 %v601_v51, %v600_v49 }
  0xf6   : > { %v604_v5 = vadd.f32 %v603_v63, %v602_v59  ;;  %v503_v7 = vadd.f32 %v502_v10, %v501_v55 }
  0xf8   : > { %v606_v50 = vadd.f32 %v605_v8, %v604_v5  ;;  %v505_v56 = vadd.f32 %v504_v33, %v503_v7 }
  0xfa   : > { %v506_v11 = vrot.slane %v505_v56, 4  ;;  %v608_v12 = vadd.f32 %v607_v9, %v606_v50 }
  0xfc   : > { %v507_v13 = vadd.f32 %v506_v11, %v505_v56  ;;  %v609_v3 = vrot.slane %v608_v12, 4 }
  0xfe   : > { %v508_v60 = vrot.slane %v507_v13, 2  ;;  %v610_v14 = vadd.f32 %v609_v3, %v608_v12 }
 0x100   : > { %v509_v15 = vadd.f32 %v508_v60, %v507_v13  ;;  %v611_v16 = vrot.slane %v610_v14, 2 }
 0x102   : > { %v510_v17 = vrot.slane %v509_v15, 1  ;;  %v612_v0 = vadd.f32 %v611_v16, %v610_v14 }
 0x104   : > { %v511_v26 = vadd.f32 %v510_v17, %v509_v15  ;;  %v613_v53 = vrot.slane %v612_v0, 1 }
 0x106   : > { %513 = vst.msk [vmem:[%s211_s28] sm:$0x1] %vm512_vm2, %v511_v26  ;;  %v614_v19 = vadd.f32 %v613_v53, %v612_v0 }
 0x108   : > { %615 = vst.msk [vmem:[%s214_s5] sm:$0x1] %vm512_vm2, %v614_v19 }
 0x109 PF: > { %s15_s15 = sadd.s32 1, %s772_s15  }
 0x10a   : > { %p12_p4 = scmp.ge.s32.totalorder %s15_s15, 4  }
 0x10c   :  { %14 = sbr.rel (!%p12_p4) target bundleno = 1 (0x1), region = 82 }

// kernel: tile.29
= control target key start
LH: loop header
LB: loop body
LE: loop exit
PB: predicated region body
PF: predicated region fallthrough
CT: control target
= control target key end

     0   :  { %s67_s10 = smov 28   ;;  %s68_s11 = smov 20   ;;  %vm3_vm0 = vcmask 31744   ;;  %vm9_vm1 = vcmask 261344   ;;  %vm15_vm2 = vcmask 228544   ;;  %vm21_vm3 = vcmask 195744   ;;  %s111_s0 = inlined_call_operand.vmem [shape: f32[8,4], index: 0, kind: input, shape index: {}]   ;;  %s112_s1 = inlined_call_operand.vmem [shape: f32[32], index: 1, kind: output, shape index: {}]  }
   0x1   :  { %v53_v0 = vld [vmem:[%s111_s0 + $0x7] sm:$0x1]   ;;  %v55_v1 = vld [vmem:[%s111_s0 + $0x5] sm:$0x1]   ;;  %v57_v2 = vld [vmem:[%s111_s0 + $0x3] sm:$0x1]  }
   0x2   :  { %7 = vrot.lane.b32.xlu0 %v53_v0, %s67_s10  ;;  %19 = vrot.lane.b32.xlu1 %v55_v1, %s68_s11  ;;  %s69_s14 = smov 12   ;;  %v54_v3 = vld [vmem:[%s111_s0 + $0x6] sm:$0x1]   ;;  %v56_v4 = vld [vmem:[%s111_s0 + $0x4] sm:$0x1]   ;;  %s70_s21 = smov 24  }
   0x3   :  { %31 = vrot.lane.b32.xlu2 %v57_v2, %s69_s14  ;;  %v58_v5 = vld [vmem:[%s111_s0 + $0x2] sm:$0x1]   ;;  %s71_s22 = smov 16   ;;  %s72_s23 = smov 8   ;;  %v59_v6 = vld [vmem:[%s111_s0 + $0x1] sm:$0x1]  }
   0x4   :  { %s73_s26 = smov 4   ;;  %v2_v7 = vld [vmem:[%s111_s0] sm:$0x1]   ;;  %vm27_vm4 = vcmask 162944   ;;  %vm33_vm5 = vcmask 130144   ;;  %vm39_vm6 = vcmask 97344  }
   0x5   :  { %4 = vst.msk [vmem:[#allocation0] sm:$0x1] %vm3_vm0, %v2_v7   ;;  %vm45_vm7 = vcmask 64544  }
   0xa   :  { %13 = vrot.lane.b32.xlu0 %v54_v3, %s70_s21  ;;  %25 = vrot.lane.b32.xlu1 %v56_v4, %s71_s22 }
   0xb   :  { %37 = vrot.lane.b32.xlu2 %v58_v5, %s72_s23 }
  0x12   :  { %43 = vrot.lane.b32.xlu0 %v59_v6, %s73_s26 }
  0x5d   :  { %v32_v8 = vpop.permute.xlu2 %31  }
  0x65   :  { %v38_v9 = vpop.permute.xlu2 %37  }
  0x74   :  { %v8_v10 = vpop.permute.xlu0 %7   ;;  %v20_v11 = vpop.permute.xlu1 %19  }
  0x75   :  { %10 = vst.msk [vmem:[#allocation0] sm:$0x1] %vm9_vm1, %v8_v10  }
  0x7c   :  { %v14_v12 = vpop.permute.xlu0 %13   ;;  %v26_v13 = vpop.permute.xlu1 %25  }
  0x7d   :  { %16 = vst.msk [vmem:[#allocation0] sm:$0x1] %vm15_vm2, %v14_v12  }
  0x7e   :  { %22 = vst.msk [vmem:[#allocation0] sm:$0x1] %vm21_vm3, %v20_v11  }
  0x7f   :  { %28 = vst.msk [vmem:[#allocation0] sm:$0x1] %vm27_vm4, %v26_v13  }
  0x80   :  { %34 = vst.msk [vmem:[#allocation0] sm:$0x1] %vm33_vm5, %v32_v8  }
  0x81   :  { %40 = vst.msk [vmem:[#allocation0] sm:$0x1] %vm39_vm6, %v38_v9  }
  0x84   :  { %v44_v14 = vpop.permute.xlu0 %43  }
  0x85   :  { %46 = vst.msk [vmem:[#allocation0] sm:$0x1] %vm45_vm7, %v44_v14  }
  0x8c   :  { %v49_v15 = vld [vmem:[#allocation0] sm:$0x1] }
  0x8d   :  { %52 = vst [vmem:[%s112_s1] sm:$0x1] %v49_v15 }

// kernel: tile.26
= control target key start
LH: loop header
LB: loop body
LE: loop exit
PB: predicated region body
PF: predicated region fallthrough
CT: control target
= control target key end

     0   :  { %s28_s0 = inlined_call_operand.vmem [shape: f32[32], index: 0, kind: input, shape index: {}]   ;;  %s29_s1 = inlined_call_operand.vmem [shape: f32[16,32], index: 1, kind: output, shape index: {}]  }
   0x1   :  { %v4_v0 = vld [vmem:[%s28_s0] ss:$0 sm:$0xff] }
   0x2   :  { %5 = vst [vmem:[%s29_s1] sm:$0xff] %v4_v0 }
   0x3   :  { %8 = vst [vmem:[%s29_s1 + $0x8] sm:$0xff] %v4_v0 }

// kernel: tile.27
= control target key start
LH: loop header
LB: loop body
LE: loop exit
PB: predicated region body
PF: predicated region fallthrough
CT: control target
= control target key end

     0   :  { %s56_s8 = smov 96   ;;  %s57_s11 = smov 32   ;;  %vm3_vm0 = vcmask 261120   ;;  %vm9_vm1 = vcmask 1048320   ;;  %vm15_vm2 = vcmask 785920   ;;  %vm21_vm3 = vcmask 523520   ;;  %s93_s0 = inlined_call_operand.vmem [shape: f32[16,32], index: 0, kind: input, shape index: {}]   ;;  %s94_s1 = inlined_call_operand.vmem [shape: f32[1,512], index: 1, kind: output, shape index: {}]  }
   0x1   :  { %v47_v0 = vld [vmem:[%s93_s0 + $0x3] ss:$4 sm:$0xf]   ;;  %v49_v1 = vld [vmem:[%s93_s0 + $0x1] ss:$4 sm:$0xf]  }
   0x2   :  { %7 = vrot.lane.b32.xlu0 %v47_v0, %s56_s8  ;;  %19 = vrot.lane.b32.xlu1 %v49_v1, %s57_s11  ;;  %v48_v2 = vld [vmem:[%s93_s0 + $0x2] ss:$4 sm:$0xf]   ;;  %s58_s14 = smov 64  }
   0x3   :  { %v2_v3 = vld [vmem:[%s93_s0] ss:$4 sm:$0xf]  }
   0x4   :  { %4 = vst.msk [vmem:[#allocation0] ss:$8 sm:$0xf] %vm3_vm0, %v2_v3  }
   0xa   :  { %13 = vrot.lane.b32.xlu0 %v48_v2, %s58_s14 }
  0x74   :  { %v8_v4 = vpop.permute.xlu0 %7   ;;  %v20_v5 = vpop.permute.xlu1 %19  }
  0x75   :  { %10 = vst.msk [vmem:[#allocation0] ss:$8 sm:$0xf] %vm9_vm1, %v8_v4  }
  0x7c   :  { %v14_v6 = vpop.permute.xlu0 %13  }
  0x7d   :  { %16 = vst.msk [vmem:[#allocation0] ss:$8 sm:$0xf] %vm15_vm2, %v14_v6  }
  0x7e   :  { %22 = vst.msk [vmem:[#allocation0] ss:$8 sm:$0xf] %vm21_vm3, %v20_v5  }
  0x85   :  { %v25_v7 = vld [vmem:[#allocation0] sm:$0x1]  ;;  %v30_v8 = vld [vmem:[#allocation0 + $0x8] sm:$0x1]  ;;  %v36_v9 = vld [vmem:[#allocation0 + $0x10] sm:$0x1] }
  0x86   :  { %28 = vst [vmem:[%s94_s1] sm:$0x1] %v25_v7  ;;  %v42_v10 = vld [vmem:[#allocation0 + $0x18] sm:$0x1] }
  0x87   :  { %50 = vst [vmem:[%s94_s1 + $0x1] sm:$0x1] %v30_v8 }
  0x88   :  { %51 = vst [vmem:[%s94_s1 + $0x2] sm:$0x1] %v36_v9 }
  0x89   :  { %52 = vst [vmem:[%s94_s1 + $0x3] sm:$0x1] %v42_v10 }

// kernel: basic_block_forward.4
= control target key start
LH: loop header
LB: loop body
LE: loop exit
PB: predicated region body
PF: predicated region fallthrough
CT: control target
= control target key end

     0   :  { %s3092_s15 = smov 0   ;;  %s4529_s0 = inlined_call_operand.vmem [shape: f32[2,16,16,16], index: 0, kind: input, shape index: {}]   ;;  %s4530_s1 = inlined_call_operand.vmem [shape: bf16[144,32], index: 1, kind: input, shape index: {}]   ;;  %s4531_s2 = inlined_call_operand.vmem [shape: f32[2,16,16,32], index: 2, kind: output, shape index: {0}]   ;;  %s4532_s3 = inlined_call_operand.vmem [shape: f32[2,1,32], index: 3, kind: output, shape index: {1}]   ;;  %s4533_s4 = inlined_call_operand.vmem [shape: f32[2,1,32], index: 4, kind: output, shape index: {2}]  }
   0x1 LB: > { %s2392_s16 = sadd.s32 4294967295, %s3057_s15   ;;  %p2396_p0 = scmp.ge.s32.totalorder %s3057_s15, 1  ;;  %s3057_s15 = sphi %s3092_s15, %s15_s15  }
   0x2   : > { %p167_p1 = scmp.lt.s32.totalorder %s3057_s15, 3 }
   0x4   : > { %p168_p2 = pnand %p2396_p0, %p167_p1 }
   0x6   : > { %171 = sbr.rel (%p168_p2) target bundleno = 657 (0x291), region = 28 }
   0xb   : > { %vm248_vm0 = vcmask 130048   ;;  %vm251_vm1 = vcmask 123904   ;;  %v3059_v0 = vmov 0.0   ;;  %s3060_s17 = smov 16   ;;  %p199_p3 = scmp.lt.s32.totalorder %s2392_s16, 1  ;;  %vm1554_vm2 = vcmask 261120  }
   0xc   : > { %249 = vst.msk [vmem:[#allocation2] sm:$0xff] %vm248_vm0, %v3059_v0  ;;  %s3061_s22 = smov 32   ;;  %s3062_s23 = smov 48   ;;  %vm1587_vm3 = vcmask 392192   ;;  %vm1620_vm4 = vcmask 523264   ;;  %vm1653_vm5 = vcmask 654336  }
   0xd   : > { %250 = vst.msk [vmem:[#allocation2 + $0x8] sm:$0xff] %vm248_vm0, %v3059_v0  ;;  %s4606_s16 = smov (!%p199_p3, %s2392_s16), 1  ;;  %s3063_s24 = smov 64   ;;  %vm1686_vm6 = vcmask 785408   ;;  %vm1719_vm7 = vcmask 916480   ;;  %vm2183_vm8 = vcmask 253952  }
   0xe   : > { %252 = vst.msk [vmem:[#allocation2 + $0x10] sm:$0x3] %vm251_vm1, %v3059_v0  ;;  %s2455_s18 = sshll.u32 %s4606_s16, 8  ;;  %s3064_s27 = smov 80  }
   0xf   : > { %253 = vst.msk [vmem:[#allocation2 + $0x18] sm:$0xff] %vm248_vm0, %v3059_v0  ;;  %s3211_s21 = scalar_lea.vmem %s4529_s0, %s2455_s18  ;;  %s3065_s28 = smov 96  }
  0x10   : > { %254 = vst.msk [vmem:[#allocation2 + $0x20] sm:$0xff] %vm248_vm0, %v3059_v0  ;;  %v222_v4 = vld [vmem:[%s3211_s21 + $0x30] sm:$0xff]  ;;  %v223_v5 = vld [vmem:[%s3211_s21 + $0x38] sm:$0xff]  ;;  %v216_v8 = vld [vmem:[%s3211_s21] sm:$0xff]  ;;  %s3066_s29 = smov 112   ;;  %s4281_s25 = scalar_lea.vmem %s4531_s2, %s2455_s18 }
  0x11   : > { %255 = vst.msk [vmem:[#allocation2 + $0x28] sm:$0x3] %vm251_vm1, %v3059_v0  ;;  %v218_v6 = vld [vmem:[%s3211_s21 + $0x10] sm:$0xff]  ;;  %v219_v7 = vld [vmem:[%s3211_s21 + $0x18] sm:$0xff]  ;;  %v217_v9 = vld [vmem:[%s3211_s21 + $0x8] sm:$0xff]  ;;  %s214_s30 = scalar_lea.vmem %s4533_s4, %s4606_s16 }
  0x12   : > { %256 = vst.msk [vmem:[#allocation2 + $0x30] sm:$0xff] %vm248_vm0, %v3059_v0  ;;  %v224_v10 = vld [vmem:[%s3211_s21 + $0x40] sm:$0xff]  ;;  %v225_v11 = vld [vmem:[%s3211_s21 + $0x48] sm:$0xff]  ;;  %v226_v15 = vld [vmem:[%s3211_s21 + $0x50] sm:$0xff] }
  0x13   : > { %257 = vst.msk [vmem:[#allocation2 + $0x38] sm:$0xff] %vm248_vm0, %v3059_v0  ;;  %v220_v12 = vld [vmem:[%s3211_s21 + $0x20] sm:$0xff]  ;;  %v221_v13 = vld [vmem:[%s3211_s21 + $0x28] sm:$0xff]  ;;  %v227_v17 = vld [vmem:[%s3211_s21 + $0x58] sm:$0xff] }
  0x14   : > { %v369_v1 = vld [vmem:[#allocation2 + $0x1] sm:$0xff]  ;;  %258 = vst.msk [vmem:[#allocation2 + $0x40] sm:$0x3] %vm251_vm1, %v3059_v0  ;;  %v230_v20 = vld [vmem:[%s3211_s21 + $0x70] sm:$0xff]  ;;  %v231_v22 = vld [vmem:[%s3211_s21 + $0x78] sm:$0xff] }
  0x15   : > { %v370_v2 = vld [vmem:[#allocation2 + $0x9] sm:$0xff]  ;;  %259 = vst.msk [vmem:[#allocation2 + $0x48] sm:$0xff] %vm248_vm0, %v3059_v0  ;;  %v228_v25 = vld [vmem:[%s3211_s21 + $0x60] sm:$0xff]  ;;  %v235_v42 = vld [vmem:[%s3211_s21 + $0x98] sm:$0xff] }
  0x16   : > { %v2491_v3 = vpack.i.bf16 %v370_v2, %v369_v1  ;;  %260 = vst.msk [vmem:[#allocation2 + $0x50] sm:$0xff] %vm248_vm0, %v3059_v0  ;;  %v229_v27 = vld [vmem:[%s3211_s21 + $0x68] sm:$0xff]  ;;  %v232_v30 = vld [vmem:[%s3211_s21 + $0x80] sm:$0xff]  ;;  %v234_v40 = vld [vmem:[%s3211_s21 + $0x90] sm:$0xff] }
  0x17   : > { %261 = vst.msk [vmem:[#allocation2 + $0x58] sm:$0x3] %vm251_vm1, %v3059_v0  ;;  %v233_v32 = vld [vmem:[%s3211_s21 + $0x88] sm:$0xff]  ;;  %v236_v35 = vld [vmem:[%s3211_s21 + $0xa0] sm:$0xff]  ;;  %v238_v44 = vld [vmem:[%s3211_s21 + $0xb0] sm:$0xff] }
  0x18   : > { %2492 = vrot.lane.b32.xlu0 %v2491_v3, %s3060_s17  ;;  %262 = vst.msk [vmem:[#allocation2 + $0x60] sm:$0xff] %vm248_vm0, %v3059_v0  ;;  %v237_v37 = vld [vmem:[%s3211_s21 + $0xa8] sm:$0xff]  ;;  %v239_v47 = vld [vmem:[%s3211_s21 + $0xb8] sm:$0xff]  ;;  %v242_v48 = vld [vmem:[%s3211_s21 + $0xd0] sm:$0xff] }
  0x19   : > { %263 = vst.msk [vmem:[#allocation2 + $0x68] sm:$0xff] %vm248_vm0, %v3059_v0  ;;  %v243_v51 = vld [vmem:[%s3211_s21 + $0xd8] sm:$0xff]  ;;  %v240_v53 = vld [vmem:[%s3211_s21 + $0xc0] sm:$0xff]  ;;  %v241_v56 = vld [vmem:[%s3211_s21 + $0xc8] sm:$0xff] }
  0x1a   : > { %264 = vst.msk [vmem:[#allocation2 + $0x70] sm:$0x3] %vm251_vm1, %v3059_v0  ;;  %v244_v58 = vld [vmem:[%s3211_s21 + $0xe0] sm:$0xff]  ;;  %v245_v59 = vld [vmem:[%s3211_s21 + $0xe8] sm:$0xff] }
  0x1b   : > { %265 = vst.msk [vmem:[#allocation2 + $0x78] sm:$0xff] %vm248_vm0, %v3059_v0 }
  0x1c   : > { %266 = vst.msk [vmem:[#allocation2 + $0x80] sm:$0xff] %vm248_vm0, %v3059_v0 }
  0x1d   : > { %267 = vst.msk [vmem:[#allocation2 + $0x88] sm:$0x3] %vm251_vm1, %v3059_v0 }
  0x1e   : > { %268 = vst.msk [vmem:[#allocation2 + $0x90] sm:$0xff] %vm248_vm0, %v3059_v0 }
  0x1f   : > { %269 = vst.msk [vmem:[#allocation2 + $0x98] sm:$0xff] %vm248_vm0, %v3059_v0 }
  0x20   : > { %270 = vst.msk [vmem:[#allocation2 + $0xa0] sm:$0x3] %vm251_vm1, %v3059_v0 }
  0x21   : > { %271 = vst.msk [vmem:[#allocation2 + $0xa8] sm:$0xff] %vm248_vm0, %v3059_v0 }
  0x22   : > { %272 = vst.msk [vmem:[#allocation2 + $0xb0] sm:$0xff] %vm248_vm0, %v3059_v0 }
  0x23   : > { %273 = vst.msk [vmem:[#allocation2 + $0xb8] sm:$0x3] %vm251_vm1, %v3059_v0 }
  0x24   : > { %274 = vst.msk [vmem:[#allocation2 + $0xc0] sm:$0xff] %vm248_vm0, %v3059_v0 }
  0x25   : > { %275 = vst.msk [vmem:[#allocation2 + $0xc8] sm:$0xff] %vm248_vm0, %v3059_v0 }
  0x26   : > { %276 = vst.msk [vmem:[#allocation2 + $0xd0] sm:$0x3] %vm251_vm1, %v3059_v0 }
  0x27   : > { %277 = vst.msk [vmem:[#allocation2 + $0xd8] sm:$0xff] %vm248_vm0, %v3059_v0 }
  0x28   : > { %278 = vst.msk [vmem:[#allocation2 + $0xe0] sm:$0xff] %vm248_vm0, %v3059_v0 }
  0x29   : > { %279 = vst.msk [vmem:[#allocation2 + $0xe8] sm:$0x3] %vm251_vm1, %v3059_v0 }
  0x2a   : > { %280 = vst.msk [vmem:[#allocation2 + $0xf0] sm:$0xff] %vm248_vm0, %v3059_v0 }
  0x2b   : > { %281 = vst.msk [vmem:[#allocation2 + $0xf8] sm:$0xff] %vm248_vm0, %v3059_v0 }
  0x2c   : > { %282 = vst.msk [vmem:[#allocation2 + $0x100] sm:$0x3] %vm251_vm1, %v3059_v0 }
  0x2d   : > { %283 = vst.msk [vmem:[#allocation2 + $0x108] sm:$0xff] %vm248_vm0, %v3059_v0 }
  0x2e   : > { %284 = vst.msk [vmem:[#allocation2 + $0x110] sm:$0xff] %vm248_vm0, %v3059_v0 }
  0x2f   : > { %285 = vst.msk [vmem:[#allocation2 + $0x118] sm:$0x3] %vm251_vm1, %v3059_v0 }
  0x30   : > { %286 = vst.msk [vmem:[#allocation2 + $0x120] sm:$0xff] %vm248_vm0, %v3059_v0 }
  0x31   : > { %287 = vst.msk [vmem:[#allocation2 + $0x128] sm:$0xff] %vm248_vm0, %v3059_v0 }
  0x32   : > { %288 = vst.msk [vmem:[#allocation2 + $0x130] sm:$0x3] %vm251_vm1, %v3059_v0 }
  0x33   : > { %289 = vst.msk [vmem:[#allocation2 + $0x138] sm:$0xff] %vm248_vm0, %v3059_v0 }
  0x34   : > { %290 = vst.msk [vmem:[#allocation2 + $0x140] sm:$0xff] %vm248_vm0, %v3059_v0 }
  0x35   : > { %291 = vst.msk [vmem:[#allocation2 + $0x148] sm:$0x3] %vm251_vm1, %v3059_v0 }
  0x36   : > { %292 = vst.msk [vmem:[#allocation2 + $0x150] sm:$0xff] %vm248_vm0, %v3059_v0 }
  0x37   : > { %293 = vst.msk [vmem:[#allocation2 + $0x158] sm:$0xff] %vm248_vm0, %v3059_v0 }
  0x38   : > { %294 = vst.msk [vmem:[#allocation2 + $0x160] sm:$0x3] %vm251_vm1, %v3059_v0 }
  0x39   : > { %295 = vst.msk [vmem:[#allocation2 + $0x168] sm:$0xff] %vm248_vm0, %v3059_v0 }
  0x3a   : > { %296 = vst.msk [vmem:[#allocation2 + $0x170] sm:$0xff] %vm248_vm0, %v3059_v0 }
  0x3b   : > { %297 = vst.msk [vmem:[#allocation2 + $0x178] sm:$0x3] %vm251_vm1, %v3059_v0 }
  0x3c   : > { %298 = vst.msk [vmem:[#allocation2 + $0x180] sm:$0xff] %vm248_vm0, %v3059_v0 }
  0x3d   : > { %299 = vst.msk [vmem:[#allocation2 + $0x188] sm:$0xff] %vm248_vm0, %v3059_v0 }
  0x3e   : > { %300 = vst.msk [vmem:[#allocation2 + $0x190] sm:$0x3] %vm251_vm1, %v3059_v0 }
  0x3f   : > { %301 = vst.msk [vmem:[#allocation2 + $0x198] sm:$0xff] %vm248_vm0, %v3059_v0 }
  0x40   : > { %302 = vst.msk [vmem:[#allocation2 + $0x1a0] sm:$0xff] %vm248_vm0, %v3059_v0 }
  0x41   : > { %303 = vst.msk [vmem:[#allocation2 + $0x1a8] sm:$0x3] %vm251_vm1, %v3059_v0 }
  0x42   : > { %311 = vst.msk [vmem:[#allocation2 + $0x61] sm:$0xff] %vm248_vm0, %v222_v4 }
  0x43   : > { %312 = vst.msk [vmem:[#allocation2 + $0x69] sm:$0xff] %vm248_vm0, %v223_v5 }
  0x44   : > { %307 = vst.msk [vmem:[#allocation2 + $0x31] sm:$0xff] %vm248_vm0, %v218_v6 }
  0x45   : > { %308 = vst.msk [vmem:[#allocation2 + $0x39] sm:$0xff] %vm248_vm0, %v219_v7 }
  0x46   : > { %305 = vst.msk [vmem:[#allocation2 + $0x19] sm:$0xff] %vm248_vm0, %v216_v8 }
  0x47   : > { %306 = vst.msk [vmem:[#allocation2 + $0x21] sm:$0xff] %vm248_vm0, %v217_v9 }
  0x48   : > { %313 = vst.msk [vmem:[#allocation2 + $0x79] sm:$0xff] %vm248_vm0, %v224_v10 }
  0x49   : > { %v377_v14 = vld [vmem:[#allocation2 + $0x61] sm:$0xff]  ;;  %314 = vst.msk [vmem:[#allocation2 + $0x81] sm:$0xff] %vm248_vm0, %v225_v11 }
  0x4a   : > { %v378_v16 = vld [vmem:[#allocation2 + $0x69] sm:$0xff]  ;;  %309 = vst.msk [vmem:[#allocation2 + $0x49] sm:$0xff] %vm248_vm0, %v220_v12 }
  0x4b   : > { %v3244_v18 = vpack.i.bf16 %v378_v16, %v377_v14  ;;  %v373_v19 = vld [vmem:[#allocation2 + $0x31] sm:$0xff]  ;;  %310 = vst.msk [vmem:[#allocation2 + $0x51] sm:$0xff] %vm248_vm0, %v221_v13 }
  0x4c   : > { %v374_v21 = vld [vmem:[#allocation2 + $0x39] sm:$0xff]  ;;  %315 = vst.msk [vmem:[#allocation2 + $0x91] sm:$0xff] %vm248_vm0, %v226_v15 }
  0x4d   : > { %2512 = vrot.lane.b32.xlu2 %v3244_v18, %s3060_s17  ;;  %v3252_v23 = vpack.i.bf16 %v374_v21, %v373_v19  ;;  %v371_v24 = vld [vmem:[#allocation2 + $0x19] sm:$0xff]  ;;  %316 = vst.msk [vmem:[#allocation2 + $0x99] sm:$0xff] %vm248_vm0, %v227_v17  ;;  %v401_v17 = vld [vmem:[#allocation2 + $0x2] sm:$0xff]  ;;  %v402_v19 = vld [vmem:[#allocation2 + $0xa] sm:$0xff] }
  0x4e   : > { %v372_v26 = vld [vmem:[#allocation2 + $0x21] sm:$0xff]  ;;  %319 = vst.msk [vmem:[#allocation2 + $0xc1] sm:$0xff] %vm248_vm0, %v230_v20  ;;  %v3345_v21 = vld [vmem:[#allocation2 + $0x32] sm:$0xff] }
  0x4f   : > { %2502 = vrot.lane.b32.xlu1 %v3252_v23, %s3060_s17  ;;  %v3260_v28 = vpack.i.bf16 %v372_v26, %v371_v24  ;;  %v379_v29 = vld [vmem:[#allocation2 + $0x79] sm:$0xff]  ;;  %320 = vst.msk [vmem:[#allocation2 + $0xc9] sm:$0xff] %vm248_vm0, %v231_v22  ;;  %v404_v16 = vld [vmem:[#allocation2 + $0x22] sm:$0xff]  ;;  %v2571_v24 = vpack.i.bf16 %v402_v19, %v401_v17 }
  0x50   : > { %v380_v31 = vld [vmem:[#allocation2 + $0x81] sm:$0xff]  ;;  %317 = vst.msk [vmem:[#allocation2 + $0xa9] sm:$0xff] %vm248_vm0, %v228_v25  ;;  %v3408_v17 = vld [vmem:[#allocation2 + $0x38] sm:$0xff] }
  0x51   : > { %2497 = vrot.lane.b32.xlu0 %v3260_v28, %s3060_s17  ;;  %v3268_v33 = vpack.i.bf16 %v380_v31, %v379_v29  ;;  %v375_v34 = vld [vmem:[#allocation2 + $0x49] sm:$0xff]  ;;  %318 = vst.msk [vmem:[#allocation2 + $0xb1] sm:$0xff] %vm248_vm0, %v229_v27  ;;  %v403_v15 = vld [vmem:[#allocation2 + $0x1a] sm:$0xff] }
  0x52   : > { %v376_v36 = vld [vmem:[#allocation2 + $0x51] sm:$0xff]  ;;  %321 = vst.msk [vmem:[#allocation2 + $0xd9] sm:$0xff] %vm248_vm0, %v232_v30  ;;  %v3343_v20 = vpack.i.bf16 %v404_v16, %v403_v15  ;;  %v3347_v22 = vld [vmem:[#allocation2 + $0x3a] sm:$0xff]  ;;  %v3355_v26 = vld [vmem:[#allocation2 + $0x62] sm:$0xff] }
  0x53   : > { %v3274_v38 = vpack.i.bf16 %v376_v36, %v375_v34  ;;  %v381_v39 = vld [vmem:[#allocation2 + $0x91] sm:$0xff]  ;;  %322 = vst.msk [vmem:[#allocation2 + $0xe1] sm:$0xff] %vm248_vm0, %v233_v32  ;;  %v3353_v25 = vpack.i.bf16 %v3347_v22, %v3345_v21  ;;  %v411_v32 = vld [vmem:[#allocation2 + $0x7a] sm:$0xff]  ;;  %v412_v34 = vld [vmem:[#allocation2 + $0x82] sm:$0xff] }
  0x54   : > { %v382_v41 = vld [vmem:[#allocation2 + $0x99] sm:$0xff]  ;;  %325 = vst.msk [vmem:[#allocation2 + $0x109] sm:$0xff] %vm248_vm0, %v236_v35  ;;  %v3357_v27 = vld [vmem:[#allocation2 + $0x6a] sm:$0xff]  ;;  %v3376_v36 = vpack.i.bf16 %v412_v34, %v411_v32 }
  0x55   : > { %2517 = vrot.lane.b32.xlu2 %v3268_v33, %s3060_s17  ;;  %v3282_v43 = vpack.i.bf16 %v382_v41, %v381_v39  ;;  %326 = vst.msk [vmem:[#allocation2 + $0x111] sm:$0xff] %vm248_vm0, %v237_v37  ;;  %v3286_v45 = vld [vmem:[#allocation2 + $0xc1] sm:$0xff]  ;;  %v3360_v29 = vld [vmem:[#allocation2 + $0x4a] sm:$0xff]  ;;  %v3362_v30 = vld [vmem:[#allocation2 + $0x52] sm:$0xff]  ;;  %v3368_v31 = vpack.i.bf16 %v3357_v27, %v3355_v26 }
  0x56   : > { %v386_v46 = vld [vmem:[#allocation2 + $0xc9] sm:$0xff]  ;;  %323 = vst.msk [vmem:[#allocation2 + $0xf1] sm:$0xff] %vm248_vm0, %v234_v40  ;;  %v3372_v35 = vpack.i.bf16 %v3362_v30, %v3360_v29  ;;  %v413_v40 = vld [vmem:[#allocation2 + $0x92] sm:$0xff]  ;;  %v414_v41 = vld [vmem:[#allocation2 + $0x9a] sm:$0xff] }
  0x57   : > { %2507 = vrot.lane.b32.xlu1 %v3274_v38, %s3060_s17  ;;  %324 = vst.msk [vmem:[#allocation2 + $0xf9] sm:$0xff] %vm248_vm0, %v235_v42  ;;  %v383_v49 = vld [vmem:[#allocation2 + $0xa9] sm:$0xff]  ;;  %v2531_v52 = vpack.i.bf16 %v386_v46, %v3286_v45  ;;  %v247_v34 = vld [vmem:[%s3211_s21 + $0xf8] sm:$0xff] }
  0x58   : > { %v384_v50 = vld [vmem:[#allocation2 + $0xb1] sm:$0xff]  ;;  %327 = vst.msk [vmem:[#allocation2 + $0x121] sm:$0xff] %vm248_vm0, %v238_v44  ;;  %v417_v44 = vld [vmem:[#allocation2 + $0xc2] sm:$0xff] }
  0x59   : > { %2522 = vrot.lane.b32.xlu0 %v3282_v43, %s3060_s17  ;;  %328 = vst.msk [vmem:[#allocation2 + $0x129] sm:$0xff] %vm248_vm0, %v239_v47  ;;  %v3301_v54 = vld [vmem:[#allocation2 + $0xd9] sm:$0xff]  ;;  %v3307_v57 = vpack.i.bf16 %v384_v50, %v383_v49  ;;  %v415_v37 = vld [vmem:[#allocation2 + $0xaa] sm:$0xff]  ;;  %v2601_v47 = vpack.i.bf16 %v414_v41, %v413_v40 }
  0x5a   : > { %v3303_v55 = vld [vmem:[#allocation2 + $0xe1] sm:$0xff]  ;;  %331 = vst.msk [vmem:[#allocation2 + $0x151] sm:$0xff] %vm248_vm0, %v242_v48  ;;  %v416_v39 = vld [vmem:[#allocation2 + $0xb2] sm:$0xff]  ;;  %v418_v46 = vld [vmem:[#allocation2 + $0xca] sm:$0xff] }
  0x5b   : > { %332 = vst.msk [vmem:[#allocation2 + $0x159] sm:$0xff] %vm248_vm0, %v243_v51  ;;  %v2536_v60 = vpack.i.bf16 %v3303_v55, %v3301_v54  ;;  %v3317_v61 = vld [vmem:[#allocation2 + $0x109] sm:$0xff]  ;;  %v2606_v42 = vpack.i.bf16 %v416_v39, %v415_v37  ;;  %v2611_v48 = vpack.i.bf16 %v418_v46, %v417_v44  ;;  %v419_v51 = vld [vmem:[#allocation2 + $0xda] sm:$0xff] }
  0x5c   : > { %329 = vst.msk [vmem:[#allocation2 + $0x139] sm:$0xff] %vm248_vm0, %v240_v53  ;;  %v392_v62 = vld [vmem:[#allocation2 + $0x111] sm:$0xff]  ;;  %v439_v37 = vld [vmem:[#allocation2 + $0x60] sm:$0xff]  ;;  %v440_v39 = vld [vmem:[#allocation2 + $0x68] sm:$0xff] }
  0x5d   : > { %2532 = vrot.lane.b32.xlu2 %v2531_v52, %s3060_s17  ;;  %330 = vst.msk [vmem:[#allocation2 + $0x141] sm:$0xff] %vm248_vm0, %v241_v56  ;;  %v3323_v63 = vld [vmem:[#allocation2 + $0xf1] sm:$0xff]  ;;  %v3329_v1 = vpack.i.bf16 %v392_v62, %v3317_v61  ;;  %v420_v52 = vld [vmem:[#allocation2 + $0xe2] sm:$0xff] }
  0x5e   : > { %4553 = vst [vmem:[#allocation3_spill] sm:$0xff] %v3317_v61  ;;  %v3325_v0 = vld [vmem:[#allocation2 + $0xf9] sm:$0xff]  ;;  %v423_v56 = vld [vmem:[#allocation2 + $0x10a] sm:$0xff] }
  0x5f   : > { %333 = vst.msk [vmem:[#allocation2 + $0x169] sm:$0xff] %vm248_vm0, %v244_v58  ;;  %2527 = vrot.lane.b32.xlu1 %v3307_v57, %s3060_s17  ;;  %v393_v2 = vld [vmem:[#allocation2 + $0x121] sm:$0xff]  ;;  %v3333_v4 = vpack.i.bf16 %v3325_v0, %v3323_v63  ;;  %v421_v49 = vld [vmem:[#allocation2 + $0xf2] sm:$0xff] }
  0x60   : > { %334 = vst.msk [vmem:[#allocation2 + $0x171] sm:$0xff] %vm248_vm0, %v245_v59  ;;  %v394_v3 = vld [vmem:[#allocation2 + $0x129] sm:$0xff]  ;;  %v422_v50 = vld [vmem:[#allocation2 + $0xfa] sm:$0xff]  ;;  %v424_v58 = vld [vmem:[#allocation2 + $0x112] sm:$0xff]  ;;  %v3387_v59 = vpack.i.bf16 %v420_v52, %v419_v51 }
  0x61   : > { %4554 = vst [vmem:[#allocation4_spill] sm:$0xff] %v3325_v0  ;;  %2537 = vrot.lane.b32.xlu0 %v2536_v60, %s3060_s17  ;;  %v2551_v5 = vpack.i.bf16 %v394_v3, %v393_v2  ;;  %v397_v6 = vld [vmem:[#allocation2 + $0x151] sm:$0xff]  ;;  %v3385_v53 = vpack.i.bf16 %v422_v50, %v421_v49  ;;  %v3391_v60 = vpack.i.bf16 %v424_v58, %v423_v56  ;;  %v425_v3 = vld [vmem:[#allocation2 + $0x122] sm:$0xff] }
  0x62   : > { %4555 = vst [vmem:[#allocation5_spill] sm:$0xff] %v3329_v1  ;;  %v398_v7 = vld [vmem:[#allocation2 + $0x159] sm:$0xff]  ;;  %v3406_v16 = vld [vmem:[#allocation2 + $0x30] sm:$0xff]  ;;  %v3420_v40 = vld [vmem:[#allocation2 + $0x48] sm:$0xff] }
  0x63   : > { %v395_v8 = vld [vmem:[#allocation2 + $0x139] sm:$0xff]  ;;  %v2561_v10 = vpack.i.bf16 %v398_v7, %v397_v6  ;;  %4556 = vst [vmem:[#allocation6_spill] sm:$0xff] %v3368_v31  ;;  %v3414_v32 = vpack.i.bf16 %v3408_v17, %v3406_v16  ;;  %v3422_v41 = vld [vmem:[#allocation2 + $0x50] sm:$0xff]  ;;  %v3436_v49 = vld [vmem:[#allocation2 + $0xa8] sm:$0xff] }
  0x64   : > { %v396_v9 = vld [vmem:[#allocation2 + $0x141] sm:$0xff]  ;;  %4557 = vst [vmem:[#allocation7_spill] sm:$0xff] %v3376_v36  ;;  %v429_v7 = vld [vmem:[#allocation2 + $0x152] sm:$0xff] }
  0x65   : > { %2547 = vrot.lane.b32.xlu2 %v3329_v1, %s3060_s17  ;;  %v2556_v13 = vpack.i.bf16 %v396_v9, %v395_v8  ;;  %4558 = vst [vmem:[#allocation8_spill] sm:$0xff] %v3385_v53  ;;  %v427_v62 = vld [vmem:[#allocation2 + $0x13a] sm:$0xff]  ;;  %v428_v2 = vld [vmem:[#allocation2 + $0x142] sm:$0xff]  ;;  %v3438_v50 = vld [vmem:[#allocation2 + $0xb0] sm:$0xff] }
  0x66   : > { %v399_v11 = vld [vmem:[#allocation2 + $0x169] sm:$0xff]  ;;  %4559 = vst [vmem:[#allocation9_spill] sm:$0xff] %v3391_v60  ;;  %v2636_v6 = vpack.i.bf16 %v428_v2, %v427_v62  ;;  %v430_v8 = vld [vmem:[#allocation2 + $0x15a] sm:$0xff]  ;;  %v3450_v2 = vpack.i.bf16 %v3438_v50, %v3436_v49 }
  0x67   : > { %2542 = vrot.lane.b32.xlu1 %v3333_v4, %s3060_s17  ;;  %v400_v12 = vld [vmem:[#allocation2 + $0x171] sm:$0xff]  ;;  %336 = vst.msk [vmem:[#allocation2 + $0x189] sm:$0xff] %vm248_vm0, %v247_v34  ;;  %v442_v46 = vld [vmem:[#allocation2 + $0x80] sm:$0xff] }
  0x68   : > { %v2566_v14 = vpack.i.bf16 %v400_v12, %v399_v11  ;;  %v3398_v11 = vld [vmem:[#allocation2 + $0x18] sm:$0xff]  ;;  %v3400_v12 = vld [vmem:[#allocation2 + $0x20] sm:$0xff]  ;;  %v3442_v58 = vld [vmem:[#allocation2 + $0x90] sm:$0xff]  ;;  %4563 = vst [vmem:[#allocation13_spill] sm:$0xff] %v3450_v2 }
  0x69   : > { %2552 = vrot.lane.b32.xlu0 %v2551_v5, %s3060_s17  ;;  %v426_v5 = vld [vmem:[#allocation2 + $0x12a] sm:$0xff]  ;;  %v2651_v15 = vpack.i.bf16 %v3400_v12, %v3398_v11  ;;  %v441_v44 = vld [vmem:[#allocation2 + $0x78] sm:$0xff]  ;;  %4562 = vst [vmem:[#allocation12_spill] sm:$0xff] %v3442_v58  ;;  %v3472_v34 = vld [vmem:[#allocation2 + $0xe0] sm:$0xff] }
  0x6a   : > { %v2631_v9 = vpack.i.bf16 %v426_v5, %v425_v3  ;;  %v3444_v62 = vld [vmem:[#allocation2 + $0x98] sm:$0xff]  ;;  %4566 = vst [vmem:[#allocation16_spill] sm:$0xff] %v3472_v34 }
  0x6b   : > { %v460_v1 = vld [vmem:[#allocation2 + $0x158] sm:$0xff] }
  0x6d   : > { %2562 = vrot.lane.b32.xlu2 %v2561_v10, %s3060_s17  ;;  %v2641_v10 = vpack.i.bf16 %v430_v8, %v429_v7  ;;  %v448_v7 = vld [vmem:[#allocation2 + $0xc8] sm:$0xff]  ;;  %v3460_v8 = vpack.i.bf16 %v3444_v62, %v3442_v58 }
  0x6f   : > { %2557 = vrot.lane.b32.xlu1 %v2556_v13, %s3060_s17  ;;  %v431_v13 = vld [vmem:[#allocation2 + $0x16a] sm:$0xff]  ;;  %4564 = vst [vmem:[#allocation14_spill] sm:$0xff] %v3460_v8 }
  0x71   : > { %2567 = vrot.lane.b32.xlu0 %v2566_v14, %s3060_s17  ;;  %v432_v14 = vld [vmem:[#allocation2 + $0x172] sm:$0xff] }
  0x72   : > { %v2646_v19 = vpack.i.bf16 %v432_v14, %v431_v13  ;;  %v3466_v13 = vld [vmem:[#allocation2 + $0xf8] sm:$0xff] }
  0x75   : > { %2577 = vrot.lane.b32.xlu2 %v3343_v20, %s3061_s22 }
  0x77   : > { %2572 = vrot.lane.b32.xlu1 %v2571_v24, %s3061_s22  ;;  %v246_v24 = vld [vmem:[%s3211_s21 + $0xf0] sm:$0xff] }
  0x78   : > { %335 = vst.msk [vmem:[#allocation2 + $0x181] sm:$0xff] %vm248_vm0, %v246_v24  ;;  %v3470_v24 = vld [vmem:[#allocation2 + $0xd8] sm:$0xff] }
  0x79   : > { %2582 = vrot.lane.b32.xlu0 %v3353_v25, %s3061_s22  ;;  %4565 = vst [vmem:[#allocation15_spill] sm:$0xff] %v3470_v24 }
  0x7d   : > { %2592 = vrot.lane.b32.xlu2 %v3368_v31, %s3061_s22 }
  0x7f   : > { %2587 = vrot.lane.b32.xlu1 %v3372_v35, %s3061_s22 }
  0x81   : > { %2597 = vrot.lane.b32.xlu0 %v3376_v36, %s3061_s22  ;;  %v3498_v36 = vld [vmem:[#allocation2 + $0x128] sm:$0xff] }
  0x82   : > { %4569 = vst [vmem:[#allocation19_spill] sm:$0xff] %v3498_v36 }
  0x85   : > { %2607 = vrot.lane.b32.xlu2 %v2606_v42, %s3061_s22  ;;  %v3426_v42 = vpack.i.bf16 %v440_v39, %v439_v37 }
  0x87   : > { %2602 = vrot.lane.b32.xlu1 %v2601_v47, %s3061_s22  ;;  %4560 = vst [vmem:[#allocation10_spill] sm:$0xff] %v3426_v42  ;;  %v3430_v47 = vpack.i.bf16 %v3422_v41, %v3420_v40 }
  0x89   : > { %2612 = vrot.lane.b32.xlu0 %v2611_v48, %s3061_s22  ;;  %v3434_v48 = vpack.i.bf16 %v442_v46, %v441_v44 }
  0x8b   : > { %4561 = vst [vmem:[#allocation11_spill] sm:$0xff] %v3434_v48 }
  0x8d   : > { %2622 = vrot.lane.b32.xlu2 %v3385_v53, %s3061_s22 }
  0x8f   : > { %2617 = vrot.lane.b32.xlu1 %v3387_v59, %s3061_s22 }
  0x91   : > { %2627 = vrot.lane.b32.xlu0 %v3391_v60, %s3061_s22  ;;  %v3502_v60 = vpop.permute.xlu0 %2492 }
  0x95   : > { %2637 = vrot.lane.b32.xlu2 %v2636_v6, %s3061_s22  ;;  %v447_v6 = vld [vmem:[#allocation2 + $0xc0] sm:$0xff] }
  0x97   : > { %2632 = vrot.lane.b32.xlu1 %v2631_v9, %s3061_s22  ;;  %v2686_v9 = vpack.i.bf16 %v448_v7, %v447_v6 }
  0x99   : > { %2642 = vrot.lane.b32.xlu0 %v2641_v10, %s3061_s22  ;;  %v3464_v10 = vld [vmem:[#allocation2 + $0xf0] sm:$0xff] }
  0x9d   : > { %2652 = vrot.lane.b32.xlu2 %v2651_v15, %s3062_s23 }
  0x9f   : > { %2647 = vrot.lane.b32.xlu1 %v2646_v19, %s3061_s22 }
  0xa1   : > { %2657 = vrot.lane.b32.xlu0 %v3414_v32, %s3062_s23 }
  0xa5   : > { %2667 = vrot.lane.b32.xlu2 %v3426_v42, %s3062_s23  ;;  %v3526_v42 = vld [vmem:[#allocation2 + $0x170] sm:$0xff] }
  0xa7   : > { %2662 = vrot.lane.b32.xlu1 %v3430_v47, %s3062_s23  ;;  %v2513_v51 = vpop.permute.xlu2 %2512 }
  0xa8   : > { %v2515_v52 = vunpack.i.h.bf16 %v2513_v51  ;;  %v2514_v56 = vunpack.i.l.bf16 %v2513_v51 }
  0xa9   : > { %2672 = vrot.lane.b32.xlu0 %v3434_v48, %s3062_s23 }
  0xaa   : > { %v3453_v3 = vsel %vm248_vm0, %v439_v37, %v2514_v56  ;;  %v3456_v5 = vsel %vm248_vm0, %v440_v39, %v2515_v52  ;;  %v3477_v37 = vpack.i.bf16 %v3466_v13, %v3464_v10  ;;  %v453_v52 = vld [vmem:[#allocation2 + $0x108] sm:$0xff]  ;;  %v454_v56 = vld [vmem:[#allocation2 + $0x110] sm:$0xff] }
  0xad   : > { %2682 = vrot.lane.b32.xlu2 %v3450_v2, %s3062_s23  ;;  %v3489_v2 = vpack.i.bf16 %v454_v56, %v453_v52 }
  0xaf   : > { %2677 = vrot.lane.b32.xlu1 %v3460_v8, %s3062_s23  ;;  %v2518_v14 = vpop.permute.xlu2 %2517  ;;  %4567 = vst [vmem:[#allocation17_spill] sm:$0xff] %v3489_v2  ;;  %v3493_v8 = vld [vmem:[#allocation2 + $0x140] sm:$0xff] }
  0xb0   : > { %v2520_v15 = vunpack.i.h.bf16 %v2518_v14  ;;  %v2519_v19 = vunpack.i.l.bf16 %v2518_v14  ;;  %v2691_v14 = vpack.i.bf16 %v3472_v34, %v3470_v24  ;;  %v463_v24 = vld [vmem:[#allocation2 + $0x180] sm:$0xff]  ;;  %v464_v34 = vld [vmem:[#allocation2 + $0x188] sm:$0xff] }
  0xb1   : > { %2687 = vrot.lane.b32.xlu0 %v2686_v9, %s3062_s23  ;;  %v3491_v9 = vld [vmem:[#allocation2 + $0x138] sm:$0xff] }
  0xb2   : > { %v3480_v39 = vsel %vm248_vm0, %v442_v46, %v2520_v15  ;;  %v3483_v51 = vsel %vm248_vm0, %v441_v44, %v2519_v19  ;;  %v3496_v19 = vld [vmem:[#allocation2 + $0x120] sm:$0xff]  ;;  %v3506_v31 = vpack.i.bf16 %v3493_v8, %v3491_v9 }
  0xb3   : > { %4568 = vst [vmem:[#allocation18_spill] sm:$0xff] %v3496_v19  ;;  %v3516_v53 = vpack.i.bf16 %v3498_v36, %v3496_v19 }
  0xb4   : > { %4570 = vst [vmem:[#allocation20_spill] sm:$0xff] %v3506_v31 }
  0xb5   : > { %2697 = vrot.lane.b32.xlu2 %v3477_v37, %s3062_s23  ;;  %4573 = vst [vmem:[#allocation23_spill] sm:$0xff] %v3516_v53 }
  0xb7   : > { %2692 = vrot.lane.b32.xlu1 %v2691_v14, %s3062_s23  ;;  %v2533_v46 = vpop.permute.xlu2 %2532 }
  0xb8   : > { %v2535_v15 = vunpack.i.h.bf16 %v2533_v46  ;;  %v2534_v44 = vunpack.i.l.bf16 %v2533_v46  ;;  %v459_v46 = vld [vmem:[#allocation2 + $0x150] sm:$0xff] }
  0xb9   : > { %2702 = vrot.lane.b32.xlu0 %v3489_v2, %s3062_s23  ;;  %v3520_v2 = vpack.i.bf16 %v460_v1, %v459_v46 }
  0xba   : > { %v3509_v48 = vsel %vm248_vm0, %v448_v7, %v2535_v15  ;;  %v3512_v14 = vsel %vm248_vm0, %v447_v6, %v2534_v44  ;;  %v3524_v44 = vld [vmem:[#allocation2 + $0x168] sm:$0xff] }
  0xbb   : > { %4571 = vst [vmem:[#allocation21_spill] sm:$0xff] %v3509_v48 }
  0xbc   : > { %4572 = vst [vmem:[#allocation22_spill] sm:$0xff] %v3512_v14 }
  0xbd   : > { %2712 = vrot.lane.b32.xlu2 %v3506_v31, %s3062_s23  ;;  %v2726_v31 = vpack.i.bf16 %v464_v34, %v463_v24 }
  0xbf   : > { %2707 = vrot.lane.b32.xlu1 %v3516_v53, %s3062_s23  ;;  %v2548_v7 = vpop.permute.xlu2 %2547 }
  0xc0   : > { %v2550_v15 = vunpack.i.h.bf16 %v2548_v7  ;;  %v2549_v6 = vunpack.i.l.bf16 %v2548_v7  ;;  %v2721_v7 = vpack.i.bf16 %v3526_v42, %v3524_v44 }
  0xc1   : > { %v3528_v14 = vpop.permute.xlu1 %2502  ;;  %2717 = vrot.lane.b32.xlu0 %v3520_v2, %s3062_s23 }
  0xc2   : > { %v3533_v19 = vsel %vm248_vm0, %v454_v56, %v2550_v15  ;;  %v3536_v36 = vsel %vm248_vm0, %v453_v52, %v2549_v6 }
  0xc3   : > { %v2498_v53 = vpop.permute.xlu0 %2497 }
  0xc4   : > { %v2499_v56 = vunpack.i.l.bf16 %v2498_v53 }
  0xc5   : > { %2727 = vrot.lane.b32.xlu2 %v2726_v31, %s3062_s23  ;;  %v2500_v31 = vunpack.i.h.bf16 %v2498_v53  ;;  %v2465_v53 = vld [vmem:[%s4530_s1 + $0x40] sm:$0xff] }
  0xc6   : > { %2000 = vmatpush.bf16.msra.mxu1 %v2465_v53  ;;  %2474 = vmatpush.bf16.msra.mxu3 %v2465_v53 }
  0xc7   : > { %2722 = vrot.lane.b32.xlu1 %v2721_v7, %s3062_s23  ;;  %v2563_v48 = vpop.permute.xlu2 %2562 }
  0xc8   : > { %v2565_v61 = vunpack.i.h.bf16 %v2563_v48  ;;  %v2564_v0 = vunpack.i.l.bf16 %v2563_v48 }
  0xc9   : > { %v3542_v58 = vpop.permute.xlu1 %2507  ;;  %2732 = vrot.lane.b32.xlu0 %v3260_v28, %s3063_s24 }
  0xca   : > { %v3547_v24 = vsel %vm248_vm0, %v460_v1, %v2565_v61  ;;  %v3550_v34 = vsel %vm248_vm0, %v459_v46, %v2564_v0  ;;  %v1524_v61 = vsel %vm248_vm0, %v3398_v11, %v2499_v56  ;;  %v1525_v0 = vsel %vm248_vm0, %v3400_v12, %v2500_v31 }
  0xcb   : > { %v3552_v52 = vpop.permute.xlu0 %2522 }
  0xcd   : > { %2742 = vrot.lane.b32.xlu2 %v3274_v38, %s3063_s24 }
  0xcf   : > { %2737 = vrot.lane.b32.xlu1 %v3252_v23, %s3063_s24  ;;  %v2578_v48 = vpop.permute.xlu2 %2577 }
  0xd0   : > { %v2580_v15 = vunpack.i.h.bf16 %v2578_v48  ;;  %v2579_v28 = vunpack.i.l.bf16 %v2578_v48 }
  0xd1   : > { %v2528_v1 = vpop.permute.xlu1 %2527  ;;  %2747 = vrot.lane.b32.xlu0 %v3244_v18, %s3063_s24  ;;  %v1753_v18 = vpack.c.bf16 %v3347_v22, %v3345_v21 }
  0xd2   : > { %v3568_v46 = vsel %vm1554_vm2, %v1524_v61, %v2579_v28  ;;  %v3571_v6 = vsel %vm1554_vm2, %v1525_v0, %v2580_v15  ;;  %v2530_v22 = vunpack.i.h.bf16 %v2528_v1  ;;  %v2529_v15 = vunpack.i.l.bf16 %v2528_v1 }
  0xd3   : > { %v3573_v7 = vpop.permute.xlu0 %2537  ;;  %2437 = vmatmul.msk.bf16.vlgmr.msra.gmra.mxu1 %vm248_vm0, %v1753_v18 }
  0xd4   : > { %v1536_v61 = vsel %vm248_vm0, %v3436_v49, %v2529_v15  ;;  %v1755_v49 = vpack.c.bf16 %v3362_v30, %v3360_v29 }
  0xd5   : > { %2757 = vrot.lane.b32.xlu2 %v3282_v43, %s3063_s24 }
  0xd7   : > { %2752 = vrot.lane.b32.xlu1 %v3268_v33, %s3063_s24  ;;  %v2593_v11 = vpop.permute.xlu2 %2592  ;;  %v2766_v33 = vpack.i.bf16 %v3301_v54, %v3286_v45 }
  0xd8   : > { %v2595_v12 = vunpack.i.h.bf16 %v2593_v11  ;;  %v2594_v31 = vunpack.i.l.bf16 %v2593_v11  ;;  %v338_v11 = vld [vmem:[#allocation2 + $0x8] sm:$0xff] }
  0xd9   : > { %v2543_v56 = vpop.permute.xlu1 %2542  ;;  %2762 = vrot.lane.b32.xlu0 %v3307_v57, %s3063_s24 }
  0xda   : > { %v3586_v48 = vsel %vm1554_vm2, %v3456_v5, %v2595_v12  ;;  %v3590_v43 = vsel %vm1554_vm2, %v3453_v3, %v2594_v31  ;;  %v1537_v3 = vsel %vm248_vm0, %v3438_v50, %v2530_v22  ;;  %v2545_v1 = vunpack.i.h.bf16 %v2543_v56  ;;  %v337_v12 = vld [vmem:[#allocation2] sm:$0xff] }
  0xdb   : > { %v3592_v21 = vpop.permute.xlu0 %2552  ;;  %v2544_v53 = vunpack.i.l.bf16 %v2543_v56  ;;  %v2495_v50 = vunpack.i.h.bf16 %v3502_v60  ;;  %v2505_v31 = vunpack.i.h.bf16 %v3528_v14 }
  0xdc   : > { %v1543_v29 = vsel %vm248_vm0, %v3466_v13, %v2545_v1 }
  0xdd   : > { %2772 = vrot.lane.b32.xlu2 %v3343_v20, %s3064_s27  ;;  %v1542_v30 = vsel %vm248_vm0, %v3464_v10, %v2544_v53  ;;  %v1523_v13 = vsel %vm248_vm0, %v338_v11, %v2495_v50 }
  0xdf   : > { %2767 = vrot.lane.b32.xlu1 %v2766_v33, %s3063_s24  ;;  %v2608_v57 = vpop.permute.xlu2 %2607  ;;  %v2504_v33 = vunpack.i.l.bf16 %v3528_v14 }
  0xe0   : > { %v2610_v5 = vunpack.i.h.bf16 %v2608_v57  ;;  %v2609_v28 = vunpack.i.l.bf16 %v2608_v57 }
  0xe1   : > { %v2558_v0 = vpop.permute.xlu1 %2557  ;;  %2777 = vrot.lane.b32.xlu0 %v3414_v32, %s3065_s28  ;;  %v2494_v32 = vunpack.i.l.bf16 %v3502_v60 }
  0xe2   : > { %v3606_v45 = vsel %vm1554_vm2, %v1537_v3, %v2610_v5  ;;  %v3609_v54 = vsel %vm1554_vm2, %v1536_v61, %v2609_v28  ;;  %v2560_v1 = vunpack.i.h.bf16 %v2558_v0  ;;  %v2559_v53 = vunpack.i.l.bf16 %v2558_v0 }
  0xe3   : > { %v3611_v20 = vpop.permute.xlu0 %2567  ;;  %2438 = vmatmul.msk.bf16.gmra.mxu1 %vm248_vm0, %v1755_v49  ;;  %v1522_v5 = vsel %vm248_vm0, %v337_v12, %v2494_v32  ;;  %v2510_v32 = vunpack.i.h.bf16 %v3542_v58 }
  0xe4   : > { %v1549_v0 = vsel %vm248_vm0, %v3493_v8, %v2560_v1  ;;  %v1548_v12 = vsel %vm248_vm0, %v3491_v9, %v2559_v53 }
  0xe5   : > { %2787 = vrot.lane.b32.xlu2 %v3353_v25, %s3064_s27 }
  0xe7   : > { %2782 = vrot.lane.b32.xlu1 %v3252_v23, %s3066_s29  ;;  %v2623_v18 = vpop.permute.xlu2 %2622  ;;  %v2801_v23 = vpack.i.bf16 %v3323_v63, %v3303_v55  ;;  %v1526_v55 = vsel %vm248_vm0, %v3406_v16, %v2504_v33  ;;  %v1527_v63 = vsel %vm248_vm0, %v3408_v17, %v2505_v31  ;;  %v1529_v33 = vsel %vm248_vm0, %v3422_v41, %v2510_v32  ;;  %v566_v41 = vld [vmem:[#allocation2 + $0x61] sm:$0xff] }
  0xe8   : > { %v2625_v56 = vunpack.i.h.bf16 %v2623_v18  ;;  %v2624_v25 = vunpack.i.l.bf16 %v2623_v18  ;;  %v2509_v18 = vunpack.i.l.bf16 %v3542_v58 }
  0xe9   : > { %v2573_v60 = vpop.permute.xlu1 %2572  ;;  %2792 = vrot.lane.b32.xlu0 %v3430_v47, %s3065_s28 }
  0xea   : > { %v2575_v22 = vunpack.i.h.bf16 %v2573_v60  ;;  %v2574_v15 = vunpack.i.l.bf16 %v2573_v60  ;;  %v3633_v57 = vsel %vm1554_vm2, %v1543_v29, %v2625_v56  ;;  %v3636_v14 = vsel %vm1554_vm2, %v1542_v30, %v2624_v25 }
  0xeb   : > { %v2583_v10 = vpop.permute.xlu0 %2582  ;;  %v1528_v8 = vsel %vm248_vm0, %v3420_v40, %v2509_v18 }
  0xec   : > { %v1556_v28 = vsel %vm1554_vm2, %v1523_v13, %v2575_v22  ;;  %v1555_v47 = vsel %vm1554_vm2, %v1522_v5, %v2574_v15  ;;  %v2585_v3 = vunpack.i.h.bf16 %v2583_v10  ;;  %v2584_v61 = vunpack.i.l.bf16 %v2583_v10  ;;  %v567_v15 = vld [vmem:[#allocation2 + $0x69] sm:$0xff] }
  0xed   : > { %2802 = vrot.lane.b32.xlu2 %v2801_v23, %s3063_s24  ;;  %v1757_v23 = vpack.c.bf16 %v3357_v27, %v3355_v26  ;;  %v2525_v13 = vunpack.i.h.bf16 %v3552_v52  ;;  %v2524_v5 = vunpack.i.l.bf16 %v3552_v52 }
  0xee   : > { %v3648_v49 = vsel %vm1554_vm2, %v1527_v63, %v2585_v3  ;;  %v3651_v50 = vsel %vm1554_vm2, %v1526_v55, %v2584_v61  ;;  %v4574_v55 = vld [vmem:[#allocation12_spill] sm:$0xff] }
  0xef   : > { %2797 = vrot.lane.b32.xlu1 %v3274_v38, %s3066_s29  ;;  %v2638_v16 = vpop.permute.xlu2 %2637  ;;  %v1534_v63 = vsel %vm248_vm0, %v4574_v55, %v2524_v5 }
  0xf0   : > { %v2640_v11 = vunpack.i.h.bf16 %v2638_v16  ;;  %v2639_v17 = vunpack.i.l.bf16 %v2638_v16  ;;  %v4576_v16 = vld [vmem:[#allocation3_spill] sm:$0xff] }
  0xf1   : > { %v2588_v31 = vpop.permute.xlu1 %2587  ;;  %2807 = vrot.lane.b32.xlu0 %v3387_v59, %s3064_s27 }
  0xf2   : > { %v2590_v56 = vunpack.i.h.bf16 %v2588_v31  ;;  %v2589_v25 = vunpack.i.l.bf16 %v2588_v31  ;;  %v3664_v58 = vsel %vm1554_vm2, %v1549_v0, %v2640_v11  ;;  %v3667_v38 = vsel %vm1554_vm2, %v1548_v12, %v2639_v17 }
  0xf3   : > { %v2598_v29 = vpop.permute.xlu0 %2597  ;;  %2439 = vmatmul.msk.bf16.gmra.mxu1 %vm248_vm0, %v1757_v23  ;;  %v2540_v12 = vunpack.i.h.bf16 %v3573_v7  ;;  %v2539_v31 = vunpack.i.l.bf16 %v3573_v7 }
  0xf4   : > { %v1561_v9 = vsel %vm1554_vm2, %v1528_v8, %v2589_v25  ;;  %v1562_v30 = vsel %vm1554_vm2, %v1529_v33, %v2590_v56  ;;  %v2600_v59 = vunpack.i.h.bf16 %v2598_v29  ;;  %v2599_v60 = vunpack.i.l.bf16 %v2598_v29  ;;  %v4579_v56 = vld [vmem:[#allocation10_spill] sm:$0xff] }
  0xf5   : > { %2817 = vrot.lane.b32.xlu2 %v3333_v4, %s3066_s29 }
  0xf6   : > { %v3681_v22 = vsel %vm1554_vm2, %v3480_v39, %v2600_v59  ;;  %v3685_v40 = vsel %vm1554_vm2, %v3483_v51, %v2599_v60  ;;  %v2831_v51 = vpack.i.bf16 %v567_v15, %v566_v41  ;;  %v4580_v15 = vld [vmem:[#allocation16_spill] sm:$0xff] }
  0xf7   : > { %2812 = vrot.lane.b32.xlu1 %v3477_v37, %s3065_s28  ;;  %v2653_v4 = vpop.permute.xlu2 %2652  ;;  %v1535_v37 = vsel %vm248_vm0, %v3444_v62, %v2525_v13  ;;  %v4578_v62 = vld [vmem:[#allocation22_spill] sm:$0xff]  ;;  %v1541_v7 = vsel %vm248_vm0, %v4580_v15, %v2540_v12  ;;  %v4581_v13 = vld [vmem:[#allocation15_spill] sm:$0xff] }
  0xf8   : > { %v2655_v26 = vunpack.i.h.bf16 %v2653_v4  ;;  %v2654_v27 = vunpack.i.l.bf16 %v2653_v4  ;;  %v1540_v5 = vsel %vm248_vm0, %v4581_v13, %v2539_v31  ;;  %v569_v31 = vld [vmem:[#allocation2 + $0x81] sm:$0xff] }
  0xf9   : > { %v2603_v39 = vpop.permute.xlu1 %2602  ;;  %2822 = vrot.lane.b32.xlu0 %v3372_v35, %s3064_s27 }
  0xfa   : > { %v2605_v10 = vunpack.i.h.bf16 %v2603_v39  ;;  %v2604_v3 = vunpack.i.l.bf16 %v2603_v39  ;;  %v3695_v61 = vsel %vm1587_vm3, %v1556_v28, %v2655_v26  ;;  %v3698_v52 = vsel %vm1587_vm3, %v1555_v47, %v2654_v27  ;;  %v4575_v28 = vld [vmem:[#allocation4_spill] sm:$0xff]  ;;  %v4577_v47 = vld [vmem:[#allocation21_spill] sm:$0xff] }
  0xfb   : > { %v2613_v1 = vpop.permute.xlu0 %2612  ;;  %v2836_v11 = vpack.i.bf16 %v4576_v16, %v4575_v28  ;;  %v600_v26 = vld [vmem:[#allocation2 + $0x7a] sm:$0xff]  ;;  %v601_v27 = vld [vmem:[#allocation2 + $0x82] sm:$0xff] }
  0xfc   : > { %v1567_v53 = vsel %vm1554_vm2, %v1534_v63, %v2604_v3  ;;  %v1568_v35 = vsel %vm1554_vm2, %v1535_v37, %v2605_v10  ;;  %v2615_v32 = vunpack.i.h.bf16 %v2613_v1  ;;  %v2614_v18 = vunpack.i.l.bf16 %v2613_v1 }
  0xfd   : > { %2832 = vrot.lane.b32.xlu2 %v2831_v51, %s3066_s29  ;;  %v2555_v63 = vunpack.i.h.bf16 %v3592_v21  ;;  %v2554_v1 = vunpack.i.l.bf16 %v3592_v21  ;;  %v568_v21 = vld [vmem:[#allocation2 + $0x79] sm:$0xff] }
  0xfe   : > { %v3711_v17 = vsel %vm1554_vm2, %v4577_v47, %v2615_v32  ;;  %v3715_v0 = vsel %vm1554_vm2, %v4578_v62, %v2614_v18  ;;  %v4583_v32 = vld [vmem:[#allocation8_spill] sm:$0xff] }
  0xff   : > { %2827 = vrot.lane.b32.xlu1 %v4579_v56, %s3065_s28  ;;  %v2668_v25 = vpop.permute.xlu2 %2667  ;;  %v4585_v56 = vld [vmem:[#allocation19_spill] sm:$0xff] }
 0x100   : > { %v2670_v33 = vunpack.i.h.bf16 %v2668_v25  ;;  %v2669_v8 = vunpack.i.l.bf16 %v2668_v25  ;;  %v1547_v25 = vsel %vm248_vm0, %v4585_v56, %v2555_v63  ;;  %v487_v63 = vld [vmem:[#allocation2 + $0x121] sm:$0xff] }
 0x101   : > { %v2618_v29 = vpop.permute.xlu1 %2617  ;;  %2837 = vrot.lane.b32.xlu0 %v2836_v11, %s3063_s24 }
 0x102   : > { %v2620_v59 = vunpack.i.h.bf16 %v2618_v29  ;;  %v2619_v60 = vunpack.i.l.bf16 %v2618_v29  ;;  %v3723_v23 = vsel %vm1587_vm3, %v1562_v30, %v2670_v33  ;;  %v3726_v41 = vsel %vm1587_vm3, %v1561_v9, %v2669_v8  ;;  %v4582_v30 = vld [vmem:[#allocation17_spill] sm:$0xff]  ;;  %v4586_v33 = vld [vmem:[#allocation18_spill] sm:$0xff] }
 0x103   : > { %v2628_v4 = vpop.permute.xlu0 %2627  ;;  %v1759_v9 = vpack.c.bf16 %v601_v27, %v600_v26  ;;  %v1546_v8 = vsel %vm248_vm0, %v4586_v33, %v2554_v1  ;;  %v2569_v26 = vunpack.i.l.bf16 %v3611_v20  ;;  %v4588_v27 = vld [vmem:[#allocation6_spill] sm:$0xff] }
 0x104   : > { %v1573_v39 = vsel %vm1554_vm2, %v1540_v5, %v2619_v60  ;;  %v1574_v51 = vsel %vm1554_vm2, %v1541_v7, %v2620_v59  ;;  %v2630_v10 = vunpack.i.h.bf16 %v2628_v4  ;;  %v2629_v3 = vunpack.i.l.bf16 %v2628_v4 }
 0x105   : > { %2847 = vrot.lane.b32.xlu2 %v4582_v30, %s3065_s28  ;;  %2440 = vmatmul.msk.bf16.gmra.mxu1 %vm248_vm0, %v1759_v9  ;;  %v2570_v4 = vunpack.i.h.bf16 %v3611_v20  ;;  %v486_v9 = vld [vmem:[#allocation2 + $0x111] sm:$0xff] }
 0x106   : > { %v3738_v37 = vsel %vm1554_vm2, %v3533_v19, %v2630_v10  ;;  %v3742_v55 = vsel %vm1554_vm2, %v3536_v36, %v2629_v3  ;;  %v4584_v19 = vld [vmem:[#allocation5_spill] sm:$0xff] }
 0x107   : > { %2842 = vrot.lane.b32.xlu1 %v4583_v32, %s3064_s27  ;;  %v2683_v18 = vpop.permute.xlu2 %2682  ;;  %v1553_v20 = vsel %vm248_vm0, %v3526_v42, %v2570_v4 }
 0x108   : > { %v2685_v28 = vunpack.i.h.bf16 %v2683_v18  ;;  %v2684_v16 = vunpack.i.l.bf16 %v2683_v18 }
 0x109   : > { %v2633_v11 = vpop.permute.xlu1 %2632  ;;  %2852 = vrot.lane.b32.xlu0 %v4584_v19, %s3066_s29 }
 0x10a   : > { %v2635_v47 = vunpack.i.h.bf16 %v2633_v11  ;;  %v2634_v62 = vunpack.i.l.bf16 %v2633_v11  ;;  %v3752_v36 = vsel %vm1587_vm3, %v1567_v53, %v2684_v16  ;;  %v3755_v12 = vsel %vm1587_vm3, %v1568_v35, %v2685_v28  ;;  %v4587_v53 = vld [vmem:[#allocation11_spill] sm:$0xff] }
 0x10b   : > { %v2643_v29 = vpop.permute.xlu0 %2642  ;;  %v2866_v35 = vpack.i.bf16 %v569_v31, %v568_v21  ;;  %v1552_v28 = vsel %vm248_vm0, %v3524_v44, %v2569_v26  ;;  %v2871_v11 = vpack.i.bf16 %v487_v63, %v486_v9  ;;  %v3790_v31 = vld [vmem:[#allocation2 + $0x92] sm:$0xff] }
 0x10c   : > { %v1579_v59 = vsel %vm1554_vm2, %v1546_v8, %v2634_v62  ;;  %v1580_v60 = vsel %vm1554_vm2, %v1547_v25, %v2635_v47  ;;  %v2645_v15 = vunpack.i.h.bf16 %v2643_v29  ;;  %v2644_v7 = vunpack.i.l.bf16 %v2643_v29  ;;  %v583_v29 = vld [vmem:[#allocation2 + $0x129] sm:$0xff] }
 0x10d   : > { %2862 = vrot.lane.b32.xlu2 %v4587_v53, %s3065_s28  ;;  %v2886_v26 = vpack.i.bf16 %v583_v29, %v487_v63  ;;  %v4591_v9 = vld [vmem:[#allocation7_spill] sm:$0xff]  ;;  %v489_v63 = vld [vmem:[#allocation2 + $0x139] sm:$0xff] }
 0x10e   : > { %v3767_v13 = vsel %vm1554_vm2, %v3547_v24, %v2645_v15  ;;  %v3771_v5 = vsel %vm1554_vm2, %v3550_v34, %v2644_v7  ;;  %v4590_v7 = vld [vmem:[#allocation23_spill] sm:$0xff] }
 0x10f   : > { %2857 = vrot.lane.b32.xlu1 %v4588_v27, %s3064_s27  ;;  %v2698_v10 = vpop.permute.xlu2 %2697 }
 0x110   : > { %v2700_v3 = vunpack.i.h.bf16 %v2698_v10  ;;  %v2699_v30 = vunpack.i.l.bf16 %v2698_v10 }
 0x111   : > { %v2648_v1 = vpop.permute.xlu1 %2647  ;;  %2867 = vrot.lane.b32.xlu0 %v2866_v35, %s3066_s29 }
 0x112   : > { %v2650_v24 = vunpack.i.h.bf16 %v2648_v1  ;;  %v2649_v32 = vunpack.i.l.bf16 %v2648_v1  ;;  %v3779_v34 = vsel %vm1587_vm3, %v1573_v39, %v2699_v30  ;;  %v3782_v18 = vsel %vm1587_vm3, %v1574_v51, %v2700_v3  ;;  %v3792_v39 = vld [vmem:[#allocation2 + $0x9a] sm:$0xff] }
 0x113   : > { %v2658_v16 = vpop.permute.xlu0 %2657  ;;  %v4589_v51 = vld [vmem:[#allocation9_spill] sm:$0xff]  ;;  %v1761_v42 = vpack.c.bf16 %v3792_v39, %v3790_v31 }
 0x114   : > { %v1585_v19 = vsel %vm1554_vm2, %v1552_v28, %v2649_v32  ;;  %v1586_v47 = vsel %vm1554_vm2, %v1553_v20, %v2650_v24  ;;  %v2660_v62 = vunpack.i.h.bf16 %v2658_v16  ;;  %v2659_v21 = vunpack.i.l.bf16 %v2658_v16  ;;  %v570_v32 = vld [vmem:[#allocation2 + $0x91] sm:$0xff]  ;;  %v571_v20 = vld [vmem:[#allocation2 + $0x99] sm:$0xff]  ;;  %v4592_v28 = vld [vmem:[#allocation14_spill] sm:$0xff] }
 0x115   : > { %2877 = vrot.lane.b32.xlu2 %v4589_v51, %s3064_s27  ;;  %2441 = vmatmul.msk.bf16.gmra.mxu1 %vm248_vm0, %v1761_v42  ;;  %v3846_v51 = vld [vmem:[#allocation2 + $0x122] sm:$0xff]  ;;  %v3848_v42 = vld [vmem:[#allocation2 + $0x12a] sm:$0xff] }
 0x116   : > { %v3800_v44 = vsel %vm1587_vm3, %v3568_v46, %v2659_v21  ;;  %v3804_v56 = vsel %vm1587_vm3, %v3571_v6, %v2660_v62 }
 0x117   : > { %2872 = vrot.lane.b32.xlu1 %v2871_v11, %s3063_s24  ;;  %v2713_v25 = vpop.permute.xlu2 %2712 }
 0x118   : > { %v2715_v33 = vunpack.i.h.bf16 %v2713_v25  ;;  %v2714_v8 = vunpack.i.l.bf16 %v2713_v25  ;;  %v2463_v25 = vld [vmem:[%s4530_s1 + $0x30] sm:$0xff] }
 0x119   : > { %v2663_v15 = vpop.permute.xlu1 %2662  ;;  %2882 = vrot.lane.b32.xlu0 %v4590_v7, %s3065_s28 }
 0x11a   : > { %v2665_v53 = vunpack.i.h.bf16 %v2663_v15  ;;  %v2664_v35 = vunpack.i.l.bf16 %v2663_v15  ;;  %v3811_v46 = vsel %vm1587_vm3, %v1579_v59, %v2714_v8  ;;  %v3814_v6 = vsel %vm1587_vm3, %v1580_v60, %v2715_v33  ;;  %v3853_v15 = vld [vmem:[#allocation2 + $0xaa] sm:$0xff] }
 0x11b   : > { %v2673_v4 = vpop.permute.xlu0 %2672  ;;  %v2901_v8 = vpack.i.bf16 %v571_v20, %v570_v32  ;;  %v572_v20 = vld [vmem:[#allocation2 + $0xa9] sm:$0xff] }
 0x11c   : > { %v3818_v27 = vsel %vm1587_vm3, %v3651_v50, %v2664_v35  ;;  %v3822_v10 = vsel %vm1587_vm3, %v3648_v49, %v2665_v53  ;;  %v2675_v3 = vunpack.i.h.bf16 %v2673_v4  ;;  %v2674_v30 = vunpack.i.l.bf16 %v2673_v4  ;;  %v2464_v50 = vld [vmem:[%s4530_s1 + $0x38] sm:$0xff] }
 0x11d   : > { %2892 = vrot.lane.b32.xlu2 %v4591_v9, %s3064_s27  ;;  %1904 = vmatpush.bf16.msra.mxu0 %v2464_v50  ;;  %v2911_v35 = vpack.i.bf16 %v3848_v42, %v3846_v51 }
 0x11e   : > { %v3828_v59 = vsel %vm1587_vm3, %v3586_v48, %v2675_v3  ;;  %v3832_v60 = vsel %vm1587_vm3, %v3590_v43, %v2674_v30  ;;  %2466 = vmatpush.bf16.msra.mxu2 %v2464_v50  ;;  %v2906_v43 = vpack.i.bf16 %v489_v63, %v583_v29  ;;  %v3855_v29 = vld [vmem:[#allocation2 + $0xb2] sm:$0xff]  ;;  %v2462_v3 = vld [vmem:[%s4530_s1 + $0x28] sm:$0xff] }
 0x11f   : > { %2887 = vrot.lane.b32.xlu1 %v2886_v26, %s3066_s29  ;;  %v2728_v49 = vpop.permute.xlu2 %2727  ;;  %v1763_v4 = vpack.c.bf16 %v3855_v29, %v3853_v15 }
 0x120   : > { %v2730_v1 = vunpack.i.h.bf16 %v2728_v49  ;;  %v2729_v24 = vunpack.i.l.bf16 %v2728_v49 }
 0x121   : > { %v2678_v48 = vpop.permute.xlu1 %2677  ;;  %2897 = vrot.lane.b32.xlu0 %v4592_v28, %s3065_s28  ;;  %1905 = vmatpush.bf16.msra.mxu0 %v2463_v25  ;;  %v2460_v28 = vld [vmem:[%s4530_s1 + $0x18] sm:$0xff] }
 0x122   : > { %v2680_v16 = vunpack.i.h.bf16 %v2678_v48  ;;  %v2679_v11 = vunpack.i.l.bf16 %v2678_v48  ;;  %v3841_v62 = vsel %vm1587_vm3, %v1585_v19, %v2729_v24  ;;  %v3844_v21 = vsel %vm1587_vm3, %v1586_v47, %v2730_v1  ;;  %2467 = vmatpush.bf16.msra.mxu2 %v2463_v25  ;;  %v573_v48 = vld [vmem:[#allocation2 + $0xb1] sm:$0xff] }
 0x123   : > { %4593 = vst [vmem:[#allocation12_spill] sm:$0xff] %v3841_v62  ;;  %v2688_v33 = vpop.permute.xlu0 %2687  ;;  %v2926_v24 = vpack.i.bf16 %v3792_v39, %v3790_v31 }
 0x124   : > { %4594 = vst [vmem:[#allocation4_spill] sm:$0xff] %v3844_v21  ;;  %v1598_v19 = vsel %vm1587_vm3, %v3685_v40, %v2679_v11  ;;  %v1599_v47 = vsel %vm1587_vm3, %v3681_v22, %v2680_v16  ;;  %v2690_v7 = vunpack.i.h.bf16 %v2688_v33  ;;  %v2689_v53 = vunpack.i.l.bf16 %v2688_v33  ;;  %v585_v22 = vld [vmem:[#allocation2 + $0x141] sm:$0xff] }
 0x125   : > { %2907 = vrot.lane.b32.xlu2 %v2906_v43, %s3063_s24  ;;  %2442 = vmatmul.msk.bf16.gmra.mxu1 %vm248_vm0, %v1763_v4  ;;  %v4595_v43 = vld [vmem:[#allocation20_spill] sm:$0xff]  ;;  %v3913_v4 = vld [vmem:[#allocation2 + $0xc2] sm:$0xff] }
 0x126   : > { %v3868_v26 = vsel %vm1587_vm3, %v3606_v45, %v2690_v7  ;;  %v3872_v40 = vsel %vm1587_vm3, %v3609_v54, %v2689_v53  ;;  %1906 = vmatpush.bf16.msra.mxu0 %v2462_v3  ;;  %2468 = vmatpush.bf16.msra.mxu2 %v2462_v3  ;;  %v2921_v45 = vpack.i.bf16 %v585_v22, %v489_v63  ;;  %v2461_v54 = vld [vmem:[%s4530_s1 + $0x20] sm:$0xff]  ;;  %v491_v7 = vld [vmem:[#allocation2 + $0x151] sm:$0xff] }
 0x127   : > { %2902 = vrot.lane.b32.xlu1 %v2901_v8, %s3066_s29  ;;  %v3878_v30 = vpop.permute.xlu2 %2742  ;;  %v2459_v53 = vld [vmem:[%s4530_s1 + $0x10] sm:$0xff] }
 0x128   : > { %v3915_v3 = vld [vmem:[#allocation2 + $0xca] sm:$0xff] }
 0x129   : > { %v3881_v9 = vpop.permute.xlu1 %2692  ;;  %2912 = vrot.lane.b32.xlu0 %v2911_v35, %s3064_s27 }
 0x12a   : > { %1907 = vmatpush.bf16.msra.mxu0 %v2461_v54  ;;  %2469 = vmatpush.bf16.msra.mxu2 %v2461_v54 }
 0x12b   : > { %v2703_v50 = vpop.permute.xlu0 %2702 }
 0x12c   : > { %v2705_v49 = vunpack.i.h.bf16 %v2703_v50  ;;  %v2704_v1 = vunpack.i.l.bf16 %v2703_v50  ;;  %v2941_v50 = vpack.i.bf16 %v491_v7, %v585_v22  ;;  %v3944_v22 = vld [vmem:[#allocation2 + $0x13a] sm:$0xff] }
 0x12d   : > { %2922 = vrot.lane.b32.xlu2 %v2921_v45, %s3066_s29 }
 0x12e   : > { %v3892_v32 = vsel %vm1587_vm3, %v3633_v57, %v2705_v49  ;;  %v3896_v63 = vsel %vm1587_vm3, %v3636_v14, %v2704_v1  ;;  %1908 = vmatpush.bf16.msra.mxu0 %v2460_v28  ;;  %2470 = vmatpush.bf16.msra.mxu2 %v2460_v28  ;;  %v2936_v14 = vpack.i.bf16 %v573_v48, %v572_v20  ;;  %v3946_v48 = vld [vmem:[#allocation2 + $0x142] sm:$0xff] }
 0x12f   : > { %2917 = vrot.lane.b32.xlu1 %v4595_v43, %s3065_s28  ;;  %v2758_v16 = vpop.permute.xlu2 %2757  ;;  %v1765_v49 = vpack.c.bf16 %v3915_v3, %v3913_v4  ;;  %v587_v43 = vld [vmem:[#allocation2 + $0x159] sm:$0xff] }
 0x130   : > { %v2760_v11 = vunpack.i.h.bf16 %v2758_v16  ;;  %v2759_v31 = vunpack.i.l.bf16 %v2758_v16  ;;  %v2457_v16 = vld [vmem:[%s4530_s1] sm:$0xff] }
 0x131   : > { %v2708_v57 = vpop.permute.xlu1 %2707  ;;  %2927 = vrot.lane.b32.xlu0 %v2926_v24, %s3064_s27  ;;  %v4596_v24 = vld [vmem:[#allocation13_spill] sm:$0xff] }
 0x132   : > { %v2710_v39 = vunpack.i.h.bf16 %v2708_v57  ;;  %v2709_v25 = vunpack.i.l.bf16 %v2708_v57  ;;  %v3905_v33 = vsel %vm1620_vm4, %v1598_v19, %v2759_v31  ;;  %v3908_v8 = vsel %vm1620_vm4, %v1599_v47, %v2760_v11  ;;  %1909 = vmatpush.bf16.msra.mxu0 %v2459_v53  ;;  %2471 = vmatpush.bf16.msra.mxu2 %v2459_v53  ;;  %v543_v53 = vld [vmem:[#allocation2 + $0xc8] sm:$0xff] }
 0x133   : > { %v2718_v35 = vpop.permute.xlu0 %2717  ;;  %v2946_v31 = vpack.i.bf16 %v3946_v48, %v3944_v22 }
 0x134   : > { %v3919_v45 = vsel %vm1587_vm3, %v3742_v55, %v2709_v25  ;;  %v3923_v19 = vsel %vm1587_vm3, %v3738_v37, %v2710_v39  ;;  %v2720_v47 = vunpack.i.h.bf16 %v2718_v35  ;;  %v2719_v54 = vunpack.i.l.bf16 %v2718_v35  ;;  %v2458_v37 = vld [vmem:[%s4530_s1 + $0x8] sm:$0xff]  ;;  %v542_v25 = vld [vmem:[#allocation2 + $0xc0] sm:$0xff] }
 0x135   : > { %2937 = vrot.lane.b32.xlu2 %v2936_v14, %s3066_s29  ;;  %2443 = vmatmul.msk.bf16.gmra.mxu1 %vm248_vm0, %v1765_v49  ;;  %v2956_v39 = vpack.i.bf16 %v587_v43, %v491_v7  ;;  %v2961_v49 = vpack.i.bf16 %v3855_v29, %v3853_v15 }
 0x136   : > { %v3930_v1 = vsel %vm1587_vm3, %v3664_v58, %v2720_v47  ;;  %v3934_v55 = vsel %vm1587_vm3, %v3667_v38, %v2719_v54  ;;  %1910 = vmatpush.bf16.msra.mxu0 %v2458_v37  ;;  %2472 = vmatpush.bf16.msra.mxu2 %v2458_v37  ;;  %v574_v54 = vld [vmem:[#allocation2 + $0xc1] sm:$0xff] }
 0x137   : > { %2932 = vrot.lane.b32.xlu1 %v4596_v24, %s3065_s28  ;;  %v3941_v20 = vpop.permute.xlu2 %2772  ;;  %v608_v37 = vld [vmem:[#allocation2 + $0xda] sm:$0xff] }
 0x138   : > { %v2775_v21 = vunpack.i.h.bf16 %v3941_v20 }
 0x139   : > { %v2723_v58 = vpop.permute.xlu1 %2722  ;;  %2942 = vrot.lane.b32.xlu0 %v2941_v50, %s3063_s24 }
 0x13a   : > { %v2725_v38 = vunpack.i.h.bf16 %v2723_v58  ;;  %v2724_v28 = vunpack.i.l.bf16 %v2723_v58  ;;  %1911 = vmatpush.bf16.msra.mxu0 %v2457_v16  ;;  %2473 = vmatpush.bf16.msra.mxu2 %v2457_v16 }
 0x13b   : > { %v3952_v11 = vpop.permute.xlu0 %2732 }
 0x13c   : > { %v3958_v57 = vsel %vm1587_vm3, %v3771_v5, %v2724_v28  ;;  %v3962_v14 = vsel %vm1587_vm3, %v3767_v13, %v2725_v38  ;;  %v2966_v5 = vpack.i.bf16 %v543_v53, %v542_v25  ;;  %v575_v13 = vld [vmem:[#allocation2 + $0xc9] sm:$0xff] }
 0x13d   : > { %4597 = vst [vmem:[#allocation3_spill] sm:$0xff] %v3962_v14  ;;  %2952 = vrot.lane.b32.xlu2 %v3520_v2, %s3065_s28  ;;  %v609_v2 = vld [vmem:[#allocation2 + $0xe2] sm:$0xff]  ;;  %v2971_v58 = vpack.i.bf16 %v575_v13, %v574_v54 }
 0x13e   : > { %v1767_v38 = vpack.c.bf16 %v609_v2, %v608_v37 }
 0x13f   : > { %2947 = vrot.lane.b32.xlu1 %v2946_v31, %s3064_s27  ;;  %v3967_v35 = vpop.permute.xlu2 %2787  ;;  %v3983_v31 = vld [vmem:[#allocation2 + $0x152] sm:$0xff] }
 0x141   : > { %v3969_v47 = vpop.permute.xlu1 %2737  ;;  %2957 = vrot.lane.b32.xlu0 %v2956_v39, %s3066_s29  ;;  %v3985_v39 = vld [vmem:[#allocation2 + $0x15a] sm:$0xff] }
 0x143   : > { %v2748_v50 = vpop.permute.xlu0 %2747 }
 0x144   : > { %v2750_v7 = vunpack.i.h.bf16 %v2748_v50  ;;  %v2749_v24 = vunpack.i.l.bf16 %v2748_v50  ;;  %v2976_v50 = vpack.i.bf16 %v575_v13, %v587_v43  ;;  %v588_v13 = vld [vmem:[#allocation2 + $0x169] sm:$0xff] }
 0x145   : > { %2967 = vrot.lane.b32.xlu2 %v2966_v5, %s3065_s28  ;;  %2444 = vmatmul.msk.bf16.gmra.mxu1 %vm248_vm0, %v1767_v38  ;;  %v557_v5 = vld [vmem:[#allocation2 + $0x170] sm:$0xff] }
 0x146   : > { %v3977_v28 = vsel %vm1620_vm4, %v3723_v23, %v2750_v7  ;;  %v3981_v16 = vsel %vm1620_vm4, %v3726_v41, %v2749_v24  ;;  %v2981_v23 = vpack.i.bf16 %v3985_v39, %v3983_v31  ;;  %v556_v41 = vld [vmem:[#allocation2 + $0x168] sm:$0xff] }
 0x147   : > { %2962 = vrot.lane.b32.xlu1 %v2961_v49, %s3064_s27  ;;  %v3988_v15 = vpop.permute.xlu2 %2802  ;;  %v2986_v24 = vpack.i.bf16 %v557_v5, %v556_v41 }
 0x149   : > { %v2753_v29 = vpop.permute.xlu1 %2752  ;;  %2972 = vrot.lane.b32.xlu0 %v2971_v58, %s3066_s29 }
 0x14a   : > { %v2755_v25 = vunpack.i.h.bf16 %v2753_v29  ;;  %v2754_v53 = vunpack.i.l.bf16 %v2753_v29  ;;  %v2996_v29 = vpack.i.bf16 %v3915_v3, %v3913_v4  ;;  %v2774_v4 = vunpack.i.l.bf16 %v3941_v20 }
 0x14b   : > { %v2763_v54 = vpop.permute.xlu0 %2762  ;;  %v2739_v20 = vunpack.i.l.bf16 %v3969_v47 }
 0x14c   : > { %v3996_v37 = vsel %vm1620_vm4, %v3832_v60, %v2754_v53  ;;  %v4000_v49 = vsel %vm1620_vm4, %v3828_v59, %v2755_v25  ;;  %v2765_v2 = vunpack.i.h.bf16 %v2763_v54  ;;  %v2764_v7 = vunpack.i.l.bf16 %v2763_v54  ;;  %v589_v59 = vld [vmem:[#allocation2 + $0x171] sm:$0xff] }
 0x14d   : > { %2982 = vrot.lane.b32.xlu2 %v2981_v23, %s3064_s27  ;;  %v544_v25 = vld [vmem:[#allocation2 + $0xd8] sm:$0xff]  ;;  %v2735_v53 = vunpack.i.h.bf16 %v3952_v11  ;;  %v2991_v5 = vpack.i.bf16 %v589_v59, %v588_v13 }
 0x14e   : > { %v4005_v58 = vsel %vm1620_vm4, %v3752_v36, %v2764_v7  ;;  %v4009_v43 = vsel %vm1620_vm4, %v3755_v12, %v2765_v2  ;;  %v2734_v36 = vunpack.i.l.bf16 %v3952_v11  ;;  %v545_v12 = vld [vmem:[#allocation2 + $0xe0] sm:$0xff]  ;;  %v610_v54 = vld [vmem:[#allocation2 + $0xf2] sm:$0xff] }
 0x14f   : > { %2977 = vrot.lane.b32.xlu1 %v2976_v50, %s3063_s24  ;;  %v4012_v60 = vpop.permute.xlu2 %2817  ;;  %v611_v50 = vld [vmem:[#allocation2 + $0xfa] sm:$0xff]  ;;  %v3001_v3 = vpack.i.bf16 %v545_v12, %v544_v25  ;;  %v1622_v13 = vsel %vm1620_vm4, %v3695_v61, %v2735_v53 }
 0x150   : > { %v4026_v7 = vpop.f32.mrf.mxu1  ;;  %v1621_v11 = vsel %vm1620_vm4, %v3698_v52, %v2734_v36  ;;  %v577_v25 = vld [vmem:[#allocation2 + $0xe1] sm:$0xff]  ;;  %v1655_v53 = vsel %vm1653_vm5, %v1622_v13, %v2775_v21 }
 0x151   : > { %v4014_v38 = vpop.permute.xlu1 %2767  ;;  %2987 = vrot.lane.b32.xlu0 %v2986_v24, %s3065_s28  ;;  %4598 = vst [vmem:[#allocation21_spill] sm:$0xff] %v4026_v7  ;;  %v1769_v24 = vpack.c.bf16 %v611_v50, %v610_v54  ;;  %v1654_v52 = vsel %vm1653_vm5, %v1621_v11, %v2774_v4  ;;  %v4045_v54 = vld [vmem:[#allocation2 + $0x172] sm:$0xff]  ;;  %v2740_v50 = vunpack.i.h.bf16 %v3969_v47  ;;  %v1623_v47 = vsel %vm1620_vm4, %v3800_v44, %v2739_v20  ;;  %v495_v44 = vld [vmem:[#allocation2 + $0x181] sm:$0xff]  ;;  %v496_v20 = vld [vmem:[#allocation2 + $0x189] sm:$0xff] }
 0x152   : > { %v2769_v23 = vunpack.i.l.bf16 %v4014_v38 }
 0x153   : > { %v2778_v41 = vpop.permute.xlu0 %2777 }
 0x154   : > { %v4024_v2 = vsel %vm1620_vm4, %v3872_v40, %v2769_v23  ;;  %v2780_v59 = vunpack.i.h.bf16 %v2778_v41  ;;  %v2779_v40 = vunpack.i.l.bf16 %v2778_v41  ;;  %v4043_v41 = vld [vmem:[#allocation2 + $0x16a] sm:$0xff] }
 0x155   : > { %2997 = vrot.lane.b32.xlu2 %v2996_v29, %s3064_s27  ;;  %2445 = vmatmul.msk.bf16.gmra.mxu1 %vm248_vm0, %v1769_v24  ;;  %v576_v29 = vld [vmem:[#allocation2 + $0xd9] sm:$0xff]  ;;  %v3016_v13 = vpack.i.bf16 %v4045_v54, %v4043_v41 }
 0x156   : > { %v3006_v62 = vpack.i.bf16 %v577_v25, %v576_v29  ;;  %v1687_v7 = vsel %vm1686_vm6, %v1654_v52, %v2779_v40  ;;  %v2790_v29 = vunpack.i.h.bf16 %v3967_v35  ;;  %v2789_v40 = vunpack.i.l.bf16 %v3967_v35  ;;  %v613_v25 = vld [vmem:[#allocation2 + $0x112] sm:$0xff] }
 0x157   : > { %2992 = vrot.lane.b32.xlu1 %v2991_v5, %s3066_s29  ;;  %v4036_v23 = vpop.permute.xlu2 %2832 }
 0x158   : > { %v4052_v14 = vpop.f32.mrf.mxu1  ;;  %v1656_v35 = vsel %vm1653_vm5, %v1623_v47, %v2789_v40  ;;  %v2695_v47 = vunpack.i.h.bf16 %v3881_v9  ;;  %v2804_v40 = vunpack.i.l.bf16 %v3988_v15 }
 0x159   : > { %v2783_v12 = vpop.permute.xlu1 %2782  ;;  %3002 = vrot.lane.b32.xlu0 %v3001_v3, %s3065_s28  ;;  %v1688_v3 = vsel %vm1686_vm6, %v1655_v53, %v2780_v59  ;;  %4599 = vst [vmem:[#allocation22_spill] sm:$0xff] %v4052_v14  ;;  %v612_v59 = vld [vmem:[#allocation2 + $0x10a] sm:$0xff] }
 0x15a   : > { %v2785_v61 = vunpack.i.h.bf16 %v2783_v12  ;;  %v2784_v36 = vunpack.i.l.bf16 %v2783_v12  ;;  %v559_v53 = vld [vmem:[#allocation2 + $0x188] sm:$0xff] }
 0x15b   : > { %v2793_v24 = vpop.permute.xlu0 %2792 }
 0x15c   : > { %v1720_v4 = vsel %vm1719_vm7, %v1687_v7, %v2784_v36  ;;  %v1721_v11 = vsel %vm1719_vm7, %v1688_v3, %v2785_v61  ;;  %v1624_v7 = vsel %vm1620_vm4, %v3804_v56, %v2740_v50  ;;  %v2795_v12 = vunpack.i.h.bf16 %v2793_v24  ;;  %v558_v61 = vld [vmem:[#allocation2 + $0x180] sm:$0xff] }
 0x15d   : > { %3012 = vrot.lane.b32.xlu2 %v2991_v5, %s3063_s24  ;;  %v1752_v21 = vpack.c.bf16 %v1721_v11, %v1720_v4  ;;  %v2794_v52 = vunpack.i.l.bf16 %v2793_v24  ;;  %v1771_v36 = vpack.c.bf16 %v613_v25, %v612_v59  ;;  %v1657_v56 = vsel %vm1653_vm5, %v1624_v7, %v2790_v29 }
 0x15e   : > { %v3021_v4 = vpack.i.bf16 %v559_v53, %v558_v61  ;;  %v3031_v11 = vpack.i.bf16 %v496_v20, %v495_v44  ;;  %v1690_v59 = vsel %vm1686_vm6, %v1657_v56, %v2795_v12  ;;  %v2694_v25 = vunpack.i.l.bf16 %v3881_v9  ;;  %v561_v61 = vld [vmem:[#allocation2 + $0x1a0] sm:$0xff]  ;;  %v4088_v9 = vld [vmem:[#allocation2 + $0x18a] sm:$0xff] }
 0x15f   : > { %3007 = vrot.lane.b32.xlu1 %v3006_v62, %s3066_s29  ;;  %1912 = vmatmul.bf16.vlgmr.msra.gmra.mxu0 %v1752_v21  ;;  %v4064_v5 = vpop.permute.xlu2 %2847  ;;  %v1689_v21 = vsel %vm1686_vm6, %v1656_v35, %v2794_v52  ;;  %v2770_v7 = vunpack.i.h.bf16 %v4014_v38  ;;  %v560_v52 = vld [vmem:[#allocation2 + $0x198] sm:$0xff]  ;;  %v2820_v38 = vunpack.i.h.bf16 %v4012_v60  ;;  %v2819_v35 = vunpack.i.l.bf16 %v4012_v60 }
 0x160   : > { %2446 = vmatmul.msk.bf16.vlgmr.msra.gmra.mxu3 %vm248_vm0, %v1771_v36  ;;  %v4075_v36 = vpop.f32.mrf.mxu1  ;;  %v1604_v44 = vsel %vm1587_vm3, %v3715_v0, %v2694_v25 }
 0x161   : > { %v2798_v3 = vpop.permute.xlu1 %2797  ;;  %3017 = vrot.lane.b32.xlu0 %v3016_v13, %s3064_s27  ;;  %v1637_v0 = vsel %vm1620_vm4, %v1604_v44, %v2770_v7 }
 0x162   : > { %v2800_v50 = vunpack.i.h.bf16 %v2798_v3  ;;  %v2799_v24 = vunpack.i.l.bf16 %v2798_v3  ;;  %v4086_v3 = vld [vmem:[#allocation2 + $0x182] sm:$0xff] }
 0x163   : > { %v2808_v62 = vpop.permute.xlu0 %2807  ;;  %v3036_v60 = vpack.i.bf16 %v4088_v9, %v4086_v3 }
 0x164   : > { %v1722_v14 = vsel %vm1719_vm7, %v1689_v21, %v2799_v24  ;;  %v1723_v13 = vsel %vm1719_vm7, %v1690_v59, %v2800_v50  ;;  %v2810_v12 = vunpack.i.h.bf16 %v2808_v62  ;;  %v2809_v53 = vunpack.i.l.bf16 %v2808_v62  ;;  %v592_v21 = vld [vmem:[#allocation2 + $0x199] sm:$0xff]  ;;  %v593_v59 = vld [vmem:[#allocation2 + $0x1a1] sm:$0xff] }
 0x165   : > { %v1754_v29 = vpack.c.bf16 %v1723_v13, %v1722_v14  ;;  %3027 = vrot.lane.b32.xlu2 %v3031_v11, %s3066_s29  ;;  %v1605_v14 = vsel %vm1587_vm3, %v3711_v17, %v2695_v47  ;;  %v3041_v50 = vpack.i.bf16 %v561_v61, %v560_v52  ;;  %v3046_v52 = vpack.i.bf16 %v593_v59, %v592_v21 }
 0x166   : > { %v1638_v24 = vsel %vm1620_vm4, %v1605_v14, %v2804_v40  ;;  %v1670_v25 = vsel %vm1653_vm5, %v1637_v0, %v2809_v53  ;;  %v2745_v53 = vunpack.i.h.bf16 %v3878_v30 }
 0x167   : > { %3022 = vrot.lane.b32.xlu1 %v3021_v4, %s3065_s28  ;;  %v4084_v20 = vpop.permute.xlu2 %2862  ;;  %v1671_v17 = vsel %vm1653_vm5, %v1638_v24, %v2810_v12  ;;  %v2744_v12 = vunpack.i.l.bf16 %v3878_v30 }
 0x168   : > { %v4106_v61 = vpop.f32.mrf.mxu1  ;;  %v1626_v30 = vsel %vm1620_vm4, %v3822_v10, %v2745_v53  ;;  %v1773_v10 = vpack.c.bf16 %v3848_v42, %v3846_v51 }
 0x169   : > { %v2813_v56 = vpop.permute.xlu1 %2812  ;;  %3032 = vrot.lane.b32.xlu0 %v3031_v11, %s3063_s24 }
 0x16a   : > { %v2815_v62 = vunpack.i.h.bf16 %v2813_v56  ;;  %v2814_v4 = vunpack.i.l.bf16 %v2813_v56 }
 0x16b   : > { %v2823_v13 = vpop.permute.xlu0 %2822 }
 0x16c   : > { %v1703_v47 = vsel %vm1686_vm6, %v1670_v25, %v2814_v4  ;;  %v1704_v11 = vsel %vm1686_vm6, %v1671_v17, %v2815_v62  ;;  %v2825_v14 = vunpack.i.h.bf16 %v2823_v13  ;;  %v2824_v56 = vunpack.i.l.bf16 %v2823_v13 }
 0x16d   : > { %v1736_v40 = vsel %vm1719_vm7, %v1703_v47, %v2819_v35  ;;  %v1737_v7 = vsel %vm1719_vm7, %v1704_v11, %v2820_v38  ;;  %3042 = vrot.lane.b32.xlu2 %v3041_v50, %s3065_s28  ;;  %v2835_v35 = vunpack.i.h.bf16 %v4036_v23  ;;  %v2834_v38 = vunpack.i.l.bf16 %v4036_v23 }
 0x16e   : > { %v1768_v44 = vpack.c.bf16 %v1737_v7, %v1736_v40  ;;  %v1625_v50 = vsel %vm1620_vm4, %v3818_v27, %v2744_v12  ;;  %v1659_v21 = vsel %vm1653_vm5, %v1626_v30, %v2825_v14  ;;  %v2850_v40 = vunpack.i.h.bf16 %v4064_v5 }
 0x16f   : > { %3037 = vrot.lane.b32.xlu1 %v3036_v60, %s3064_s27  ;;  %1917 = vmatmul.bf16.gmra.mxu0 %v1754_v29  ;;  %v4118_v4 = vpop.permute.xlu2 %2877  ;;  %v1658_v29 = vsel %vm1653_vm5, %v1625_v50, %v2824_v56  ;;  %v2805_v60 = vunpack.i.h.bf16 %v3988_v15  ;;  %v2849_v7 = vunpack.i.l.bf16 %v4064_v5  ;;  %s211_s27 = scalar_lea.vmem %s4532_s3, %s4606_s16 }
 0x170   : > { %1952 = vmatmul.bf16.vlgmr.msra.gmra.mxu2 %v1768_v44  ;;  %v4129_v11 = vpop.f32.mrf.mxu1  ;;  %2447 = vmatmul.msk.bf16.gmra.mxu3 %vm248_vm0, %v1773_v10 }
 0x171   : > { %v2828_v24 = vpop.permute.xlu1 %2827  ;;  %3047 = vrot.lane.b32.xlu0 %v3046_v52, %s3066_s29  ;;  %v1639_v44 = vsel %vm1620_vm4, %v3779_v34, %v2805_v60 }
 0x172   : > { %v2830_v0 = vunpack.i.h.bf16 %v2828_v24  ;;  %v2829_v62 = vunpack.i.l.bf16 %v2828_v24 }
 0x173   : > { %v2838_v59 = vpop.permute.xlu0 %2837 }
 0x174   : > { %v1691_v23 = vsel %vm1686_vm6, %v1658_v29, %v2829_v62  ;;  %v1692_v25 = vsel %vm1686_vm6, %v1659_v21, %v2830_v0  ;;  %v2839_v47 = vunpack.i.l.bf16 %v2838_v59  ;;  %v2864_v0 = vunpack.i.l.bf16 %v4084_v20 }
 0x175   : > { %v1724_v17 = vsel %vm1719_vm7, %v1691_v23, %v2834_v38  ;;  %v1725_v27 = vsel %vm1719_vm7, %v1692_v25, %v2835_v35 }
 0x176   : > { %v1756_v13 = vpack.c.bf16 %v1725_v27, %v1724_v17  ;;  %v1640_v51 = vsel %vm1620_vm4, %v3782_v18, %v2839_v47  ;;  %v2865_v18 = vunpack.i.h.bf16 %v4084_v20 }
 0x177   : > { %v4140_v56 = vpop.permute.xlu2 %2892 }
 0x178   : > { %v4148_v29 = vpop.f32.mrf.mxu1 }
 0x179   : > { %v2843_v52 = vpop.permute.xlu1 %2842 }
 0x17a   : > { %v2845_v53 = vunpack.i.h.bf16 %v2843_v52  ;;  %v2844_v12 = vunpack.i.l.bf16 %v2843_v52  ;;  %v1775_v52 = vpack.c.bf16 %v3946_v48, %v3944_v22 }
 0x17b   : > { %v2853_v42 = vpop.permute.xlu0 %2852 }
 0x17c   : > { %v1672_v15 = vsel %vm1653_vm5, %v1639_v44, %v2844_v12  ;;  %v1673_v14 = vsel %vm1653_vm5, %v1640_v51, %v2845_v53  ;;  %v2855_v35 = vunpack.i.h.bf16 %v2853_v42  ;;  %v2854_v38 = vunpack.i.l.bf16 %v2853_v42 }
 0x17d   : > { %v1705_v5 = vsel %vm1686_vm6, %v1672_v15, %v2849_v7  ;;  %v1706_v24 = vsel %vm1686_vm6, %v1673_v14, %v2850_v40  ;;  %v2840_v12 = vunpack.i.h.bf16 %v2838_v59  ;;  %v2880_v42 = vunpack.i.h.bf16 %v4118_v4 }
 0x17e   : > { %v1738_v50 = vsel %vm1719_vm7, %v1705_v5, %v2854_v38  ;;  %v1739_v34 = vsel %vm1719_vm7, %v1706_v24, %v2855_v35  ;;  %v2879_v14 = vunpack.i.l.bf16 %v4118_v4 }
 0x17f   : > { %1922 = vmatmul.bf16.gmra.mxu0 %v1756_v13  ;;  %v1770_v30 = vpack.c.bf16 %v1739_v34, %v1738_v50  ;;  %v4156_v20 = vpop.permute.xlu2 %2907  ;;  %v1641_v35 = vsel %vm1620_vm4, %v3896_v63, %v2840_v12 }
 0x180   : > { %2448 = vmatmul.msk.bf16.gmra.mxu3 %vm248_vm0, %v1775_v52  ;;  %v1674_v34 = vsel %vm1653_vm5, %v1641_v35, %v2879_v14  ;;  %v2909_v12 = vunpack.i.l.bf16 %v4156_v20 }
 0x181   : > { %v2858_v62 = vpop.permute.xlu1 %2857  ;;  %1957 = vmatmul.bf16.gmra.mxu2 %v1770_v30 }
 0x182   : > { %v2860_v21 = vunpack.i.h.bf16 %v2858_v62  ;;  %v2859_v23 = vunpack.i.l.bf16 %v2858_v62  ;;  %v4163_v51 = vpop.f32.mrf.mxu1 }
 0x183   : > { %v2868_v25 = vpop.permute.xlu0 %2867 }
 0x184   : > { %v1660_v17 = vsel %vm1653_vm5, %v3981_v16, %v2859_v23  ;;  %v1661_v27 = vsel %vm1653_vm5, %v3977_v28, %v2860_v21  ;;  %v2870_v10 = vunpack.i.h.bf16 %v2868_v25  ;;  %v2869_v13 = vunpack.i.l.bf16 %v2868_v25 }
 0x185   : > { %v1693_v60 = vsel %vm1686_vm6, %v1660_v17, %v2864_v0  ;;  %v1694_v47 = vsel %vm1686_vm6, %v1661_v27, %v2865_v18  ;;  %v1777_v21 = vpack.c.bf16 %v3985_v39, %v3983_v31  ;;  %v2895_v23 = vunpack.i.h.bf16 %v4140_v56 }
 0x186   : > { %v1726_v40 = vsel %vm1719_vm7, %v1693_v60, %v2869_v13  ;;  %v1727_v7 = vsel %vm1719_vm7, %v1694_v47, %v2870_v10  ;;  %v2894_v25 = vunpack.i.l.bf16 %v4140_v56 }
 0x187   : > { %v1758_v53 = vpack.c.bf16 %v1727_v7, %v1726_v40  ;;  %v2923_v38 = vpop.permute.xlu2 %2922  ;;  %v1663_v60 = vsel %vm1653_vm5, %v4000_v49, %v2895_v23 }
 0x188   : > { %v1662_v13 = vsel %vm1653_vm5, %v3996_v37, %v2894_v25  ;;  %v2924_v14 = vunpack.i.l.bf16 %v2923_v38 }
 0x189   : > { %v2873_v16 = vpop.permute.xlu1 %2872 }
 0x18a   : > { %v2874_v28 = vunpack.i.l.bf16 %v2873_v16  ;;  %v4177_v62 = vpop.f32.mrf.mxu1 }
 0x18b   : > { %v2883_v44 = vpop.permute.xlu0 %2882 }
 0x18c   : > { %v1642_v15 = vsel %vm1620_vm4, %v3892_v32, %v2874_v28  ;;  %v2885_v22 = vunpack.i.h.bf16 %v2883_v44  ;;  %v2884_v48 = vunpack.i.l.bf16 %v2883_v44  ;;  %v2875_v44 = vunpack.i.h.bf16 %v2873_v16 }
 0x18d   : > { %v1675_v5 = vsel %vm1653_vm5, %v1642_v15, %v2880_v42  ;;  %v2925_v15 = vunpack.i.h.bf16 %v2923_v38 }
 0x18e   : > { %v1707_v18 = vsel %vm1686_vm6, %v1674_v34, %v2884_v48  ;;  %v1708_v32 = vsel %vm1686_vm6, %v1675_v5, %v2885_v22  ;;  %v1644_v22 = vsel %vm1620_vm4, %v3923_v19, %v2909_v12  ;;  %v1643_v48 = vsel %vm1620_vm4, %v3919_v45, %v2875_v44 }
 0x18f   : > { %1927 = vmatmul.bf16.gmra.mxu0 %v1758_v53  ;;  %v2938_v47 = vpop.permute.xlu2 %2937  ;;  %v1779_v19 = vpack.c.bf16 %v4045_v54, %v4043_v41 }
 0x190   : > { %2449 = vmatmul.msk.bf16.gmra.mxu3 %vm248_vm0, %v1777_v21  ;;  %v2939_v21 = vunpack.i.l.bf16 %v2938_v47 }
 0x191   : > { %v2888_v59 = vpop.permute.xlu1 %2887 }
 0x192   : > { %v2890_v24 = vunpack.i.h.bf16 %v2888_v59  ;;  %v2889_v50 = vunpack.i.l.bf16 %v2888_v59  ;;  %v4193_v49 = vpop.f32.mrf.mxu1 }
 0x193   : > { %v2898_v30 = vpop.permute.xlu0 %2897 }
 0x194   : > { %v1740_v4 = vsel %vm1719_vm7, %v1707_v18, %v2889_v50  ;;  %v1741_v63 = vsel %vm1719_vm7, %v1708_v32, %v2890_v24  ;;  %v2900_v17 = vunpack.i.h.bf16 %v2898_v30  ;;  %v2899_v27 = vunpack.i.l.bf16 %v2898_v30 }
 0x195   : > { %v1772_v0 = vpack.c.bf16 %v1741_v63, %v1740_v4 }
 0x196   : > { %v1695_v39 = vsel %vm1686_vm6, %v1662_v13, %v2899_v27  ;;  %v1696_v56 = vsel %vm1686_vm6, %v1663_v60, %v2900_v17 }
 0x197   : > { %1962 = vmatmul.bf16.gmra.mxu2 %v1772_v0  ;;  %v2953_v34 = vpop.permute.xlu2 %2952  ;;  %v2940_v0 = vunpack.i.h.bf16 %v2938_v47 }
 0x199   : > { %v2903_v10 = vpop.permute.xlu1 %2902 }
 0x19a   : > { %v2905_v40 = vunpack.i.h.bf16 %v2903_v10  ;;  %v2904_v7 = vunpack.i.l.bf16 %v2903_v10  ;;  %v4208_v25 = vpop.f32.mrf.mxu1 }
 0x19b   : > { %v2913_v31 = vpop.permute.xlu0 %2912 }
 0x19c   : > { %v1728_v52 = vsel %vm1719_vm7, %v1695_v39, %v2904_v7  ;;  %v1729_v53 = vsel %vm1719_vm7, %v1696_v56, %v2905_v40  ;;  %v2915_v37 = vunpack.i.h.bf16 %v2913_v31  ;;  %v2914_v42 = vunpack.i.l.bf16 %v2913_v31 }
 0x19d   : > { %v1760_v28 = vpack.c.bf16 %v1729_v53, %v1728_v52  ;;  %v2910_v39 = vunpack.i.h.bf16 %v4156_v20  ;;  %v2955_v52 = vunpack.i.h.bf16 %v2953_v34 }
 0x19e   : > { %v1676_v24 = vsel %vm1653_vm5, %v1643_v48, %v2914_v42  ;;  %v1677_v16 = vsel %vm1653_vm5, %v1644_v22, %v2915_v37 }
 0x19f   : > { %1932 = vmatmul.bf16.gmra.mxu0 %v1760_v28  ;;  %v2968_v7 = vpop.permute.xlu2 %2967  ;;  %v1645_v12 = vsel %vm1620_vm4, %v3811_v46, %v2910_v39 }
 0x1a0   : > { %2450 = vmatmul.msk.bf16.gmra.mxu3 %vm248_vm0, %v1779_v19 }
 0x1a1   : > { %v2918_v35 = vpop.permute.xlu1 %2917 }
 0x1a2   : > { %v2920_v5 = vunpack.i.h.bf16 %v2918_v35  ;;  %v2919_v59 = vunpack.i.l.bf16 %v2918_v35  ;;  %v4223_v42 = vpop.f32.mrf.mxu1 }
 0x1a3   : > { %v2928_v50 = vpop.permute.xlu0 %2927 }
 0x1a4   : > { %v1709_v30 = vsel %vm1686_vm6, %v1676_v24, %v2919_v59  ;;  %v1710_v18 = vsel %vm1686_vm6, %v1677_v16, %v2920_v5  ;;  %v2930_v4 = vunpack.i.h.bf16 %v2928_v50  ;;  %v2929_v63 = vunpack.i.l.bf16 %v2928_v50 }
 0x1a5   : > { %v1742_v38 = vsel %vm1719_vm7, %v1709_v30, %v2924_v14  ;;  %v1743_v32 = vsel %vm1719_vm7, %v1710_v18, %v2925_v15  ;;  %v2970_v16 = vunpack.i.h.bf16 %v2968_v7  ;;  %v2969_v50 = vunpack.i.l.bf16 %v2968_v7 }
 0x1a6   : > { %v1774_v45 = vpack.c.bf16 %v1743_v32, %v1742_v38  ;;  %v1664_v10 = vsel %vm1653_vm5, %v3905_v33, %v2929_v63  ;;  %v1665_v13 = vsel %vm1653_vm5, %v3908_v8, %v2930_v4  ;;  %v2954_v33 = vunpack.i.l.bf16 %v2953_v34 }
 0x1a7   : > { %v2983_v24 = vpop.permute.xlu2 %2982 }
 0x1a8   : > { %1967 = vmatmul.bf16.gmra.mxu2 %v1774_v45 }
 0x1a9   : > { %v2933_v23 = vpop.permute.xlu1 %2932 }
 0x1aa   : > { %v2935_v17 = vunpack.i.h.bf16 %v2933_v23  ;;  %v2934_v27 = vunpack.i.l.bf16 %v2933_v23  ;;  %v4240_v63 = vpop.f32.mrf.mxu1 }
 0x1ab   : > { %v2943_v41 = vpop.permute.xlu0 %2942 }
 0x1ac   : > { %v1697_v54 = vsel %vm1686_vm6, %v1664_v10, %v2934_v27  ;;  %v1698_v60 = vsel %vm1686_vm6, %v1665_v13, %v2935_v17  ;;  %v2944_v56 = vunpack.i.l.bf16 %v2943_v41  ;;  %v2945_v10 = vunpack.i.h.bf16 %v2943_v41 }
 0x1ad   : > { %v1730_v40 = vsel %vm1719_vm7, %v1697_v54, %v2939_v21  ;;  %v1731_v47 = vsel %vm1719_vm7, %v1698_v60, %v2940_v0  ;;  %v2984_v60 = vunpack.i.l.bf16 %v2983_v24 }
 0x1ae   : > { %v1762_v31 = vpack.c.bf16 %v1731_v47, %v1730_v40  ;;  %v1646_v44 = vsel %vm1620_vm4, %v3814_v6, %v2944_v56  ;;  %v1781_v6 = vpack.c.bf16 %v4088_v9, %v4086_v3  ;;  %v624_v40 = vld [vmem:[#allocation2 + $0x19a] sm:$0xff]  ;;  %v625_v47 = vld [vmem:[#allocation2 + $0x1a2] sm:$0xff]  ;;  %v1647_v7 = vsel %vm1620_vm4, %v3934_v55, %v2945_v10 }
 0x1af   : > { %v2998_v27 = vpop.permute.xlu2 %2997 }
 0x1b0   : > { %1937 = vmatmul.bf16.gmra.mxu0 %v1762_v31  ;;  %2451 = vmatmul.msk.bf16.gmra.mxu3 %vm248_vm0, %v1781_v6 }
 0x1b1   : > { %v2948_v53 = vpop.permute.xlu1 %2947 }
 0x1b2   : > { %v2950_v28 = vunpack.i.h.bf16 %v2948_v53  ;;  %v2949_v8 = vunpack.i.l.bf16 %v2948_v53  ;;  %v4248_v56 = vpop.f32.mrf.mxu1 }
 0x1b3   : > { %v2958_v37 = vpop.permute.xlu0 %2957 }
 0x1b4   : > { %v1678_v15 = vsel %vm1653_vm5, %v1645_v12, %v2949_v8  ;;  %v1679_v20 = vsel %vm1653_vm5, %v1646_v44, %v2950_v28  ;;  %v2960_v14 = vunpack.i.h.bf16 %v2958_v37  ;;  %v2959_v35 = vunpack.i.l.bf16 %v2958_v37 }
 0x1b5   : > { %v1711_v22 = vsel %vm1686_vm6, %v1678_v15, %v2954_v33  ;;  %v1712_v48 = vsel %vm1686_vm6, %v1679_v20, %v2955_v52  ;;  %v1783_v52 = vpack.c.bf16 %v625_v47, %v624_v40 }
 0x1b6   : > { %v1744_v5 = vsel %vm1719_vm7, %v1711_v22, %v2959_v35  ;;  %v1745_v46 = vsel %vm1719_vm7, %v1712_v48, %v2960_v14  ;;  %v3000_v35 = vunpack.i.h.bf16 %v2998_v27  ;;  %v2999_v22 = vunpack.i.l.bf16 %v2998_v27  ;;  %v4600_v27 = vld [vmem:[#allocation3_spill] sm:$0xff] }
 0x1b7   : > { %v1776_v59 = vpack.c.bf16 %v1745_v46, %v1744_v5  ;;  %v3013_v37 = vpop.permute.xlu2 %3012 }
 0x1b9   : > { %v2963_v34 = vpop.permute.xlu1 %2962  ;;  %1972 = vmatmul.bf16.gmra.mxu2 %v1776_v59 }
 0x1ba   : > { %v2965_v30 = vunpack.i.h.bf16 %v2963_v34  ;;  %v2964_v18 = vunpack.i.l.bf16 %v2963_v34  ;;  %v4259_v6 = vpop.f32.mrf.mxu1 }
 0x1bb   : > { %v2973_v38 = vpop.permute.xlu0 %2972 }
 0x1bc   : > { %v1666_v32 = vsel %vm1653_vm5, %v4005_v58, %v2964_v18  ;;  %v1667_v19 = vsel %vm1653_vm5, %v4009_v43, %v2965_v30  ;;  %v2975_v45 = vunpack.i.h.bf16 %v2973_v38  ;;  %v2974_v4 = vunpack.i.l.bf16 %v2973_v38 }
 0x1bd   : > { %v1699_v3 = vsel %vm1686_vm6, %v1666_v32, %v2969_v50  ;;  %v1700_v9 = vsel %vm1686_vm6, %v1667_v19, %v2970_v16  ;;  %v2985_v43 = vunpack.i.h.bf16 %v2983_v24  ;;  %v1668_v24 = vsel %vm1653_vm5, %v4024_v2, %v2999_v22 }
 0x1be   : > { %v1732_v0 = vsel %vm1719_vm7, %v1699_v3, %v2974_v4  ;;  %v1733_v21 = vsel %vm1719_vm7, %v1700_v9, %v2975_v45  ;;  %v3015_v4 = vunpack.i.h.bf16 %v3013_v37  ;;  %v3014_v3 = vunpack.i.l.bf16 %v3013_v37 }
 0x1bf   : > { %v1764_v23 = vpack.c.bf16 %v1733_v21, %v1732_v0  ;;  %v3028_v19 = vpop.permute.xlu2 %3027 }
 0x1c0   : > { %2452 = vmatmul.msk.bf16.gmra.mxu3 %vm248_vm0, %v1783_v52  ;;  %v3030_v21 = vunpack.i.h.bf16 %v3028_v19 }
 0x1c1   : > { %v2978_v17 = vpop.permute.xlu1 %2977  ;;  %1942 = vmatmul.bf16.gmra.mxu0 %v1764_v23  ;;  %v3029_v23 = vunpack.i.l.bf16 %v3028_v19 }
 0x1c2   : > { %v2979_v58 = vunpack.i.l.bf16 %v2978_v17  ;;  %v2980_v8 = vunpack.i.h.bf16 %v2978_v17  ;;  %v1649_v17 = vsel %vm1620_vm4, %v3958_v57, %v3014_v3  ;;  %v4274_v40 = vpop.f32.mrf.mxu1 }
 0x1c3   : > { %v2988_v13 = vpop.permute.xlu0 %2987 }
 0x1c4   : > { %v1648_v54 = vsel %vm1620_vm4, %v3930_v1, %v2979_v58  ;;  %v2990_v31 = vunpack.i.h.bf16 %v2988_v13  ;;  %v2989_v39 = vunpack.i.l.bf16 %v2988_v13  ;;  %v1680_v1 = vsel %vm1653_vm5, %v1647_v7, %v2984_v60 }
 0x1c5   : > { %v1681_v33 = vsel %vm1653_vm5, %v1648_v54, %v2985_v43  ;;  %v1636_v48 = vsel %vm1620_vm4, %v3868_v26, %v2980_v8  ;;  %v1650_v58 = vsel %vm1620_vm4, %v4600_v27, %v3015_v4 }
 0x1c6   : > { %v1713_v44 = vsel %vm1686_vm6, %v1680_v1, %v2989_v39  ;;  %v1714_v55 = vsel %vm1686_vm6, %v1681_v33, %v2990_v31  ;;  %v1669_v34 = vsel %vm1653_vm5, %v1636_v48, %v3000_v35  ;;  %v4601_v31 = vld [vmem:[#allocation21_spill] sm:$0xff] }
 0x1c9   : > { %v2993_v53 = vpop.permute.xlu1 %2992 }
 0x1ca   : > { %v2995_v41 = vunpack.i.h.bf16 %v2993_v53  ;;  %v2994_v28 = vunpack.i.l.bf16 %v2993_v53 }
 0x1cb   : > { %v3003_v12 = vpop.permute.xlu0 %3002 }
 0x1cc   : > { %v1746_v15 = vsel %vm1719_vm7, %v1713_v44, %v2994_v28  ;;  %v1747_v20 = vsel %vm1719_vm7, %v1714_v55, %v2995_v41  ;;  %v3005_v5 = vunpack.i.h.bf16 %v3003_v12  ;;  %v3004_v46 = vunpack.i.l.bf16 %v3003_v12  ;;  %v3043_v41 = vpop.permute.xlu2 %3042 }
 0x1cd   : > { %v1778_v14 = vpack.c.bf16 %v1747_v20, %v1746_v15  ;;  %v3045_v12 = vunpack.i.h.bf16 %v3043_v41  ;;  %v3044_v44 = vunpack.i.l.bf16 %v3043_v41  ;;  %v4602_v15 = vld [vmem:[#allocation12_spill] sm:$0xff] }
 0x1ce   : > { %v1701_v18 = vsel %vm1686_vm6, %v1668_v24, %v3004_v46  ;;  %v1702_v38 = vsel %vm1686_vm6, %v1669_v34, %v3005_v5 }
 0x1cf   : > { %1977 = vmatmul.bf16.gmra.mxu2 %v1778_v14  ;;  %v4603_v14 = vld [vmem:[#allocation4_spill] sm:$0xff] }
 0x1d1   : > { %v3008_v59 = vpop.permute.xlu1 %3007 }
 0x1d2   : > { %v3010_v16 = vunpack.i.h.bf16 %v3008_v59  ;;  %v3009_v50 = vunpack.i.l.bf16 %v3008_v59 }
 0x1d3   : > { %v3018_v30 = vpop.permute.xlu0 %3017 }
 0x1d4   : > { %v1734_v26 = vsel %vm1719_vm7, %v1701_v18, %v3009_v50  ;;  %v1735_v32 = vsel %vm1719_vm7, %v1702_v38, %v3010_v16  ;;  %v3020_v9 = vunpack.i.h.bf16 %v3018_v30  ;;  %v3019_v2 = vunpack.i.l.bf16 %v3018_v30  ;;  %v4604_v50 = vld [vmem:[#allocation22_spill] sm:$0xff]  ;;  %v4297_v30 = vpop.f32.mrf.mxu1 }
 0x1d5   : > { %v1766_v45 = vpack.c.bf16 %v1735_v32, %v1734_v26 }
 0x1d6   : > { %v1682_v43 = vsel %vm1653_vm5, %v1649_v17, %v3019_v2  ;;  %v1683_v54 = vsel %vm1653_vm5, %v1650_v58, %v3020_v9 }
 0x1d7   : > { %1947 = vmatmul.bf16.gmra.mxu0 %v1766_v45 }
 0x1d9   : > { %v3023_v0 = vpop.permute.xlu1 %3022 }
 0x1da   : > { %v3025_v10 = vunpack.i.h.bf16 %v3023_v0  ;;  %v3024_v13 = vunpack.i.l.bf16 %v3023_v0 }
 0x1db   : > { %v3033_v60 = vpop.permute.xlu0 %3032 }
 0x1dc   : > { %v1913_v57 = vpop.f32.mrf.mxu0  ;;  %v1715_v47 = vsel %vm1686_vm6, %v1682_v43, %v3024_v13  ;;  %v1716_v7 = vsel %vm1686_vm6, %v1683_v54, %v3025_v10  ;;  %v3035_v28 = vunpack.i.h.bf16 %v3033_v60  ;;  %v3034_v1 = vunpack.i.l.bf16 %v3033_v60  ;;  %v2042_v10 = vpop.f32.mrf.mxu1 }
 0x1dd   : > { %v2003_v39 = vadd.f32 %v4601_v31, %v1913_v57  ;;  %v1748_v52 = vsel %vm1719_vm7, %v1715_v47, %v3029_v23  ;;  %v1749_v33 = vsel %vm1719_vm7, %v1716_v7, %v3030_v21 }
 0x1de   : > { %v1780_v53 = vpack.c.bf16 %v1749_v33, %v1748_v52  ;;  %v1651_v20 = vsel %vm1620_vm4, %v4602_v15, %v3034_v1  ;;  %v1652_v35 = vsel %vm1620_vm4, %v4603_v14, %v3035_v28 }
 0x1df   : > { %2082 = vst.msk [vmem:[%s4281_s25] sm:$0xff] %vm1554_vm2, %v2003_v39  ;;  %v2185_v16 = vmul.f32 %v2003_v39, %v2003_v39  ;;  %v2114_v19 = vsel %vm1554_vm2, %v2003_v39, 0.0 }
 0x1e0   : > { %1982 = vmatmul.bf16.gmra.mxu2 %v1780_v53 }
 0x1e1   : > { %v3038_v8 = vpop.permute.xlu1 %3037  ;;  %v2217_v2 = vsel %vm1554_vm2, %v2185_v16, 0.0 }
 0x1e2   : > { %v3040_v55 = vunpack.i.h.bf16 %v3038_v8  ;;  %v3039_v37 = vunpack.i.l.bf16 %v3038_v8 }
 0x1e3   : > { %v3048_v22 = vpop.permute.xlu0 %3047  ;;  %v2047_v28 = vpop.f32.mrf.mxu3 }
 0x1e4   : > { %v1684_v48 = vsel %vm1653_vm5, %v1651_v20, %v3039_v37  ;;  %v1685_v5 = vsel %vm1653_vm5, %v1652_v35, %v3040_v55  ;;  %v3050_v46 = vunpack.i.h.bf16 %v3048_v22  ;;  %v3049_v59 = vunpack.i.l.bf16 %v3048_v22  ;;  %v1915_v24 = vpop.f32.mrf.mxu0  ;;  %v2044_v33 = vpop.f32.mrf.mxu1 }
 0x1e5   : > { %v2005_v34 = vadd.f32 %v4604_v50, %v1915_v24  ;;  %v1717_v18 = vsel %vm1686_vm6, %v1684_v48, %v3044_v44  ;;  %v1718_v38 = vsel %vm1686_vm6, %v1685_v5, %v3045_v12 }
 0x1e6   : > { %v1750_v26 = vsel %vm1719_vm7, %v1717_v18, %v3049_v59  ;;  %v1751_v32 = vsel %vm1719_vm7, %v1718_v38, %v3050_v46 }
 0x1e7   : > { %2083 = vst.msk [vmem:[%s4281_s25 + $0x8] sm:$0xff] %vm1554_vm2, %v2005_v34  ;;  %v2115_v45 = vsel %vm1554_vm2, %v2005_v34, 0.0  ;;  %v2186_v4 = vmul.f32 %v2005_v34, %v2005_v34  ;;  %v1782_v3 = vpack.c.bf16 %v1751_v32, %v1750_v26 }
 0x1e8   : > { %v2116_v9 = vadd.f32 %v2115_v45, %v2114_v19 }
 0x1e9   : > { %v2218_v0 = vsel %vm1554_vm2, %v2186_v4, 0.0 }
 0x1ea   : > { %v2219_v21 = vadd.f32 %v2218_v0, %v2217_v2 }
 0x1eb   : > { %v2049_v22 = vpop.f32.mrf.mxu3 }
 0x1ec   : > { %v1918_v23 = vpop.f32.mrf.mxu0 }
 0x1ed   : > { %v2008_v17 = vadd.f32 %v4075_v36, %v1918_v23 }
 0x1ef   : > { %2084 = vst.msk [vmem:[%s4281_s25 + $0x10] sm:$0xff] %vm1554_vm2, %v2008_v17  ;;  %v2117_v27 = vsel %vm1554_vm2, %v2008_v17, 0.0  ;;  %v2187_v58 = vmul.f32 %v2008_v17, %v2008_v17 }
 0x1f0   : > { %v2118_v13 = vadd.f32 %v2117_v27, %v2116_v9  ;;  %1987 = vmatmul.bf16.gmra.mxu2 %v1782_v3 }
 0x1f1   : > { %v2220_v43 = vsel %vm1554_vm2, %v2187_v58, 0.0 }
 0x1f2   : > { %v2221_v54 = vadd.f32 %v2220_v43, %v2219_v21 }
 0x1f3   : > { %v1953_v60 = vpop.f32.mrf.mxu2  ;;  %v2052_v18 = vpop.f32.mrf.mxu3 }
 0x1f4   : > { %v4314_v57 = vadd.f32 %v2042_v10, %v1953_v60  ;;  %v1920_v47 = vpop.f32.mrf.mxu0 }
 0x1f5   : > { %v2010_v7 = vadd.f32 %v4106_v61, %v1920_v47 }
 0x1f6   : > { %2098 = vst.msk [vmem:[%s4281_s25 + $0x80] sm:$0xff] %vm1554_vm2, %v4314_v57 }
 0x1f7   : > { %2085 = vst.msk [vmem:[%s4281_s25 + $0x18] sm:$0xff] %vm1554_vm2, %v2010_v7  ;;  %v2119_v36 = vsel %vm1554_vm2, %v2010_v7, 0.0  ;;  %v2188_v31 = vmul.f32 %v2010_v7, %v2010_v7 }
 0x1f8   : > { %v2120_v39 = vadd.f32 %v2119_v36, %v2118_v13 }
 0x1f9   : > { %v2222_v52 = vsel %vm1554_vm2, %v2188_v31, 0.0 }
 0x1fa   : > { %v2223_v53 = vadd.f32 %v2222_v52, %v2221_v54 }
 0x1fb   : > { %v1955_v41 = vpop.f32.mrf.mxu2  ;;  %v2054_v32 = vpop.f32.mrf.mxu3 }
 0x1fc   : > { %v4324_v1 = vadd.f32 %v2044_v33, %v1955_v41  ;;  %v1923_v8 = vpop.f32.mrf.mxu0 }
 0x1fd   : > { %v2013_v61 = vadd.f32 %v4129_v11, %v1923_v8 }
 0x1fe   : > { %2099 = vst.msk [vmem:[%s4281_s25 + $0x88] sm:$0xff] %vm1554_vm2, %v4324_v1 }
 0x1ff   : > { %2086 = vst.msk [vmem:[%s4281_s25 + $0x20] sm:$0xff] %vm1554_vm2, %v2013_v61  ;;  %v2121_v12 = vsel %vm1554_vm2, %v2013_v61, 0.0  ;;  %v2189_v44 = vmul.f32 %v2013_v61, %v2013_v61 }
 0x200   : > { %v2122_v55 = vadd.f32 %v2121_v12, %v2120_v39 }
 0x201   : > { %v2224_v37 = vsel %vm1554_vm2, %v2189_v44, 0.0 }
 0x202   : > { %v2225_v15 = vadd.f32 %v2224_v37, %v2223_v53 }
 0x203   : > { %v2057_v3 = vpop.f32.mrf.mxu3 }
 0x204   : > { %v1925_v20 = vpop.f32.mrf.mxu0  ;;  %v1958_v14 = vpop.f32.mrf.mxu2 }
 0x205   : > { %v2015_v35 = vadd.f32 %v4148_v29, %v1925_v20  ;;  %v4335_v11 = vadd.f32 %v2047_v28, %v1958_v14 }
 0x207   : > { %2087 = vst.msk [vmem:[%s4281_s25 + $0x28] sm:$0xff] %vm1554_vm2, %v2015_v35  ;;  %v2123_v48 = vsel %vm1554_vm2, %v2015_v35, 0.0  ;;  %v2190_v5 = vmul.f32 %v2015_v35, %v2015_v35 }
 0x208   : > { %v2124_v46 = vadd.f32 %v2123_v48, %v2122_v55  ;;  %2100 = vst.msk [vmem:[%s4281_s25 + $0x90] sm:$0xff] %vm1554_vm2, %v4335_v11 }
 0x209   : > { %v2226_v59 = vsel %vm1554_vm2, %v2190_v5, 0.0 }
 0x20a   : > { %v4344_v24 = vadd.f32 %v2226_v59, %v2225_v15 }
 0x20b   : > { %v2059_v23 = vpop.f32.mrf.mxu3 }
 0x20c   : > { %v1928_v29 = vpop.f32.mrf.mxu0  ;;  %v1960_v16 = vpop.f32.mrf.mxu2 }
 0x20d   : > { %v2018_v50 = vadd.f32 %v4163_v51, %v1928_v29  ;;  %v4347_v34 = vadd.f32 %v2049_v22, %v1960_v16 }
 0x20f   : > { %2088 = vst.msk [vmem:[%s4281_s25 + $0x30] sm:$0xff] %vm1554_vm2, %v2018_v50  ;;  %v2191_v52 = vmul.f32 %v2018_v50, %v2018_v50  ;;  %v2125_v53 = vsel %vm1554_vm2, %v2018_v50, 0.0 }
 0x210   : > { %2101 = vst.msk [vmem:[%s4281_s25 + $0x98] sm:$0xff] %vm1554_vm2, %v4347_v34  ;;  %v2126_v61 = vadd.f32 %v2125_v53, %v2124_v46  ;;  %v2201_v53 = vmul.f32 %v4314_v57, %v4314_v57 }
 0x213   : > { %v2062_v13 = vpop.f32.mrf.mxu3 }
 0x214   : > { %v1930_v38 = vpop.f32.mrf.mxu0 }
 0x215   : > { %v2020_v26 = vadd.f32 %v4177_v62, %v1930_v38 }
 0x217   : > { %2089 = vst.msk [vmem:[%s4281_s25 + $0x38] sm:$0xff] %vm1554_vm2, %v2020_v26  ;;  %v2192_v41 = vmul.f32 %v2020_v26, %v2020_v26  ;;  %v2127_v28 = vsel %vm1554_vm2, %v2020_v26, 0.0 }
 0x218   : > { %v2128_v37 = vadd.f32 %v2127_v28, %v2126_v61  ;;  %v2145_v61 = vsel %vm1554_vm2, %v4314_v57, 0.0 }
 0x219   : > { %v2230_v12 = vsel %vm1554_vm2, %v2192_v41, 0.0 }
 0x21a   : > { %v1963_v19 = vpop.f32.mrf.mxu2 }
 0x21b   : > { %v4357_v45 = vadd.f32 %v2052_v18, %v1963_v19  ;;  %v2064_v7 = vpop.f32.mrf.mxu3 }
 0x21c   : > { %v1933_v51 = vpop.f32.mrf.mxu0 }
 0x21d   : > { %2102 = vst.msk [vmem:[%s4281_s25 + $0xa0] sm:$0xff] %vm1554_vm2, %v4357_v45  ;;  %v2023_v4 = vadd.f32 %v4193_v49, %v1933_v51 }
 0x21f   : > { %2090 = vst.msk [vmem:[%s4281_s25 + $0x40] sm:$0xff] %vm1554_vm2, %v2023_v4  ;;  %v2193_v8 = vmul.f32 %v2023_v4, %v2023_v4  ;;  %v2129_v44 = vsel %vm1554_vm2, %v2023_v4, 0.0 }
 0x220   : > { %v2130_v22 = vadd.f32 %v2129_v44, %v2128_v37  ;;  %v2147_v37 = vsel %vm1554_vm2, %v4324_v1, 0.0 }
 0x221   : > { %v2232_v15 = vsel %vm1554_vm2, %v2193_v8, 0.0 }
 0x222   : > { %v1965_v9 = vpop.f32.mrf.mxu2 }
 0x223   : > { %v4365_v2 = vadd.f32 %v2054_v32, %v1965_v9  ;;  %v2067_v33 = vpop.f32.mrf.mxu3 }
 0x224   : > { %v1935_v62 = vpop.f32.mrf.mxu0 }
 0x225   : > { %2103 = vst.msk [vmem:[%s4281_s25 + $0xa8] sm:$0xff] %vm1554_vm2, %v4365_v2  ;;  %v2025_v0 = vadd.f32 %v4208_v25, %v1935_v62 }
 0x227   : > { %2091 = vst.msk [vmem:[%s4281_s25 + $0x48] sm:$0xff] %vm1554_vm2, %v2025_v0  ;;  %v2194_v55 = vmul.f32 %v2025_v0, %v2025_v0  ;;  %v2131_v20 = vsel %vm1554_vm2, %v2025_v0, 0.0 }
 0x228   : > { %v2132_v50 = vadd.f32 %v2131_v20, %v2130_v22 }
 0x229   : > { %v2234_v5 = vsel %vm1554_vm2, %v2194_v55, 0.0 }
 0x22b   : > { %v1968_v21 = vpop.f32.mrf.mxu2  ;;  %v2069_v16 = vpop.f32.mrf.mxu3 }
 0x22c   : > { %v4373_v49 = vadd.f32 %v2057_v3, %v1968_v21 }
 0x22d   : > { %v1938_v17 = vpop.f32.mrf.mxu0 }
 0x22e   : > { %2104 = vst.msk [vmem:[%s4281_s25 + $0xb0] sm:$0xff] %vm1554_vm2, %v4373_v49  ;;  %v2028_v27 = vadd.f32 %v4223_v42, %v1938_v17 }
 0x230   : > { %2092 = vst.msk [vmem:[%s4281_s25 + $0x50] sm:$0xff] %vm1554_vm2, %v2028_v27  ;;  %v2195_v14 = vmul.f32 %v2028_v27, %v2028_v27  ;;  %v2133_v46 = vsel %vm1554_vm2, %v2028_v27, 0.0 }
 0x231   : > { %v2134_v4 = vadd.f32 %v2133_v46, %v2132_v50 }
 0x232   : > { %v2236_v38 = vsel %vm1554_vm2, %v2195_v14, 0.0 }
 0x233   : > { %v1970_v58 = vpop.f32.mrf.mxu2 }
 0x234   : > { %v4381_v10 = vadd.f32 %v2059_v23, %v1970_v58 }
 0x235   : > { %v1940_v25 = vpop.f32.mrf.mxu0 }
 0x236   : > { %2105 = vst.msk [vmem:[%s4281_s25 + $0xb8] sm:$0xff] %vm1554_vm2, %v4381_v10  ;;  %v2030_v43 = vadd.f32 %v4240_v63, %v1940_v25 }
 0x238   : > { %2093 = vst.msk [vmem:[%s4281_s25 + $0x58] sm:$0xff] %vm1554_vm2, %v2030_v43  ;;  %v2196_v59 = vmul.f32 %v2030_v43, %v2030_v43  ;;  %v2135_v26 = vsel %vm1554_vm2, %v2030_v43, 0.0 }
 0x239   : > { %v2136_v21 = vadd.f32 %v2135_v26, %v2134_v4  ;;  %v2153_v26 = vsel %vm1554_vm2, %v4357_v45, 0.0 }
 0x23a   : > { %v2238_v3 = vsel %vm1554_vm2, %v2196_v59, 0.0 }
 0x23c   : > { %v1973_v54 = vpop.f32.mrf.mxu2 }
 0x23d   : > { %v4389_v60 = vadd.f32 %v2062_v13, %v1973_v54 }
 0x23e   : > { %v1943_v42 = vpop.f32.mrf.mxu0 }
 0x23f   : > { %2106 = vst.msk [vmem:[%s4281_s25 + $0xc0] sm:$0xff] %vm1554_vm2, %v4389_v60  ;;  %v2033_v47 = vadd.f32 %v4248_v56, %v1943_v42  ;;  %v2228_v56 = vsel %vm1554_vm2, %v2191_v52, 0.0 }
 0x241   : > { %2094 = vst.msk [vmem:[%s4281_s25 + $0x60] sm:$0xff] %vm1554_vm2, %v2033_v47  ;;  %v2197_v32 = vmul.f32 %v2033_v47, %v2033_v47  ;;  %v2137_v9 = vsel %vm1554_vm2, %v2033_v47, 0.0 }
 0x243   : > { %v2240_v23 = vsel %vm1554_vm2, %v2197_v32, 0.0  ;;  %v2206_v32 = vmul.f32 %v4365_v2, %v4365_v2 }
 0x244   : > { %v1975_v36 = vpop.f32.mrf.mxu2 }
 0x245   : > { %v4397_v31 = vadd.f32 %v2064_v7, %v1975_v36 }
 0x246   : > { %v1945_v39 = vpop.f32.mrf.mxu0 }
 0x247   : > { %2107 = vst.msk [vmem:[%s4281_s25 + $0xc8] sm:$0xff] %vm1554_vm2, %v4397_v31  ;;  %v2035_v63 = vadd.f32 %v4259_v6, %v1945_v39  ;;  %v2229_v6 = vadd.f32 %v2228_v56, %v4344_v24 }
 0x249   : > { %2095 = vst.msk [vmem:[%s4281_s25 + $0x68] sm:$0xff] %vm1554_vm2, %v2035_v63  ;;  %v2231_v35 = vadd.f32 %v2230_v12, %v2229_v6  ;;  %v2198_v62 = vmul.f32 %v2035_v63, %v2035_v63  ;;  %v2139_v17 = vsel %vm1554_vm2, %v2035_v63, 0.0  ;;  %v2072_v63 = vpop.f32.mrf.mxu3  ;;  %v2202_v12 = vmul.f32 %v4324_v1, %v4324_v1 }
 0x24a   : > { %v2248_v6 = vsel %vm1554_vm2, %v2201_v53, 0.0 }
 0x24b   : > { %v2233_v24 = vadd.f32 %v2232_v15, %v2231_v35  ;;  %v2242_v13 = vsel %vm1554_vm2, %v2198_v62, 0.0  ;;  %v2203_v15 = vmul.f32 %v4335_v11, %v4335_v11  ;;  %v2250_v22 = vsel %vm1554_vm2, %v2202_v12, 0.0 }
 0x24d   : > { %v2235_v51 = vadd.f32 %v2234_v5, %v2233_v24  ;;  %v2204_v5 = vmul.f32 %v4347_v34, %v4347_v34  ;;  %v2252_v1 = vsel %vm1554_vm2, %v2203_v15, 0.0  ;;  %v2205_v24 = vmul.f32 %v4357_v45, %v4357_v45 }
 0x24e   : > { %v2258_v45 = vsel %vm1554_vm2, %v2206_v32, 0.0 }
 0x24f   : > { %v2237_v0 = vadd.f32 %v2236_v38, %v2235_v51  ;;  %v2256_v4 = vsel %vm1554_vm2, %v2205_v24, 0.0 }
 0x251   : > { %v2239_v58 = vadd.f32 %v2238_v3, %v2237_v0  ;;  %v2074_v50 = vpop.f32.mrf.mxu3  ;;  %v2207_v3 = vmul.f32 %v4373_v49, %v4373_v49 }
 0x252   : > { %v1978_v48 = vpop.f32.mrf.mxu2 }
 0x253   : > { %v4415_v29 = vadd.f32 %v2067_v33, %v1978_v48  ;;  %v2241_v42 = vadd.f32 %v2240_v23, %v2239_v58  ;;  %v2149_v48 = vsel %vm1554_vm2, %v4335_v11, 0.0  ;;  %v2254_v11 = vsel %vm1554_vm2, %v2204_v5, 0.0 }
 0x254   : > { %v1948_v18 = vpop.f32.mrf.mxu0  ;;  %v2157_v23 = vsel %vm1554_vm2, %v4373_v49, 0.0  ;;  %v2161_v49 = vsel %vm1554_vm2, %v4389_v60, 0.0 }
 0x255   : > { %2108 = vst.msk [vmem:[%s4281_s25 + $0xd0] sm:$0xff] %vm1554_vm2, %v4415_v29  ;;  %v2038_v19 = vadd.f32 %v4274_v40, %v1948_v18  ;;  %v2138_v40 = vadd.f32 %v2137_v9, %v2136_v21  ;;  %v2243_v52 = vadd.f32 %v2242_v13, %v2241_v42 }
 0x257   : > { %2096 = vst.msk [vmem:[%s4281_s25 + $0x70] sm:$0xff] %vm1554_vm2, %v2038_v19  ;;  %v2199_v27 = vmul.f32 %v2038_v19, %v2038_v19  ;;  %v2141_v43 = vsel %vm1554_vm2, %v2038_v19, 0.0  ;;  %v2140_v47 = vadd.f32 %v2139_v17, %v2138_v40  ;;  %v2208_v17 = vmul.f32 %v4381_v10, %v4381_v10 }
 0x258   : > { %v2159_v40 = vsel %vm1554_vm2, %v4381_v10, 0.0  ;;  %v2163_v10 = vsel %vm1554_vm2, %v4397_v31, 0.0 }
 0x259   : > { %v2244_v36 = vsel %vm1554_vm2, %v2199_v27, 0.0  ;;  %v2142_v33 = vadd.f32 %v2141_v43, %v2140_v47  ;;  %v2262_v42 = vsel %vm1554_vm2, %v2208_v17, 0.0  ;;  %v2210_v47 = vmul.f32 %v4397_v31, %v4397_v31 }
 0x25a   : > { %v1980_v25 = vpop.f32.mrf.mxu2  ;;  %v2245_v28 = vadd.f32 %v2244_v36, %v2243_v52  ;;  %v2211_v52 = vmul.f32 %v4415_v29, %v4415_v29 }
 0x25b   : > { %v4431_v54 = vadd.f32 %v2069_v16, %v1980_v25  ;;  %v2151_v16 = vsel %vm1554_vm2, %v4347_v34, 0.0  ;;  %v2155_v34 = vsel %vm1554_vm2, %v4365_v2, 0.0  ;;  %v2260_v2 = vsel %vm1554_vm2, %v2207_v3, 0.0 }
 0x25c   : > { %v1950_v7 = vpop.f32.mrf.mxu0  ;;  %v2209_v25 = vmul.f32 %v4389_v60, %v4389_v60  ;;  %v2266_v60 = vsel %vm1554_vm2, %v2210_v47, 0.0  ;;  %v2268_v31 = vsel %vm1554_vm2, %v2211_v52, 0.0 }
 0x25d   : > { %2109 = vst.msk [vmem:[%s4281_s25 + $0xd8] sm:$0xff] %vm1554_vm2, %v4431_v54  ;;  %v2040_v39 = vadd.f32 %v4297_v30, %v1950_v7  ;;  %v2077_v7 = vpop.f32.mrf.mxu3 }
 0x25f   : > { %2097 = vst.msk [vmem:[%s4281_s25 + $0x78] sm:$0xff] %vm1554_vm2, %v2040_v39  ;;  %v2143_v41 = vsel %vm1554_vm2, %v2040_v39, 0.0  ;;  %v2200_v56 = vmul.f32 %v2040_v39, %v2040_v39 }
 0x260   : > { %v2144_v8 = vadd.f32 %v2143_v41, %v2142_v33 }
 0x261   : > { %v2246_v30 = vsel %vm1554_vm2, %v2200_v56, 0.0 }
 0x262   : > { %v2146_v44 = vadd.f32 %v2145_v61, %v2144_v8  ;;  %v2247_v55 = vadd.f32 %v2246_v30, %v2245_v28  ;;  %v2165_v28 = vsel %vm1554_vm2, %v4415_v29, 0.0  ;;  %v2212_v8 = vmul.f32 %v4431_v54, %v4431_v54 }
 0x263   : > { %v1983_v20 = vpop.f32.mrf.mxu2  ;;  %v2167_v30 = vsel %vm1554_vm2, %v4431_v54, 0.0 }
 0x264   : > { %v2148_v14 = vadd.f32 %v2147_v37, %v2146_v44  ;;  %v2249_v35 = vadd.f32 %v2248_v6, %v2247_v55  ;;  %v2073_v57 = vadd.f32 %v2072_v63, %v1983_v20  ;;  %v2264_v63 = vsel %vm1554_vm2, %v2209_v25, 0.0 }
 0x265   : > { %v2270_v37 = vsel %vm1554_vm2, %v2212_v8, 0.0  ;;  %v2079_v5 = vpop.f32.mrf.mxu3 }
 0x266   : > { %v2150_v46 = vadd.f32 %v2149_v48, %v2148_v14  ;;  %v2251_v59 = vadd.f32 %v2250_v22, %v2249_v35  ;;  %2110 = vst.msk [vmem:[%s4281_s25 + $0xe0] sm:$0xff] %vm1554_vm2, %v2073_v57  ;;  %v2213_v44 = vmul.f32 %v2073_v57, %v2073_v57  ;;  %v2169_v15 = vsel %vm1554_vm2, %v2073_v57, 0.0 }
 0x268   : > { %v2152_v18 = vadd.f32 %v2151_v16, %v2150_v46  ;;  %v2253_v38 = vadd.f32 %v2252_v1, %v2251_v59  ;;  %v2272_v35 = vsel %vm1554_vm2, %v2213_v44, 0.0 }
 0x26a   : > { %v2154_v19 = vadd.f32 %v2153_v26, %v2152_v18  ;;  %v2255_v51 = vadd.f32 %v2254_v11, %v2253_v38 }
 0x26b   : > { %v1985_v9 = vpop.f32.mrf.mxu2 }
 0x26c   : > { %v2156_v62 = vadd.f32 %v2155_v34, %v2154_v19  ;;  %v2257_v0 = vadd.f32 %v2256_v4, %v2255_v51  ;;  %v2075_v21 = vadd.f32 %v2074_v50, %v1985_v9 }
 0x26e   : > { %v2259_v27 = vadd.f32 %v2258_v45, %v2257_v0  ;;  %v2158_v58 = vadd.f32 %v2157_v23, %v2156_v62  ;;  %2111 = vst.msk [vmem:[%s4281_s25 + $0xe8] sm:$0xff] %vm1554_vm2, %v2075_v21  ;;  %v2214_v29 = vmul.f32 %v2075_v21, %v2075_v21  ;;  %v2171_v22 = vsel %vm1554_vm2, %v2075_v21, 0.0 }
 0x270   : > { %v2160_v13 = vadd.f32 %v2159_v40, %v2158_v58  ;;  %v2261_v43 = vadd.f32 %v2260_v2, %v2259_v27  ;;  %v2274_v16 = vsel %vm1554_vm2, %v2214_v29, 0.0 }
 0x272   : > { %v2162_v36 = vadd.f32 %v2161_v49, %v2160_v13  ;;  %v2263_v39 = vadd.f32 %v2262_v42, %v2261_v43 }
 0x273   : > { %v1988_v33 = vpop.f32.mrf.mxu2 }
 0x274   : > { %v2164_v53 = vadd.f32 %v2163_v10, %v2162_v36  ;;  %v2265_v41 = vadd.f32 %v2264_v63, %v2263_v39  ;;  %v2078_v56 = vadd.f32 %v2077_v7, %v1988_v33 }
 0x276   : > { %v2166_v61 = vadd.f32 %v2165_v28, %v2164_v53  ;;  %v2267_v12 = vadd.f32 %v2266_v60, %v2265_v41  ;;  %2112 = vst.msk [vmem:[%s4281_s25 + $0xf0] sm:$0xff] %vm1554_vm2, %v2078_v56  ;;  %v2215_v48 = vmul.f32 %v2078_v56, %v2078_v56  ;;  %v2173_v24 = vsel %vm1554_vm2, %v2078_v56, 0.0 }
 0x278   : > { %v2168_v55 = vadd.f32 %v2167_v30, %v2166_v61  ;;  %v2269_v6 = vadd.f32 %v2268_v31, %v2267_v12  ;;  %v2276_v11 = vsel %vm1554_vm2, %v2215_v48, 0.0 }
 0x27a   : > { %v2170_v20 = vadd.f32 %v2169_v15, %v2168_v55  ;;  %v2271_v14 = vadd.f32 %v2270_v37, %v2269_v6 }
 0x27b   : > { %v1990_v46 = vpop.f32.mrf.mxu2 }
 0x27c   : > { %v2273_v59 = vadd.f32 %v2272_v35, %v2271_v14  ;;  %v2172_v54 = vadd.f32 %v2171_v22, %v2170_v20  ;;  %v2080_v1 = vadd.f32 %v2079_v5, %v1990_v46 }
 0x27e   : > { %v2275_v50 = vadd.f32 %v2274_v16, %v2273_v59  ;;  %v2174_v57 = vadd.f32 %v2173_v24, %v2172_v54  ;;  %2113 = vst.msk [vmem:[%s4281_s25 + $0xf8] sm:$0xff] %vm1554_vm2, %v2080_v1  ;;  %v2175_v18 = vsel %vm1554_vm2, %v2080_v1, 0.0  ;;  %v2216_v38 = vmul.f32 %v2080_v1, %v2080_v1 }
 0x280   : > { %v2277_v26 = vadd.f32 %v2276_v11, %v2275_v50  ;;  %v2176_v32 = vadd.f32 %v2175_v18, %v2174_v57  ;;  %v2278_v19 = vsel %vm1554_vm2, %v2216_v38, 0.0 }
 0x282   : > { %v2177_v51 = vrot.slane %v2176_v32, 4  ;;  %v2279_v4 = vadd.f32 %v2278_v19, %v2277_v26 }
 0x284   : > { %v2178_v34 = vadd.f32 %v2177_v51, %v2176_v32  ;;  %v2280_v3 = vrot.slane %v2279_v4, 4 }
 0x286   : > { %v2179_v9 = vrot.slane %v2178_v34, 2  ;;  %v2281_v62 = vadd.f32 %v2280_v3, %v2279_v4 }
 0x288   : > { %v2180_v0 = vadd.f32 %v2179_v9, %v2178_v34  ;;  %v2282_v21 = vrot.slane %v2281_v62, 2 }
 0x28a   : > { %v2181_v45 = vrot.slane %v2180_v0, 1  ;;  %v2283_v23 = vadd.f32 %v2282_v21, %v2281_v62 }
 0x28c   : > { %v2182_v17 = vadd.f32 %v2181_v45, %v2180_v0  ;;  %v2284_v27 = vrot.slane %v2283_v23, 1 }
 0x28e   : > { %2184 = vst.msk [vmem:[%s211_s27] sm:$0x1] %vm2183_vm8, %v2182_v17  ;;  %v2285_v58 = vadd.f32 %v2284_v27, %v2283_v23 }
 0x290   : > { %2286 = vst.msk [vmem:[%s214_s30] sm:$0x1] %vm2183_vm8, %v2285_v58 }
 0x291 PF: > { %s15_s15 = sadd.s32 1, %s3057_s15  }
 0x292   : > { %p12_p4 = scmp.ge.s32.totalorder %s15_s15, 4  }
 0x294   :  { %14 = sbr.rel (!%p12_p4) target bundleno = 1 (0x1), region = 84 }

// kernel: basic_block_forward.5
= control target key start
LH: loop header
LB: loop body
LE: loop exit
PB: predicated region body
PF: predicated region fallthrough
CT: control target
= control target key end

     0   :  { %s3241_s21 = smov 0   ;;  %s4769_s0 = inlined_call_operand.vmem [shape: f32[2,16,16,32], index: 0, kind: input, shape index: {}]   ;;  %s4770_s1 = inlined_call_operand.vmem [shape: bf16[288,32], index: 1, kind: input, shape index: {}]   ;;  %s4771_s2 = inlined_call_operand.vmem [shape: f32[1,32], index: 2, kind: input, shape index: {}]   ;;  %s4772_s3 = inlined_call_operand.vmem [shape: f32[1,32], index: 3, kind: input, shape index: {}]   ;;  %s4773_s4 = inlined_call_operand.vmem [shape: f32[2,16,16,32], index: 4, kind: output, shape index: {0}]   ;;  %s4774_s5 = inlined_call_operand.vmem [shape: f32[2,1,32], index: 5, kind: output, shape index: {1}]   ;;  %s4775_s6 = inlined_call_operand.vmem [shape: f32[2,1,32], index: 6, kind: output, shape index: {2}]  }
   0x1 LB: > { %s2563_s22 = sadd.s32 4294967295, %s3200_s21   ;;  %p2567_p0 = scmp.ge.s32.totalorder %s3200_s21, 1  ;;  %s3200_s21 = sphi %s3241_s21, %s17_s21  }
   0x2   : > { %p217_p1 = scmp.lt.s32.totalorder %s3200_s21, 3 }
   0x4   : > { %p218_p2 = pnand %p2567_p0, %p217_p1 }
   0x6   : > { %221 = sbr.rel (%p218_p2) target bundleno = 635 (0x27b), region = 36 }
   0xb   : > { %vm406_vm0 = vcmask 261120   ;;  %vm409_vm1 = vcmask 254976   ;;  %v3202_v0 = vmov 0.0   ;;  %s3203_s23 = smov 32   ;;  %p253_p3 = scmp.lt.s32.totalorder %s2563_s22, 1  ;;  %vm1584_vm2 = vcmask 523264  }
   0xc   : > { %407 = vst.msk [vmem:[#allocation2] sm:$0xff] %vm406_vm0, %v3202_v0  ;;  %v3345_v4 = vld [vmem:[%s4771_s2] ss:$0 sm:$0xff]  ;;  %s3204_s8 = smov 64   ;;  %s3205_s13 = smov 96   ;;  %vm1617_vm3 = vcmask 785408  }
   0xd   : > { %408 = vst.msk [vmem:[#allocation2 + $0x8] sm:$0xff] %vm406_vm0, %v3202_v0  ;;  %s4810_s22 = smov (!%p253_p3, %s2563_s22), 1  ;;  %v3362_v9 = vld [vmem:[%s4772_s3] ss:$0 sm:$0xff]  ;;  %vm2354_vm4 = vcmask 253952  }
   0xe   : > { %410 = vst.msk [vmem:[#allocation2 + $0x10] sm:$0x3] %vm409_vm1, %v3202_v0  ;;  %s2662_s24 = sshll.u32 %s4810_s22, 8  ;;  %s265_s10 = scalar_lea.vmem %s4774_s5, %s4810_s22 }
   0xf   : > { %411 = vst.msk [vmem:[#allocation2 + $0x18] sm:$0xff] %vm406_vm0, %v3202_v0  ;;  %s3336_s27 = scalar_lea.vmem %s4769_s0, %s2662_s24  ;;  %s268_s14 = scalar_lea.vmem %s4775_s6, %s4810_s22 }
  0x10   : > { %412 = vst.msk [vmem:[#allocation2 + $0x20] sm:$0xff] %vm406_vm0, %v3202_v0  ;;  %v276_v5 = vld [vmem:[%s3336_s27 + $0x30] sm:$0xff]  ;;  %v277_v6 = vld [vmem:[%s3336_s27 + $0x38] sm:$0xff]  ;;  %v270_v12 = vld [vmem:[%s3336_s27] sm:$0xff] }
  0x11   : > { %413 = vst.msk [vmem:[#allocation2 + $0x28] sm:$0x3] %vm409_vm1, %v3202_v0  ;;  %v272_v7 = vld [vmem:[%s3336_s27 + $0x10] sm:$0xff]  ;;  %v312_v8 = vmul.f32 %v3345_v4, %v276_v5  ;;  %v273_v10 = vld [vmem:[%s3336_s27 + $0x18] sm:$0xff]  ;;  %v313_v11 = vmul.f32 %v3345_v4, %v277_v6  ;;  %v271_v14 = vld [vmem:[%s3336_s27 + $0x8] sm:$0xff]  ;;  %v306_v18 = vmul.f32 %v3345_v4, %v270_v12 }
  0x12   : > { %414 = vst.msk [vmem:[#allocation2 + $0x30] sm:$0xff] %vm406_vm0, %v3202_v0  ;;  %v308_v13 = vmul.f32 %v3345_v4, %v272_v7  ;;  %v309_v15 = vmul.f32 %v3345_v4, %v273_v10  ;;  %v278_v16 = vld [vmem:[%s3336_s27 + $0x40] sm:$0xff]  ;;  %v279_v19 = vld [vmem:[%s3336_s27 + $0x48] sm:$0xff]  ;;  %v307_v21 = vmul.f32 %v3345_v4, %v271_v14  ;;  %v280_v28 = vld [vmem:[%s3336_s27 + $0x50] sm:$0xff] }
  0x13   : > { %415 = vst.msk [vmem:[#allocation2 + $0x38] sm:$0xff] %vm406_vm0, %v3202_v0  ;;  %v348_v17 = vadd.f32 %v3362_v9, %v312_v8  ;;  %v349_v20 = vadd.f32 %v3362_v9, %v313_v11  ;;  %v274_v22 = vld [vmem:[%s3336_s27 + $0x20] sm:$0xff]  ;;  %v314_v24 = vmul.f32 %v3345_v4, %v278_v16  ;;  %v275_v25 = vld [vmem:[%s3336_s27 + $0x28] sm:$0xff]  ;;  %v315_v27 = vmul.f32 %v3345_v4, %v279_v19  ;;  %v281_v32 = vld [vmem:[%s3336_s27 + $0x58] sm:$0xff] }
  0x14   : > { %v527_v1 = vld [vmem:[#allocation2 + $0x1] sm:$0xff]  ;;  %416 = vst.msk [vmem:[#allocation2 + $0x40] sm:$0x3] %vm409_vm1, %v3202_v0  ;;  %v344_v23 = vadd.f32 %v3362_v9, %v308_v13  ;;  %v345_v26 = vadd.f32 %v3362_v9, %v309_v15  ;;  %v342_v30 = vadd.f32 %v3362_v9, %v306_v18  ;;  %v310_v31 = vmul.f32 %v3345_v4, %v274_v22  ;;  %v284_v36 = vld [vmem:[%s3336_s27 + $0x70] sm:$0xff]  ;;  %v285_v40 = vld [vmem:[%s3336_s27 + $0x78] sm:$0xff] }
  0x15   : > { %v528_v2 = vld [vmem:[#allocation2 + $0x9] sm:$0xff]  ;;  %417 = vst.msk [vmem:[#allocation2 + $0x48] sm:$0xff] %vm406_vm0, %v3202_v0  ;;  %v380_v29 = vmax.f32 %v348_v17, 0.0  ;;  %v381_v33 = vmax.f32 %v349_v20, 0.0  ;;  %v343_v34 = vadd.f32 %v3362_v9, %v307_v21  ;;  %v311_v35 = vmul.f32 %v3345_v4, %v275_v25  ;;  %v282_v44 = vld [vmem:[%s3336_s27 + $0x60] sm:$0xff]  ;;  %v289_v10 = vld [vmem:[%s3336_s27 + $0x98] sm:$0xff] }
  0x16   : > { %v2712_v3 = vpack.i.bf16 %v528_v2, %v527_v1  ;;  %418 = vst.msk [vmem:[#allocation2 + $0x50] sm:$0xff] %vm406_vm0, %v3202_v0  ;;  %v376_v37 = vmax.f32 %v344_v23, 0.0  ;;  %v350_v38 = vadd.f32 %v3362_v9, %v314_v24  ;;  %v316_v39 = vmul.f32 %v3345_v4, %v280_v28  ;;  %v283_v48 = vld [vmem:[%s3336_s27 + $0x68] sm:$0xff]  ;;  %v286_v52 = vld [vmem:[%s3336_s27 + $0x80] sm:$0xff]  ;;  %v288_v5 = vld [vmem:[%s3336_s27 + $0x90] sm:$0xff] }
  0x17   : > { %419 = vst.msk [vmem:[#allocation2 + $0x58] sm:$0x3] %vm409_vm1, %v3202_v0  ;;  %v377_v41 = vmax.f32 %v345_v26, 0.0  ;;  %v351_v42 = vadd.f32 %v3362_v9, %v315_v27  ;;  %v317_v43 = vmul.f32 %v3345_v4, %v281_v32  ;;  %v374_v45 = vmax.f32 %v342_v30, 0.0  ;;  %v287_v56 = vld [vmem:[%s3336_s27 + $0x88] sm:$0xff]  ;;  %v290_v60 = vld [vmem:[%s3336_s27 + $0xa0] sm:$0xff] }
  0x18   : > { %2713 = vrot.lane.b32.xlu0 %v2712_v3, %s3203_s23  ;;  %420 = vst.msk [vmem:[#allocation2 + $0x60] sm:$0xff] %vm406_vm0, %v3202_v0  ;;  %v346_v46 = vadd.f32 %v3362_v9, %v310_v31  ;;  %v320_v47 = vmul.f32 %v3345_v4, %v284_v36  ;;  %v375_v49 = vmax.f32 %v343_v34, 0.0  ;;  %v347_v50 = vadd.f32 %v3362_v9, %v311_v35  ;;  %v292_v15 = vld [vmem:[%s3336_s27 + $0xb0] sm:$0xff]  ;;  %v293_v20 = vld [vmem:[%s3336_s27 + $0xb8] sm:$0xff] }
  0x19   : > { %421 = vst.msk [vmem:[#allocation2 + $0x68] sm:$0xff] %vm406_vm0, %v3202_v0  ;;  %v321_v51 = vmul.f32 %v3345_v4, %v285_v40  ;;  %v382_v53 = vmax.f32 %v350_v38, 0.0  ;;  %v352_v54 = vadd.f32 %v3362_v9, %v316_v39  ;;  %v318_v55 = vmul.f32 %v3345_v4, %v282_v44  ;;  %v296_v26 = vld [vmem:[%s3336_s27 + $0xd0] sm:$0xff]  ;;  %v297_v31 = vld [vmem:[%s3336_s27 + $0xd8] sm:$0xff] }
  0x1a   : > { %422 = vst.msk [vmem:[#allocation2 + $0x70] sm:$0x3] %vm409_vm1, %v3202_v0  ;;  %v383_v57 = vmax.f32 %v351_v42, 0.0  ;;  %v353_v58 = vadd.f32 %v3362_v9, %v317_v43  ;;  %v319_v59 = vmul.f32 %v3345_v4, %v283_v48  ;;  %v378_v61 = vmax.f32 %v346_v46, 0.0  ;;  %v295_v42 = vld [vmem:[%s3336_s27 + $0xc8] sm:$0xff]  ;;  %v298_v48 = vld [vmem:[%s3336_s27 + $0xe0] sm:$0xff] }
  0x1b   : > { %423 = vst.msk [vmem:[#allocation2 + $0x78] sm:$0xff] %vm406_vm0, %v3202_v0  ;;  %v356_v62 = vadd.f32 %v3362_v9, %v320_v47  ;;  %v322_v63 = vmul.f32 %v3345_v4, %v286_v52  ;;  %v379_v1 = vmax.f32 %v347_v50, 0.0  ;;  %v357_v2 = vadd.f32 %v3362_v9, %v321_v51 }
  0x1c   : > { %424 = vst.msk [vmem:[#allocation2 + $0x80] sm:$0xff] %vm406_vm0, %v3202_v0  ;;  %v323_v3 = vmul.f32 %v3345_v4, %v287_v56  ;;  %v384_v6 = vmax.f32 %v352_v54, 0.0  ;;  %v354_v7 = vadd.f32 %v3362_v9, %v318_v55  ;;  %v326_v8 = vmul.f32 %v3345_v4, %v290_v60 }
  0x1d   : > { %425 = vst.msk [vmem:[#allocation2 + $0x88] sm:$0x3] %vm409_vm1, %v3202_v0  ;;  %v385_v12 = vmax.f32 %v353_v58, 0.0  ;;  %v355_v13 = vadd.f32 %v3362_v9, %v319_v59  ;;  %v388_v17 = vmax.f32 %v356_v62, 0.0  ;;  %v358_v18 = vadd.f32 %v3362_v9, %v322_v63 }
  0x1e   : > { %426 = vst.msk [vmem:[#allocation2 + $0x90] sm:$0xff] %vm406_vm0, %v3202_v0  ;;  %v324_v19 = vmul.f32 %v3345_v4, %v288_v5  ;;  %v389_v23 = vmax.f32 %v357_v2, 0.0  ;;  %v359_v24 = vadd.f32 %v3362_v9, %v323_v3  ;;  %v325_v25 = vmul.f32 %v3345_v4, %v289_v10 }
  0x1f   : > { %427 = vst.msk [vmem:[#allocation2 + $0x98] sm:$0xff] %vm406_vm0, %v3202_v0  ;;  %v386_v28 = vmax.f32 %v354_v7, 0.0  ;;  %v328_v30 = vmul.f32 %v3345_v4, %v292_v15  ;;  %v387_v34 = vmax.f32 %v355_v13, 0.0  ;;  %v329_v36 = vmul.f32 %v3345_v4, %v293_v20 }
  0x20   : > { %428 = vst.msk [vmem:[#allocation2 + $0xa0] sm:$0x3] %vm409_vm1, %v3202_v0  ;;  %v390_v39 = vmax.f32 %v358_v18, 0.0  ;;  %v360_v40 = vadd.f32 %v3362_v9, %v324_v19  ;;  %v361_v46 = vadd.f32 %v3362_v9, %v325_v25  ;;  %v333_v47 = vmul.f32 %v3345_v4, %v297_v31 }
  0x21   : > { %429 = vst.msk [vmem:[#allocation2 + $0xa8] sm:$0xff] %vm406_vm0, %v3202_v0  ;;  %v364_v51 = vadd.f32 %v3362_v9, %v328_v30  ;;  %v331_v58 = vmul.f32 %v3345_v4, %v295_v42  ;;  %v334_v62 = vmul.f32 %v3345_v4, %v298_v48 }
  0x22   : > { %430 = vst.msk [vmem:[#allocation2 + $0xb0] sm:$0xff] %vm406_vm0, %v3202_v0  ;;  %v392_v60 = vmax.f32 %v360_v40, 0.0  ;;  %v369_v2 = vadd.f32 %v3362_v9, %v333_v47 }
  0x23   : > { %431 = vst.msk [vmem:[#allocation2 + $0xb8] sm:$0x3] %vm409_vm1, %v3202_v0  ;;  %v370_v15 = vadd.f32 %v3362_v9, %v334_v62 }
  0x24   : > { %432 = vst.msk [vmem:[#allocation2 + $0xc0] sm:$0xff] %vm406_vm0, %v3202_v0 }
  0x25   : > { %433 = vst.msk [vmem:[#allocation2 + $0xc8] sm:$0xff] %vm406_vm0, %v3202_v0 }
  0x26   : > { %434 = vst.msk [vmem:[#allocation2 + $0xd0] sm:$0x3] %vm409_vm1, %v3202_v0 }
  0x27   : > { %435 = vst.msk [vmem:[#allocation2 + $0xd8] sm:$0xff] %vm406_vm0, %v3202_v0 }
  0x28   : > { %436 = vst.msk [vmem:[#allocation2 + $0xe0] sm:$0xff] %vm406_vm0, %v3202_v0 }
  0x29   : > { %437 = vst.msk [vmem:[#allocation2 + $0xe8] sm:$0x3] %vm409_vm1, %v3202_v0 }
  0x2a   : > { %438 = vst.msk [vmem:[#allocation2 + $0xf0] sm:$0xff] %vm406_vm0, %v3202_v0 }
  0x2b   : > { %439 = vst.msk [vmem:[#allocation2 + $0xf8] sm:$0xff] %vm406_vm0, %v3202_v0 }
  0x2c   : > { %440 = vst.msk [vmem:[#allocation2 + $0x100] sm:$0x3] %vm409_vm1, %v3202_v0 }
  0x2d   : > { %441 = vst.msk [vmem:[#allocation2 + $0x108] sm:$0xff] %vm406_vm0, %v3202_v0 }
  0x2e   : > { %442 = vst.msk [vmem:[#allocation2 + $0x110] sm:$0xff] %vm406_vm0, %v3202_v0 }
  0x2f   : > { %443 = vst.msk [vmem:[#allocation2 + $0x118] sm:$0x3] %vm409_vm1, %v3202_v0 }
  0x30   : > { %444 = vst.msk [vmem:[#allocation2 + $0x120] sm:$0xff] %vm406_vm0, %v3202_v0 }
  0x31   : > { %445 = vst.msk [vmem:[#allocation2 + $0x128] sm:$0xff] %vm406_vm0, %v3202_v0 }
  0x32   : > { %446 = vst.msk [vmem:[#allocation2 + $0x130] sm:$0x3] %vm409_vm1, %v3202_v0 }
  0x33   : > { %447 = vst.msk [vmem:[#allocation2 + $0x138] sm:$0xff] %vm406_vm0, %v3202_v0 }
  0x34   : > { %448 = vst.msk [vmem:[#allocation2 + $0x140] sm:$0xff] %vm406_vm0, %v3202_v0 }
  0x35   : > { %449 = vst.msk [vmem:[#allocation2 + $0x148] sm:$0x3] %vm409_vm1, %v3202_v0 }
  0x36   : > { %450 = vst.msk [vmem:[#allocation2 + $0x150] sm:$0xff] %vm406_vm0, %v3202_v0 }
  0x37   : > { %451 = vst.msk [vmem:[#allocation2 + $0x158] sm:$0xff] %vm406_vm0, %v3202_v0 }
  0x38   : > { %452 = vst.msk [vmem:[#allocation2 + $0x160] sm:$0x3] %vm409_vm1, %v3202_v0 }
  0x39   : > { %453 = vst.msk [vmem:[#allocation2 + $0x168] sm:$0xff] %vm406_vm0, %v3202_v0 }
  0x3a   : > { %454 = vst.msk [vmem:[#allocation2 + $0x170] sm:$0xff] %vm406_vm0, %v3202_v0 }
  0x3b   : > { %455 = vst.msk [vmem:[#allocation2 + $0x178] sm:$0x3] %vm409_vm1, %v3202_v0 }
  0x3c   : > { %456 = vst.msk [vmem:[#allocation2 + $0x180] sm:$0xff] %vm406_vm0, %v3202_v0 }
  0x3d   : > { %457 = vst.msk [vmem:[#allocation2 + $0x188] sm:$0xff] %vm406_vm0, %v3202_v0 }
  0x3e   : > { %458 = vst.msk [vmem:[#allocation2 + $0x190] sm:$0x3] %vm409_vm1, %v3202_v0 }
  0x3f   : > { %459 = vst.msk [vmem:[#allocation2 + $0x198] sm:$0xff] %vm406_vm0, %v3202_v0 }
  0x40   : > { %460 = vst.msk [vmem:[#allocation2 + $0x1a0] sm:$0xff] %vm406_vm0, %v3202_v0 }
  0x41   : > { %461 = vst.msk [vmem:[#allocation2 + $0x1a8] sm:$0x3] %vm409_vm1, %v3202_v0  ;;  %v291_v0 = vld [vmem:[%s3336_s27 + $0xa8] sm:$0xff] }
  0x42   : > { %469 = vst.msk [vmem:[#allocation2 + $0x61] sm:$0xff] %vm406_vm0, %v380_v29  ;;  %v327_v14 = vmul.f32 %v3345_v4, %v291_v0  ;;  %v362_v29 = vadd.f32 %v3362_v9, %v326_v8 }
  0x43   : > { %470 = vst.msk [vmem:[#allocation2 + $0x69] sm:$0xff] %vm406_vm0, %v381_v33 }
  0x44   : > { %465 = vst.msk [vmem:[#allocation2 + $0x31] sm:$0xff] %vm406_vm0, %v376_v37  ;;  %v363_v35 = vadd.f32 %v3362_v9, %v327_v14  ;;  %v294_v37 = vld [vmem:[%s3336_s27 + $0xc0] sm:$0xff]  ;;  %v394_v50 = vmax.f32 %v362_v29, 0.0 }
  0x45   : > { %466 = vst.msk [vmem:[#allocation2 + $0x39] sm:$0xff] %vm406_vm0, %v377_v41  ;;  %v332_v41 = vmul.f32 %v3345_v4, %v296_v26  ;;  %v330_v52 = vmul.f32 %v3345_v4, %v294_v37  ;;  %v402_v26 = vmax.f32 %v370_v15, 0.0 }
  0x46   : > { %463 = vst.msk [vmem:[#allocation2 + $0x19] sm:$0xff] %vm406_vm0, %v374_v45  ;;  %v391_v45 = vmax.f32 %v359_v24, 0.0  ;;  %v395_v56 = vmax.f32 %v363_v35, 0.0 }
  0x47   : > { %464 = vst.msk [vmem:[#allocation2 + $0x21] sm:$0xff] %vm406_vm0, %v375_v49  ;;  %v366_v7 = vadd.f32 %v3362_v9, %v330_v52  ;;  %v560_v52 = vld [vmem:[#allocation2 + $0xa] sm:$0xff] }
  0x48   : > { %471 = vst.msk [vmem:[#allocation2 + $0x79] sm:$0xff] %vm406_vm0, %v382_v53  ;;  %v299_v53 = vld [vmem:[%s3336_s27 + $0xe8] sm:$0xff] }
  0x49   : > { %v535_v11 = vld [vmem:[#allocation2 + $0x61] sm:$0xff]  ;;  %472 = vst.msk [vmem:[#allocation2 + $0x81] sm:$0xff] %vm406_vm0, %v383_v57  ;;  %v365_v57 = vadd.f32 %v3362_v9, %v329_v36  ;;  %v335_v3 = vmul.f32 %v3345_v4, %v299_v53  ;;  %v398_v20 = vmax.f32 %v366_v7, 0.0 }
  0x4a   : > { %v536_v16 = vld [vmem:[#allocation2 + $0x69] sm:$0xff]  ;;  %467 = vst.msk [vmem:[#allocation2 + $0x49] sm:$0xff] %vm406_vm0, %v378_v61  ;;  %v368_v61 = vadd.f32 %v3362_v9, %v332_v41 }
  0x4b   : > { %v3453_v21 = vpack.i.bf16 %v536_v16, %v535_v11  ;;  %v531_v22 = vld [vmem:[#allocation2 + $0x31] sm:$0xff]  ;;  %468 = vst.msk [vmem:[#allocation2 + $0x51] sm:$0xff] %vm406_vm0, %v379_v1  ;;  %v393_v1 = vmax.f32 %v361_v46, 0.0  ;;  %v397_v10 = vmax.f32 %v365_v57, 0.0  ;;  %v367_v11 = vadd.f32 %v3362_v9, %v331_v58 }
  0x4c   : > { %v532_v27 = vld [vmem:[#allocation2 + $0x39] sm:$0xff]  ;;  %473 = vst.msk [vmem:[#allocation2 + $0x91] sm:$0xff] %vm406_vm0, %v384_v6  ;;  %v396_v6 = vmax.f32 %v364_v51, 0.0  ;;  %v400_v14 = vmax.f32 %v368_v61, 0.0  ;;  %v401_v16 = vmax.f32 %v369_v2, 0.0  ;;  %v559_v51 = vld [vmem:[#allocation2 + $0x2] sm:$0xff] }
  0x4d   : > { %2733 = vrot.lane.b32.xlu2 %v3453_v21, %s3203_s23  ;;  %v3465_v32 = vpack.i.bf16 %v532_v27, %v531_v22  ;;  %v529_v33 = vld [vmem:[#allocation2 + $0x19] sm:$0xff]  ;;  %474 = vst.msk [vmem:[#allocation2 + $0x99] sm:$0xff] %vm406_vm0, %v385_v12  ;;  %v2792_v57 = vpack.i.bf16 %v560_v52, %v559_v51 }
  0x4e   : > { %v530_v38 = vld [vmem:[#allocation2 + $0x21] sm:$0xff]  ;;  %477 = vst.msk [vmem:[#allocation2 + $0xc1] sm:$0xff] %vm406_vm0, %v388_v17  ;;  %v371_v17 = vadd.f32 %v3362_v9, %v335_v3 }
  0x4f   : > { %2723 = vrot.lane.b32.xlu1 %v3465_v32, %s3203_s23  ;;  %v2717_v43 = vpack.i.bf16 %v530_v38, %v529_v33  ;;  %v537_v44 = vld [vmem:[#allocation2 + $0x79] sm:$0xff]  ;;  %478 = vst.msk [vmem:[#allocation2 + $0xc9] sm:$0xff] %vm406_vm0, %v389_v23  ;;  %v399_v23 = vmax.f32 %v367_v11, 0.0 }
  0x50   : > { %v538_v49 = vld [vmem:[#allocation2 + $0x81] sm:$0xff]  ;;  %475 = vst.msk [vmem:[#allocation2 + $0xa9] sm:$0xff] %vm406_vm0, %v386_v28  ;;  %v403_v28 = vmax.f32 %v371_v17, 0.0 }
  0x51   : > { %2718 = vrot.lane.b32.xlu0 %v2717_v43, %s3203_s23  ;;  %v3486_v54 = vpack.i.bf16 %v538_v49, %v537_v44  ;;  %v533_v55 = vld [vmem:[#allocation2 + $0x49] sm:$0xff]  ;;  %476 = vst.msk [vmem:[#allocation2 + $0xb1] sm:$0xff] %vm406_vm0, %v387_v34  ;;  %v561_v49 = vld [vmem:[#allocation2 + $0x1a] sm:$0xff] }
  0x52   : > { %v534_v59 = vld [vmem:[#allocation2 + $0x51] sm:$0xff]  ;;  %479 = vst.msk [vmem:[#allocation2 + $0xd9] sm:$0xff] %vm406_vm0, %v390_v39  ;;  %v3573_v2 = vld [vmem:[#allocation2 + $0x82] sm:$0xff] }
  0x53   : > { %v3494_v63 = vpack.i.bf16 %v534_v59, %v533_v55  ;;  %v539_v0 = vld [vmem:[#allocation2 + $0x91] sm:$0xff]  ;;  %480 = vst.msk [vmem:[#allocation2 + $0xe1] sm:$0xff] %vm406_vm0, %v391_v45  ;;  %v3556_v59 = vld [vmem:[#allocation2 + $0x62] sm:$0xff] }
  0x54   : > { %v540_v5 = vld [vmem:[#allocation2 + $0x99] sm:$0xff]  ;;  %483 = vst.msk [vmem:[#allocation2 + $0x109] sm:$0xff] %vm406_vm0, %v394_v50  ;;  %v562_v50 = vld [vmem:[#allocation2 + $0x22] sm:$0xff]  ;;  %v3561_v61 = vld [vmem:[#allocation2 + $0x4a] sm:$0xff] }
  0x55   : > { %2738 = vrot.lane.b32.xlu2 %v3486_v54, %s3203_s23  ;;  %v3503_v8 = vpack.i.bf16 %v540_v5, %v539_v0  ;;  %484 = vst.msk [vmem:[#allocation2 + $0x111] sm:$0xff] %vm406_vm0, %v395_v56  ;;  %v543_v12 = vld [vmem:[#allocation2 + $0xc1] sm:$0xff]  ;;  %v3544_v53 = vpack.i.bf16 %v562_v50, %v561_v49  ;;  %v3546_v55 = vld [vmem:[#allocation2 + $0x32] sm:$0xff] }
  0x56   : > { %v544_v13 = vld [vmem:[#allocation2 + $0xc9] sm:$0xff]  ;;  %481 = vst.msk [vmem:[#allocation2 + $0xf1] sm:$0xff] %vm406_vm0, %v392_v60  ;;  %v3548_v56 = vld [vmem:[#allocation2 + $0x3a] sm:$0xff]  ;;  %v3563_v62 = vld [vmem:[#allocation2 + $0x52] sm:$0xff] }
  0x57   : > { %2728 = vrot.lane.b32.xlu1 %v3494_v63, %s3203_s23  ;;  %482 = vst.msk [vmem:[#allocation2 + $0xf9] sm:$0xff] %vm406_vm0, %v393_v1  ;;  %v541_v18 = vld [vmem:[#allocation2 + $0xa9] sm:$0xff]  ;;  %v3516_v22 = vpack.i.bf16 %v544_v13, %v543_v12  ;;  %v3554_v58 = vpack.i.bf16 %v3548_v56, %v3546_v55  ;;  %v3571_v1 = vld [vmem:[#allocation2 + $0x7a] sm:$0xff]  ;;  %v3577_v3 = vpack.i.bf16 %v3563_v62, %v3561_v61 }
  0x58   : > { %v542_v19 = vld [vmem:[#allocation2 + $0xb1] sm:$0xff]  ;;  %485 = vst.msk [vmem:[#allocation2 + $0x121] sm:$0xff] %vm406_vm0, %v396_v6  ;;  %v3583_v5 = vpack.i.bf16 %v3573_v2, %v3571_v1  ;;  %v3593_v11 = vld [vmem:[#allocation2 + $0x9a] sm:$0xff]  ;;  %v575_v13 = vld [vmem:[#allocation2 + $0xc2] sm:$0xff] }
  0x59   : > { %2743 = vrot.lane.b32.xlu0 %v3503_v8, %s3203_s23  ;;  %486 = vst.msk [vmem:[#allocation2 + $0x129] sm:$0xff] %vm406_vm0, %v397_v10  ;;  %v545_v24 = vld [vmem:[#allocation2 + $0xd9] sm:$0xff]  ;;  %v3520_v27 = vpack.i.bf16 %v542_v19, %v541_v18  ;;  %v3558_v60 = vld [vmem:[#allocation2 + $0x6a] sm:$0xff] }
  0x5a   : > { %v546_v25 = vld [vmem:[#allocation2 + $0xe1] sm:$0xff]  ;;  %489 = vst.msk [vmem:[#allocation2 + $0x151] sm:$0xff] %vm406_vm0, %v400_v14  ;;  %v3569_v0 = vpack.i.bf16 %v3558_v60, %v3556_v59  ;;  %v3585_v6 = vld [vmem:[#allocation2 + $0xaa] sm:$0xff]  ;;  %v3587_v7 = vld [vmem:[#allocation2 + $0xb2] sm:$0xff] }
  0x5b   : > { %490 = vst.msk [vmem:[#allocation2 + $0x159] sm:$0xff] %vm406_vm0, %v401_v16  ;;  %v2757_v29 = vpack.i.bf16 %v546_v25, %v545_v24  ;;  %v549_v30 = vld [vmem:[#allocation2 + $0x109] sm:$0xff]  ;;  %v3591_v10 = vld [vmem:[#allocation2 + $0x92] sm:$0xff]  ;;  %v3599_v12 = vpack.i.bf16 %v3587_v7, %v3585_v6  ;;  %v577_v19 = vld [vmem:[#allocation2 + $0xda] sm:$0xff] }
  0x5c   : > { %487 = vst.msk [vmem:[#allocation2 + $0x139] sm:$0xff] %vm406_vm0, %v398_v20  ;;  %v550_v31 = vld [vmem:[#allocation2 + $0x111] sm:$0xff]  ;;  %v3603_v15 = vpack.i.bf16 %v3593_v11, %v3591_v10  ;;  %v578_v20 = vld [vmem:[#allocation2 + $0xe2] sm:$0xff] }
  0x5d   : > { %2753 = vrot.lane.b32.xlu2 %v3516_v22, %s3203_s23  ;;  %488 = vst.msk [vmem:[#allocation2 + $0x141] sm:$0xff] %vm406_vm0, %v399_v23  ;;  %v547_v33 = vld [vmem:[#allocation2 + $0xf1] sm:$0xff]  ;;  %v2767_v35 = vpack.i.bf16 %v550_v31, %v549_v30  ;;  %v3659_v50 = vld [vmem:[#allocation2 + $0x48] sm:$0xff] }
  0x5e   : > { %491 = vst.msk [vmem:[#allocation2 + $0x169] sm:$0xff] %vm406_vm0, %v402_v26  ;;  %v548_v34 = vld [vmem:[#allocation2 + $0xf9] sm:$0xff]  ;;  %v576_v14 = vld [vmem:[#allocation2 + $0xca] sm:$0xff]  ;;  %v3613_v26 = vpack.i.bf16 %v578_v20, %v577_v19 }
  0x5f   : > { %2748 = vrot.lane.b32.xlu1 %v3520_v27, %s3203_s23  ;;  %492 = vst.msk [vmem:[#allocation2 + $0x171] sm:$0xff] %vm406_vm0, %v403_v28  ;;  %v551_v36 = vld [vmem:[#allocation2 + $0x121] sm:$0xff]  ;;  %v2762_v38 = vpack.i.bf16 %v548_v34, %v547_v33  ;;  %v3607_v16 = vpack.i.bf16 %v576_v14, %v575_v13  ;;  %v579_v17 = vld [vmem:[#allocation2 + $0xf2] sm:$0xff]  ;;  %v581_v24 = vld [vmem:[#allocation2 + $0x10a] sm:$0xff]  ;;  %v1751_v14 = vpack.c.bf16 %v3563_v62, %v3561_v61 }
  0x60   : > { %v552_v37 = vld [vmem:[#allocation2 + $0x129] sm:$0xff]  ;;  %v580_v18 = vld [vmem:[#allocation2 + $0xfa] sm:$0xff]  ;;  %v582_v25 = vld [vmem:[#allocation2 + $0x112] sm:$0xff] }
  0x61   : > { %2758 = vrot.lane.b32.xlu0 %v2757_v29, %s3203_s23  ;;  %v2772_v39 = vpack.i.bf16 %v552_v37, %v551_v36  ;;  %v555_v40 = vld [vmem:[#allocation2 + $0x151] sm:$0xff]  ;;  %v2842_v23 = vpack.i.bf16 %v580_v18, %v579_v17  ;;  %v2847_v28 = vpack.i.bf16 %v582_v25, %v581_v24  ;;  %v583_v31 = vld [vmem:[#allocation2 + $0x122] sm:$0xff] }
  0x62   : > { %v556_v41 = vld [vmem:[#allocation2 + $0x159] sm:$0xff]  ;;  %v584_v33 = vld [vmem:[#allocation2 + $0x12a] sm:$0xff] }
  0x63   : > { %v553_v42 = vld [vmem:[#allocation2 + $0x139] sm:$0xff]  ;;  %v3535_v44 = vpack.i.bf16 %v556_v41, %v555_v40  ;;  %v3624_v37 = vld [vmem:[%s4770_s1 + $0x88] sm:$0xff]  ;;  %v3636_v41 = vld [vmem:[#allocation2 + $0x30] sm:$0xff] }
  0x64   : > { %v554_v43 = vld [vmem:[#allocation2 + $0x141] sm:$0xff]  ;;  %4784 = vst [vmem:[#allocation3_spill] sm:$0xff] %v3624_v37  ;;  %2170 = vmatpush.bf16.msra.mxu2 %v3624_v37  ;;  %v3661_v51 = vld [vmem:[#allocation2 + $0x50] sm:$0xff]  ;;  %v505_v61 = vld [vmem:[#allocation2 + $0x78] sm:$0xff] }
  0x65   : > { %2768 = vrot.lane.b32.xlu2 %v2767_v35, %s3203_s23  ;;  %v557_v45 = vld [vmem:[#allocation2 + $0x169] sm:$0xff]  ;;  %v2777_v47 = vpack.i.bf16 %v554_v43, %v553_v42  ;;  %v585_v29 = vld [vmem:[#allocation2 + $0x13a] sm:$0xff]  ;;  %v587_v35 = vld [vmem:[#allocation2 + $0x152] sm:$0xff]  ;;  %v2892_v52 = vpack.i.bf16 %v3661_v51, %v3659_v50 }
  0x66   : > { %v558_v46 = vld [vmem:[#allocation2 + $0x171] sm:$0xff]  ;;  %v586_v30 = vld [vmem:[#allocation2 + $0x142] sm:$0xff]  ;;  %v588_v36 = vld [vmem:[#allocation2 + $0x15a] sm:$0xff] }
  0x67   : > { %2763 = vrot.lane.b32.xlu1 %v2762_v38, %s3203_s23  ;;  %v3539_v48 = vpack.i.bf16 %v558_v46, %v557_v45  ;;  %v3619_v34 = vpack.i.bf16 %v586_v30, %v585_v29  ;;  %v2852_v38 = vpack.i.bf16 %v584_v33, %v583_v31  ;;  %v3634_v40 = vpack.i.bf16 %v588_v36, %v587_v35  ;;  %v3638_v42 = vld [vmem:[#allocation2 + $0x38] sm:$0xff]  ;;  %v504_v13 = vld [vmem:[#allocation2 + $0x68] sm:$0xff]  ;;  %v506_v62 = vld [vmem:[#allocation2 + $0x80] sm:$0xff] }
  0x68   : > { %v2872_v43 = vpack.i.bf16 %v3638_v42, %v3636_v41  ;;  %v1748_v45 = vpack.c.bf16 %v3548_v56, %v3546_v55  ;;  %v3648_v46 = vld [vmem:[#allocation2 + $0x18] sm:$0xff]  ;;  %v3694_v25 = vld [vmem:[#allocation2 + $0xc8] sm:$0xff]  ;;  %v3698_v31 = vld [vmem:[#allocation2 + $0x140] sm:$0xff] }
  0x69   : > { %2773 = vrot.lane.b32.xlu0 %v2772_v39, %s3203_s23  ;;  %v3630_v39 = vld [vmem:[%s4770_s1 + $0x80] sm:$0xff]  ;;  %4787 = vst [vmem:[#allocation6_spill] sm:$0xff] %v3698_v31  ;;  %v300_v33 = vld [vmem:[%s3336_s27 + $0xf0] sm:$0xff]  ;;  %v301_v35 = vld [vmem:[%s3336_s27 + $0xf8] sm:$0xff] }
  0x6a   : > { %4785 = vst [vmem:[#allocation4_spill] sm:$0xff] %v3630_v39  ;;  %2171 = vmatpush.bf16.msra.mxu2 %v3630_v39 }
  0x6d   : > { %2783 = vrot.lane.b32.xlu2 %v3535_v44, %s3203_s23  ;;  %2644 = vmatmul.msk.bf16.vlgmr.msra.gmra.mxu2 %vm406_vm0, %v1748_v45  ;;  %v337_v45 = vmul.f32 %v3345_v4, %v301_v35 }
  0x6f   : > { %2778 = vrot.lane.b32.xlu1 %v2777_v47, %s3203_s23  ;;  %v3650_v47 = vld [vmem:[#allocation2 + $0x20] sm:$0xff] }
  0x70   : > { %v2877_v49 = vpack.i.bf16 %v3650_v47, %v3648_v46 }
  0x71   : > { %2788 = vrot.lane.b32.xlu0 %v3539_v48, %s3203_s23 }
  0x75   : > { %2798 = vrot.lane.b32.xlu2 %v3544_v53, %s3204_s8 }
  0x77   : > { %2793 = vrot.lane.b32.xlu1 %v2792_v57, %s3204_s8 }
  0x79   : > { %2803 = vrot.lane.b32.xlu0 %v3554_v58, %s3204_s8 }
  0x7d   : > { %2813 = vrot.lane.b32.xlu2 %v3569_v0, %s3204_s8  ;;  %2645 = vmatmul.msk.bf16.gmra.mxu2 %vm406_vm0, %v1751_v14 }
  0x7f   : > { %2808 = vrot.lane.b32.xlu1 %v3577_v3, %s3204_s8 }
  0x81   : > { %2818 = vrot.lane.b32.xlu0 %v3583_v5, %s3204_s8 }
  0x85   : > { %2828 = vrot.lane.b32.xlu2 %v3599_v12, %s3204_s8 }
  0x87   : > { %2823 = vrot.lane.b32.xlu1 %v3603_v15, %s3204_s8 }
  0x89   : > { %2833 = vrot.lane.b32.xlu0 %v3607_v16, %s3204_s8 }
  0x8a   : > { %v3704_v36 = vpop.permute.xlu0 %2713 }
  0x8d   : > { %2843 = vrot.lane.b32.xlu2 %v2842_v23, %s3204_s8 }
  0x8f   : > { %2838 = vrot.lane.b32.xlu1 %v3613_v26, %s3204_s8 }
  0x91   : > { %2848 = vrot.lane.b32.xlu0 %v2847_v28, %s3204_s8 }
  0x95   : > { %2858 = vrot.lane.b32.xlu2 %v3619_v34, %s3204_s8 }
  0x97   : > { %2853 = vrot.lane.b32.xlu1 %v2852_v38, %s3204_s8  ;;  %v1754_v38 = vpack.c.bf16 %v3558_v60, %v3556_v59  ;;  %v373_v59 = vadd.f32 %v3362_v9, %v337_v45 }
  0x99   : > { %2863 = vrot.lane.b32.xlu0 %v3634_v40, %s3204_s8  ;;  %2646 = vmatmul.msk.bf16.gmra.mxu2 %vm406_vm0, %v1754_v38 }
  0x9d   : > { %2873 = vrot.lane.b32.xlu2 %v2872_v43, %s3204_s8 }
  0x9f   : > { %2868 = vrot.lane.b32.xlu1 %v3544_v53, %s3203_s23  ;;  %v503_v53 = vld [vmem:[#allocation2 + $0x60] sm:$0xff] }
  0xa0   : > { %v2912_v24 = vpack.i.bf16 %v504_v13, %v503_v53 }
  0xa1   : > { %2878 = vrot.lane.b32.xlu0 %v2877_v49, %s3205_s13 }
  0xa5   : > { %2888 = vrot.lane.b32.xlu2 %v3554_v58, %s3203_s23 }
  0xa7   : > { %2883 = vrot.lane.b32.xlu1 %v3465_v32, %s3205_s13  ;;  %v2734_v55 = vpop.permute.xlu2 %2733 }
  0xa8   : > { %v2736_v56 = vunpack.i.h.bf16 %v2734_v55  ;;  %v2735_v57 = vunpack.i.l.bf16 %v2734_v55 }
  0xa9   : > { %2893 = vrot.lane.b32.xlu0 %v2892_v52, %s3204_s8 }
  0xaa   : > { %v3673_v17 = vsel %vm406_vm0, %v503_v53, %v2735_v57  ;;  %v3676_v58 = vsel %vm406_vm0, %v504_v13, %v2736_v56  ;;  %v405_v56 = vmax.f32 %v373_v59, 0.0  ;;  %v617_v13 = vld [vmem:[#allocation2 + $0x150] sm:$0xff] }
  0xab   : > { %v510_v59 = vld [vmem:[#allocation2 + $0xb0] sm:$0xff] }
  0xac   : > { %494 = vst.msk [vmem:[#allocation2 + $0x189] sm:$0xff] %vm406_vm0, %v405_v56 }
  0xad   : > { %2903 = vrot.lane.b32.xlu2 %v3494_v63, %s3205_s13  ;;  %v3692_v63 = vld [vmem:[#allocation2 + $0xc0] sm:$0xff] }
  0xaf   : > { %2898 = vrot.lane.b32.xlu1 %v2872_v43, %s3205_s13  ;;  %v2739_v32 = vpop.permute.xlu2 %2738  ;;  %v336_v43 = vmul.f32 %v3345_v4, %v300_v33  ;;  %v2937_v4 = vpack.i.bf16 %v506_v62, %v505_v61 }
  0xb0   : > { %v2741_v18 = vunpack.i.h.bf16 %v2739_v32  ;;  %v2740_v19 = vunpack.i.l.bf16 %v2739_v32  ;;  %v507_v32 = vld [vmem:[#allocation2 + $0x90] sm:$0xff] }
  0xb1   : > { %2908 = vrot.lane.b32.xlu0 %v3577_v3, %s3203_s23  ;;  %v3696_v3 = vld [vmem:[#allocation2 + $0x138] sm:$0xff]  ;;  %v372_v55 = vadd.f32 %v3362_v9, %v336_v43 }
  0xb2   : > { %v3685_v20 = vsel %vm406_vm0, %v506_v62, %v2741_v18  ;;  %v3688_v23 = vsel %vm406_vm0, %v505_v61, %v2740_v19  ;;  %4786 = vst [vmem:[#allocation5_spill] sm:$0xff] %v3696_v3  ;;  %v618_v9 = vld [vmem:[#allocation2 + $0x158] sm:$0xff] }
  0xb3   : > { %v404_v60 = vmax.f32 %v372_v55, 0.0  ;;  %v508_v18 = vld [vmem:[#allocation2 + $0x98] sm:$0xff]  ;;  %v509_v55 = vld [vmem:[#allocation2 + $0xa8] sm:$0xff] }
  0xb4   : > { %v3812_v39 = vpack.i.bf16 %v510_v59, %v509_v55 }
  0xb5   : > { %2918 = vrot.lane.b32.xlu2 %v2892_v52, %s3205_s13  ;;  %493 = vst.msk [vmem:[#allocation2 + $0x181] sm:$0xff] %vm406_vm0, %v404_v60 }
  0xb7   : > { %2913 = vrot.lane.b32.xlu1 %v2912_v24, %s3204_s8  ;;  %v2754_v28 = vpop.permute.xlu2 %2753 }
  0xb8   : > { %v2756_v29 = vunpack.i.h.bf16 %v2754_v28  ;;  %v2755_v30 = vunpack.i.l.bf16 %v2754_v28 }
  0xb9   : > { %2923 = vrot.lane.b32.xlu0 %v3453_v21, %s3205_s13  ;;  %v2927_v21 = vpack.i.bf16 %v3698_v31, %v3696_v3 }
  0xba   : > { %v3712_v49 = vsel %vm406_vm0, %v3694_v25, %v2756_v29  ;;  %v3716_v52 = vsel %vm406_vm0, %v3692_v63, %v2755_v30  ;;  %v2962_v29 = vpack.i.bf16 %v508_v18, %v507_v32  ;;  %v1757_v30 = vpack.c.bf16 %v3573_v2, %v3571_v1  ;;  %v3760_v1 = vld [vmem:[#allocation2 + $0x168] sm:$0xff]  ;;  %v3762_v2 = vld [vmem:[#allocation2 + $0x170] sm:$0xff] }
  0xbb   : > { %v3771_v56 = vpack.i.bf16 %v3762_v2, %v3760_v1 }
  0xbc   : > { %2647 = vmatmul.msk.bf16.gmra.mxu2 %vm406_vm0, %v1757_v30 }
  0xbd   : > { %2933 = vrot.lane.b32.xlu2 %v3569_v0, %s3203_s23  ;;  %v3737_v0 = vpack.i.bf16 %v618_v9, %v617_v13 }
  0xbf   : > { %2928 = vrot.lane.b32.xlu1 %v2927_v21, %s3205_s13  ;;  %v3726_v57 = vpop.permute.xlu2 %2768 }
  0xc1   : > { %2938 = vrot.lane.b32.xlu0 %v2937_v4, %s3204_s8  ;;  %v3731_v53 = vpop.permute.xlu1 %2723 }
  0xc3   : > { %v3733_v14 = vpop.permute.xlu0 %2718 }
  0xc5   : > { %2948 = vrot.lane.b32.xlu2 %v3486_v54, %s3205_s13 }
  0xc7   : > { %2943 = vrot.lane.b32.xlu1 %v2912_v24, %s3205_s13  ;;  %v2784_v19 = vpop.permute.xlu2 %2783 }
  0xc8   : > { %v2786_v61 = vunpack.i.h.bf16 %v2784_v19  ;;  %v2785_v62 = vunpack.i.l.bf16 %v2784_v19 }
  0xc9   : > { %2953 = vrot.lane.b32.xlu0 %v3737_v0, %s3205_s13  ;;  %v3742_v28 = vpop.permute.xlu1 %2728 }
  0xca   : > { %v3747_v54 = vsel %vm406_vm0, %v618_v9, %v2786_v61  ;;  %v3750_v33 = vsel %vm406_vm0, %v617_v13, %v2785_v62 }
  0xcb   : > { %v2744_v35 = vpop.permute.xlu0 %2743 }
  0xcc   : > { %v2746_v24 = vunpack.i.h.bf16 %v2744_v35  ;;  %v2745_v38 = vunpack.i.l.bf16 %v2744_v35 }
  0xcd   : > { %2963 = vrot.lane.b32.xlu2 %v2962_v29, %s3204_s8 }
  0xce   : > { %v3755_v43 = vsel %vm406_vm0, %v508_v18, %v2746_v24  ;;  %v3758_v45 = vsel %vm406_vm0, %v507_v32, %v2745_v38  ;;  %v3773_v32 = vld [vmem:[#allocation2 + $0xd8] sm:$0xff]  ;;  %v3775_v18 = vld [vmem:[#allocation2 + $0xe0] sm:$0xff] }
  0xcf   : > { %2958 = vrot.lane.b32.xlu1 %v3583_v5, %s3203_s23  ;;  %v3766_v21 = vpop.permute.xlu2 %2798 }
  0xd1   : > { %2968 = vrot.lane.b32.xlu0 %v2937_v4, %s3205_s13  ;;  %v2749_v60 = vpop.permute.xlu1 %2748 }
  0xd2   : > { %v2751_v13 = vunpack.i.h.bf16 %v2749_v60  ;;  %v2750_v9 = vunpack.i.l.bf16 %v2749_v60 }
  0xd3   : > { %v2759_v19 = vpop.permute.xlu0 %2758 }
  0xd4   : > { %v1567_v5 = vsel %vm406_vm0, %v510_v59, %v2751_v13  ;;  %v1566_v61 = vsel %vm406_vm0, %v509_v55, %v2750_v9  ;;  %v2761_v62 = vunpack.i.h.bf16 %v2759_v19  ;;  %v2760_v4 = vunpack.i.l.bf16 %v2759_v19  ;;  %v2671_v13 = vld [vmem:[%s4770_s1 + $0x38] sm:$0xff]  ;;  %v3796_v9 = vld [vmem:[#allocation2 + $0xf0] sm:$0xff] }
  0xd5   : > { %2978 = vrot.lane.b32.xlu2 %v3771_v56, %s3205_s13  ;;  %v3798_v19 = vld [vmem:[#allocation2 + $0xf8] sm:$0xff]  ;;  %1986 = vmatpush.bf16.msra.mxu0 %v2671_v13  ;;  %v589_v59 = vld [vmem:[#allocation2 + $0x16a] sm:$0xff] }
  0xd6   : > { %v3783_v30 = vsel %vm406_vm0, %v3775_v18, %v2761_v62  ;;  %v3787_v35 = vsel %vm406_vm0, %v3773_v32, %v2760_v4  ;;  %v1760_v4 = vpack.c.bf16 %v3593_v11, %v3591_v10  ;;  %2682 = vmatpush.bf16.msra.mxu3 %v2671_v13 }
  0xd7   : > { %2973 = vrot.lane.b32.xlu1 %v3503_v8, %s3205_s13  ;;  %v2814_v24 = vpop.permute.xlu2 %2813 }
  0xd8   : > { %v2816_v38 = vunpack.i.h.bf16 %v2814_v24  ;;  %v2815_v60 = vunpack.i.l.bf16 %v2814_v24  ;;  %2648 = vmatmul.msk.bf16.gmra.mxu2 %vm406_vm0, %v1760_v4 }
  0xd9   : > { %2983 = vrot.lane.b32.xlu0 %v3603_v15, %s3203_s23  ;;  %v2764_v62 = vpop.permute.xlu1 %2763 }
  0xda   : > { %v2766_v8 = vunpack.i.h.bf16 %v2764_v62  ;;  %v2765_v3 = vunpack.i.l.bf16 %v2764_v62  ;;  %v3804_v24 = vsel %vm1584_vm2, %v3673_v17, %v2815_v60  ;;  %v3808_v15 = vsel %vm1584_vm2, %v3676_v58, %v2816_v38  ;;  %v2670_v17 = vld [vmem:[%s4770_s1 + $0x30] sm:$0xff]  ;;  %v621_v58 = vld [vmem:[#allocation2 + $0x180] sm:$0xff]  ;;  %v622_v38 = vld [vmem:[#allocation2 + $0x188] sm:$0xff] }
  0xdb   : > { %4788 = vst [vmem:[#allocation7_spill] sm:$0xff] %v3804_v24  ;;  %v3810_v31 = vpop.permute.xlu0 %2773  ;;  %1987 = vmatpush.bf16.msra.mxu0 %v2670_v17  ;;  %2683 = vmatpush.bf16.msra.mxu3 %v2670_v17  ;;  %v590_v62 = vld [vmem:[#allocation2 + $0x172] sm:$0xff] }
  0xdc   : > { %4789 = vst [vmem:[#allocation8_spill] sm:$0xff] %v3808_v15  ;;  %v1573_v10 = vsel %vm406_vm0, %v3798_v19, %v2766_v8  ;;  %v1572_v11 = vsel %vm406_vm0, %v3796_v9, %v2765_v3  ;;  %v2669_v3 = vld [vmem:[%s4770_s1 + $0x28] sm:$0xff]  ;;  %v3837_v8 = vpack.i.bf16 %v622_v38, %v621_v58  ;;  %v3846_v24 = vpack.i.bf16 %v590_v62, %v589_v59  ;;  %v3854_v58 = vld [vmem:[%s4770_s1 + $0x70] sm:$0xff] }
  0xdd   : > { %4790 = vst [vmem:[#allocation9_spill] sm:$0xff] %v3810_v31  ;;  %2993 = vrot.lane.b32.xlu2 %v2962_v29, %s3205_s13  ;;  %v3831_v29 = vld [vmem:[%s4770_s1 + $0x78] sm:$0xff] }
  0xde   : > { %2075 = vmatpush.bf16.msra.mxu1 %v3831_v29 }
  0xdf   : > { %2988 = vrot.lane.b32.xlu1 %v3812_v39, %s3204_s8  ;;  %v2829_v55 = vpop.permute.xlu2 %2828  ;;  %1988 = vmatpush.bf16.msra.mxu0 %v2669_v3 }
  0xe0   : > { %v2831_v60 = vunpack.i.h.bf16 %v2829_v55  ;;  %v2830_v13 = vunpack.i.l.bf16 %v2829_v55  ;;  %2684 = vmatpush.bf16.msra.mxu3 %v2669_v3 }
  0xe1   : > { %2998 = vrot.lane.b32.xlu0 %v3520_v27, %s3205_s13  ;;  %v3835_v4 = vpop.permute.xlu1 %2778  ;;  %v2668_v27 = vld [vmem:[%s4770_s1 + $0x20] sm:$0xff] }
  0xe2   : > { %v3841_v17 = vsel %vm1584_vm2, %v1566_v61, %v2830_v13  ;;  %v3844_v55 = vsel %vm1584_vm2, %v1567_v5, %v2831_v60  ;;  %2076 = vmatpush.bf16.msra.mxu1 %v3854_v58  ;;  %v2667_v60 = vld [vmem:[%s4770_s1 + $0x18] sm:$0xff]  ;;  %v1763_v13 = vpack.c.bf16 %v3587_v7, %v3585_v6  ;;  %v2666_v6 = vld [vmem:[%s4770_s1 + $0x10] sm:$0xff]  ;;  %v3903_v7 = vld [vmem:[%s4770_s1 + $0x60] sm:$0xff] }
  0xe3   : > { %v2789_v15 = vpop.permute.xlu0 %2788  ;;  %1989 = vmatpush.bf16.msra.mxu0 %v2668_v27 }
  0xe4   : > { %v2791_v37 = vunpack.i.h.bf16 %v2789_v15  ;;  %v2790_v31 = vunpack.i.l.bf16 %v2789_v15  ;;  %2685 = vmatpush.bf16.msra.mxu3 %v2668_v27 }
  0xe5   : > { %3008 = vrot.lane.b32.xlu2 %v3837_v8, %s3205_s13 }
  0xe6   : > { %v3860_v5 = vsel %vm406_vm0, %v3762_v2, %v2791_v37  ;;  %v3864_v61 = vsel %vm406_vm0, %v3760_v1, %v2790_v31  ;;  %v3875_v37 = vld [vmem:[%s4770_s1 + $0x68] sm:$0xff]  ;;  %v2726_v31 = vunpack.i.h.bf16 %v3731_v53  ;;  %v2725_v1 = vunpack.i.l.bf16 %v3731_v53 }
  0xe7   : > { %3003 = vrot.lane.b32.xlu1 %v3846_v24, %s3204_s8  ;;  %v2844_v15 = vpop.permute.xlu2 %2843  ;;  %1990 = vmatpush.bf16.msra.mxu0 %v2667_v60  ;;  %v3894_v53 = vpack.i.bf16 %v3694_v25, %v3692_v63 }
  0xe8   : > { %v2846_v38 = vunpack.i.h.bf16 %v2844_v15  ;;  %v2845_v59 = vunpack.i.l.bf16 %v2844_v15  ;;  %2077 = vmatpush.bf16.msra.mxu1 %v3875_v37  ;;  %2649 = vmatmul.msk.bf16.gmra.mxu2 %vm406_vm0, %v1763_v13  ;;  %v1557_v63 = vsel %vm406_vm0, %v3638_v42, %v2726_v31  ;;  %v3930_v42 = vld [vmem:[%s4770_s1 + $0x58] sm:$0xff] }
  0xe9   : > { %3013 = vrot.lane.b32.xlu0 %v3599_v12, %s3203_s23  ;;  %v3881_v2 = vpop.permute.xlu1 %2793  ;;  %2686 = vmatpush.bf16.msra.mxu3 %v2667_v60 }
  0xea   : > { %v3887_v62 = vsel %vm1584_vm2, %v1572_v11, %v2845_v59  ;;  %v3890_v3 = vsel %vm1584_vm2, %v1573_v10, %v2846_v38  ;;  %v1556_v10 = vsel %vm406_vm0, %v3636_v41, %v2725_v1  ;;  %v2731_v38 = vunpack.i.h.bf16 %v3742_v28 }
  0xeb   : > { %v2804_v27 = vpop.permute.xlu0 %2803  ;;  %1991 = vmatpush.bf16.msra.mxu0 %v2666_v6  ;;  %v2730_v59 = vunpack.i.l.bf16 %v3742_v28 }
  0xec   : > { %v2806_v12 = vunpack.i.h.bf16 %v2804_v27  ;;  %v2805_v15 = vunpack.i.l.bf16 %v2804_v27  ;;  %2078 = vmatpush.bf16.msra.mxu1 %v3903_v7  ;;  %v1559_v1 = vsel %vm406_vm0, %v3661_v51, %v2731_v38 }
  0xed   : > { %3023 = vrot.lane.b32.xlu2 %v3812_v39, %s3205_s13  ;;  %2687 = vmatpush.bf16.msra.mxu3 %v2666_v6  ;;  %v2665_v39 = vld [vmem:[%s4770_s1 + $0x8] sm:$0xff]  ;;  %v1558_v13 = vsel %vm406_vm0, %v3659_v50, %v2730_v59  ;;  %v3945_v6 = vld [vmem:[%s4770_s1 + $0x50] sm:$0xff] }
  0xee   : > { %v3913_v25 = vsel %vm1584_vm2, %v1556_v10, %v2805_v15  ;;  %v3916_v11 = vsel %vm1584_vm2, %v1557_v63, %v2806_v12  ;;  %v764_v59 = vld [vmem:[#allocation2 + $0xc2] sm:$0xff] }
  0xef   : > { %3018 = vrot.lane.b32.xlu1 %v3894_v53, %s3204_s8  ;;  %v3922_v41 = vpop.permute.xlu2 %2858  ;;  %1992 = vmatpush.bf16.msra.mxu0 %v2665_v39 }
  0xf0   : > { %2079 = vmatpush.bf16.msra.mxu1 %v3930_v42 }
  0xf1   : > { %3028 = vrot.lane.b32.xlu0 %v3516_v22, %s3205_s13  ;;  %v2809_v60 = vpop.permute.xlu1 %2808  ;;  %2688 = vmatpush.bf16.msra.mxu3 %v2665_v39  ;;  %v2664_v22 = vld [vmem:[%s4770_s1] sm:$0xff]  ;;  %v765_v39 = vld [vmem:[#allocation2 + $0xca] sm:$0xff] }
  0xf2   : > { %v2811_v28 = vunpack.i.h.bf16 %v2809_v60  ;;  %v2810_v31 = vunpack.i.l.bf16 %v2809_v60 }
  0xf3   : > { %v2819_v27 = vpop.permute.xlu0 %2818  ;;  %1993 = vmatpush.bf16.msra.mxu0 %v2664_v22 }
  0xf4   : > { %v2821_v12 = vunpack.i.h.bf16 %v2819_v27  ;;  %v2820_v15 = vunpack.i.l.bf16 %v2819_v27  ;;  %v3948_v10 = vsel %vm1584_vm2, %v1558_v13, %v2810_v31  ;;  %v3951_v51 = vsel %vm1584_vm2, %v1559_v1, %v2811_v28  ;;  %2080 = vmatpush.bf16.msra.mxu1 %v3945_v6  ;;  %v4013_v27 = vld [vmem:[#allocation2 + $0xe1] sm:$0xff] }
  0xf5   : > { %3038 = vrot.lane.b32.xlu2 %v3737_v0, %s3204_s8  ;;  %2689 = vmatpush.bf16.msra.mxu3 %v2664_v22  ;;  %v3971_v0 = vld [vmem:[%s4770_s1 + $0x48] sm:$0xff]  ;;  %v4022_v22 = vld [vmem:[#allocation2 + $0x110] sm:$0xff] }
  0xf6   : > { %v3958_v50 = vsel %vm1584_vm2, %v3688_v23, %v2820_v15  ;;  %v3962_v63 = vsel %vm1584_vm2, %v3685_v20, %v2821_v12  ;;  %v3978_v23 = vpack.i.bf16 %v3775_v18, %v3773_v32  ;;  %v2771_v12 = vunpack.i.h.bf16 %v3726_v57  ;;  %v4020_v15 = vld [vmem:[#allocation2 + $0x108] sm:$0xff] }
  0xf7   : > { %3033 = vrot.lane.b32.xlu1 %v3619_v34, %s3203_s23  ;;  %v3966_v38 = vpop.permute.xlu2 %2873  ;;  %v1766_v34 = vpack.c.bf16 %v765_v39, %v764_v59 }
  0xf8   : > { %2081 = vmatpush.bf16.msra.mxu1 %v3971_v0 }
  0xf9   : > { %2690 = vmatpush.bf16.msrb.mxu3 %v3831_v29  ;;  %3043 = vrot.lane.b32.xlu0 %v3535_v44, %s3205_s13  ;;  %v2824_v20 = vpop.permute.xlu1 %2823  ;;  %v3985_v29 = vld [vmem:[%s4770_s1 + $0x40] sm:$0xff] }
  0xfa   : > { %v2826_v60 = vunpack.i.h.bf16 %v2824_v20  ;;  %v2825_v28 = vunpack.i.l.bf16 %v2824_v20  ;;  %2650 = vmatmul.msk.bf16.gmra.mxu2 %vm406_vm0, %v1766_v34 }
  0xfb   : > { %v2834_v31 = vpop.permute.xlu0 %2833 }
  0xfc   : > { %v2836_v1 = vunpack.i.h.bf16 %v2834_v31  ;;  %v2835_v13 = vunpack.i.l.bf16 %v2834_v31  ;;  %v3990_v44 = vsel %vm1584_vm2, %v3758_v45, %v2825_v28  ;;  %v3994_v32 = vsel %vm1584_vm2, %v3755_v43, %v2826_v60  ;;  %2082 = vmatpush.bf16.msra.mxu1 %v3985_v29  ;;  %v4011_v43 = vld [vmem:[#allocation2 + $0xd9] sm:$0xff] }
  0xfd   : > { %2691 = vmatpush.bf16.msrb.mxu3 %v3854_v58  ;;  %3053 = vrot.lane.b32.xlu2 %v3978_v23, %s3204_s8  ;;  %v3062_v20 = vpack.i.bf16 %v4013_v27, %v4011_v43  ;;  %v1575_v60 = vsel %vm406_vm0, %v4022_v22, %v2771_v12 }
  0xfe   : > { %v4001_v18 = vsel %vm1584_vm2, %v3716_v52, %v2835_v13  ;;  %v4005_v58 = vsel %vm1584_vm2, %v3712_v49, %v2836_v1  ;;  %v2770_v52 = vunpack.i.l.bf16 %v3726_v57  ;;  %v767_v1 = vld [vmem:[#allocation2 + $0xe2] sm:$0xff] }
  0xff   : > { %3048 = vrot.lane.b32.xlu1 %v3607_v16, %s3203_s23  ;;  %v4009_v45 = vpop.permute.xlu2 %2888 }
 0x100   : > { %v1574_v28 = vsel %vm406_vm0, %v4020_v15, %v2770_v52 }
 0x101   : > { %2692 = vmatpush.bf16.msrb.mxu3 %v3875_v37  ;;  %3058 = vrot.lane.b32.xlu0 %v3894_v53, %s3205_s13  ;;  %v2839_v49 = vpop.permute.xlu1 %2838 }
 0x102   : > { %v2841_v16 = vunpack.i.h.bf16 %v2839_v49  ;;  %v2840_v59 = vunpack.i.l.bf16 %v2839_v49 }
 0x103   : > { %v2849_v39 = vpop.permute.xlu0 %2848 }
 0x104   : > { %v2851_v34 = vunpack.i.h.bf16 %v2849_v39  ;;  %v2850_v37 = vunpack.i.l.bf16 %v2849_v39  ;;  %v4029_v57 = vsel %vm1584_vm2, %v3787_v35, %v2840_v59  ;;  %v4033_v53 = vsel %vm1584_vm2, %v3783_v30, %v2841_v16  ;;  %v766_v30 = vld [vmem:[#allocation2 + $0xda] sm:$0xff] }
 0x105   : > { %2693 = vmatpush.bf16.msrb.mxu3 %v3903_v7  ;;  %3068 = vrot.lane.b32.xlu2 %v3634_v40, %s3203_s23  ;;  %v1769_v40 = vpack.c.bf16 %v767_v1, %v766_v30  ;;  %v4061_v16 = vpack.i.bf16 %v3798_v19, %v3796_v9  ;;  %v496_v19 = vld [vmem:[#allocation2 + $0x8] sm:$0xff] }
 0x106   : > { %v4042_v31 = vsel %vm1584_vm2, %v1574_v28, %v2850_v37  ;;  %v4045_v7 = vsel %vm1584_vm2, %v1575_v60, %v2851_v34 }
 0x107   : > { %4791 = vst [vmem:[#allocation10_spill] sm:$0xff] %v4042_v31  ;;  %3063 = vrot.lane.b32.xlu1 %v3062_v20, %s3205_s13  ;;  %v4048_v35 = vpop.permute.xlu2 %2903  ;;  %v495_v20 = vld [vmem:[#allocation2] sm:$0xff] }
 0x108   : > { %4792 = vst [vmem:[#allocation11_spill] sm:$0xff] %v4045_v7 }
 0x109   : > { %2694 = vmatpush.bf16.msrb.mxu3 %v3930_v42  ;;  %3073 = vrot.lane.b32.xlu0 %v3771_v56, %s3204_s8  ;;  %v4053_v13 = vpop.permute.xlu1 %2853  ;;  %v4063_v42 = vld [vmem:[#allocation2 + $0xf1] sm:$0xff]  ;;  %v4065_v56 = vld [vmem:[#allocation2 + $0xf9] sm:$0xff] }
 0x10a   : > { %2651 = vmatmul.msk.bf16.gmra.mxu2 %vm406_vm0, %v1769_v40 }
 0x10b   : > { %v2864_v12 = vpop.permute.xlu0 %2863 }
 0x10c   : > { %v2866_v52 = vunpack.i.h.bf16 %v2864_v12  ;;  %v2865_v49 = vunpack.i.l.bf16 %v2864_v12 }
 0x10d   : > { %2695 = vmatpush.bf16.msrb.mxu3 %v3945_v6  ;;  %3083 = vrot.lane.b32.xlu2 %v3613_v26, %s3203_s23  ;;  %v2716_v6 = vunpack.i.h.bf16 %v3704_v36  ;;  %v2715_v26 = vunpack.i.l.bf16 %v3704_v36  ;;  %v3097_v36 = vpack.i.bf16 %v4065_v56, %v4063_v42 }
 0x10e   : > { %v4069_v59 = vsel %vm1584_vm2, %v3750_v33, %v2865_v49  ;;  %v4073_v39 = vsel %vm1584_vm2, %v3747_v54, %v2866_v52  ;;  %v2796_v33 = vunpack.i.h.bf16 %v3881_v2  ;;  %v2795_v54 = vunpack.i.l.bf16 %v3881_v2 }
 0x10f   : > { %3078 = vrot.lane.b32.xlu1 %v3539_v48, %s3205_s13  ;;  %v2919_v9 = vpop.permute.xlu2 %2918  ;;  %v1552_v30 = vsel %vm406_vm0, %v495_v20, %v2715_v26  ;;  %v4104_v20 = vld [vmem:[#allocation2 + $0x181] sm:$0xff] }
 0x110   : > { %v2921_v34 = vunpack.i.h.bf16 %v2919_v9  ;;  %v2920_v37 = vunpack.i.l.bf16 %v2919_v9  ;;  %v623_v9 = vld [vmem:[#allocation2 + $0x19] sm:$0xff] }
 0x111   : > { %2696 = vmatpush.bf16.msrb.mxu3 %v3971_v0  ;;  %3088 = vrot.lane.b32.xlu0 %v4061_v16, %s3204_s8  ;;  %v2869_v60 = vpop.permute.xlu1 %2868  ;;  %v1553_v0 = vsel %vm406_vm0, %v496_v19, %v2716_v6 }
 0x112   : > { %v4088_v48 = vsel %vm1617_vm3, %v3913_v25, %v2920_v37  ;;  %v4092_v28 = vsel %vm1617_vm3, %v3916_v11, %v2921_v34  ;;  %v2871_v40 = vunpack.i.h.bf16 %v2869_v60  ;;  %v2870_v12 = vunpack.i.l.bf16 %v2869_v60  ;;  %v624_v25 = vld [vmem:[#allocation2 + $0x21] sm:$0xff]  ;;  %v4106_v34 = vld [vmem:[#allocation2 + $0x189] sm:$0xff] }
 0x113   : > { %v2879_v2 = vpop.permute.xlu0 %2878  ;;  %v1585_v11 = vsel %vm1584_vm2, %v1552_v30, %v2795_v54  ;;  %v1586_v6 = vsel %vm1584_vm2, %v1553_v0, %v2796_v33  ;;  %v2876_v37 = vunpack.i.h.bf16 %v3966_v38  ;;  %v673_v0 = vld [vmem:[#allocation2 + $0xf2] sm:$0xff]  ;;  %v674_v30 = vld [vmem:[#allocation2 + $0xfa] sm:$0xff] }
 0x114   : > { %v2881_v52 = vunpack.i.h.bf16 %v2879_v2  ;;  %v2880_v49 = vunpack.i.l.bf16 %v2879_v2  ;;  %v1651_v33 = vsel %vm406_vm0, %v624_v25, %v2871_v40  ;;  %v1650_v54 = vsel %vm406_vm0, %v623_v9, %v2870_v12 }
 0x115   : > { %2697 = vmatpush.bf16.msrb.mxu3 %v3985_v29  ;;  %3098 = vrot.lane.b32.xlu2 %v3097_v36, %s3205_s13  ;;  %v2875_v29 = vunpack.i.l.bf16 %v3966_v38  ;;  %v3112_v38 = vpack.i.bf16 %v4106_v34, %v4104_v20  ;;  %v1683_v40 = vsel %vm1584_vm2, %v1651_v33, %v2876_v37  ;;  %v2801_v37 = vunpack.i.h.bf16 %v3766_v21 }
 0x116   : > { %v1618_v26 = vsel %vm1617_vm3, %v1585_v11, %v2880_v49  ;;  %v1619_v19 = vsel %vm1617_vm3, %v1586_v6, %v2881_v52  ;;  %v1772_v52 = vpack.c.bf16 %v674_v30, %v673_v0  ;;  %v2891_v33 = vunpack.i.h.bf16 %v4009_v45 }
 0x117   : > { %3093 = vrot.lane.b32.xlu1 %v3978_v23, %s3205_s13  ;;  %v1746_v60 = vpack.c.bf16 %v1619_v19, %v1618_v26  ;;  %v4112_v36 = vpop.permute.xlu2 %2933  ;;  %v1682_v6 = vsel %vm1584_vm2, %v1650_v54, %v2875_v29  ;;  %v3117_v26 = vpack.i.bf16 %v674_v30, %v673_v0  ;;  %v2721_v19 = vunpack.i.h.bf16 %v3733_v14  ;;  %v626_v30 = vld [vmem:[#allocation2 + $0x39] sm:$0xff] }
 0x118   : > { %v2890_v54 = vunpack.i.l.bf16 %v4009_v45 }
 0x119   : > { %3103 = vrot.lane.b32.xlu0 %v3846_v24, %s3203_s23  ;;  %1994 = vmatmul.bf16.vlgmr.msra.gmra.mxu0 %v1746_v60  ;;  %v2884_v2 = vpop.permute.xlu1 %2883  ;;  %v2720_v24 = vunpack.i.l.bf16 %v3733_v14  ;;  %v2800_v60 = vunpack.i.l.bf16 %v3766_v21  ;;  %v625_v14 = vld [vmem:[#allocation2 + $0x31] sm:$0xff]  ;;  %v1555_v21 = vsel %vm406_vm0, %v3650_v47, %v2721_v19  ;;  %v1653_v47 = vsel %vm406_vm0, %v626_v30, %v2891_v33  ;;  %v4171_v33 = vld [vmem:[#allocation2 + $0x182] sm:$0xff] }
 0x11a   : > { %v2886_v49 = vunpack.i.h.bf16 %v2884_v2  ;;  %v2885_v23 = vunpack.i.l.bf16 %v2884_v2  ;;  %2652 = vmatmul.msk.bf16.gmra.mxu2 %vm406_vm0, %v1772_v52  ;;  %v4129_v2 = vpop.f32.mrf.mxu2  ;;  %4794 = vst [vmem:[#allocation13_spill] sm:$0xff] %v4171_v33  ;;  %v4175_v30 = vld [vmem:[#allocation2 + $0x18a] sm:$0xff] }
 0x11b   : > { %v2894_v11 = vpop.permute.xlu0 %2893  ;;  %v1554_v0 = vsel %vm406_vm0, %v3648_v46, %v2720_v24  ;;  %v4152_v46 = vpack.i.bf16 %v4022_v22, %v4020_v15  ;;  %v1652_v24 = vsel %vm406_vm0, %v625_v14, %v2890_v54  ;;  %v2906_v15 = vunpack.i.h.bf16 %v4048_v35  ;;  %v719_v14 = vld [vmem:[#allocation2 + $0x1a0] sm:$0xff]  ;;  %4795 = vst [vmem:[#allocation14_spill] sm:$0xff] %v4175_v30 }
 0x11c   : > { %v1714_v12 = vsel %vm1617_vm3, %v1682_v6, %v2885_v23  ;;  %v1715_v25 = vsel %vm1617_vm3, %v1683_v40, %v2886_v49  ;;  %v4143_v49 = vld [vmem:[#allocation2 + $0x109] sm:$0xff]  ;;  %v4145_v23 = vld [vmem:[#allocation2 + $0x111] sm:$0xff]  ;;  %v1587_v6 = vsel %vm1584_vm2, %v1554_v0, %v2800_v60  ;;  %v2896_v45 = vunpack.i.h.bf16 %v2894_v11 }
 0x11d   : > { %3113 = vrot.lane.b32.xlu2 %v3112_v38, %s3205_s13  ;;  %v1747_v9 = vpack.c.bf16 %v1715_v25, %v1714_v12  ;;  %4793 = vst [vmem:[#allocation12_spill] sm:$0xff] %v4145_v23  ;;  %v2895_v40 = vunpack.i.l.bf16 %v2894_v11  ;;  %v1588_v25 = vsel %vm1584_vm2, %v1555_v21, %v2801_v37  ;;  %v3132_v11 = vpack.i.bf16 %v4145_v23, %v4143_v49  ;;  %v718_v0 = vld [vmem:[#allocation2 + $0x198] sm:$0xff] }
 0x11e   : > { %v2905_v22 = vunpack.i.l.bf16 %v4048_v35  ;;  %v676_v21 = vld [vmem:[#allocation2 + $0x112] sm:$0xff] }
 0x11f   : > { %3108 = vrot.lane.b32.xlu1 %v3837_v8, %s3204_s8  ;;  %2083 = vmatmul.bf16.vlgmr.msra.gmra.mxu1 %v1747_v9  ;;  %v4134_v29 = vpop.permute.xlu2 %2948  ;;  %v1684_v54 = vsel %vm1584_vm2, %v1652_v24, %v2895_v40 }
 0x121   : > { %3118 = vrot.lane.b32.xlu0 %v3117_v26, %s3203_s23  ;;  %v2899_v38 = vpop.permute.xlu1 %2898 }
 0x122   : > { %v2901_v52 = vunpack.i.h.bf16 %v2899_v38  ;;  %v2900_v8 = vunpack.i.l.bf16 %v2899_v38  ;;  %v4165_v60 = vpop.f32.mrf.mxu2  ;;  %v675_v38 = vld [vmem:[#allocation2 + $0x10a] sm:$0xff] }
 0x123   : > { %v4148_v12 = vpop.permute.xlu0 %2908  ;;  %v3152_v23 = vpack.i.bf16 %v676_v21, %v675_v38 }
 0x124   : > { %v1620_v9 = vsel %vm1617_vm3, %v1587_v6, %v2900_v8  ;;  %v1621_v26 = vsel %vm1617_vm3, %v1588_v25, %v2901_v52  ;;  %v3142_v52 = vpack.i.bf16 %v719_v14, %v718_v0  ;;  %v1775_v8 = vpack.c.bf16 %v676_v21, %v675_v38  ;;  %v750_v6 = vld [vmem:[#allocation2 + $0x199] sm:$0xff]  ;;  %v751_v25 = vld [vmem:[#allocation2 + $0x1a1] sm:$0xff] }
 0x125   : > { %3128 = vrot.lane.b32.xlu2 %v4061_v16, %s3205_s13  ;;  %v1749_v19 = vpack.c.bf16 %v1621_v26, %v1620_v9  ;;  %v1685_v16 = vsel %vm1584_vm2, %v1653_v47, %v2896_v45  ;;  %v1716_v9 = vsel %vm1617_vm3, %v1684_v54, %v2905_v22  ;;  %v3137_v45 = vpack.i.bf16 %v4175_v30, %v4171_v33  ;;  %v4796_v47 = vld [vmem:[#allocation9_spill] sm:$0xff]  ;;  %v4189_v0 = vld [vmem:[#allocation2 + $0x128] sm:$0xff] }
 0x126   : > { %v1717_v40 = vsel %vm1617_vm3, %v1685_v16, %v2906_v15  ;;  %v2776_v26 = vunpack.i.h.bf16 %v4796_v47  ;;  %v2856_v14 = vunpack.i.h.bf16 %v4053_v13  ;;  %v2855_v22 = vunpack.i.l.bf16 %v4053_v13  ;;  %v4229_v21 = vld [vmem:[#allocation2 + $0x121] sm:$0xff] }
 0x127   : > { %3123 = vrot.lane.b32.xlu1 %v4152_v46, %s3204_s8  ;;  %v4169_v37 = vpop.permute.xlu2 %2963  ;;  %v3147_v15 = vpack.i.bf16 %v751_v25, %v750_v6  ;;  %v1750_v54 = vpack.c.bf16 %v1717_v40, %v1716_v9  ;;  %v2910_v1 = vunpack.i.l.bf16 %v4148_v12  ;;  %v627_v6 = vld [vmem:[#allocation2 + $0x49] sm:$0xff]  ;;  %v628_v25 = vld [vmem:[#allocation2 + $0x51] sm:$0xff] }
 0x128   : > { %v1577_v7 = vsel %vm406_vm0, %v4189_v0, %v2776_v26 }
 0x129   : > { %3133 = vrot.lane.b32.xlu0 %v3132_v11, %s3205_s13  ;;  %1999 = vmatmul.bf16.gmra.mxu0 %v1749_v19  ;;  %v2914_v35 = vpop.permute.xlu1 %2913  ;;  %v2775_v11 = vunpack.i.l.bf16 %v4796_v47  ;;  %v4187_v19 = vld [vmem:[#allocation2 + $0x120] sm:$0xff] }
 0x12a   : > { %2653 = vmatmul.msk.bf16.gmra.mxu2 %vm406_vm0, %v1775_v8  ;;  %v4194_v16 = vpop.f32.mrf.mxu2  ;;  %v2911_v8 = vunpack.i.h.bf16 %v4148_v12  ;;  %v2916_v40 = vunpack.i.h.bf16 %v2914_v35  ;;  %v2915_v31 = vunpack.i.l.bf16 %v2914_v35  ;;  %v1654_v35 = vsel %vm406_vm0, %v627_v6, %v2910_v1  ;;  %v709_v6 = vld [vmem:[#allocation2 + $0x128] sm:$0xff] }
 0x12b   : > { %v4180_v24 = vpop.permute.xlu0 %2923  ;;  %v1576_v13 = vsel %vm406_vm0, %v4187_v19, %v2775_v11 }
 0x12c   : > { %v1609_v12 = vsel %vm1584_vm2, %v1576_v13, %v2855_v22  ;;  %v2925_v22 = vunpack.i.l.bf16 %v4180_v24  ;;  %v1686_v13 = vsel %vm1584_vm2, %v1654_v35, %v2915_v31  ;;  %v4797_v31 = vld [vmem:[#allocation3_spill] sm:$0xff] }
 0x12d   : > { %3143 = vrot.lane.b32.xlu2 %v3142_v52, %s3204_s8 }
 0x12f   : > { %3138 = vrot.lane.b32.xlu1 %v3137_v45, %s3203_s23  ;;  %2088 = vmatmul.bf16.gmra.mxu1 %v1750_v54  ;;  %v2979_v47 = vpop.permute.xlu2 %2978  ;;  %v1610_v45 = vsel %vm1584_vm2, %v1577_v7, %v2856_v14 }
 0x130   : > { %v2981_v9 = vunpack.i.h.bf16 %v2979_v47  ;;  %v2980_v52 = vunpack.i.l.bf16 %v2979_v47  ;;  %v1655_v47 = vsel %vm406_vm0, %v628_v25, %v2911_v8 }
 0x131   : > { %3148 = vrot.lane.b32.xlu0 %v3147_v15, %s3205_s13  ;;  %v2929_v30 = vpop.permute.xlu1 %2928  ;;  %v1687_v8 = vsel %vm1584_vm2, %v1655_v47, %v2916_v40 }
 0x132   : > { %v2931_v54 = vunpack.i.h.bf16 %v2929_v30  ;;  %v2930_v33 = vunpack.i.l.bf16 %v2929_v30  ;;  %v4208_v26 = vsel %vm1617_vm3, %v4069_v59, %v2980_v52  ;;  %v4212_v11 = vsel %vm1617_vm3, %v4073_v39, %v2981_v9  ;;  %v4226_v1 = vpop.f32.mrf.mxu2  ;;  %v4231_v52 = vld [vmem:[#allocation2 + $0x129] sm:$0xff] }
 0x133   : > { %v4216_v15 = vpop.permute.xlu0 %2938  ;;  %v1788_v7 = vpack.c.bf16 %v4212_v11, %v4208_v26  ;;  %v2926_v59 = vunpack.i.h.bf16 %v4180_v24 }
 0x134   : > { %v1642_v30 = vsel %vm1617_vm3, %v1609_v12, %v2930_v33  ;;  %v1643_v14 = vsel %vm1617_vm3, %v1610_v45, %v2931_v54  ;;  %v708_v33 = vld [vmem:[#allocation2 + $0x120] sm:$0xff]  ;;  %v773_v45 = vld [vmem:[#allocation2 + $0x12a] sm:$0xff]  ;;  %v1718_v54 = vsel %vm1617_vm3, %v1686_v13, %v2925_v22  ;;  %v2780_v13 = vunpack.i.l.bf16 %v3835_v4 }
 0x135   : > { %v1782_v39 = vpack.c.bf16 %v1643_v14, %v1642_v30  ;;  %v3157_v24 = vpack.i.bf16 %v709_v6, %v708_v33  ;;  %v772_v12 = vld [vmem:[#allocation2 + $0x122] sm:$0xff]  ;;  %v1719_v47 = vsel %vm1617_vm3, %v1687_v8, %v2926_v59  ;;  %v3167_v59 = vpack.i.bf16 %v4231_v52, %v4229_v21  ;;  %v4799_v6 = vld [vmem:[#allocation4_spill] sm:$0xff] }
 0x136   : > { %v1778_v35 = vpack.c.bf16 %v773_v45, %v772_v12 }
 0x137   : > { %3153 = vrot.lane.b32.xlu1 %v3152_v23, %s3203_s23  ;;  %2054 = vmatmul.bf16.vlgmr.msra.gmra.mxu3 %v1782_v39  ;;  %v2994_v38 = vpop.permute.xlu2 %2993  ;;  %v4798_v23 = vpack.c.bf16 %v4092_v28, %v4088_v48  ;;  %v710_v39 = vld [vmem:[#allocation2 + $0x138] sm:$0xff]  ;;  %v2781_v28 = vunpack.i.h.bf16 %v3835_v4 }
 0x138   : > { %v2996_v25 = vunpack.i.h.bf16 %v2994_v38  ;;  %v2995_v9 = vunpack.i.l.bf16 %v2994_v38  ;;  %2698 = vmatpush.bf16.msra.mxu3 %v4797_v31  ;;  %v711_v38 = vld [vmem:[#allocation2 + $0x140] sm:$0xff]  ;;  %3158 = vrot.lane.b32.xlu2 %v3157_v24, %s3204_s8 }
 0x139   : > { %3163 = vrot.lane.b32.xlu0 %v4152_v46, %s3205_s13  ;;  %2004 = vmatmul.bf16.gmra.mxu0 %v4798_v23  ;;  %v2944_v40 = vpop.permute.xlu1 %2943  ;;  %v3177_v31 = vpack.i.bf16 %v711_v38, %v710_v39  ;;  %v630_v39 = vld [vmem:[#allocation2 + $0x69] sm:$0xff] }
 0x13a   : > { %v2946_v30 = vunpack.i.h.bf16 %v2944_v40  ;;  %v2945_v14 = vunpack.i.l.bf16 %v2944_v40  ;;  %v4244_v33 = vsel %vm1617_vm3, %v3958_v50, %v2995_v9  ;;  %v4248_v48 = vsel %vm1617_vm3, %v3962_v63, %v2996_v25  ;;  %2654 = vmatmul.msk.bf16.gmra.mxu2 %vm406_vm0, %v1778_v35  ;;  %v4264_v35 = vpop.f32.mrf.mxu2 }
 0x13b   : > { %v2954_v46 = vpop.permute.xlu0 %2953  ;;  %v1761_v22 = vpack.c.bf16 %v4248_v48, %v4244_v33  ;;  %v2861_v50 = vunpack.i.h.bf16 %v3922_v41  ;;  %v2860_v25 = vunpack.i.l.bf16 %v3922_v41  ;;  %v1753_v9 = vpack.c.bf16 %v1719_v47, %v1718_v54  ;;  %v629_v47 = vld [vmem:[#allocation2 + $0x61] sm:$0xff] }
 0x13c   : > { %v1624_v8 = vsel %vm1617_vm3, %v3948_v10, %v2945_v14  ;;  %v1625_v63 = vsel %vm1617_vm3, %v3951_v51, %v2946_v30  ;;  %2699 = vmatpush.bf16.msra.mxu3 %v4799_v6  ;;  %v2956_v23 = vunpack.i.h.bf16 %v2954_v46  ;;  %v2955_v40 = vunpack.i.l.bf16 %v2954_v46  ;;  %v4800_v10 = vld [vmem:[#allocation6_spill] sm:$0xff]  ;;  %v4801_v51 = vld [vmem:[#allocation5_spill] sm:$0xff] }
 0x13d   : > { %v1755_v24 = vpack.c.bf16 %v1625_v63, %v1624_v8  ;;  %v1579_v14 = vsel %vm406_vm0, %v4800_v10, %v2781_v28  ;;  %v1578_v30 = vsel %vm406_vm0, %v4801_v51, %v2780_v13  ;;  %v2936_v41 = vunpack.i.h.bf16 %v4112_v36  ;;  %v4802_v10 = vld [vmem:[#allocation7_spill] sm:$0xff] }
 0x13e   : > { %v2935_v54 = vunpack.i.l.bf16 %v4112_v36  ;;  %v1611_v46 = vsel %vm1584_vm2, %v1578_v30, %v2860_v25  ;;  %v3172_v8 = vpack.i.bf16 %v773_v45, %v772_v12  ;;  %v2941_v13 = vunpack.i.h.bf16 %v4216_v15 }
 0x13f   : > { %3168 = vrot.lane.b32.xlu1 %v3167_v59, %s3205_s13  ;;  %2093 = vmatmul.bf16.gmra.mxu1 %v1753_v9  ;;  %v4267_v4 = vpop.permute.xlu2 %3008  ;;  %v1612_v59 = vsel %vm1584_vm2, %v1579_v14, %v2861_v50  ;;  %v1644_v63 = vsel %vm1617_vm3, %v1611_v46, %v2955_v40  ;;  %v2940_v6 = vunpack.i.l.bf16 %v4216_v15  ;;  %v3182_v36 = vpack.i.bf16 %v4189_v0, %v4187_v19  ;;  %v4803_v14 = vld [vmem:[#allocation8_spill] sm:$0xff]  ;;  %v775_v46 = vld [vmem:[#allocation2 + $0x142] sm:$0xff] }
 0x140   : > { %v1645_v28 = vsel %vm1617_vm3, %v1612_v59, %v2956_v23  ;;  %3173 = vrot.lane.b32.xlu2 %v3172_v8, %s3203_s23  ;;  %v1657_v25 = vsel %vm406_vm0, %v630_v39, %v2936_v41  ;;  %v1656_v50 = vsel %vm406_vm0, %v629_v47, %v2935_v54  ;;  %v2951_v40 = vunpack.i.h.bf16 %v4134_v29  ;;  %v4298_v59 = vld [vmem:[#allocation2 + $0x139] sm:$0xff] }
 0x141   : > { %v2959_v38 = vpop.permute.xlu1 %2958  ;;  %3178 = vrot.lane.b32.xlu0 %v3177_v31, %s3204_s8  ;;  %v1785_v45 = vpack.c.bf16 %v1645_v28, %v1644_v63  ;;  %v2950_v23 = vunpack.i.l.bf16 %v4134_v29  ;;  %v1688_v30 = vsel %vm1584_vm2, %v1656_v50, %v2940_v6  ;;  %v1689_v41 = vsel %vm1584_vm2, %v1657_v25, %v2941_v13  ;;  %v774_v29 = vld [vmem:[#allocation2 + $0x13a] sm:$0xff] }
 0x142   : > { %v4293_v19 = vpop.f32.mrf.mxu2  ;;  %v1781_v63 = vpack.c.bf16 %v775_v46, %v774_v29  ;;  %v4300_v28 = vld [vmem:[#allocation2 + $0x141] sm:$0xff] }
 0x143   : > { %v2969_v9 = vpop.permute.xlu0 %2968  ;;  %v3187_v6 = vpack.i.bf16 %v4300_v28, %v4298_v59 }
 0x144   : > { %v2971_v31 = vunpack.i.h.bf16 %v2969_v9  ;;  %v2970_v12 = vunpack.i.l.bf16 %v2969_v9  ;;  %v1720_v9 = vsel %vm1617_vm3, %v1688_v30, %v2950_v23  ;;  %v631_v23 = vld [vmem:[#allocation2 + $0x79] sm:$0xff] }
 0x146   : > { %v1626_v15 = vsel %vm1617_vm3, %v4802_v10, %v2970_v12  ;;  %v1627_v51 = vsel %vm1617_vm3, %v4803_v14, %v2971_v31  ;;  %v632_v10 = vld [vmem:[#allocation2 + $0x81] sm:$0xff]  ;;  %v2966_v14 = vunpack.i.h.bf16 %v4169_v37 }
 0x147   : > { %3183 = vrot.lane.b32.xlu1 %v3182_v36, %s3205_s13  ;;  %2059 = vmatmul.bf16.gmra.mxu3 %v1785_v45  ;;  %v3024_v0 = vpop.permute.xlu2 %3023  ;;  %v1758_v54 = vpack.c.bf16 %v1627_v51, %v1626_v15  ;;  %v1721_v36 = vsel %vm1617_vm3, %v1689_v41, %v2951_v40  ;;  %v2960_v40 = vunpack.i.l.bf16 %v2959_v38 }
 0x148   : > { %v3026_v47 = vunpack.i.h.bf16 %v3024_v0  ;;  %v3025_v39 = vunpack.i.l.bf16 %v3024_v0  ;;  %3188 = vrot.lane.b32.xlu2 %v3187_v6, %s3205_s13  ;;  %v1756_v50 = vpack.c.bf16 %v1721_v36, %v1720_v9  ;;  %v3011_v9 = vunpack.i.h.bf16 %v4267_v4  ;;  %s4466_s13 = scalar_lea.vmem %s4773_s4, %s2662_s24 }
 0x149   : > { %2009 = vmatmul.bf16.gmra.mxu0 %v1755_v24  ;;  %v2974_v8 = vpop.permute.xlu1 %2973  ;;  %v1658_v30 = vsel %vm406_vm0, %v631_v23, %v2960_v40  ;;  %v3010_v36 = vunpack.i.l.bf16 %v4267_v4 }
 0x14a   : > { %v4308_v13 = vsel %vm1617_vm3, %v3990_v44, %v3025_v39  ;;  %2655 = vmatmul.msk.bf16.gmra.mxu2 %vm406_vm0, %v1781_v63  ;;  %v4313_v24 = vsel %vm1617_vm3, %v3994_v32, %v3026_v47  ;;  %v4318_v12 = vpop.f32.mrf.mxu2  ;;  %v2961_v44 = vunpack.i.h.bf16 %v2959_v38  ;;  %v2965_v32 = vunpack.i.l.bf16 %v4169_v37  ;;  %v776_v37 = vld [vmem:[#allocation2 + $0x152] sm:$0xff]  ;;  %v777_v63 = vld [vmem:[#allocation2 + $0x15a] sm:$0xff] }
 0x14b   : > { %v2984_v25 = vpop.permute.xlu0 %2983  ;;  %v1764_v31 = vpack.c.bf16 %v4313_v24, %v4308_v13  ;;  %v2976_v41 = vunpack.i.h.bf16 %v2974_v8  ;;  %v2975_v47 = vunpack.i.l.bf16 %v2974_v8  ;;  %v1784_v6 = vpack.c.bf16 %v777_v63, %v776_v37 }
 0x14c   : > { %v1659_v0 = vsel %vm406_vm0, %v632_v10, %v2961_v44  ;;  %v1690_v29 = vsel %vm1584_vm2, %v1658_v30, %v2965_v32  ;;  %v2986_v30 = vunpack.i.h.bf16 %v2984_v25 }
 0x14d   : > { %v1691_v46 = vsel %vm1584_vm2, %v1659_v0, %v2966_v14  ;;  %v1722_v26 = vsel %vm1617_vm3, %v1690_v29, %v2975_v47  ;;  %v633_v47 = vld [vmem:[#allocation2 + $0x91] sm:$0xff]  ;;  %v634_v29 = vld [vmem:[#allocation2 + $0x99] sm:$0xff] }
 0x14e   : > { %v1723_v11 = vsel %vm1617_vm3, %v1691_v46, %v2976_v41  ;;  %v2985_v41 = vunpack.i.l.bf16 %v2984_v25 }
 0x14f   : > { %2098 = vmatmul.bf16.gmra.mxu1 %v1756_v50  ;;  %v4320_v45 = vpop.permute.xlu2 %3038  ;;  %v1759_v4 = vpack.c.bf16 %v1723_v11, %v1722_v26  ;;  %v778_v26 = vld [vmem:[#allocation2 + $0x16a] sm:$0xff]  ;;  %v779_v11 = vld [vmem:[#allocation2 + $0x172] sm:$0xff] }
 0x151   : > { %v2989_v15 = vpop.permute.xlu1 %2988 }
 0x152   : > { %v4326_v39 = vpop.f32.mrf.mxu2  ;;  %v2990_v37 = vunpack.i.l.bf16 %v2989_v15 }
 0x153   : > { %v2999_v51 = vpop.permute.xlu0 %2998 }
 0x157   : > { %2064 = vmatmul.bf16.gmra.mxu3 %v1788_v7  ;;  %v4331_v38 = vpop.permute.xlu2 %3053 }
 0x159   : > { %2014 = vmatmul.bf16.gmra.mxu0 %v1758_v54  ;;  %v3004_v8 = vpop.permute.xlu1 %3003 }
 0x15a   : > { %v3006_v50 = vunpack.i.h.bf16 %v3004_v8  ;;  %v3005_v44 = vunpack.i.l.bf16 %v3004_v8  ;;  %2656 = vmatmul.msk.bf16.gmra.mxu2 %vm406_vm0, %v1784_v6  ;;  %v3000_v8 = vunpack.i.l.bf16 %v2999_v51 }
 0x15b   : > { %v4339_v7 = vpop.permute.xlu0 %3013  ;;  %v4348_v32 = vpop.f32.mrf.mxu2 }
 0x15c   : > { %v1615_v40 = vsel %vm1584_vm2, %v3864_v61, %v3005_v44  ;;  %v1616_v23 = vsel %vm1584_vm2, %v3860_v5, %v3006_v50  ;;  %v2991_v61 = vunpack.i.h.bf16 %v2989_v15  ;;  %v1661_v5 = vsel %vm406_vm0, %v634_v29, %v2986_v30 }
 0x15d   : > { %v1648_v54 = vsel %vm1617_vm3, %v1615_v40, %v3010_v36  ;;  %v1649_v10 = vsel %vm1617_vm3, %v1616_v23, %v3011_v9  ;;  %v1660_v36 = vsel %vm406_vm0, %v633_v47, %v2985_v41  ;;  %v3001_v9 = vunpack.i.h.bf16 %v2999_v51 }
 0x15e   : > { %v1791_v14 = vpack.c.bf16 %v1649_v10, %v1648_v54  ;;  %v1692_v25 = vsel %vm1584_vm2, %v1660_v36, %v2990_v37  ;;  %v1693_v44 = vsel %vm1584_vm2, %v1661_v5, %v2991_v61  ;;  %v3041_v15 = vunpack.i.h.bf16 %v4320_v45 }
 0x15f   : > { %2103 = vmatmul.bf16.gmra.mxu1 %v1759_v4  ;;  %v4350_v0 = vpop.permute.xlu2 %3068  ;;  %v3040_v40 = vunpack.i.l.bf16 %v4320_v45  ;;  %v1787_v23 = vpack.c.bf16 %v779_v11, %v778_v26  ;;  %v1724_v10 = vsel %vm1617_vm3, %v1692_v25, %v3000_v8  ;;  %v3016_v5 = vunpack.i.h.bf16 %v4339_v7  ;;  %v636_v8 = vld [vmem:[#allocation2 + $0xb1] sm:$0xff] }
 0x160   : > { %v3015_v36 = vunpack.i.l.bf16 %v4339_v7 }
 0x161   : > { %v3019_v46 = vpop.permute.xlu1 %3018 }
 0x162   : > { %v3020_v26 = vunpack.i.l.bf16 %v3019_v46 }
 0x163   : > { %v4352_v63 = vpop.permute.xlu0 %3028  ;;  %v4356_v6 = vpop.f32.mrf.mxu2 }
 0x164   : > { %v3030_v7 = vunpack.i.l.bf16 %v4352_v63 }
 0x167   : > { %2069 = vmatmul.bf16.gmra.mxu3 %v1791_v14  ;;  %v4358_v50 = vpop.permute.xlu2 %3083  ;;  %v1725_v14 = vsel %vm1617_vm3, %v1693_v44, %v3001_v9  ;;  %v635_v9 = vld [vmem:[#allocation2 + $0xa9] sm:$0xff]  ;;  %v3021_v44 = vunpack.i.h.bf16 %v3019_v46 }
 0x168   : > { %v1762_v48 = vpack.c.bf16 %v1725_v14, %v1724_v10 }
 0x169   : > { %2019 = vmatmul.bf16.gmra.mxu0 %v1761_v22  ;;  %v3034_v51 = vpop.permute.xlu1 %3033 }
 0x16a   : > { %v3036_v4 = vunpack.i.h.bf16 %v3034_v51  ;;  %v3035_v54 = vunpack.i.l.bf16 %v3034_v51  ;;  %2657 = vmatmul.msk.bf16.gmra.mxu2 %vm406_vm0, %v1787_v23  ;;  %v1662_v51 = vsel %vm406_vm0, %v635_v9, %v3015_v36 }
 0x16b   : > { %v3044_v30 = vpop.permute.xlu0 %3043  ;;  %v4376_v61 = vpop.f32.mrf.mxu2 }
 0x16c   : > { %v1675_v41 = vsel %vm406_vm0, %v4300_v28, %v3036_v4  ;;  %v1674_v45 = vsel %vm406_vm0, %v4298_v59, %v3035_v54  ;;  %v3046_v47 = vunpack.i.h.bf16 %v3044_v30  ;;  %v3045_v33 = vunpack.i.l.bf16 %v3044_v30 }
 0x16d   : > { %v1706_v22 = vsel %vm1584_vm2, %v1674_v45, %v3040_v40  ;;  %v1707_v29 = vsel %vm1584_vm2, %v1675_v41, %v3041_v15  ;;  %v1663_v40 = vsel %vm406_vm0, %v636_v8, %v3016_v5  ;;  %v3031_v54 = vunpack.i.h.bf16 %v4352_v63 }
 0x16e   : > { %v1738_v28 = vsel %vm1617_vm3, %v1706_v22, %v3045_v33  ;;  %v1739_v59 = vsel %vm1617_vm3, %v1707_v29, %v3046_v47  ;;  %v1694_v41 = vsel %vm1584_vm2, %v1662_v51, %v3020_v26  ;;  %v1695_v45 = vsel %vm1584_vm2, %v1663_v40, %v3021_v44  ;;  %v649_v22 = vld [vmem:[#allocation2 + $0x151] sm:$0xff]  ;;  %v650_v29 = vld [vmem:[#allocation2 + $0x159] sm:$0xff] }
 0x16f   : > { %2108 = vmatmul.bf16.gmra.mxu1 %v1762_v48  ;;  %v4378_v37 = vpop.permute.xlu2 %3098  ;;  %v1783_v15 = vpack.c.bf16 %v1739_v59, %v1738_v28  ;;  %v3070_v33 = vunpack.i.l.bf16 %v4350_v0  ;;  %v1727_v48 = vsel %vm1617_vm3, %v1695_v45, %v3031_v54 }
 0x171   : > { %v3049_v25 = vpop.permute.xlu1 %3048  ;;  %v1676_v13 = vsel %vm406_vm0, %v649_v22, %v3070_v33 }
 0x172   : > { %v3051_v8 = vunpack.i.h.bf16 %v3049_v25 }
 0x173   : > { %v3059_v11 = vpop.permute.xlu0 %3058  ;;  %v4392_v30 = vpop.f32.mrf.mxu2 }
 0x174   : > { %v3061_v23 = vunpack.i.h.bf16 %v3059_v11  ;;  %v3060_v4 = vunpack.i.l.bf16 %v3059_v11  ;;  %v637_v11 = vld [vmem:[#allocation2 + $0xc1] sm:$0xff] }
 0x176   : > { %v1632_v10 = vsel %vm1617_vm3, %v3841_v17, %v3060_v4  ;;  %v1633_v14 = vsel %vm1617_vm3, %v3844_v55, %v3061_v23  ;;  %v3071_v17 = vunpack.i.h.bf16 %v4350_v0  ;;  %v1726_v55 = vsel %vm1617_vm3, %v1694_v41, %v3030_v7 }
 0x177   : > { %2143 = vmatmul.bf16.vlgmr.msrb.gmra.mxu3 %v1783_v15  ;;  %v4394_v46 = vpop.permute.xlu2 %3113  ;;  %v1767_v47 = vpack.c.bf16 %v1633_v14, %v1632_v10  ;;  %v1765_v59 = vpack.c.bf16 %v1727_v48, %v1726_v55  ;;  %v3050_v0 = vunpack.i.l.bf16 %v3049_v25  ;;  %v638_v15 = vld [vmem:[#allocation2 + $0xc9] sm:$0xff]  ;;  %v3056_v25 = vunpack.i.h.bf16 %v4331_v38 }
 0x178   : > { %v1677_v9 = vsel %vm406_vm0, %v650_v29, %v3071_v17  ;;  %v3055_v14 = vunpack.i.l.bf16 %v4331_v38  ;;  %v1665_v17 = vsel %vm406_vm0, %v638_v15, %v3051_v8  ;;  %v651_v15 = vld [vmem:[#allocation2 + $0x169] sm:$0xff] }
 0x179   : > { %2024 = vmatmul.bf16.gmra.mxu0 %v1764_v31  ;;  %v3064_v63 = vpop.permute.xlu1 %3063  ;;  %v1664_v33 = vsel %vm406_vm0, %v637_v11, %v3050_v0 }
 0x17a   : > { %v3066_v22 = vunpack.i.h.bf16 %v3064_v63  ;;  %v1696_v38 = vsel %vm1584_vm2, %v1664_v33, %v3055_v14 }
 0x17b   : > { %v3074_v5 = vpop.permute.xlu0 %3073 }
 0x17c   : > { %v3076_v36 = vunpack.i.h.bf16 %v3074_v5  ;;  %v3075_v28 = vunpack.i.l.bf16 %v3074_v5  ;;  %v1697_v5 = vsel %vm1584_vm2, %v1665_v17, %v3056_v25 }
 0x17d   : > { %v4407_v24 = vpop.f32.mrf.mxu2 }
 0x17e   : > { %v1708_v51 = vsel %vm1584_vm2, %v1676_v13, %v3075_v28  ;;  %v1709_v23 = vsel %vm1584_vm2, %v1677_v9, %v3076_v36  ;;  %v1729_v13 = vsel %vm1617_vm3, %v1697_v5, %v3066_v22  ;;  %v3101_v5 = vunpack.i.h.bf16 %v4378_v37 }
 0x17f   : > { %2113 = vmatmul.bf16.gmra.mxu1 %v1765_v59  ;;  %v3129_v31 = vpop.permute.xlu2 %3128 }
 0x180   : > { %v3131_v44 = vunpack.i.h.bf16 %v3129_v31  ;;  %v3130_v26 = vunpack.i.l.bf16 %v3129_v31 }
 0x181   : > { %v3079_v40 = vpop.permute.xlu1 %3078 }
 0x182   : > { %v3081_v4 = vunpack.i.h.bf16 %v3079_v40  ;;  %v3080_v54 = vunpack.i.l.bf16 %v3079_v40  ;;  %v4413_v7 = vsel %vm1617_vm3, %v4029_v57, %v3130_v26  ;;  %v4417_v10 = vsel %vm1617_vm3, %v4033_v53, %v3131_v44 }
 0x183   : > { %v3089_v41 = vpop.permute.xlu0 %3088  ;;  %v1773_v45 = vpack.c.bf16 %v4417_v10, %v4413_v7  ;;  %v3065_v53 = vunpack.i.l.bf16 %v3064_v63  ;;  %v3086_v40 = vunpack.i.h.bf16 %v4358_v50 }
 0x184   : > { %v1740_v55 = vsel %vm1617_vm3, %v1708_v51, %v3080_v54  ;;  %v1741_v57 = vsel %vm1617_vm3, %v1709_v23, %v3081_v4  ;;  %v3085_v51 = vunpack.i.l.bf16 %v4358_v50  ;;  %v3116_v4 = vunpack.i.h.bf16 %v4394_v46 }
 0x185   : > { %v1786_v48 = vpack.c.bf16 %v1741_v57, %v1740_v55  ;;  %v4427_v29 = vpop.f32.mrf.mxu2  ;;  %v1728_v9 = vsel %vm1617_vm3, %v1696_v38, %v3065_v53  ;;  %v3091_v33 = vunpack.i.h.bf16 %v3089_v41  ;;  %v3090_v55 = vunpack.i.l.bf16 %v3089_v41 }
 0x186   : > { %v1768_v26 = vpack.c.bf16 %v1729_v13, %v1728_v9  ;;  %v1666_v50 = vsel %vm406_vm0, %v4011_v43, %v3085_v51 }
 0x187   : > { %2148 = vmatmul.bf16.gmra.mxu3 %v1786_v48  ;;  %v1667_v48 = vsel %vm406_vm0, %v4013_v27, %v3086_v40  ;;  %v1698_v27 = vsel %vm1584_vm2, %v1666_v50, %v3090_v55 }
 0x189   : > { %2029 = vmatmul.bf16.gmra.mxu0 %v1767_v47  ;;  %v3094_v36 = vpop.permute.xlu1 %3093  ;;  %v652_v47 = vld [vmem:[#allocation2 + $0x171] sm:$0xff] }
 0x18a   : > { %v3096_v28 = vunpack.i.h.bf16 %v3094_v36  ;;  %v3095_v59 = vunpack.i.l.bf16 %v3094_v36  ;;  %v3100_v36 = vunpack.i.l.bf16 %v4378_v37 }
 0x18b   : > { %v3104_v31 = vpop.permute.xlu0 %3103 }
 0x18c   : > { %v1634_v8 = vsel %vm1617_vm3, %v4001_v18, %v3095_v59  ;;  %v1635_v63 = vsel %vm1617_vm3, %v4005_v58, %v3096_v28  ;;  %v3106_v0 = vunpack.i.h.bf16 %v3104_v31  ;;  %v3105_v44 = vunpack.i.l.bf16 %v3104_v31 }
 0x18d   : > { %v1770_v11 = vpack.c.bf16 %v1635_v63, %v1634_v8  ;;  %v4439_v23 = vpop.f32.mrf.mxu2  ;;  %v3115_v18 = vunpack.i.l.bf16 %v4394_v46  ;;  %v1699_v59 = vsel %vm1584_vm2, %v1667_v48, %v3091_v33  ;;  %v1730_v9 = vsel %vm1617_vm3, %v1698_v27, %v3100_v36 }
 0x18e   : > { %v1679_v54 = vsel %vm406_vm0, %v652_v47, %v3106_v0  ;;  %v1678_v58 = vsel %vm406_vm0, %v651_v15, %v3105_v44  ;;  %v1731_v13 = vsel %vm1617_vm3, %v1699_v59, %v3101_v5 }
 0x18f   : > { %2118 = vmatmul.bf16.gmra.mxu1 %v1768_v26  ;;  %v1771_v37 = vpack.c.bf16 %v1731_v13, %v1730_v9  ;;  %v3144_v26 = vpop.permute.xlu2 %3143 }
 0x190   : > { %v3146_v51 = vunpack.i.h.bf16 %v3144_v26 }
 0x191   : > { %v3109_v25 = vpop.permute.xlu1 %3108 }
 0x192   : > { %v3111_v14 = vunpack.i.h.bf16 %v3109_v25  ;;  %v3110_v17 = vunpack.i.l.bf16 %v3109_v25 }
 0x193   : > { %v3119_v57 = vpop.permute.xlu0 %3118 }
 0x194   : > { %v1710_v22 = vsel %vm1584_vm2, %v1678_v58, %v3110_v17  ;;  %v1711_v46 = vsel %vm1584_vm2, %v1679_v54, %v3111_v14  ;;  %v3120_v15 = vunpack.i.l.bf16 %v3119_v57 }
 0x195   : > { %v1742_v53 = vsel %vm1617_vm3, %v1710_v22, %v3115_v18  ;;  %v1743_v38 = vsel %vm1617_vm3, %v1711_v46, %v3116_v4  ;;  %v4459_v31 = vpop.f32.mrf.mxu2  ;;  %v3145_v4 = vunpack.i.l.bf16 %v3144_v26 }
 0x196   : > { %v1995_v41 = vpop.f32.mrf.mxu0  ;;  %v1789_v28 = vpack.c.bf16 %v1743_v38, %v1742_v53  ;;  %v1668_v14 = vsel %vm406_vm0, %v4063_v42, %v3120_v15 }
 0x198   : > { %2153 = vmatmul.bf16.gmra.mxu3 %v1789_v28 }
 0x199   : > { %2034 = vmatmul.bf16.gmra.mxu0 %v1770_v11  ;;  %v3124_v43 = vpop.permute.xlu1 %3123  ;;  %v3121_v11 = vunpack.i.h.bf16 %v3119_v57 }
 0x19a   : > { %v3125_v18 = vunpack.i.l.bf16 %v3124_v43  ;;  %v3126_v17 = vunpack.i.h.bf16 %v3124_v43 }
 0x19b   : > { %v3134_v8 = vpop.permute.xlu0 %3133  ;;  %v1669_v25 = vsel %vm406_vm0, %v4065_v56, %v3121_v11 }
 0x19c   : > { %v2084_v63 = vpop.f32.mrf.mxu1  ;;  %v3136_v46 = vunpack.i.h.bf16 %v3134_v8  ;;  %v3135_v38 = vunpack.i.l.bf16 %v3134_v8  ;;  %v1701_v59 = vsel %vm1584_vm2, %v1669_v25, %v3126_v17 }
 0x19d   : > { %v2085_v0 = vadd.f32 %v2084_v63, %v1995_v41  ;;  %v4479_v22 = vpop.f32.mrf.mxu2 }
 0x19e   : > { %v1997_v44 = vpop.f32.mrf.mxu0 }
 0x19f   : > { %v2174_v47 = vadd.f32 %v4129_v2, %v2085_v0  ;;  %2123 = vmatmul.bf16.gmra.mxu1 %v1771_v37 }
 0x1a1   : > { %2253 = vst.msk [vmem:[%s4466_s13] sm:$0xff] %vm406_vm0, %v2174_v47  ;;  %v3139_v40 = vpop.permute.xlu1 %3138  ;;  %v2356_v41 = vmul.f32 %v2174_v47, %v2174_v47  ;;  %v2285_v43 = vsel %vm406_vm0, %v2174_v47, 0.0 }
 0x1a2   : > { %v3141_v54 = vunpack.i.h.bf16 %v3139_v40  ;;  %v3140_v58 = vunpack.i.l.bf16 %v3139_v40 }
 0x1a3   : > { %v3149_v33 = vpop.permute.xlu0 %3148  ;;  %v2388_v37 = vsel %vm406_vm0, %v2356_v41, 0.0 }
 0x1a4   : > { %v1681_v2 = vsel %vm406_vm0, %v4106_v34, %v3141_v54  ;;  %v1680_v55 = vsel %vm406_vm0, %v4104_v20, %v3140_v58  ;;  %v3151_v57 = vunpack.i.h.bf16 %v3149_v33  ;;  %v3150_v48 = vunpack.i.l.bf16 %v3149_v33  ;;  %v2086_v50 = vpop.f32.mrf.mxu1  ;;  %v3159_v58 = vpop.permute.xlu2 %3158 }
 0x1a5   : > { %v2087_v53 = vadd.f32 %v2086_v50, %v1997_v44  ;;  %v1712_v56 = vsel %vm1584_vm2, %v1680_v55, %v3145_v4  ;;  %v1713_v42 = vsel %vm1584_vm2, %v1681_v2, %v3146_v51  ;;  %v1700_v20 = vsel %vm1584_vm2, %v1668_v14, %v3125_v18  ;;  %v4501_v4 = vpop.f32.mrf.mxu2 }
 0x1a6   : > { %v2000_v5 = vpop.f32.mrf.mxu0  ;;  %v1744_v36 = vsel %vm1617_vm3, %v1712_v56, %v3150_v48  ;;  %v1745_v34 = vsel %vm1617_vm3, %v1713_v42, %v3151_v57  ;;  %v1732_v0 = vsel %vm1617_vm3, %v1700_v20, %v3135_v38  ;;  %v3161_v50 = vunpack.i.h.bf16 %v3159_v58 }
 0x1a7   : > { %v2176_v28 = vadd.f32 %v4165_v60, %v2087_v53  ;;  %v1792_v27 = vpack.c.bf16 %v1745_v34, %v1744_v36  ;;  %v1733_v60 = vsel %vm1617_vm3, %v1701_v59, %v3136_v46  ;;  %v4804_v46 = vld [vmem:[#allocation12_spill] sm:$0xff]  ;;  %v4806_v36 = vld [vmem:[#allocation14_spill] sm:$0xff] }
 0x1a8   : > { %v1774_v7 = vpack.c.bf16 %v1733_v60, %v1732_v0 }
 0x1a9   : > { %2254 = vst.msk [vmem:[%s4466_s13 + $0x8] sm:$0xff] %vm406_vm0, %v2176_v28  ;;  %v2286_v9 = vsel %vm406_vm0, %v2176_v28, 0.0  ;;  %v2357_v13 = vmul.f32 %v2176_v28, %v2176_v28  ;;  %2039 = vmatmul.bf16.gmra.mxu0 %v1773_v45  ;;  %v3154_v8 = vpop.permute.xlu1 %3153  ;;  %2158 = vmatmul.bf16.gmra.mxu3 %v1792_v27 }
 0x1aa   : > { %v2287_v63 = vadd.f32 %v2286_v9, %v2285_v43  ;;  %v3155_v18 = vunpack.i.l.bf16 %v3154_v8  ;;  %v3156_v14 = vunpack.i.h.bf16 %v3154_v8 }
 0x1ab   : > { %v2389_v44 = vsel %vm406_vm0, %v2357_v13, 0.0  ;;  %v3164_v26 = vpop.permute.xlu0 %3163 }
 0x1ac   : > { %v2390_v11 = vadd.f32 %v2389_v44, %v2388_v37  ;;  %v3166_v15 = vunpack.i.h.bf16 %v3164_v26  ;;  %v2089_v47 = vpop.f32.mrf.mxu1  ;;  %v3165_v40 = vunpack.i.l.bf16 %v3164_v26  ;;  %v1670_v48 = vsel %vm406_vm0, %v4143_v49, %v3155_v18  ;;  %v3174_v8 = vpop.permute.xlu2 %3173 }
 0x1ad   : > { %v2090_v51 = vadd.f32 %v2089_v47, %v2000_v5  ;;  %v4805_v5 = vld [vmem:[#allocation13_spill] sm:$0xff]  ;;  %v4519_v59 = vpop.f32.mrf.mxu2  ;;  %v4807_v47 = vld [vmem:[#allocation10_spill] sm:$0xff] }
 0x1ae   : > { %v2002_v10 = vpop.f32.mrf.mxu0  ;;  %v1639_v45 = vsel %vm1617_vm3, %v3890_v3, %v3166_v15  ;;  %v1638_v25 = vsel %vm1617_vm3, %v3887_v62, %v3165_v40  ;;  %v3160_v3 = vunpack.i.l.bf16 %v3159_v58  ;;  %v1671_v62 = vsel %vm406_vm0, %v4804_v46, %v3156_v14 }
 0x1af   : > { %v2179_v54 = vadd.f32 %v4194_v16, %v2090_v51  ;;  %2128 = vmatmul.bf16.gmra.mxu1 %v1774_v7  ;;  %v1776_v17 = vpack.c.bf16 %v1639_v45, %v1638_v25  ;;  %v1790_v34 = vpack.c.bf16 %v4806_v36, %v4805_v5  ;;  %v1703_v49 = vsel %vm1584_vm2, %v1671_v62, %v3161_v50  ;;  %v4808_v51 = vld [vmem:[#allocation11_spill] sm:$0xff] }
 0x1b0   : > { %v1702_v28 = vsel %vm1584_vm2, %v1670_v48, %v3160_v3  ;;  %v3176_v25 = vunpack.i.h.bf16 %v3174_v8  ;;  %v3175_v14 = vunpack.i.l.bf16 %v3174_v8  ;;  %v782_v3 = vld [vmem:[#allocation2 + $0x19a] sm:$0xff]  ;;  %v783_v48 = vld [vmem:[#allocation2 + $0x1a2] sm:$0xff] }
 0x1b1   : > { %2255 = vst.msk [vmem:[%s4466_s13 + $0x10] sm:$0xff] %vm406_vm0, %v2179_v54  ;;  %v2288_v33 = vsel %vm406_vm0, %v2179_v54, 0.0  ;;  %v2358_v2 = vmul.f32 %v2179_v54, %v2179_v54  ;;  %v3169_v55 = vpop.permute.xlu1 %3168  ;;  %v1793_v36 = vpack.c.bf16 %v783_v48, %v782_v3 }
 0x1b2   : > { %v2289_v57 = vadd.f32 %v2288_v33, %v2287_v63  ;;  %v3170_v42 = vunpack.i.l.bf16 %v3169_v55  ;;  %v3171_v20 = vunpack.i.h.bf16 %v3169_v55 }
 0x1b3   : > { %v2391_v16 = vsel %vm406_vm0, %v2358_v2, 0.0 }
 0x1b4   : > { %v2392_v53 = vadd.f32 %v2391_v16, %v2390_v11  ;;  %v2091_v56 = vpop.f32.mrf.mxu1  ;;  %v1734_v63 = vsel %vm1617_vm3, %v1702_v28, %v3170_v42  ;;  %v1735_v44 = vsel %vm1617_vm3, %v1703_v49, %v3171_v20  ;;  %v3189_v62 = vpop.permute.xlu2 %3188 }
 0x1b5   : > { %v2092_v38 = vadd.f32 %v2091_v56, %v2002_v10  ;;  %v1777_v45 = vpack.c.bf16 %v1735_v44, %v1734_v63  ;;  %v4540_v16 = vpop.f32.mrf.mxu2  ;;  %v1672_v56 = vsel %vm406_vm0, %v4229_v21, %v3175_v14  ;;  %v3190_v20 = vunpack.i.l.bf16 %v3189_v62 }
 0x1b6   : > { %v2005_v41 = vpop.f32.mrf.mxu0 }
 0x1b7   : > { %v2181_v27 = vadd.f32 %v4226_v1, %v2092_v38 }
 0x1b9   : > { %2256 = vst.msk [vmem:[%s4466_s13 + $0x18] sm:$0xff] %vm406_vm0, %v2181_v27  ;;  %v2290_v43 = vsel %vm406_vm0, %v2181_v27, 0.0  ;;  %v2359_v9 = vmul.f32 %v2181_v27, %v2181_v27  ;;  %2044 = vmatmul.bf16.gmra.mxu0 %v1776_v17  ;;  %v3184_v13 = vpop.permute.xlu1 %3183  ;;  %2658 = vmatmul.msk.bf16.vlgmr.msra.gmra.mxu3 %vm406_vm0, %v1790_v34  ;;  %v3179_v17 = vpop.permute.xlu0 %3178  ;;  %v3191_v34 = vunpack.i.h.bf16 %v3189_v62 }
 0x1ba   : > { %v2291_v0 = vadd.f32 %v2290_v43, %v2289_v57  ;;  %v3186_v60 = vunpack.i.h.bf16 %v3184_v13  ;;  %v3185_v37 = vunpack.i.l.bf16 %v3184_v13  ;;  %v4526_v1 = vpop.f32.mrf.mxu3  ;;  %v3180_v46 = vunpack.i.l.bf16 %v3179_v17 }
 0x1bb   : > { %v2393_v26 = vsel %vm406_vm0, %v2359_v9, 0.0 }
 0x1bc   : > { %v2394_v11 = vadd.f32 %v2393_v26, %v2392_v53  ;;  %v2094_v15 = vpop.f32.mrf.mxu1  ;;  %v1640_v40 = vsel %vm1617_vm3, %v4807_v47, %v3185_v37  ;;  %v1641_v7 = vsel %vm1617_vm3, %v4808_v51, %v3186_v60  ;;  %v1673_v53 = vsel %vm406_vm0, %v4231_v52, %v3176_v25 }
 0x1bd   : > { %v2095_v10 = vadd.f32 %v2094_v15, %v2005_v41  ;;  %v1779_v18 = vpack.c.bf16 %v1641_v7, %v1640_v40  ;;  %v1704_v27 = vsel %vm1584_vm2, %v1672_v56, %v3180_v46  ;;  %v4559_v60 = vpop.f32.mrf.mxu2 }
 0x1be   : > { %v2007_v54 = vpop.f32.mrf.mxu0  ;;  %v1736_v13 = vsel %vm1617_vm3, %v1704_v27, %v3190_v20 }
 0x1bf   : > { %v2184_v58 = vadd.f32 %v4264_v35, %v2095_v10  ;;  %2133 = vmatmul.bf16.gmra.mxu1 %v1777_v45  ;;  %v3181_v35 = vunpack.i.h.bf16 %v3179_v17 }
 0x1c1   : > { %2257 = vst.msk [vmem:[%s4466_s13 + $0x20] sm:$0xff] %vm406_vm0, %v2184_v58  ;;  %v2292_v33 = vsel %vm406_vm0, %v2184_v58, 0.0  ;;  %v2360_v2 = vmul.f32 %v2184_v58, %v2184_v58  ;;  %v1705_v49 = vsel %vm1584_vm2, %v1673_v53, %v3181_v35 }
 0x1c2   : > { %v2293_v55 = vadd.f32 %v2292_v33, %v2291_v0  ;;  %v4538_v57 = vpop.f32.mrf.mxu3 }
 0x1c3   : > { %v2395_v50 = vsel %vm406_vm0, %v2360_v2, 0.0 }
 0x1c4   : > { %v2396_v42 = vadd.f32 %v2395_v50, %v2394_v11  ;;  %v2096_v38 = vpop.f32.mrf.mxu1 }
 0x1c5   : > { %v2097_v5 = vadd.f32 %v2096_v38, %v2007_v54  ;;  %v4568_v58 = vpop.f32.mrf.mxu2 }
 0x1c6   : > { %v2010_v41 = vpop.f32.mrf.mxu0 }
 0x1c7   : > { %v2186_v28 = vadd.f32 %v4293_v19, %v2097_v5  ;;  %v1737_v19 = vsel %vm1617_vm3, %v1705_v49, %v3191_v34 }
 0x1c8   : > { %v1780_v44 = vpack.c.bf16 %v1737_v19, %v1736_v13 }
 0x1c9   : > { %2258 = vst.msk [vmem:[%s4466_s13 + $0x28] sm:$0xff] %vm406_vm0, %v2186_v28  ;;  %v2294_v52 = vsel %vm406_vm0, %v2186_v28, 0.0  ;;  %v2361_v43 = vmul.f32 %v2186_v28, %v2186_v28  ;;  %2049 = vmatmul.bf16.gmra.mxu0 %v1779_v18  ;;  %2659 = vmatmul.msk.bf16.gmra.mxu3 %vm406_vm0, %v1793_v36 }
 0x1ca   : > { %v2295_v21 = vadd.f32 %v2294_v52, %v2293_v55  ;;  %v4554_v9 = vpop.f32.mrf.mxu3 }
 0x1cb   : > { %v2397_v8 = vsel %vm406_vm0, %v2361_v43, 0.0 }
 0x1cc   : > { %v2398_v63 = vadd.f32 %v2397_v8, %v2396_v42  ;;  %v2099_v0 = vpop.f32.mrf.mxu1 }
 0x1cd   : > { %v2100_v37 = vadd.f32 %v2099_v0, %v2010_v41  ;;  %v4578_v46 = vpop.f32.mrf.mxu2 }
 0x1ce   : > { %v2012_v26 = vpop.f32.mrf.mxu0 }
 0x1cf   : > { %v2189_v11 = vadd.f32 %v4318_v12, %v2100_v37  ;;  %2138 = vmatmul.bf16.gmra.mxu1 %v1780_v44 }
 0x1d1   : > { %2259 = vst.msk [vmem:[%s4466_s13 + $0x30] sm:$0xff] %vm406_vm0, %v2189_v11  ;;  %v2296_v15 = vsel %vm406_vm0, %v2189_v11, 0.0  ;;  %v2362_v47 = vmul.f32 %v2189_v11, %v2189_v11 }
 0x1d2   : > { %v2297_v40 = vadd.f32 %v2296_v15, %v2295_v21  ;;  %v4565_v51 = vpop.f32.mrf.mxu3 }
 0x1d3   : > { %v2399_v7 = vsel %vm406_vm0, %v2362_v47, 0.0 }
 0x1d4   : > { %v2400_v10 = vadd.f32 %v2399_v7, %v2398_v63  ;;  %v2101_v45 = vpop.f32.mrf.mxu1 }
 0x1d5   : > { %v2102_v18 = vadd.f32 %v2101_v45, %v2012_v26  ;;  %v4592_v49 = vpop.f32.mrf.mxu2 }
 0x1d6   : > { %v2015_v54 = vpop.f32.mrf.mxu0 }
 0x1d7   : > { %v2191_v12 = vadd.f32 %v4326_v39, %v2102_v18 }
 0x1d9   : > { %2260 = vst.msk [vmem:[%s4466_s13 + $0x38] sm:$0xff] %vm406_vm0, %v2191_v12  ;;  %v2298_v25 = vsel %vm406_vm0, %v2191_v12, 0.0  ;;  %v2363_v14 = vmul.f32 %v2191_v12, %v2191_v12 }
 0x1da   : > { %v2299_v17 = vadd.f32 %v2298_v25, %v2297_v40  ;;  %v4574_v33 = vpop.f32.mrf.mxu3 }
 0x1db   : > { %v2401_v2 = vsel %vm406_vm0, %v2363_v14, 0.0 }
 0x1dc   : > { %v2402_v55 = vadd.f32 %v2401_v2, %v2400_v10  ;;  %v2104_v3 = vpop.f32.mrf.mxu1 }
 0x1dd   : > { %v2105_v48 = vadd.f32 %v2104_v3, %v2015_v54  ;;  %v2233_v15 = vpop.f32.mrf.mxu2 }
 0x1de   : > { %v2017_v50 = vpop.f32.mrf.mxu0 }
 0x1df   : > { %v2194_v35 = vadd.f32 %v4348_v32, %v2105_v48 }
 0x1e1   : > { %2261 = vst.msk [vmem:[%s4466_s13 + $0x40] sm:$0xff] %vm406_vm0, %v2194_v35  ;;  %v2300_v39 = vsel %vm406_vm0, %v2194_v35, 0.0  ;;  %v2364_v62 = vmul.f32 %v2194_v35, %v2194_v35 }
 0x1e2   : > { %v2301_v53 = vadd.f32 %v2300_v39, %v2299_v17  ;;  %v4583_v56 = vpop.f32.mrf.mxu3 }
 0x1e3   : > { %v2403_v42 = vsel %vm406_vm0, %v2364_v62, 0.0 }
 0x1e4   : > { %v2404_v38 = vadd.f32 %v2403_v42, %v2402_v55  ;;  %v2106_v5 = vpop.f32.mrf.mxu1 }
 0x1e5   : > { %v2107_v36 = vadd.f32 %v2106_v5, %v2017_v50  ;;  %v2235_v3 = vpop.f32.mrf.mxu2 }
 0x1e6   : > { %v2020_v34 = vpop.f32.mrf.mxu0 }
 0x1e7   : > { %v2196_v20 = vadd.f32 %v4356_v6, %v2107_v36 }
 0x1e9   : > { %2262 = vst.msk [vmem:[%s4466_s13 + $0x48] sm:$0xff] %vm406_vm0, %v2196_v20  ;;  %v2302_v32 = vsel %vm406_vm0, %v2196_v20, 0.0  ;;  %v2365_v41 = vmul.f32 %v2196_v20, %v2196_v20 }
 0x1ea   : > { %v2303_v28 = vadd.f32 %v2302_v32, %v2301_v53  ;;  %v4590_v27 = vpop.f32.mrf.mxu3 }
 0x1eb   : > { %v2405_v52 = vsel %vm406_vm0, %v2365_v41, 0.0 }
 0x1ec   : > { %v2406_v43 = vadd.f32 %v2405_v52, %v2404_v38  ;;  %v2109_v21 = vpop.f32.mrf.mxu1 }
 0x1ed   : > { %v2110_v13 = vadd.f32 %v2109_v21, %v2020_v34  ;;  %v2238_v34 = vpop.f32.mrf.mxu2 }
 0x1ee   : > { %v2022_v19 = vpop.f32.mrf.mxu0 }
 0x1ef   : > { %v2199_v8 = vadd.f32 %v4376_v61, %v2110_v13 }
 0x1f1   : > { %2263 = vst.msk [vmem:[%s4466_s13 + $0x50] sm:$0xff] %vm406_vm0, %v2199_v8  ;;  %v2304_v6 = vsel %vm406_vm0, %v2199_v8, 0.0  ;;  %v2366_v63 = vmul.f32 %v2199_v8, %v2199_v8 }
 0x1f2   : > { %v2305_v0 = vadd.f32 %v2304_v6, %v2303_v28  ;;  %v4599_v37 = vpop.f32.mrf.mxu3 }
 0x1f3   : > { %v2407_v44 = vsel %vm406_vm0, %v2366_v63, 0.0 }
 0x1f4   : > { %v2408_v26 = vadd.f32 %v2407_v44, %v2406_v43  ;;  %v2111_v11 = vpop.f32.mrf.mxu1 }
 0x1f5   : > { %v2112_v47 = vadd.f32 %v2111_v11, %v2022_v19  ;;  %v2240_v21 = vpop.f32.mrf.mxu2 }
 0x1f6   : > { %v2025_v40 = vpop.f32.mrf.mxu0 }
 0x1f7   : > { %v2201_v7 = vadd.f32 %v4392_v30, %v2112_v47 }
 0x1f9   : > { %2264 = vst.msk [vmem:[%s4466_s13 + $0x58] sm:$0xff] %vm406_vm0, %v2201_v7  ;;  %v2306_v61 = vsel %vm406_vm0, %v2201_v7, 0.0  ;;  %v2367_v10 = vmul.f32 %v2201_v7, %v2201_v7 }
 0x1fa   : > { %v2307_v45 = vadd.f32 %v2306_v61, %v2305_v0  ;;  %v2144_v18 = vpop.f32.mrf.mxu3 }
 0x1fb   : > { %v2409_v54 = vsel %vm406_vm0, %v2367_v10, 0.0  ;;  %v2145_v12 = vadd.f32 %v2144_v18, %v4526_v1 }
 0x1fc   : > { %v2410_v25 = vadd.f32 %v2409_v54, %v2408_v26  ;;  %v2114_v14 = vpop.f32.mrf.mxu1 }
 0x1fd   : > { %v2115_v17 = vadd.f32 %v2114_v14, %v2025_v40  ;;  %v4608_v2 = vadd.f32 %v2233_v15, %v2145_v12 }
 0x1fe   : > { %v2027_v55 = vpop.f32.mrf.mxu0 }
 0x1ff   : > { %v2204_v30 = vadd.f32 %v4407_v24, %v2115_v17  ;;  %2277 = vst.msk [vmem:[%s4466_s13 + $0xc0] sm:$0xff] %vm406_vm0, %v4608_v2 }
 0x201   : > { %2265 = vst.msk [vmem:[%s4466_s13 + $0x60] sm:$0xff] %vm406_vm0, %v2204_v30  ;;  %v2308_v48 = vsel %vm406_vm0, %v2204_v30, 0.0  ;;  %v2368_v50 = vmul.f32 %v2204_v30, %v2204_v30 }
 0x202   : > { %v4617_v1 = vadd.f32 %v2308_v48, %v2307_v45  ;;  %v2146_v35 = vpop.f32.mrf.mxu3 }
 0x203   : > { %v2411_v39 = vsel %vm406_vm0, %v2368_v50, 0.0  ;;  %v2147_v62 = vadd.f32 %v2146_v35, %v4538_v57 }
 0x204   : > { %v4621_v53 = vadd.f32 %v2411_v39, %v2410_v25  ;;  %v2116_v24 = vpop.f32.mrf.mxu1 }
 0x205   : > { %v2117_v42 = vadd.f32 %v2116_v24, %v2027_v55  ;;  %v4623_v38 = vadd.f32 %v2235_v3, %v2147_v62 }
 0x206   : > { %v2030_v5 = vpop.f32.mrf.mxu0 }
 0x207   : > { %v2206_v36 = vadd.f32 %v4427_v29, %v2117_v42  ;;  %2278 = vst.msk [vmem:[%s4466_s13 + $0xc8] sm:$0xff] %vm406_vm0, %v4623_v38 }
 0x209   : > { %2266 = vst.msk [vmem:[%s4466_s13 + $0x68] sm:$0xff] %vm406_vm0, %v2206_v36  ;;  %v2369_v50 = vmul.f32 %v2206_v36, %v2206_v36 }
 0x20a   : > { %v2149_v20 = vpop.f32.mrf.mxu3 }
 0x20b   : > { %v2150_v57 = vadd.f32 %v2149_v20, %v4554_v9  ;;  %v2413_v39 = vsel %vm406_vm0, %v2369_v50, 0.0 }
 0x20c   : > { %v2119_v32 = vpop.f32.mrf.mxu1 }
 0x20d   : > { %v2120_v41 = vadd.f32 %v2119_v32, %v2030_v5  ;;  %v4632_v28 = vadd.f32 %v2238_v34, %v2150_v57 }
 0x20e   : > { %v2032_v52 = vpop.f32.mrf.mxu0 }
 0x20f   : > { %v2209_v43 = vadd.f32 %v4439_v23, %v2120_v41  ;;  %2279 = vst.msk [vmem:[%s4466_s13 + $0xd0] sm:$0xff] %vm406_vm0, %v4632_v28  ;;  %v2414_v41 = vadd.f32 %v2413_v39, %v4621_v53 }
 0x211   : > { %2267 = vst.msk [vmem:[%s4466_s13 + $0x70] sm:$0xff] %vm406_vm0, %v2209_v43  ;;  %v2370_v35 = vmul.f32 %v2209_v43, %v2209_v43  ;;  %v2312_v42 = vsel %vm406_vm0, %v2209_v43, 0.0 }
 0x212   : > { %v2151_v29 = vpop.f32.mrf.mxu3 }
 0x213   : > { %v2152_v13 = vadd.f32 %v2151_v29, %v4565_v51  ;;  %v2415_v57 = vsel %vm406_vm0, %v2370_v35, 0.0 }
 0x214   : > { %v2121_v9 = vpop.f32.mrf.mxu1 }
 0x215   : > { %v2122_v19 = vadd.f32 %v2121_v9, %v2032_v52  ;;  %v4641_v8 = vadd.f32 %v2240_v21, %v2152_v13 }
 0x216   : > { %v2035_v6 = vpop.f32.mrf.mxu0 }
 0x217   : > { %v2211_v63 = vadd.f32 %v4459_v31, %v2122_v19  ;;  %2280 = vst.msk [vmem:[%s4466_s13 + $0xd8] sm:$0xff] %vm406_vm0, %v4641_v8 }
 0x219   : > { %2268 = vst.msk [vmem:[%s4466_s13 + $0x78] sm:$0xff] %vm406_vm0, %v2211_v63 }
 0x21b   : > { %v2154_v23 = vpop.f32.mrf.mxu3 }
 0x21c   : > { %v2124_v0 = vpop.f32.mrf.mxu1 }
 0x21d   : > { %v2125_v44 = vadd.f32 %v2124_v0, %v2035_v6 }
 0x21e   : > { %v2037_v26 = vpop.f32.mrf.mxu0 }
 0x21f   : > { %v2214_v51 = vadd.f32 %v4479_v22, %v2125_v44 }
 0x221   : > { %2269 = vst.msk [vmem:[%s4466_s13 + $0x80] sm:$0xff] %vm406_vm0, %v2214_v51  ;;  %v2372_v32 = vmul.f32 %v2214_v51, %v2214_v51  ;;  %v2316_v21 = vsel %vm406_vm0, %v2214_v51, 0.0 }
 0x223   : > { %v2156_v11 = vpop.f32.mrf.mxu3  ;;  %v2419_v19 = vsel %vm406_vm0, %v2372_v32, 0.0 }
 0x224   : > { %v2126_v15 = vpop.f32.mrf.mxu1 }
 0x225   : > { %v2127_v47 = vadd.f32 %v2126_v15, %v2037_v26 }
 0x226   : > { %v2040_v40 = vpop.f32.mrf.mxu0 }
 0x227   : > { %v2216_v31 = vadd.f32 %v4501_v4, %v2127_v47  ;;  %v2155_v4 = vadd.f32 %v2154_v23, %v4574_v33  ;;  %v2157_v33 = vadd.f32 %v2156_v11, %v4583_v56 }
 0x229   : > { %2270 = vst.msk [vmem:[%s4466_s13 + $0x88] sm:$0xff] %vm406_vm0, %v2216_v31  ;;  %v2373_v43 = vmul.f32 %v2216_v31, %v2216_v31 }
 0x22b   : > { %v2421_v0 = vsel %vm406_vm0, %v2373_v43, 0.0 }
 0x22c   : > { %v2129_v7 = vpop.f32.mrf.mxu1  ;;  %v2159_v61 = vpop.f32.mrf.mxu3 }
 0x22d   : > { %v2130_v10 = vadd.f32 %v2129_v7, %v2040_v40 }
 0x22e   : > { %v2042_v45 = vpop.f32.mrf.mxu0 }
 0x22f   : > { %v2219_v18 = vadd.f32 %v4519_v59, %v2130_v10 }
 0x231   : > { %2271 = vst.msk [vmem:[%s4466_s13 + $0x90] sm:$0xff] %vm406_vm0, %v2219_v18  ;;  %v2374_v6 = vmul.f32 %v2219_v18, %v2219_v18  ;;  %v2320_v51 = vsel %vm406_vm0, %v2219_v18, 0.0 }
 0x234   : > { %v2131_v22 = vpop.f32.mrf.mxu1  ;;  %v4658_v54 = vpop.f32.mrf.mxu3 }
 0x235   : > { %v2132_v12 = vadd.f32 %v2131_v22, %v2042_v45 }
 0x236   : > { %v2045_v25 = vpop.f32.mrf.mxu0 }
 0x237   : > { %v2221_v14 = vadd.f32 %v4540_v16, %v2132_v12  ;;  %v2310_v16 = vsel %vm406_vm0, %v2206_v36, 0.0  ;;  %v2314_v36 = vsel %vm406_vm0, %v2211_v63, 0.0 }
 0x238   : > { %v2311_v20 = vadd.f32 %v2310_v16, %v4617_v1  ;;  %v2416_v1 = vadd.f32 %v2415_v57, %v2414_v41  ;;  %v2380_v57 = vmul.f32 %v4608_v2, %v4608_v2 }
 0x239   : > { %2272 = vst.msk [vmem:[%s4466_s13 + $0x98] sm:$0xff] %vm406_vm0, %v2221_v14  ;;  %v2375_v11 = vmul.f32 %v2221_v14, %v2221_v14 }
 0x23a   : > { %v2313_v52 = vadd.f32 %v2312_v42, %v2311_v20 }
 0x23b   : > { %v2425_v18 = vsel %vm406_vm0, %v2375_v11, 0.0 }
 0x23c   : > { %v2134_v17 = vpop.f32.mrf.mxu1  ;;  %v2243_v55 = vpop.f32.mrf.mxu3  ;;  %v2315_v9 = vadd.f32 %v2314_v36, %v2313_v52  ;;  %v2332_v52 = vsel %vm406_vm0, %v4608_v2, 0.0  ;;  %v2336_v2 = vsel %vm406_vm0, %v4632_v28, 0.0 }
 0x23d   : > { %v2135_v3 = vadd.f32 %v2134_v17, %v2045_v25  ;;  %v4664_v30 = vadd.f32 %v2243_v55, %v2155_v4 }
 0x23e   : > { %v2047_v59 = vpop.f32.mrf.mxu0  ;;  %v2317_v23 = vadd.f32 %v2316_v21, %v2315_v9  ;;  %v2382_v9 = vmul.f32 %v4632_v28, %v4632_v28 }
 0x23f   : > { %v2224_v48 = vadd.f32 %v4559_v60, %v2135_v3  ;;  %2281 = vst.msk [vmem:[%s4466_s13 + $0xe0] sm:$0xff] %vm406_vm0, %v4664_v30  ;;  %v2371_v60 = vmul.f32 %v2211_v63, %v2211_v63  ;;  %v2160_v63 = vadd.f32 %v2159_v61, %v4590_v27  ;;  %v2322_v27 = vsel %vm406_vm0, %v2221_v14, 0.0 }
 0x240   : > { %v2162_v14 = vadd.f32 %v4658_v54, %v4599_v37  ;;  %v2340_v28 = vsel %vm406_vm0, %v4664_v30, 0.0 }
 0x241   : > { %2273 = vst.msk [vmem:[%s4466_s13 + $0xa0] sm:$0xff] %vm406_vm0, %v2224_v48  ;;  %v2417_v29 = vsel %vm406_vm0, %v2371_v60, 0.0  ;;  %v2376_v61 = vmul.f32 %v2224_v48, %v2224_v48  ;;  %v2324_v12 = vsel %vm406_vm0, %v2224_v48, 0.0 }
 0x242   : > { %v2418_v53 = vadd.f32 %v2417_v29, %v2416_v1  ;;  %v2334_v1 = vsel %vm406_vm0, %v4623_v38, 0.0 }
 0x243   : > { %v2427_v55 = vsel %vm406_vm0, %v2376_v61, 0.0 }
 0x244   : > { %v2136_v62 = vpop.f32.mrf.mxu1  ;;  %v2245_v24 = vpop.f32.mrf.mxu3  ;;  %v2420_v40 = vadd.f32 %v2419_v19, %v2418_v53 }
 0x245   : > { %v2137_v5 = vadd.f32 %v2136_v62, %v2047_v59  ;;  %v4676_v34 = vadd.f32 %v2245_v24, %v2157_v33 }
 0x246   : > { %v2050_v13 = vpop.f32.mrf.mxu0  ;;  %v2422_v45 = vadd.f32 %v2421_v0, %v2420_v40  ;;  %v2439_v0 = vsel %vm406_vm0, %v2382_v9, 0.0 }
 0x247   : > { %v2226_v56 = vadd.f32 %v4568_v58, %v2137_v5  ;;  %2282 = vst.msk [vmem:[%s4466_s13 + $0xe8] sm:$0xff] %vm406_vm0, %v4676_v34  ;;  %v2318_v58 = vsel %vm406_vm0, %v2216_v31, 0.0  ;;  %v2423_v31 = vsel %vm406_vm0, %v2374_v6, 0.0 }
 0x248   : > { %v2319_v7 = vadd.f32 %v2318_v58, %v2317_v23  ;;  %v2424_v4 = vadd.f32 %v2423_v31, %v2422_v45 }
 0x249   : > { %2274 = vst.msk [vmem:[%s4466_s13 + $0xa8] sm:$0xff] %vm406_vm0, %v2226_v56  ;;  %v2377_v25 = vmul.f32 %v2226_v56, %v2226_v56 }
 0x24a   : > { %v2321_v22 = vadd.f32 %v2320_v51, %v2319_v7  ;;  %v2426_v50 = vadd.f32 %v2425_v18, %v2424_v4 }
 0x24b   : > { %v2429_v33 = vsel %vm406_vm0, %v2377_v25, 0.0 }
 0x24c   : > { %v2139_v44 = vpop.f32.mrf.mxu1  ;;  %v2248_v26 = vpop.f32.mrf.mxu3  ;;  %v2323_v17 = vadd.f32 %v2322_v27, %v2321_v22  ;;  %v2428_v42 = vadd.f32 %v2427_v55, %v2426_v50 }
 0x24d   : > { %v2140_v15 = vadd.f32 %v2139_v44, %v2050_v13  ;;  %v4695_v47 = vadd.f32 %v2248_v26, %v2160_v63  ;;  %v2435_v13 = vsel %vm406_vm0, %v2380_v57, 0.0  ;;  %v2383_v63 = vmul.f32 %v4641_v8, %v4641_v8 }
 0x24e   : > { %v2052_v3 = vpop.f32.mrf.mxu0  ;;  %v2325_v16 = vadd.f32 %v2324_v12, %v2323_v17  ;;  %v2430_v5 = vadd.f32 %v2429_v33, %v2428_v42  ;;  %v2384_v44 = vmul.f32 %v4664_v30, %v4664_v30 }
 0x24f   : > { %v2229_v10 = vadd.f32 %v4578_v46, %v2140_v15  ;;  %2283 = vst.msk [vmem:[%s4466_s13 + $0xf0] sm:$0xff] %vm406_vm0, %v4695_v47  ;;  %v2326_v46 = vsel %vm406_vm0, %v2226_v56, 0.0  ;;  %v2441_v11 = vsel %vm406_vm0, %v2383_v63, 0.0  ;;  %v2385_v15 = vmul.f32 %v4676_v34, %v4676_v34 }
 0x250   : > { %v2327_v37 = vadd.f32 %v2326_v46, %v2325_v16  ;;  %v2443_v31 = vsel %vm406_vm0, %v2384_v44, 0.0  ;;  %v2386_v27 = vmul.f32 %v4695_v47, %v4695_v47  ;;  %v2344_v30 = vsel %vm406_vm0, %v4695_v47, 0.0 }
 0x251   : > { %2275 = vst.msk [vmem:[%s4466_s13 + $0xb0] sm:$0xff] %vm406_vm0, %v2229_v10  ;;  %v2378_v59 = vmul.f32 %v2229_v10, %v2229_v10  ;;  %v2328_v39 = vsel %vm406_vm0, %v2229_v10, 0.0  ;;  %v2445_v45 = vsel %vm406_vm0, %v2385_v15, 0.0 }
 0x252   : > { %v2329_v20 = vadd.f32 %v2328_v39, %v2327_v37  ;;  %v2447_v25 = vsel %vm406_vm0, %v2386_v27, 0.0 }
 0x253   : > { %v2431_v54 = vsel %vm406_vm0, %v2378_v59, 0.0 }
 0x254   : > { %v2141_v35 = vpop.f32.mrf.mxu1  ;;  %v2250_v48 = vpop.f32.mrf.mxu3  ;;  %v2432_v56 = vadd.f32 %v2431_v54, %v2430_v5 }
 0x255   : > { %v2142_v62 = vadd.f32 %v2141_v35, %v2052_v3  ;;  %v2251_v24 = vadd.f32 %v2250_v48, %v2162_v14 }
 0x257   : > { %v2231_v60 = vadd.f32 %v4592_v49, %v2142_v62  ;;  %2284 = vst.msk [vmem:[%s4466_s13 + $0xf8] sm:$0xff] %vm406_vm0, %v2251_v24  ;;  %v2381_v49 = vmul.f32 %v4623_v38, %v4623_v38  ;;  %v2338_v38 = vsel %vm406_vm0, %v4641_v8, 0.0  ;;  %v2342_v8 = vsel %vm406_vm0, %v4676_v34, 0.0 }
 0x258   : > { %v2387_v22 = vmul.f32 %v2251_v24, %v2251_v24  ;;  %v2346_v4 = vsel %vm406_vm0, %v2251_v24, 0.0 }
 0x259   : > { %2276 = vst.msk [vmem:[%s4466_s13 + $0xb8] sm:$0xff] %vm406_vm0, %v2231_v60  ;;  %v2330_v36 = vsel %vm406_vm0, %v2231_v60, 0.0  ;;  %v2379_v32 = vmul.f32 %v2231_v60, %v2231_v60  ;;  %v2437_v6 = vsel %vm406_vm0, %v2381_v49, 0.0 }
 0x25a   : > { %v2331_v41 = vadd.f32 %v2330_v36, %v2329_v20  ;;  %v2449_v14 = vsel %vm406_vm0, %v2387_v22, 0.0 }
 0x25b   : > { %v2433_v43 = vsel %vm406_vm0, %v2379_v32, 0.0 }
 0x25c   : > { %v2333_v29 = vadd.f32 %v2332_v52, %v2331_v41  ;;  %v2434_v21 = vadd.f32 %v2433_v43, %v2432_v56 }
 0x25e   : > { %v2335_v19 = vadd.f32 %v2334_v1, %v2333_v29  ;;  %v2436_v58 = vadd.f32 %v2435_v13, %v2434_v21 }
 0x260   : > { %v2337_v53 = vadd.f32 %v2336_v2, %v2335_v19  ;;  %v2438_v23 = vadd.f32 %v2437_v6, %v2436_v58 }
 0x262   : > { %v2440_v26 = vadd.f32 %v2439_v0, %v2438_v23  ;;  %v2339_v51 = vadd.f32 %v2338_v38, %v2337_v53 }
 0x264   : > { %v2341_v40 = vadd.f32 %v2340_v28, %v2339_v51  ;;  %v2442_v7 = vadd.f32 %v2441_v11, %v2440_v26 }
 0x266   : > { %v2343_v61 = vadd.f32 %v2342_v8, %v2341_v40  ;;  %v2444_v10 = vadd.f32 %v2443_v31, %v2442_v7 }
 0x268   : > { %v2345_v18 = vadd.f32 %v2344_v30, %v2343_v61  ;;  %v2446_v12 = vadd.f32 %v2445_v45, %v2444_v10 }
 0x26a   : > { %v2347_v17 = vadd.f32 %v2346_v4, %v2345_v18  ;;  %v2448_v34 = vadd.f32 %v2447_v25, %v2446_v12 }
 0x26c   : > { %v2348_v55 = vrot.slane %v2347_v17, 4  ;;  %v2450_v46 = vadd.f32 %v2449_v14, %v2448_v34 }
 0x26e   : > { %v2349_v3 = vadd.f32 %v2348_v55, %v2347_v17  ;;  %v2451_v59 = vrot.slane %v2450_v46, 4 }
 0x270   : > { %v2350_v50 = vrot.slane %v2349_v3, 2  ;;  %v2452_v16 = vadd.f32 %v2451_v59, %v2450_v46 }
 0x272   : > { %v2351_v47 = vadd.f32 %v2350_v50, %v2349_v3  ;;  %v2453_v35 = vrot.slane %v2452_v16, 2 }
 0x274   : > { %v2352_v48 = vrot.slane %v2351_v47, 1  ;;  %v2454_v33 = vadd.f32 %v2453_v35, %v2452_v16 }
 0x276   : > { %v2353_v39 = vadd.f32 %v2352_v48, %v2351_v47  ;;  %v2455_v62 = vrot.slane %v2454_v33, 1 }
 0x278   : > { %2355 = vst.msk [vmem:[%s265_s10] sm:$0x1] %vm2354_vm4, %v2353_v39  ;;  %v2456_v24 = vadd.f32 %v2455_v62, %v2454_v33 }
 0x27a   : > { %2457 = vst.msk [vmem:[%s268_s14] sm:$0x1] %vm2354_vm4, %v2456_v24 }
 0x27b PF: > { %s17_s21 = sadd.s32 1, %s3200_s21  }
 0x27c   : > { %p14_p4 = scmp.ge.s32.totalorder %s17_s21, 4  }
 0x27e   :  { %16 = sbr.rel (!%p14_p4) target bundleno = 1 (0x1), region = 92 }

// kernel: basic_block_forward.7
= control target key start
LH: loop header
LB: loop body
LE: loop exit
PB: predicated region body
PF: predicated region fallthrough
CT: control target
= control target key end

     0   :  { %s498_s0 = inlined_call_operand.vmem [shape: f32[32,512], index: 0, kind: input, shape index: {}]   ;;  %s499_s1 = inlined_call_operand.vmem [shape: f32[1,512], index: 1, kind: input, shape index: {}]   ;;  %s500_s2 = inlined_call_operand.vmem [shape: f32[1,512], index: 2, kind: input, shape index: {}]   ;;  %s501_s3 = inlined_call_operand.vmem [shape: f32[32,512], index: 3, kind: input, shape index: {}]   ;;  %s502_s4 = inlined_call_operand.vmem [shape: f32[1,512], index: 4, kind: input, shape index: {}]   ;;  %s503_s5 = inlined_call_operand.vmem [shape: f32[1,512], index: 5, kind: input, shape index: {}]   ;;  %s504_s6 = inlined_call_operand.vmem [shape: f32[32,512], index: 6, kind: output, shape index: {}]  }
   0x1   :  { %v23_v0 = vld [vmem:[%s498_s0] sm:$0xff]  ;;  %v24_v7 = vld [vmem:[%s498_s0 + $0x8] sm:$0xff]  ;;  %v25_v17 = vld [vmem:[%s498_s0 + $0x10] sm:$0xff] }
   0x2   :  { %v39_v1 = vld [vmem:[%s499_s1] sm:$0xf]  ;;  %v92_v12 = vld [vmem:[%s501_s3 + $0x8] sm:$0xff]  ;;  %v93_v22 = vld [vmem:[%s501_s3 + $0x10] sm:$0xff] }
   0x3   :  { %v65_v2 = vld [vmem:[%s500_s2] sm:$0xf]  ;;  %v255_v3 = vperm.slane %v39_v1, 0  ;;  %v273_v10 = vperm.slane %v39_v1, 1  ;;  %v292_v20 = vperm.slane %v39_v1, 2  ;;  %v26_v27 = vld [vmem:[%s498_s0 + $0x18] sm:$0xff] }
   0x4   :  { %v257_v4 = vperm.slane %v65_v2, 0  ;;  %v91_v5 = vld [vmem:[%s501_s3] sm:$0xff]  ;;  %v275_v11 = vperm.slane %v65_v2, 1  ;;  %v294_v21 = vperm.slane %v65_v2, 2  ;;  %v313_v31 = vperm.slane %v39_v1, 3  ;;  %v94_v33 = vld [vmem:[%s501_s3 + $0x18] sm:$0xff] }
   0x5   :  { %v107_v6 = vld [vmem:[%s502_s4] sm:$0xf]  ;;  %v49_v13 = vmul.f32 %v255_v3, %v23_v0  ;;  %v50_v19 = vmul.f32 %v273_v10, %v24_v7  ;;  %v51_v30 = vmul.f32 %v292_v20, %v25_v17  ;;  %v315_v32 = vperm.slane %v65_v2, 3  ;;  %v28_v35 = vld [vmem:[%s498_s0 + $0x28] sm:$0xff]  ;;  %v29_v45 = vld [vmem:[%s498_s0 + $0x30] sm:$0xff] }
   0x6   :  { %v268_v8 = vperm.slane %v107_v6, 0  ;;  %v149_v9 = vld [vmem:[%s503_s5] sm:$0xf]  ;;  %v283_v15 = vperm.slane %v107_v6, 1  ;;  %v301_v25 = vperm.slane %v107_v6, 2  ;;  %v327_v38 = vperm.slane %v107_v6, 3 }
   0x7   :  { %v281_v14 = vperm.slane %v149_v9, 0  ;;  %v285_v16 = vperm.slane %v149_v9, 1  ;;  %v75_v23 = vadd.f32 %v257_v4, %v49_v13  ;;  %v303_v26 = vperm.slane %v149_v9, 2  ;;  %v27_v28 = vld [vmem:[%s498_s0 + $0x20] sm:$0xff]  ;;  %v96_v44 = vld [vmem:[%s501_s3 + $0x28] sm:$0xff]  ;;  %v97_v54 = vld [vmem:[%s501_s3 + $0x30] sm:$0xff] }
   0x8   :  { %v117_v18 = vmul.f32 %v268_v8, %v91_v5  ;;  %v118_v24 = vmul.f32 %v283_v15, %v92_v12  ;;  %v76_v29 = vadd.f32 %v275_v11, %v50_v19  ;;  %v95_v34 = vld [vmem:[%s501_s3 + $0x20] sm:$0xff]  ;;  %v119_v37 = vmul.f32 %v301_v25, %v93_v22  ;;  %v30_v55 = vld [vmem:[%s498_s0 + $0x38] sm:$0xff]  ;;  %v32_v12 = vld [vmem:[%s498_s0 + $0x48] sm:$0xff] }
   0x9   :  { %v329_v39 = vperm.slane %v149_v9, 3  ;;  %v77_v41 = vadd.f32 %v294_v21, %v51_v30  ;;  %v52_v42 = vmul.f32 %v313_v31, %v26_v27  ;;  %v53_v43 = vmul.f32 %v255_v3, %v27_v28  ;;  %v98_v60 = vld [vmem:[%s501_s3 + $0x38] sm:$0xff]  ;;  %v31_v1 = vld [vmem:[%s498_s0 + $0x40] sm:$0xff]  ;;  %v100_v28 = vld [vmem:[%s501_s3 + $0x48] sm:$0xff] }
   0xa   :  { %v133_v36 = vadd.f32 %v117_v18, %v75_v23  ;;  %v134_v40 = vadd.f32 %v118_v24, %v76_v29  ;;  %v120_v47 = vmul.f32 %v327_v38, %v94_v33  ;;  %v121_v48 = vmul.f32 %v268_v8, %v95_v34  ;;  %v99_v9 = vld [vmem:[%s501_s3 + $0x40] sm:$0xff]  ;;  %v33_v29 = vld [vmem:[%s498_s0 + $0x50] sm:$0xff] }
   0xb   :  { %v54_v49 = vmul.f32 %v273_v10, %v28_v35  ;;  %v135_v51 = vadd.f32 %v119_v37, %v77_v41  ;;  %v78_v52 = vadd.f32 %v315_v32, %v52_v42  ;;  %v79_v53 = vadd.f32 %v257_v4, %v53_v43  ;;  %v101_v30 = vld [vmem:[%s501_s3 + $0x50] sm:$0xff]  ;;  %v34_v37 = vld [vmem:[%s498_s0 + $0x58] sm:$0xff] }
   0xc   :  { %v159_v46 = vadd.f32 %v281_v14, %v133_v36  ;;  %v160_v50 = vadd.f32 %v285_v16, %v134_v40  ;;  %v122_v58 = vmul.f32 %v283_v15, %v96_v44  ;;  %v55_v59 = vmul.f32 %v292_v20, %v29_v45  ;;  %v102_v44 = vld [vmem:[%s501_s3 + $0x58] sm:$0xff]  ;;  %v35_v45 = vld [vmem:[%s498_s0 + $0x60] sm:$0xff] }
   0xd   :  { %v80_v57 = vadd.f32 %v275_v11, %v54_v49  ;;  %v161_v62 = vadd.f32 %v303_v26, %v135_v51  ;;  %v136_v63 = vadd.f32 %v120_v47, %v78_v52  ;;  %v137_v0 = vadd.f32 %v121_v48, %v79_v53 }
   0xe   :  { %v175_v56 = vmax.f32 %v159_v46, 0.0  ;;  %v176_v61 = vmax.f32 %v160_v50, 0.0  ;;  %v81_v5 = vadd.f32 %v294_v21, %v55_v59  ;;  %v123_v6 = vmul.f32 %v301_v25, %v97_v54  ;;  %v103_v50 = vld [vmem:[%s501_s3 + $0x60] sm:$0xff] }
   0xf   :  { %v138_v2 = vadd.f32 %v122_v58, %v80_v57  ;;  %v56_v7 = vmul.f32 %v313_v31, %v30_v55  ;;  %v177_v13 = vmax.f32 %v161_v62, 0.0  ;;  %v162_v17 = vadd.f32 %v329_v39, %v136_v63  ;;  %v36_v55 = vld [vmem:[%s498_s0 + $0x68] sm:$0xff] }
  0x10   :  { %191 = vst [vmem:[%s504_s6] sm:$0xff] %v175_v56  ;;  %v163_v18 = vadd.f32 %v281_v14, %v137_v0  ;;  %v124_v19 = vmul.f32 %v327_v38, %v98_v60  ;;  %v139_v23 = vadd.f32 %v123_v6, %v81_v5  ;;  %v57_v27 = vmul.f32 %v255_v3, %v31_v1  ;;  %v104_v60 = vld [vmem:[%s501_s3 + $0x68] sm:$0xff] }
  0x11   :  { %192 = vst [vmem:[%s504_s6 + $0x8] sm:$0xff] %v176_v61  ;;  %v164_v22 = vadd.f32 %v285_v16, %v138_v2  ;;  %v82_v24 = vadd.f32 %v315_v32, %v56_v7  ;;  %v178_v33 = vmax.f32 %v162_v17, 0.0  ;;  %v125_v35 = vmul.f32 %v268_v8, %v99_v9  ;;  %v37_v61 = vld [vmem:[%s498_s0 + $0x70] sm:$0xff]  ;;  %v38_v9 = vld [vmem:[%s498_s0 + $0x78] sm:$0xff] }
  0x12   :  { %193 = vst [vmem:[%s504_s6 + $0x10] sm:$0xff] %v177_v13  ;;  %v179_v34 = vmax.f32 %v163_v18, 0.0  ;;  %v58_v36 = vmul.f32 %v273_v10, %v32_v12  ;;  %v165_v41 = vadd.f32 %v303_v26, %v139_v23  ;;  %v83_v43 = vadd.f32 %v257_v4, %v57_v27  ;;  %v105_v7 = vld [vmem:[%s501_s3 + $0x70] sm:$0xff] }
  0x13   :  { %v180_v40 = vmax.f32 %v164_v22, 0.0  ;;  %v140_v42 = vadd.f32 %v124_v19, %v82_v24  ;;  %194 = vst [vmem:[%s504_s6 + $0x18] sm:$0xff] %v178_v33  ;;  %v126_v47 = vmul.f32 %v283_v15, %v100_v28  ;;  %v59_v48 = vmul.f32 %v292_v20, %v33_v29 }
  0x14   :  { %v84_v46 = vadd.f32 %v275_v11, %v58_v36  ;;  %v127_v49 = vmul.f32 %v301_v25, %v101_v30  ;;  %195 = vst [vmem:[%s504_s6 + $0x20] sm:$0xff] %v179_v34  ;;  %v181_v51 = vmax.f32 %v165_v41, 0.0  ;;  %v141_v53 = vadd.f32 %v125_v35, %v83_v43 }
  0x15   :  { %v166_v52 = vadd.f32 %v329_v39, %v140_v42  ;;  %v60_v54 = vmul.f32 %v313_v31, %v34_v37  ;;  %196 = vst [vmem:[%s504_s6 + $0x28] sm:$0xff] %v180_v40  ;;  %v85_v57 = vadd.f32 %v294_v21, %v59_v48  ;;  %v128_v58 = vmul.f32 %v327_v38, %v102_v44 }
  0x16   :  { %v142_v56 = vadd.f32 %v126_v47, %v84_v46  ;;  %v61_v59 = vmul.f32 %v255_v3, %v35_v45  ;;  %197 = vst [vmem:[%s504_s6 + $0x30] sm:$0xff] %v181_v51  ;;  %v167_v63 = vadd.f32 %v281_v14, %v141_v53  ;;  %v129_v1 = vmul.f32 %v268_v8, %v103_v50 }
  0x17   :  { %v182_v62 = vmax.f32 %v166_v52, 0.0  ;;  %v86_v0 = vadd.f32 %v315_v32, %v60_v54  ;;  %v143_v2 = vadd.f32 %v127_v49, %v85_v57  ;;  %v62_v6 = vmul.f32 %v273_v10, %v36_v55  ;;  %v106_v10 = vld [vmem:[%s501_s3 + $0x78] sm:$0xff] }
  0x18   :  { %v168_v3 = vadd.f32 %v285_v16, %v142_v56  ;;  %v87_v5 = vadd.f32 %v257_v4, %v61_v59  ;;  %v183_v8 = vmax.f32 %v167_v63, 0.0  ;;  %v130_v13 = vmul.f32 %v283_v15, %v104_v60 }
  0x19   :  { %198 = vst [vmem:[%s504_s6 + $0x38] sm:$0xff] %v182_v62  ;;  %v144_v12 = vadd.f32 %v128_v58, %v86_v0  ;;  %v63_v4 = vmul.f32 %v292_v20, %v37_v61  ;;  %v169_v18 = vadd.f32 %v303_v26, %v143_v2  ;;  %v88_v22 = vadd.f32 %v275_v11, %v62_v6 }
  0x1a   :  { %v184_v17 = vmax.f32 %v168_v3, 0.0  ;;  %v145_v19 = vadd.f32 %v129_v1, %v87_v5  ;;  %199 = vst [vmem:[%s504_s6 + $0x40] sm:$0xff] %v183_v8  ;;  %v131_v20 = vmul.f32 %v301_v25, %v105_v7  ;;  %v64_v24 = vmul.f32 %v313_v31, %v38_v9 }
  0x1b   :  { %v170_v23 = vadd.f32 %v329_v39, %v144_v12  ;;  %v89_v15 = vadd.f32 %v294_v21, %v63_v4  ;;  %v185_v27 = vmax.f32 %v169_v18, 0.0  ;;  %v146_v11 = vadd.f32 %v130_v13, %v88_v22 }
  0x1c   :  { %200 = vst [vmem:[%s504_s6 + $0x48] sm:$0xff] %v184_v17  ;;  %v171_v28 = vadd.f32 %v281_v14, %v145_v19  ;;  %v132_v29 = vmul.f32 %v327_v38, %v106_v10  ;;  %v90_v34 = vadd.f32 %v315_v32, %v64_v24 }
  0x1d   :  { %v186_v30 = vmax.f32 %v170_v23, 0.0  ;;  %v147_v33 = vadd.f32 %v131_v20, %v89_v15  ;;  %201 = vst [vmem:[%s504_s6 + $0x50] sm:$0xff] %v185_v27  ;;  %v172_v25 = vadd.f32 %v285_v16, %v146_v11 }
  0x1e   :  { %v187_v21 = vmax.f32 %v171_v28, 0.0  ;;  %v148_v31 = vadd.f32 %v132_v29, %v90_v34 }
  0x1f   :  { %202 = vst [vmem:[%s504_s6 + $0x58] sm:$0xff] %v186_v30  ;;  %v173_v14 = vadd.f32 %v303_v26, %v147_v33  ;;  %v188_v38 = vmax.f32 %v172_v25, 0.0 }
  0x20   :  { %203 = vst [vmem:[%s504_s6 + $0x60] sm:$0xff] %v187_v21  ;;  %v174_v35 = vadd.f32 %v329_v39, %v148_v31 }
  0x21   :  { %v189_v32 = vmax.f32 %v173_v14, 0.0  ;;  %204 = vst [vmem:[%s504_s6 + $0x68] sm:$0xff] %v188_v38 }
  0x22   :  { %v190_v16 = vmax.f32 %v174_v35, 0.0 }
  0x23   :  { %205 = vst [vmem:[%s504_s6 + $0x70] sm:$0xff] %v189_v32 }
  0x24   :  { %206 = vst [vmem:[%s504_s6 + $0x78] sm:$0xff] %v190_v16 }

</bundles_post_ra>
